<compile_context>
chip_gen: v7x
topology: tpu7x:2x2x1
jax: 0.10.0
libtpu: 0.0.40
codegen_flags: <defaults>
</compile_context>

<pallas_src>
import functools
import numpy as np
import jax
import jax.numpy as jnp
from jax.experimental import pallas as pl
from jax.experimental.pallas import tpu as pltpu

# ---------------- small synthetic configuration ----------------
BATCH = 2
IN_CH = 3
IMG = 64              # input spatial size
STRIDE = 8            # backbone stub downsample factor (real MobileNetV3 uses 32)
FEAT_CH = 16          # stand-in for mobilenet_v3_large out_inplanes (=960)
HIDDEN = 32           # hidden_chan of the ConvGRU cell
K_SIZE = 3            # k_size
GN_SIZE = 32          # group_norm_size
ASPP_CH = 256         # torchvision ASPP / DeepLabHead intermediate channels
ASPP_DILATIONS = (12, 24, 36)
NUM_CLASSES = 2
EPS = 1e-5
HEAD_K = 3            # DeepLabHead 3x3 conv

# bf16 MXU inputs (f32 accumulation) for the large-contraction matmuls.
MATMUL_DTYPE = jnp.bfloat16


def _group_norm(v, gamma, beta):
    """Two-pass GroupNorm over a single (spatial, channels-in-group) block."""
    m = jnp.mean(v)
    cdev = v - m
    var = jnp.mean(cdev * cdev)
    return cdev * jax.lax.rsqrt(var + EPS) * gamma + beta


# ======================= fused backbone-stub + ConvGRU kernel =======================

def _backbone_gru_kernel(xs_ref, bbw_ref, bbb_ref, wtap_ref, cb_ref, gng_ref,
                         gnb_ref, o_ref, pad_ref, *, hf, wf):
    """Per-sample: patchify 1x1 conv (backbone stub) + full ConvGRU cell.

    xs_ref  : (1, hf, wf, s*s*IN_CH)   space-to-depth'd input patch features
    bbw_ref : (s*s*IN_CH, FEAT_CH)     backbone-stub 1x1 conv weight
    wtap_ref: (9, FEAT_CH, 2*HIDDEN)   per-tap [z-gate | candidate] conv weights
    cb_ref  : (1, 2*HIDDEN)            conv biases   [b1[:HIDDEN] | b2]
    gng/gnb : (1, 2*HIDDEN)            GroupNorm affine [gn1[:HIDDEN] | gn2]
    o_ref   : (1, hf, wf, HIDDEN)      h_next
    pad_ref : VMEM (hf+2, wf+2, FEAT_CH) zero-padded feature scratch
    """
    p = hf * wf
    cin = xs_ref.shape[-1]
    fch = bbw_ref.shape[-1]

    # backbone stub: 1x1 conv + ReLU over the patchified input.
    xs = xs_ref[0].reshape(p, cin)
    feat = jnp.maximum(
        jnp.dot(xs, bbw_ref[...], preferred_element_type=jnp.float32)
        + bbb_ref[...], 0.0)                                          # (p, FEAT_CH)

    # zero-pad for the 3x3 GRU convolutions (padding = 1).
    pad_ref[...] = jnp.zeros_like(pad_ref)
    pad_ref[1:1 + hf, 1:1 + wf, :] = feat.reshape(hf, wf, fch)

    # hidden_state is None on this step -> h_prev = 0, so the HIDDEN half of
    # both conv contractions, the reset gate and (1-z)*h_prev all vanish.
    # The z-gate conv and the candidate conv share the same input taps, so
    # their weights are concatenated along Cout: one MXU matmul per tap.
    acc = None
    for t in range(K_SIZE * K_SIZE):
        a, b = divmod(t, K_SIZE)
        xt = pad_ref[a:a + hf, b:b + wf, :].reshape(p, fch)
        d = jnp.dot(xt, wtap_ref[t], preferred_element_type=jnp.float32)
        acc = d if acc is None else acc + d
    g = acc + cb_ref[...]                                             # (p, 2*HIDDEN)

    # GroupNorm (one group per half at this config: GN_SIZE == HIDDEN) + gates.
    # Gate-channel order assumed (z, r) as in the reference CGRU_cell.
    zpre = g[:, :HIDDEN]
    cpre = g[:, HIDDEN:]
    z = jax.nn.sigmoid(_group_norm(zpre, gng_ref[:, :HIDDEN], gnb_ref[:, :HIDDEN]))
    cand = jnp.tanh(_group_norm(cpre, gng_ref[:, HIDDEN:], gnb_ref[:, HIDDEN:]))
    o_ref[0] = (z * cand).reshape(hf, wf, HIDDEN)   # (1-z)*h_prev == 0


def backbone_gru_fused(xs, params):
    """Backbone-stub conv + ConvGRU cell in one kernel per sample."""
    n, hf, wf, cin = xs.shape
    ntap = K_SIZE * K_SIZE

    # TODO(synk): valid for the first GRU step only (h_prev == 0); a recurrent
    # step would need the full (feat, h) contraction and the reset gate.
    w1z = params["gru_w1"][:, :, :FEAT_CH, :HIDDEN]                   # (3,3,16,32)
    w2f = params["gru_w2"][:, :, :FEAT_CH, :]                         # (3,3,16,32)
    w_tap = jnp.concatenate([w1z, w2f], axis=-1).reshape(ntap, FEAT_CH, 2 * HIDDEN)
    conv_b = jnp.concatenate([params["gru_b1"][:HIDDEN], params["gru_b2"]])[None, :]
    gn_g = jnp.concatenate([params["gru_gn1_g"][:HIDDEN], params["gru_gn2_g"]])[None, :]
    gn_b = jnp.concatenate([params["gru_gn1_b"][:HIDDEN], params["gru_gn2_b"]])[None, :]
    bb_w = params["bb_w"][0, 0]                                       # (s*s*IN_CH, FEAT_CH)
    bb_b = params["bb_b"][None, :]

    kern = functools.partial(_backbone_gru_kernel, hf=hf, wf=wf)
    return pl.pallas_call(
        kern,
        out_shape=jax.ShapeDtypeStruct((n, hf, wf, HIDDEN), jnp.float32),
        grid=(n,),
        in_specs=[
            pl.BlockSpec((1, hf, wf, cin), lambda i: (i, 0, 0, 0)),
            pl.BlockSpec((cin, FEAT_CH), lambda i: (0, 0)),
            pl.BlockSpec((1, FEAT_CH), lambda i: (0, 0)),
            pl.BlockSpec((ntap, FEAT_CH, 2 * HIDDEN), lambda i: (0, 0, 0)),
            pl.BlockSpec((1, 2 * HIDDEN), lambda i: (0, 0)),
            pl.BlockSpec((1, 2 * HIDDEN), lambda i: (0, 0)),
            pl.BlockSpec((1, 2 * HIDDEN), lambda i: (0, 0)),
        ],
        out_specs=pl.BlockSpec((1, hf, wf, HIDDEN), lambda i: (i, 0, 0, 0)),
        scratch_shapes=[pltpu.VMEM((hf + 2, wf + 2, FEAT_CH), jnp.float32)],
        compiler_params=pltpu.CompilerParams(dimension_semantics=("parallel",)),
    )(xs, bb_w, bb_b, w_tap, conv_b, gn_g, gn_b)


# ======================= fused DeepLabHead + upsample kernel =======================

def _head_kernel(x_ref, wbr_ref, brs_ref, brt_ref,
                 wpl_ref, pls_ref, plt_ref,
                 wpm_ref, wpp_ref, prs_ref, prt_ref,
                 whead_ref, hs_ref, ht_ref,
                 wc_ref, bc_ref, ah_ref, awt_ref,
                 o_ref, ppad_ref, *, hf, wf):
    """Per-sample: ASPP + projection + 3x3 head conv + classifier + bilinear upsample.

    x_ref   : (1, hf, wf, HIDDEN)       GRU output
    wbr_ref : (HIDDEN, 4*ASPP_CH)       4 ASPP spatial branches as one 1x1 weight
    wpl_ref : (HIDDEN, ASPP_CH)         image-pool branch 1x1 weight
    wpm/wpp : (4*ASPP_CH, ASPP_CH)/(ASPP_CH, ASPP_CH) bf16 projection weights
    whead_ref: (9, ASPP_CH, ASPP_CH)    bf16 per-tap 3x3 head conv weights
    wc_ref  : (ASPP_CH, NUM_CLASSES)    classifier 1x1 weight; bc_ref its bias
    ah_ref  : (H, hf)  awt_ref: (wf, W) separable bilinear interpolation matrices
    o_ref   : (1, NUM_CLASSES, H, W)    channels-first logits at input resolution
    ppad_ref: VMEM (hf+2, wf+2, ASPP_CH) bf16 zero-padded projection scratch
    """
    p = hf * wf
    cin = x_ref.shape[-1]
    ncls = o_ref.shape[1]
    x = x_ref[0].reshape(p, cin)

    # ASPP spatial branches: the dilated 3x3 branches degenerate to their center
    # tap (off-center taps only see zero padding at hf,wf <= min(dilation)), so
    # all four branches collapse into one 1x1 matmul.
    br = jnp.dot(x, wbr_ref[...], preferred_element_type=jnp.float32)
    br = jnp.maximum(br * brs_ref[...] + brt_ref[...], 0.0)            # (p, 4*ASPP_CH)

    # image-pooling branch: global average pool + 1x1 conv + BN + ReLU.
    xm = jnp.mean(x, axis=0, keepdims=True)                            # (1, cin)
    pb = jnp.dot(xm, wpl_ref[...], preferred_element_type=jnp.float32)
    pb = jnp.maximum(pb * pls_ref[...] + plt_ref[...], 0.0)            # (1, ASPP_CH)

    # 1x1 projection conv over concat(spatial branches, pooled) split in two.
    proj = jnp.dot(br.astype(wpm_ref.dtype), wpm_ref[...],
                   preferred_element_type=jnp.float32)
    proj = proj + jnp.dot(pb.astype(wpp_ref.dtype), wpp_ref[...],
                          preferred_element_type=jnp.float32)
    proj = jnp.maximum(proj * prs_ref[...] + prt_ref[...], 0.0)        # (p, ASPP_CH)
    # TODO(synk): ASPP Dropout(0.5) is identity in eval mode.

    # DeepLabHead 3x3 conv + BN + ReLU: per-tap MXU accumulation over zero padding.
    ppad_ref[...] = jnp.zeros_like(ppad_ref)
    ppad_ref[1:1 + hf, 1:1 + wf, :] = (
        proj.astype(ppad_ref.dtype).reshape(hf, wf, ASPP_CH))
    acc = None
    for t in range(HEAD_K * HEAD_K):
        a, b = divmod(t, HEAD_K)
        xt = ppad_ref[a:a + hf, b:b + wf, :].reshape(p, ASPP_CH)
        d = jnp.dot(xt, whead_ref[t], preferred_element_type=jnp.float32)
        acc = d if acc is None else acc + d
    y = jnp.maximum(acc * hs_ref[...] + ht_ref[...], 0.0)              # (p, ASPP_CH)

    # 1x1 classifier conv.
    logits = jnp.dot(y, wc_ref[...], preferred_element_type=jnp.float32) + bc_ref[...]

    # Separable bilinear upsample (align_corners=False): out_c = Ah @ L_c @ Aw^T.
    lg = logits.reshape(hf, wf, ncls)
    for c in range(ncls):
        t0 = jnp.dot(lg[:, :, c], awt_ref[...],
                     preferred_element_type=jnp.float32)               # (hf, W)
        o_ref[0, c] = jnp.dot(ah_ref[...], t0,
                              preferred_element_type=jnp.float32)      # (H, W)


def _bn_eval_affine(c):
    """Freshly-initialized BatchNorm in eval mode folded into (scale, shift).

    Real pretrained BN running stats would be folded per-layer the same way."""
    gamma = jnp.ones((c,), jnp.float32)
    beta = jnp.zeros((c,), jnp.float32)
    mean = jnp.zeros((c,), jnp.float32)
    var = jnp.ones((c,), jnp.float32)
    scale = gamma / jnp.sqrt(var + EPS)
    shift = beta - mean * scale
    return scale, shift


def _bilinear_matrix(out_size, in_size):
    """PyTorch bilinear (align_corners=False) interpolation weights: (out, in)."""
    scale = in_size / out_size
    dst = np.arange(out_size, dtype=np.float64)
    src = (dst + 0.5) * scale - 0.5
    src = np.maximum(src, 0.0)               # PyTorch clamps negative source coords
    p0 = np.minimum(np.floor(src).astype(np.int64), in_size - 1)
    p1 = np.minimum(p0 + 1, in_size - 1)
    lam = src - p0
    m = np.zeros((out_size, in_size), np.float64)
    rows = np.arange(out_size)
    np.add.at(m, (rows, p0), 1.0 - lam)
    np.add.at(m, (rows, p1), lam)
    return m.astype(np.float32)


def head_fused(x, params, out_h, out_w):
    """ASPP([12,24,36]) + projection + 3x3 head conv + classifier + bilinear upsample."""
    n, hf, wf, cin = x.shape
    # Center-tap reduction of the dilated branches is only valid while the
    # feature map is no larger than the smallest dilation (true at 8x8 / d=12).
    assert hf <= min(ASPP_DILATIONS) and wf <= min(ASPP_DILATIONS), (
        "non-degenerate ASPP resolution: dilated taps would see real data")

    sc, sh = _bn_eval_affine(ASPP_CH)
    w_br = jnp.concatenate(
        [params["aspp0_w"][0, 0], params["aspp1_w"][1, 1],
         params["aspp2_w"][1, 1], params["aspp3_w"][1, 1]], axis=-1)   # (cin, 4*A)
    br_scale = jnp.concatenate([sc] * 4)[None, :]
    br_shift = jnp.concatenate([sh] * 4)[None, :]
    w_pool = params["aspp4_w"][0, 0]                                   # (cin, A)
    w_proj = params["proj_w"][0, 0]                                    # (5*A, A)
    w_proj_main = w_proj[:4 * ASPP_CH].astype(MATMUL_DTYPE)
    w_proj_pool = w_proj[4 * ASPP_CH:].astype(MATMUL_DTYPE)
    w_head = params["head_w"].reshape(HEAD_K * HEAD_K, ASPP_CH, ASPP_CH).astype(MATMUL_DTYPE)
    hsc, hsh = _bn_eval_affine(ASPP_CH)
    w_cls = params["cls_w"][0, 0]                                      # (A, ncls)
    b_cls = params["cls_b"][None, :]
    ah = jnp.asarray(_bilinear_matrix(out_h, hf))                      # (H, hf)
    awt = jnp.asarray(_bilinear_matrix(out_w, wf).T)                   # (wf, W)

    kern = functools.partial(_head_kernel, hf=hf, wf=wf)
    return pl.pallas_call(
        kern,
        out_shape=jax.ShapeDtypeStruct((n, NUM_CLASSES, out_h, out_w), jnp.float32),
        grid=(n,),
        in_specs=[
            pl.BlockSpec((1, hf, wf, cin), lambda i: (i, 0, 0, 0)),
            pl.BlockSpec((cin, 4 * ASPP_CH), lambda i: (0, 0)),
            pl.BlockSpec((1, 4 * ASPP_CH), lambda i: (0, 0)),
            pl.BlockSpec((1, 4 * ASPP_CH), lambda i: (0, 0)),
            pl.BlockSpec((cin, ASPP_CH), lambda i: (0, 0)),
            pl.BlockSpec((1, ASPP_CH), lambda i: (0, 0)),
            pl.BlockSpec((1, ASPP_CH), lambda i: (0, 0)),
            pl.BlockSpec((4 * ASPP_CH, ASPP_CH), lambda i: (0, 0)),
            pl.BlockSpec((ASPP_CH, ASPP_CH), lambda i: (0, 0)),
            pl.BlockSpec((1, ASPP_CH), lambda i: (0, 0)),
            pl.BlockSpec((1, ASPP_CH), lambda i: (0, 0)),
            pl.BlockSpec((HEAD_K * HEAD_K, ASPP_CH, ASPP_CH), lambda i: (0, 0, 0)),
            pl.BlockSpec((1, ASPP_CH), lambda i: (0, 0)),
            pl.BlockSpec((1, ASPP_CH), lambda i: (0, 0)),
            pl.BlockSpec((ASPP_CH, NUM_CLASSES), lambda i: (0, 0)),
            pl.BlockSpec((1, NUM_CLASSES), lambda i: (0, 0)),
            pl.BlockSpec((out_h, hf), lambda i: (0, 0)),
            pl.BlockSpec((wf, out_w), lambda i: (0, 0)),
        ],
        out_specs=pl.BlockSpec((1, NUM_CLASSES, out_h, out_w), lambda i: (i, 0, 0, 0)),
        scratch_shapes=[pltpu.VMEM((hf + 2, wf + 2, ASPP_CH), MATMUL_DTYPE)],
        compiler_params=pltpu.CompilerParams(dimension_semantics=("parallel",)),
    )(x, w_br, br_scale, br_shift, w_pool, sc[None, :], sh[None, :],
      w_proj_main, w_proj_pool, sc[None, :], sh[None, :],
      w_head, hsc[None, :], hsh[None, :], w_cls, b_cls, ah, awt)


# ======================= model forward =======================

def gru_deeplabv3_forward(params, x_nchw):
    n, c, h, w = x_nchw.shape
    hf, wf = h // STRIDE, w // STRIDE

    # -------- backbone input prep --------
    # TODO(synk): pretrained MobileNetV3-Large features (inverted residuals, SE,
    # hard-swish, torchvision weights) have no clean Pallas equivalent here;
    # replaced by a deterministic patchify (space-to-depth + 1x1 conv + ReLU) stub.
    xs = (x_nchw.astype(jnp.float32)
          .reshape(n, c, hf, STRIDE, wf, STRIDE)
          .transpose(0, 2, 4, 3, 5, 1)
          .reshape(n, hf, wf, STRIDE * STRIDE * c))

    # -------- backbone stub + ConvGRU cell (hidden_state None -> zeros), fused --------
    h_next = backbone_gru_fused(xs, params)                            # (N, hf, wf, HIDDEN)

    # -------- DeepLabHead + F.interpolate(bilinear, align_corners=False), fused --------
    return head_fused(h_next, params, h, w)                            # (N, 2, H, W)


# ======================= parameters =======================

def init_params(key):
    ks = jax.random.split(key, 12)

    def w_init(k, shape):
        fan_in = shape[0] * shape[1] * shape[2]
        return (jax.random.normal(k, shape, jnp.float32) / np.sqrt(fan_in)).astype(jnp.float32)

    cin_gru = FEAT_CH + HIDDEN
    return {
        "bb_w": w_init(ks[0], (1, 1, STRIDE * STRIDE * IN_CH, FEAT_CH)),
        "bb_b": jnp.zeros((FEAT_CH,), jnp.float32),
        "gru_w1": w_init(ks[1], (K_SIZE, K_SIZE, cin_gru, 2 * HIDDEN)),
        "gru_b1": jnp.zeros((2 * HIDDEN,), jnp.float32),
        "gru_gn1_g": jnp.ones((2 * HIDDEN,), jnp.float32),
        "gru_gn1_b": jnp.zeros((2 * HIDDEN,), jnp.float32),
        "gru_w2": w_init(ks[2], (K_SIZE, K_SIZE, cin_gru, HIDDEN)),
        "gru_b2": jnp.zeros((HIDDEN,), jnp.float32),
        "gru_gn2_g": jnp.ones((HIDDEN,), jnp.float32),
        "gru_gn2_b": jnp.zeros((HIDDEN,), jnp.float32),
        "aspp0_w": w_init(ks[3], (1, 1, HIDDEN, ASPP_CH)),
        "aspp1_w": w_init(ks[4], (3, 3, HIDDEN, ASPP_CH)),
        "aspp2_w": w_init(ks[5], (3, 3, HIDDEN, ASPP_CH)),
        "aspp3_w": w_init(ks[6], (3, 3, HIDDEN, ASPP_CH)),
        "aspp4_w": w_init(ks[7], (1, 1, HIDDEN, ASPP_CH)),
        "proj_w": w_init(ks[8], (1, 1, 5 * ASPP_CH, ASPP_CH)),
        "head_w": w_init(ks[9], (3, 3, ASPP_CH, ASPP_CH)),
        "cls_w": w_init(ks[10], (1, 1, ASPP_CH, NUM_CLASSES)),
        "cls_b": jnp.zeros((NUM_CLASSES,), jnp.float32),
    }


# ======================= main =======================

if __name__ == "__main__":
    key = jax.random.PRNGKey(0)
    pkey, xkey = jax.random.split(key)
    params = init_params(pkey)
    x = jax.random.normal(xkey, (BATCH, IN_CH, IMG, IMG), jnp.float32)  # NCHW, like PyTorch

    fwd = jax.jit(gru_deeplabv3_forward)
    out = jax.block_until_ready(fwd(params, x))

    assert out.shape == (BATCH, NUM_CLASSES, IMG, IMG), out.shape
    assert bool(jnp.all(jnp.isfinite(out)))
    print("KERNEL_OK")
</pallas_src>

<mosaic_0001>
module attributes {stable_mosaic.version = 11 : i64} {
  func.func @_backbone_gru_kernel(%arg0: i32, %arg1: memref<1x8x8x192xf32, #tpu.memory_space<vmem>>, %arg2: memref<192x16xf32, #tpu.memory_space<vmem>>, %arg3: memref<1x16xf32, #tpu.memory_space<vmem>>, %arg4: memref<9x16x64xf32, #tpu.memory_space<vmem>>, %arg5: memref<1x64xf32, #tpu.memory_space<vmem>>, %arg6: memref<1x64xf32, #tpu.memory_space<vmem>>, %arg7: memref<1x64xf32, #tpu.memory_space<vmem>>, %arg8: memref<1x8x8x32xf32, #tpu.memory_space<vmem>>, %arg9: memref<10x10x16xf32, #tpu.memory_space<vmem>>) attributes {dimension_semantics = [#tpu.dimension_semantics<parallel>], iteration_bounds = array<i64: 2>, scalar_prefetch = 0 : i64, scratch_operands = 1 : i64, tpu.core_type = #tpu.core_type<tc>, window_params = [{transform_indices = @transform_0, window_bounds = array<i64: 1, 8, 8, 192>}, {pipeline_mode = #tpu.pipeline_mode<synchronous>, transform_indices = @transform_1, window_bounds = array<i64: 192, 16>}, {pipeline_mode = #tpu.pipeline_mode<synchronous>, transform_indices = @transform_2, window_bounds = array<i64: 1, 16>}, {pipeline_mode = #tpu.pipeline_mode<synchronous>, transform_indices = @transform_3, window_bounds = array<i64: 9, 16, 64>}, {pipeline_mode = #tpu.pipeline_mode<synchronous>, transform_indices = @transform_4, window_bounds = array<i64: 1, 64>}, {pipeline_mode = #tpu.pipeline_mode<synchronous>, transform_indices = @transform_5, window_bounds = array<i64: 1, 64>}, {pipeline_mode = #tpu.pipeline_mode<synchronous>, transform_indices = @transform_6, window_bounds = array<i64: 1, 64>}, {transform_indices = @transform_7, window_bounds = array<i64: 1, 8, 8, 32>}]} {
    %c0 = arith.constant 0 : index
    %c0_0 = arith.constant 0 : index
    %c0_1 = arith.constant 0 : index
    %c0_2 = arith.constant 0 : index
    %0 = vector.load %arg1[%c0, %c0_0, %c0_1, %c0_2] : memref<1x8x8x192xf32, #tpu.memory_space<vmem>>, vector<1x8x8x192xf32>
    %1 = vector.shape_cast %0 : vector<1x8x8x192xf32> to vector<8x8x192xf32>
    %2 = vector.shape_cast %1 : vector<8x8x192xf32> to vector<64x192xf32>
    %c0_3 = arith.constant 0 : index
    %c0_4 = arith.constant 0 : index
    %3 = vector.load %arg2[%c0_3, %c0_4] : memref<192x16xf32, #tpu.memory_space<vmem>>, vector<192x16xf32>
    %cst = arith.constant dense<0.000000e+00> : vector<64x16xf32>
    %4 = tpu.matmul %2, %3, %cst {dimension_numbers = #tpu.dot_dimension_numbers<[1], [0], [0], [1], [0, 0, 1, 1], [], []>} : vector<64x192xf32>, vector<192x16xf32>, vector<64x16xf32> -> vector<64x16xf32>
    %c0_5 = arith.constant 0 : index
    %c0_6 = arith.constant 0 : index
    %5 = vector.load %arg3[%c0_5, %c0_6] : memref<1x16xf32, #tpu.memory_space<vmem>>, vector<1x16xf32>
    %6 = vector.broadcast %5 : vector<1x16xf32> to vector<64x16xf32>
    %7 = arith.addf %4, %6 : vector<64x16xf32>
    %cst_7 = arith.constant 0.000000e+00 : f32
    %8 = vector.broadcast %cst_7 : f32 to vector<64x16xf32>
    %9 = arith.maximumf %7, %8 : vector<64x16xf32>
    %cst_8 = arith.constant 0.000000e+00 : f32
    %10 = vector.broadcast %cst_8 : f32 to vector<10x10x16xf32>
    %c0_9 = arith.constant 0 : index
    %c0_10 = arith.constant 0 : index
    %c0_11 = arith.constant 0 : index
    %11 = vector.load %arg9[%c0_9, %c0_10, %c0_11] : memref<10x10x16xf32, #tpu.memory_space<vmem>>, vector<10x10x16xf32>
    tpu.vector_store %arg9[%c0_9, %c0_10, %c0_11], %10 {strides = array<i32>} : memref<10x10x16xf32, #tpu.memory_space<vmem>>, vector<10x10x16xf32>,
    %12 = vector.shape_cast %9 : vector<64x16xf32> to vector<8x8x16xf32>
    %c1 = arith.constant 1 : index
    %c1_12 = arith.constant 1 : index
    %c0_13 = arith.constant 0 : index
    %13 = vector.load %arg9[%c1, %c1_12, %c0_13] : memref<10x10x16xf32, #tpu.memory_space<vmem>>, vector<8x8x16xf32>
    tpu.vector_store %arg9[%c1, %c1_12, %c0_13], %12 {strides = array<i32>} : memref<10x10x16xf32, #tpu.memory_space<vmem>>, vector<8x8x16xf32>,
    %c0_14 = arith.constant 0 : index
    %c0_15 = arith.constant 0 : index
    %c0_16 = arith.constant 0 : index
    %14 = vector.load %arg9[%c0_14, %c0_15, %c0_16] : memref<10x10x16xf32, #tpu.memory_space<vmem>>, vector<8x8x16xf32>
    %15 = vector.shape_cast %14 : vector<8x8x16xf32> to vector<64x16xf32>
    %c0_17 = arith.constant 0 : index
    %c0_18 = arith.constant 0 : index
    %c0_19 = arith.constant 0 : index
    %16 = vector.load %arg4[%c0_17, %c0_18, %c0_19] : memref<9x16x64xf32, #tpu.memory_space<vmem>>, vector<1x16x64xf32>
    %17 = vector.shape_cast %16 : vector<1x16x64xf32> to vector<16x64xf32>
    %cst_20 = arith.constant dense<0.000000e+00> : vector<64x64xf32>
    %18 = tpu.matmul %15, %17, %cst_20 {dimension_numbers = #tpu.dot_dimension_numbers<[1], [0], [0], [1], [0, 0, 1, 1], [], []>} : vector<64x16xf32>, vector<16x64xf32>, vector<64x64xf32> -> vector<64x64xf32>
    %c0_21 = arith.constant 0 : index
    %c1_22 = arith.constant 1 : index
    %c0_23 = arith.constant 0 : index
    %19 = vector.load %arg9[%c0_21, %c1_22, %c0_23] : memref<10x10x16xf32, #tpu.memory_space<vmem>>, vector<8x8x16xf32>
    %20 = vector.shape_cast %19 : vector<8x8x16xf32> to vector<64x16xf32>
    %c1_24 = arith.constant 1 : index
    %c0_25 = arith.constant 0 : index
    %c0_26 = arith.constant 0 : index
    %21 = vector.load %arg4[%c1_24, %c0_25, %c0_26] : memref<9x16x64xf32, #tpu.memory_space<vmem>>, vector<1x16x64xf32>
    %22 = vector.shape_cast %21 : vector<1x16x64xf32> to vector<16x64xf32>
    %cst_27 = arith.constant dense<0.000000e+00> : vector<64x64xf32>
    %23 = tpu.matmul %20, %22, %cst_27 {dimension_numbers = #tpu.dot_dimension_numbers<[1], [0], [0], [1], [0, 0, 1, 1], [], []>} : vector<64x16xf32>, vector<16x64xf32>, vector<64x64xf32> -> vector<64x64xf32>
    %24 = arith.addf %18, %23 : vector<64x64xf32>
    %c0_28 = arith.constant 0 : index
    %c2 = arith.constant 2 : index
    %c0_29 = arith.constant 0 : index
    %25 = vector.load %arg9[%c0_28, %c2, %c0_29] : memref<10x10x16xf32, #tpu.memory_space<vmem>>, vector<8x8x16xf32>
    %26 = vector.shape_cast %25 : vector<8x8x16xf32> to vector<64x16xf32>
    %c2_30 = arith.constant 2 : index
    %c0_31 = arith.constant 0 : index
    %c0_32 = arith.constant 0 : index
    %27 = vector.load %arg4[%c2_30, %c0_31, %c0_32] : memref<9x16x64xf32, #tpu.memory_space<vmem>>, vector<1x16x64xf32>
    %28 = vector.shape_cast %27 : vector<1x16x64xf32> to vector<16x64xf32>
    %cst_33 = arith.constant dense<0.000000e+00> : vector<64x64xf32>
    %29 = tpu.matmul %26, %28, %cst_33 {dimension_numbers = #tpu.dot_dimension_numbers<[1], [0], [0], [1], [0, 0, 1, 1], [], []>} : vector<64x16xf32>, vector<16x64xf32>, vector<64x64xf32> -> vector<64x64xf32>
    %30 = arith.addf %24, %29 : vector<64x64xf32>
    %c1_34 = arith.constant 1 : index
    %c0_35 = arith.constant 0 : index
    %c0_36 = arith.constant 0 : index
    %31 = vector.load %arg9[%c1_34, %c0_35, %c0_36] : memref<10x10x16xf32, #tpu.memory_space<vmem>>, vector<8x8x16xf32>
    %32 = vector.shape_cast %31 : vector<8x8x16xf32> to vector<64x16xf32>
    %c3 = arith.constant 3 : index
    %c0_37 = arith.constant 0 : index
    %c0_38 = arith.constant 0 : index
    %33 = vector.load %arg4[%c3, %c0_37, %c0_38] : memref<9x16x64xf32, #tpu.memory_space<vmem>>, vector<1x16x64xf32>
    %34 = vector.shape_cast %33 : vector<1x16x64xf32> to vector<16x64xf32>
    %cst_39 = arith.constant dense<0.000000e+00> : vector<64x64xf32>
    %35 = tpu.matmul %32, %34, %cst_39 {dimension_numbers = #tpu.dot_dimension_numbers<[1], [0], [0], [1], [0, 0, 1, 1], [], []>} : vector<64x16xf32>, vector<16x64xf32>, vector<64x64xf32> -> vector<64x64xf32>
    %36 = arith.addf %30, %35 : vector<64x64xf32>
    %c1_40 = arith.constant 1 : index
    %c1_41 = arith.constant 1 : index
    %c0_42 = arith.constant 0 : index
    %37 = vector.load %arg9[%c1_40, %c1_41, %c0_42] : memref<10x10x16xf32, #tpu.memory_space<vmem>>, vector<8x8x16xf32>
    %38 = vector.shape_cast %37 : vector<8x8x16xf32> to vector<64x16xf32>
    %c4 = arith.constant 4 : index
    %c0_43 = arith.constant 0 : index
    %c0_44 = arith.constant 0 : index
    %39 = vector.load %arg4[%c4, %c0_43, %c0_44] : memref<9x16x64xf32, #tpu.memory_space<vmem>>, vector<1x16x64xf32>
    %40 = vector.shape_cast %39 : vector<1x16x64xf32> to vector<16x64xf32>
    %cst_45 = arith.constant dense<0.000000e+00> : vector<64x64xf32>
    %41 = tpu.matmul %38, %40, %cst_45 {dimension_numbers = #tpu.dot_dimension_numbers<[1], [0], [0], [1], [0, 0, 1, 1], [], []>} : vector<64x16xf32>, vector<16x64xf32>, vector<64x64xf32> -> vector<64x64xf32>
    %42 = arith.addf %36, %41 : vector<64x64xf32>
    %c1_46 = arith.constant 1 : index
    %c2_47 = arith.constant 2 : index
    %c0_48 = arith.constant 0 : index
    %43 = vector.load %arg9[%c1_46, %c2_47, %c0_48] : memref<10x10x16xf32, #tpu.memory_space<vmem>>, vector<8x8x16xf32>
    %44 = vector.shape_cast %43 : vector<8x8x16xf32> to vector<64x16xf32>
    %c5 = arith.constant 5 : index
    %c0_49 = arith.constant 0 : index
    %c0_50 = arith.constant 0 : index
    %45 = vector.load %arg4[%c5, %c0_49, %c0_50] : memref<9x16x64xf32, #tpu.memory_space<vmem>>, vector<1x16x64xf32>
    %46 = vector.shape_cast %45 : vector<1x16x64xf32> to vector<16x64xf32>
    %cst_51 = arith.constant dense<0.000000e+00> : vector<64x64xf32>
    %47 = tpu.matmul %44, %46, %cst_51 {dimension_numbers = #tpu.dot_dimension_numbers<[1], [0], [0], [1], [0, 0, 1, 1], [], []>} : vector<64x16xf32>, vector<16x64xf32>, vector<64x64xf32> -> vector<64x64xf32>
    %48 = arith.addf %42, %47 : vector<64x64xf32>
    %c2_52 = arith.constant 2 : index
    %c0_53 = arith.constant 0 : index
    %c0_54 = arith.constant 0 : index
    %49 = vector.load %arg9[%c2_52, %c0_53, %c0_54] : memref<10x10x16xf32, #tpu.memory_space<vmem>>, vector<8x8x16xf32>
    %50 = vector.shape_cast %49 : vector<8x8x16xf32> to vector<64x16xf32>
    %c6 = arith.constant 6 : index
    %c0_55 = arith.constant 0 : index
    %c0_56 = arith.constant 0 : index
    %51 = vector.load %arg4[%c6, %c0_55, %c0_56] : memref<9x16x64xf32, #tpu.memory_space<vmem>>, vector<1x16x64xf32>
    %52 = vector.shape_cast %51 : vector<1x16x64xf32> to vector<16x64xf32>
    %cst_57 = arith.constant dense<0.000000e+00> : vector<64x64xf32>
    %53 = tpu.matmul %50, %52, %cst_57 {dimension_numbers = #tpu.dot_dimension_numbers<[1], [0], [0], [1], [0, 0, 1, 1], [], []>} : vector<64x16xf32>, vector<16x64xf32>, vector<64x64xf32> -> vector<64x64xf32>
    %54 = arith.addf %48, %53 : vector<64x64xf32>
    %c2_58 = arith.constant 2 : index
    %c1_59 = arith.constant 1 : index
    %c0_60 = arith.constant 0 : index
    %55 = vector.load %arg9[%c2_58, %c1_59, %c0_60] : memref<10x10x16xf32, #tpu.memory_space<vmem>>, vector<8x8x16xf32>
    %56 = vector.shape_cast %55 : vector<8x8x16xf32> to vector<64x16xf32>
    %c7 = arith.constant 7 : index
    %c0_61 = arith.constant 0 : index
    %c0_62 = arith.constant 0 : index
    %57 = vector.load %arg4[%c7, %c0_61, %c0_62] : memref<9x16x64xf32, #tpu.memory_space<vmem>>, vector<1x16x64xf32>
    %58 = vector.shape_cast %57 : vector<1x16x64xf32> to vector<16x64xf32>
    %cst_63 = arith.constant dense<0.000000e+00> : vector<64x64xf32>
    %59 = tpu.matmul %56, %58, %cst_63 {dimension_numbers = #tpu.dot_dimension_numbers<[1], [0], [0], [1], [0, 0, 1, 1], [], []>} : vector<64x16xf32>, vector<16x64xf32>, vector<64x64xf32> -> vector<64x64xf32>
    %60 = arith.addf %54, %59 : vector<64x64xf32>
    %c2_64 = arith.constant 2 : index
    %c2_65 = arith.constant 2 : index
    %c0_66 = arith.constant 0 : index
    %61 = vector.load %arg9[%c2_64, %c2_65, %c0_66] : memref<10x10x16xf32, #tpu.memory_space<vmem>>, vector<8x8x16xf32>
    %62 = vector.shape_cast %61 : vector<8x8x16xf32> to vector<64x16xf32>
    %c8 = arith.constant 8 : index
    %c0_67 = arith.constant 0 : index
    %c0_68 = arith.constant 0 : index
    %63 = vector.load %arg4[%c8, %c0_67, %c0_68] : memref<9x16x64xf32, #tpu.memory_space<vmem>>, vector<1x16x64xf32>
    %64 = vector.shape_cast %63 : vector<1x16x64xf32> to vector<16x64xf32>
    %cst_69 = arith.constant dense<0.000000e+00> : vector<64x64xf32>
    %65 = tpu.matmul %62, %64, %cst_69 {dimension_numbers = #tpu.dot_dimension_numbers<[1], [0], [0], [1], [0, 0, 1, 1], [], []>} : vector<64x16xf32>, vector<16x64xf32>, vector<64x64xf32> -> vector<64x64xf32>
    %66 = arith.addf %60, %65 : vector<64x64xf32>
    %c0_70 = arith.constant 0 : index
    %c0_71 = arith.constant 0 : index
    %67 = vector.load %arg5[%c0_70, %c0_71] : memref<1x64xf32, #tpu.memory_space<vmem>>, vector<1x64xf32>
    %68 = vector.broadcast %67 : vector<1x64xf32> to vector<64x64xf32>
    %69 = arith.addf %66, %68 : vector<64x64xf32>
    %70 = vector.extract_strided_slice %69 {offsets = [0, 0], sizes = [64, 32], strides = [1, 1]} : vector<64x64xf32> to vector<64x32xf32>
    %71 = vector.extract_strided_slice %69 {offsets = [0, 32], sizes = [64, 32], strides = [1, 1]} : vector<64x64xf32> to vector<64x32xf32>
    %c0_72 = arith.constant 0 : index
    %c0_73 = arith.constant 0 : index
    %72 = vector.load %arg6[%c0_72, %c0_73] : memref<1x64xf32, #tpu.memory_space<vmem>>, vector<1x32xf32>
    %c0_74 = arith.constant 0 : index
    %c0_75 = arith.constant 0 : index
    %73 = vector.load %arg7[%c0_74, %c0_75] : memref<1x64xf32, #tpu.memory_space<vmem>>, vector<1x32xf32>
    %74 = vector.shape_cast %70 : vector<64x32xf32> to vector<1x64x32xf32>
    %cst_76 = arith.constant dense<0.000000e+00> : vector<1xf32>
    %75 = vector.multi_reduction <add>, %74, %cst_76 [1, 2] : vector<1x64x32xf32> to vector<1xf32>
    %76 = vector.shape_cast %75 : vector<1xf32> to vector<1x1x1xf32>
    %77 = vector.extract %76[0, 0, 0] : f32 from vector<1x1x1xf32>
    %cst_77 = arith.constant 2.048000e+03 : f32
    %78 = arith.divf %77, %cst_77 : f32
    %79 = vector.broadcast %78 : f32 to vector<64x32xf32>
    %80 = arith.subf %70, %79 : vector<64x32xf32>
    %81 = arith.mulf %80, %80 : vector<64x32xf32>
    %82 = vector.shape_cast %81 : vector<64x32xf32> to vector<1x64x32xf32>
    %cst_78 = arith.constant dense<0.000000e+00> : vector<1xf32>
    %83 = vector.multi_reduction <add>, %82, %cst_78 [1, 2] : vector<1x64x32xf32> to vector<1xf32>
    %84 = vector.shape_cast %83 : vector<1xf32> to vector<1x1x1xf32>
    %85 = vector.extract %84[0, 0, 0] : f32 from vector<1x1x1xf32>
    %cst_79 = arith.constant 2.048000e+03 : f32
    %86 = arith.divf %85, %cst_79 : f32
    %cst_80 = arith.constant 9.99999974E-6 : f32
    %87 = arith.addf %86, %cst_80 : f32
    %88 = math.rsqrt %87 : f32
    %89 = vector.broadcast %88 : f32 to vector<64x32xf32>
    %90 = arith.mulf %80, %89 : vector<64x32xf32>
    %91 = vector.broadcast %72 : vector<1x32xf32> to vector<64x32xf32>
    %92 = arith.mulf %90, %91 : vector<64x32xf32>
    %93 = vector.broadcast %73 : vector<1x32xf32> to vector<64x32xf32>
    %94 = arith.addf %92, %93 : vector<64x32xf32>
    %95 = arith.negf %94 : vector<64x32xf32>
    %96 = math.exp %95 : vector<64x32xf32>
    %cst_81 = arith.constant 1.000000e+00 : f32
    %97 = vector.broadcast %cst_81 : f32 to vector<64x32xf32>
    %98 = arith.addf %97, %96 : vector<64x32xf32>
    %99 = arith.divf %97, %98 : vector<64x32xf32>
    %c0_82 = arith.constant 0 : index
    %c32 = arith.constant 32 : index
    %100 = vector.load %arg6[%c0_82, %c32] : memref<1x64xf32, #tpu.memory_space<vmem>>, vector<1x32xf32>
    %c0_83 = arith.constant 0 : index
    %c32_84 = arith.constant 32 : index
    %101 = vector.load %arg7[%c0_83, %c32_84] : memref<1x64xf32, #tpu.memory_space<vmem>>, vector<1x32xf32>
    %102 = vector.shape_cast %71 : vector<64x32xf32> to vector<1x64x32xf32>
    %cst_85 = arith.constant dense<0.000000e+00> : vector<1xf32>
    %103 = vector.multi_reduction <add>, %102, %cst_85 [1, 2] : vector<1x64x32xf32> to vector<1xf32>
    %104 = vector.shape_cast %103 : vector<1xf32> to vector<1x1x1xf32>
    %105 = vector.extract %104[0, 0, 0] : f32 from vector<1x1x1xf32>
    %cst_86 = arith.constant 2.048000e+03 : f32
    %106 = arith.divf %105, %cst_86 : f32
    %107 = vector.broadcast %106 : f32 to vector<64x32xf32>
    %108 = arith.subf %71, %107 : vector<64x32xf32>
    %109 = arith.mulf %108, %108 : vector<64x32xf32>
    %110 = vector.shape_cast %109 : vector<64x32xf32> to vector<1x64x32xf32>
    %cst_87 = arith.constant dense<0.000000e+00> : vector<1xf32>
    %111 = vector.multi_reduction <add>, %110, %cst_87 [1, 2] : vector<1x64x32xf32> to vector<1xf32>
    %112 = vector.shape_cast %111 : vector<1xf32> to vector<1x1x1xf32>
    %113 = vector.extract %112[0, 0, 0] : f32 from vector<1x1x1xf32>
    %cst_88 = arith.constant 2.048000e+03 : f32
    %114 = arith.divf %113, %cst_88 : f32
    %cst_89 = arith.constant 9.99999974E-6 : f32
    %115 = arith.addf %114, %cst_89 : f32
    %116 = math.rsqrt %115 : f32
    %117 = vector.broadcast %116 : f32 to vector<64x32xf32>
    %118 = arith.mulf %108, %117 : vector<64x32xf32>
    %119 = vector.broadcast %100 : vector<1x32xf32> to vector<64x32xf32>
    %120 = arith.mulf %118, %119 : vector<64x32xf32>
    %121 = vector.broadcast %101 : vector<1x32xf32> to vector<64x32xf32>
    %122 = arith.addf %120, %121 : vector<64x32xf32>
    %123 = math.tanh %122 : vector<64x32xf32>
    %124 = arith.mulf %99, %123 : vector<64x32xf32>
    %125 = vector.shape_cast %124 : vector<64x32xf32> to vector<8x8x32xf32>
    %c0_90 = arith.constant 0 : index
    %c0_91 = arith.constant 0 : index
    %c0_92 = arith.constant 0 : index
    %c0_93 = arith.constant 0 : index
    %126 = vector.load %arg8[%c0_90, %c0_91, %c0_92, %c0_93] : memref<1x8x8x32xf32, #tpu.memory_space<vmem>>, vector<1x8x8x32xf32>
    %127 = vector.shape_cast %126 : vector<1x8x8x32xf32> to vector<8x8x32xf32>
    %128 = vector.shape_cast %125 : vector<8x8x32xf32> to vector<1x8x8x32xf32>
    tpu.vector_store %arg8[%c0_90, %c0_91, %c0_92, %c0_93], %128 {strides = array<i32>} : memref<1x8x8x32xf32, #tpu.memory_space<vmem>>, vector<1x8x8x32xf32>,
    return
  }
  func.func @transform_0(%arg0: i32) -> (i32, i32, i32, i32) {
    %c0_i32 = arith.constant 0 : i32
    %c0_i32_0 = arith.constant 0 : i32
    %c0_i32_1 = arith.constant 0 : i32
    %c0_i32_2 = arith.constant 0 : i32
    return %arg0, %c0_i32, %c0_i32_0, %c0_i32_1 : i32, i32, i32, i32
  }
  func.func @transform_1(%arg0: i32) -> (i32, i32) {
    %c0_i32 = arith.constant 0 : i32
    %c0_i32_0 = arith.constant 0 : i32
    %c0_i32_1 = arith.constant 0 : i32
    return %c0_i32, %c0_i32_0 : i32, i32
  }
  func.func @transform_2(%arg0: i32) -> (i32, i32) {
    %c0_i32 = arith.constant 0 : i32
    %c0_i32_0 = arith.constant 0 : i32
    %c0_i32_1 = arith.constant 0 : i32
    return %c0_i32, %c0_i32_0 : i32, i32
  }
  func.func @transform_3(%arg0: i32) -> (i32, i32, i32) {
    %c0_i32 = arith.constant 0 : i32
    %c0_i32_0 = arith.constant 0 : i32
    %c0_i32_1 = arith.constant 0 : i32
    %c0_i32_2 = arith.constant 0 : i32
    return %c0_i32, %c0_i32_0, %c0_i32_1 : i32, i32, i32
  }
  func.func @transform_4(%arg0: i32) -> (i32, i32) {
    %c0_i32 = arith.constant 0 : i32
    %c0_i32_0 = arith.constant 0 : i32
    %c0_i32_1 = arith.constant 0 : i32
    return %c0_i32, %c0_i32_0 : i32, i32
  }
  func.func @transform_5(%arg0: i32) -> (i32, i32) {
    %c0_i32 = arith.constant 0 : i32
    %c0_i32_0 = arith.constant 0 : i32
    %c0_i32_1 = arith.constant 0 : i32
    return %c0_i32, %c0_i32_0 : i32, i32
  }
  func.func @transform_6(%arg0: i32) -> (i32, i32) {
    %c0_i32 = arith.constant 0 : i32
    %c0_i32_0 = arith.constant 0 : i32
    %c0_i32_1 = arith.constant 0 : i32
    return %c0_i32, %c0_i32_0 : i32, i32
  }
  func.func @transform_7(%arg0: i32) -> (i32, i32, i32, i32) {
    %c0_i32 = arith.constant 0 : i32
    %c0_i32_0 = arith.constant 0 : i32
    %c0_i32_1 = arith.constant 0 : i32
    %c0_i32_2 = arith.constant 0 : i32
    return %arg0, %c0_i32, %c0_i32_0, %c0_i32_1 : i32, i32, i32, i32
  }
}

module attributes {stable_mosaic.version = 11 : i64} {
  func.func @_head_kernel(%arg0: i32, %arg1: memref<1x8x8x32xf32, #tpu.memory_space<vmem>>, %arg2: memref<32x1024xf32, #tpu.memory_space<vmem>>, %arg3: memref<1x1024xf32, #tpu.memory_space<vmem>>, %arg4: memref<1x1024xf32, #tpu.memory_space<vmem>>, %arg5: memref<32x256xf32, #tpu.memory_space<vmem>>, %arg6: memref<1x256xf32, #tpu.memory_space<vmem>>, %arg7: memref<1x256xf32, #tpu.memory_space<vmem>>, %arg8: memref<1024x256xbf16, #tpu.memory_space<vmem>>, %arg9: memref<256x256xbf16, #tpu.memory_space<vmem>>, %arg10: memref<1x256xf32, #tpu.memory_space<vmem>>, %arg11: memref<1x256xf32, #tpu.memory_space<vmem>>, %arg12: memref<9x256x256xbf16, #tpu.memory_space<vmem>>, %arg13: memref<1x256xf32, #tpu.memory_space<vmem>>, %arg14: memref<1x256xf32, #tpu.memory_space<vmem>>, %arg15: memref<256x2xf32, #tpu.memory_space<vmem>>, %arg16: memref<1x2xf32, #tpu.memory_space<vmem>>, %arg17: memref<64x8xf32, #tpu.memory_space<vmem>>, %arg18: memref<8x64xf32, #tpu.memory_space<vmem>>, %arg19: memref<1x2x64x64xf32, #tpu.memory_space<vmem>>, %arg20: memref<10x10x256xbf16, #tpu.memory_space<vmem>>) attributes {dimension_semantics = [#tpu.dimension_semantics<parallel>], iteration_bounds = array<i64: 2>, scalar_prefetch = 0 : i64, scratch_operands = 1 : i64, tpu.core_type = #tpu.core_type<tc>, window_params = [{transform_indices = @transform_0, window_bounds = array<i64: 1, 8, 8, 32>}, {pipeline_mode = #tpu.pipeline_mode<synchronous>, transform_indices = @transform_1, window_bounds = array<i64: 32, 1024>}, {pipeline_mode = #tpu.pipeline_mode<synchronous>, transform_indices = @transform_2, window_bounds = array<i64: 1, 1024>}, {pipeline_mode = #tpu.pipeline_mode<synchronous>, transform_indices = @transform_3, window_bounds = array<i64: 1, 1024>}, {pipeline_mode = #tpu.pipeline_mode<synchronous>, transform_indices = @transform_4, window_bounds = array<i64: 32, 256>}, {pipeline_mode = #tpu.pipeline_mode<synchronous>, transform_indices = @transform_5, window_bounds = array<i64: 1, 256>}, {pipeline_mode = #tpu.pipeline_mode<synchronous>, transform_indices = @transform_6, window_bounds = array<i64: 1, 256>}, {pipeline_mode = #tpu.pipeline_mode<synchronous>, transform_indices = @transform_7, window_bounds = array<i64: 1024, 256>}, {pipeline_mode = #tpu.pipeline_mode<synchronous>, transform_indices = @transform_8, window_bounds = array<i64: 256, 256>}, {pipeline_mode = #tpu.pipeline_mode<synchronous>, transform_indices = @transform_9, window_bounds = array<i64: 1, 256>}, {pipeline_mode = #tpu.pipeline_mode<synchronous>, transform_indices = @transform_10, window_bounds = array<i64: 1, 256>}, {pipeline_mode = #tpu.pipeline_mode<synchronous>, transform_indices = @transform_11, window_bounds = array<i64: 9, 256, 256>}, {pipeline_mode = #tpu.pipeline_mode<synchronous>, transform_indices = @transform_12, window_bounds = array<i64: 1, 256>}, {pipeline_mode = #tpu.pipeline_mode<synchronous>, transform_indices = @transform_13, window_bounds = array<i64: 1, 256>}, {pipeline_mode = #tpu.pipeline_mode<synchronous>, transform_indices = @transform_14, window_bounds = array<i64: 256, 2>}, {pipeline_mode = #tpu.pipeline_mode<synchronous>, transform_indices = @transform_15, window_bounds = array<i64: 1, 2>}, {pipeline_mode = #tpu.pipeline_mode<synchronous>, transform_indices = @transform_16, window_bounds = array<i64: 64, 8>}, {pipeline_mode = #tpu.pipeline_mode<synchronous>, transform_indices = @transform_17, window_bounds = array<i64: 8, 64>}, {transform_indices = @transform_18, window_bounds = array<i64: 1, 2, 64, 64>}]} {
    %c0 = arith.constant 0 : index
    %c0_0 = arith.constant 0 : index
    %c0_1 = arith.constant 0 : index
    %c0_2 = arith.constant 0 : index
    %0 = vector.load %arg1[%c0, %c0_0, %c0_1, %c0_2] : memref<1x8x8x32xf32, #tpu.memory_space<vmem>>, vector<1x8x8x32xf32>
    %1 = vector.shape_cast %0 : vector<1x8x8x32xf32> to vector<8x8x32xf32>
    %2 = vector.shape_cast %1 : vector<8x8x32xf32> to vector<64x32xf32>
    %c0_3 = arith.constant 0 : index
    %c0_4 = arith.constant 0 : index
    %3 = vector.load %arg2[%c0_3, %c0_4] : memref<32x1024xf32, #tpu.memory_space<vmem>>, vector<32x1024xf32>
    %cst = arith.constant dense<0.000000e+00> : vector<64x1024xf32>
    %4 = tpu.matmul %2, %3, %cst {dimension_numbers = #tpu.dot_dimension_numbers<[1], [0], [0], [1], [0, 0, 1, 1], [], []>} : vector<64x32xf32>, vector<32x1024xf32>, vector<64x1024xf32> -> vector<64x1024xf32>
    %c0_5 = arith.constant 0 : index
    %c0_6 = arith.constant 0 : index
    %5 = vector.load %arg3[%c0_5, %c0_6] : memref<1x1024xf32, #tpu.memory_space<vmem>>, vector<1x1024xf32>
    %6 = vector.broadcast %5 : vector<1x1024xf32> to vector<64x1024xf32>
    %7 = arith.mulf %4, %6 : vector<64x1024xf32>
    %c0_7 = arith.constant 0 : index
    %c0_8 = arith.constant 0 : index
    %8 = vector.load %arg4[%c0_7, %c0_8] : memref<1x1024xf32, #tpu.memory_space<vmem>>, vector<1x1024xf32>
    %9 = vector.broadcast %8 : vector<1x1024xf32> to vector<64x1024xf32>
    %10 = arith.addf %7, %9 : vector<64x1024xf32>
    %cst_9 = arith.constant 0.000000e+00 : f32
    %11 = vector.broadcast %cst_9 : f32 to vector<64x1024xf32>
    %12 = arith.maximumf %10, %11 : vector<64x1024xf32>
    %cst_10 = arith.constant dense<0.000000e+00> : vector<32xf32>
    %13 = vector.multi_reduction <add>, %2, %cst_10 [0] : vector<64x32xf32> to vector<32xf32>
    %14 = vector.shape_cast %13 : vector<32xf32> to vector<1x32xf32>
    %cst_11 = arith.constant 6.400000e+01 : f32
    %15 = vector.broadcast %cst_11 : f32 to vector<1x32xf32>
    %16 = arith.divf %14, %15 : vector<1x32xf32>
    %c0_12 = arith.constant 0 : index
    %c0_13 = arith.constant 0 : index
    %17 = vector.load %arg5[%c0_12, %c0_13] : memref<32x256xf32, #tpu.memory_space<vmem>>, vector<32x256xf32>
    %cst_14 = arith.constant dense<0.000000e+00> : vector<1x256xf32>
    %18 = tpu.matmul %16, %17, %cst_14 {dimension_numbers = #tpu.dot_dimension_numbers<[1], [0], [0], [1], [0, 0, 1, 1], [], []>} : vector<1x32xf32>, vector<32x256xf32>, vector<1x256xf32> -> vector<1x256xf32>
    %c0_15 = arith.constant 0 : index
    %c0_16 = arith.constant 0 : index
    %19 = vector.load %arg6[%c0_15, %c0_16] : memref<1x256xf32, #tpu.memory_space<vmem>>, vector<1x256xf32>
    %20 = arith.mulf %18, %19 : vector<1x256xf32>
    %c0_17 = arith.constant 0 : index
    %c0_18 = arith.constant 0 : index
    %21 = vector.load %arg7[%c0_17, %c0_18] : memref<1x256xf32, #tpu.memory_space<vmem>>, vector<1x256xf32>
    %22 = arith.addf %20, %21 : vector<1x256xf32>
    %cst_19 = arith.constant 0.000000e+00 : f32
    %23 = vector.broadcast %cst_19 : f32 to vector<1x256xf32>
    %24 = arith.maximumf %22, %23 : vector<1x256xf32>
    %25 = arith.truncf %12 : vector<64x1024xf32> to vector<64x1024xbf16>
    %c0_20 = arith.constant 0 : index
    %c0_21 = arith.constant 0 : index
    %26 = vector.load %arg8[%c0_20, %c0_21] : memref<1024x256xbf16, #tpu.memory_space<vmem>>, vector<1024x256xbf16>
    %cst_22 = arith.constant dense<0.000000e+00> : vector<64x256xf32>
    %27 = tpu.matmul %25, %26, %cst_22 {dimension_numbers = #tpu.dot_dimension_numbers<[1], [0], [0], [1], [0, 0, 1, 1], [], []>} : vector<64x1024xbf16>, vector<1024x256xbf16>, vector<64x256xf32> -> vector<64x256xf32>
    %28 = arith.truncf %24 : vector<1x256xf32> to vector<1x256xbf16>
    %c0_23 = arith.constant 0 : index
    %c0_24 = arith.constant 0 : index
    %29 = vector.load %arg9[%c0_23, %c0_24] : memref<256x256xbf16, #tpu.memory_space<vmem>>, vector<256x256xbf16>
    %cst_25 = arith.constant dense<0.000000e+00> : vector<1x256xf32>
    %30 = tpu.matmul %28, %29, %cst_25 {dimension_numbers = #tpu.dot_dimension_numbers<[1], [0], [0], [1], [0, 0, 1, 1], [], []>} : vector<1x256xbf16>, vector<256x256xbf16>, vector<1x256xf32> -> vector<1x256xf32>
    %31 = vector.broadcast %30 : vector<1x256xf32> to vector<64x256xf32>
    %32 = arith.addf %27, %31 : vector<64x256xf32>
    %c0_26 = arith.constant 0 : index
    %c0_27 = arith.constant 0 : index
    %33 = vector.load %arg10[%c0_26, %c0_27] : memref<1x256xf32, #tpu.memory_space<vmem>>, vector<1x256xf32>
    %34 = vector.broadcast %33 : vector<1x256xf32> to vector<64x256xf32>
    %35 = arith.mulf %32, %34 : vector<64x256xf32>
    %c0_28 = arith.constant 0 : index
    %c0_29 = arith.constant 0 : index
    %36 = vector.load %arg11[%c0_28, %c0_29] : memref<1x256xf32, #tpu.memory_space<vmem>>, vector<1x256xf32>
    %37 = vector.broadcast %36 : vector<1x256xf32> to vector<64x256xf32>
    %38 = arith.addf %35, %37 : vector<64x256xf32>
    %cst_30 = arith.constant 0.000000e+00 : f32
    %39 = vector.broadcast %cst_30 : f32 to vector<64x256xf32>
    %40 = arith.maximumf %38, %39 : vector<64x256xf32>
    %cst_31 = arith.constant 0.000000e+00 : bf16
    %41 = vector.broadcast %cst_31 : bf16 to vector<10x10x256xbf16>
    %c0_32 = arith.constant 0 : index
    %c0_33 = arith.constant 0 : index
    %c0_34 = arith.constant 0 : index
    %42 = vector.load %arg20[%c0_32, %c0_33, %c0_34] : memref<10x10x256xbf16, #tpu.memory_space<vmem>>, vector<10x10x256xbf16>
    tpu.vector_store %arg20[%c0_32, %c0_33, %c0_34], %41 {strides = array<i32>} : memref<10x10x256xbf16, #tpu.memory_space<vmem>>, vector<10x10x256xbf16>,
    %43 = arith.truncf %40 : vector<64x256xf32> to vector<64x256xbf16>
    %44 = vector.shape_cast %43 : vector<64x256xbf16> to vector<8x8x256xbf16>
    %c1 = arith.constant 1 : index
    %c1_35 = arith.constant 1 : index
    %c0_36 = arith.constant 0 : index
    %45 = vector.load %arg20[%c1, %c1_35, %c0_36] : memref<10x10x256xbf16, #tpu.memory_space<vmem>>, vector<8x8x256xbf16>
    tpu.vector_store %arg20[%c1, %c1_35, %c0_36], %44 {strides = array<i32>} : memref<10x10x256xbf16, #tpu.memory_space<vmem>>, vector<8x8x256xbf16>,
    %c0_37 = arith.constant 0 : index
    %c0_38 = arith.constant 0 : index
    %c0_39 = arith.constant 0 : index
    %46 = vector.load %arg20[%c0_37, %c0_38, %c0_39] : memref<10x10x256xbf16, #tpu.memory_space<vmem>>, vector<8x8x256xbf16>
    %47 = vector.shape_cast %46 : vector<8x8x256xbf16> to vector<64x256xbf16>
    %c0_40 = arith.constant 0 : index
    %c0_41 = arith.constant 0 : index
    %c0_42 = arith.constant 0 : index
    %48 = vector.load %arg12[%c0_40, %c0_41, %c0_42] : memref<9x256x256xbf16, #tpu.memory_space<vmem>>, vector<1x256x256xbf16>
    %49 = vector.shape_cast %48 : vector<1x256x256xbf16> to vector<256x256xbf16>
    %cst_43 = arith.constant dense<0.000000e+00> : vector<64x256xf32>
    %50 = tpu.matmul %47, %49, %cst_43 {dimension_numbers = #tpu.dot_dimension_numbers<[1], [0], [0], [1], [0, 0, 1, 1], [], []>} : vector<64x256xbf16>, vector<256x256xbf16>, vector<64x256xf32> -> vector<64x256xf32>
    %c0_44 = arith.constant 0 : index
    %c1_45 = arith.constant 1 : index
    %c0_46 = arith.constant 0 : index
    %51 = vector.load %arg20[%c0_44, %c1_45, %c0_46] : memref<10x10x256xbf16, #tpu.memory_space<vmem>>, vector<8x8x256xbf16>
    %52 = vector.shape_cast %51 : vector<8x8x256xbf16> to vector<64x256xbf16>
    %c1_47 = arith.constant 1 : index
    %c0_48 = arith.constant 0 : index
    %c0_49 = arith.constant 0 : index
    %53 = vector.load %arg12[%c1_47, %c0_48, %c0_49] : memref<9x256x256xbf16, #tpu.memory_space<vmem>>, vector<1x256x256xbf16>
    %54 = vector.shape_cast %53 : vector<1x256x256xbf16> to vector<256x256xbf16>
    %cst_50 = arith.constant dense<0.000000e+00> : vector<64x256xf32>
    %55 = tpu.matmul %52, %54, %cst_50 {dimension_numbers = #tpu.dot_dimension_numbers<[1], [0], [0], [1], [0, 0, 1, 1], [], []>} : vector<64x256xbf16>, vector<256x256xbf16>, vector<64x256xf32> -> vector<64x256xf32>
    %56 = arith.addf %50, %55 : vector<64x256xf32>
    %c0_51 = arith.constant 0 : index
    %c2 = arith.constant 2 : index
    %c0_52 = arith.constant 0 : index
    %57 = vector.load %arg20[%c0_51, %c2, %c0_52] : memref<10x10x256xbf16, #tpu.memory_space<vmem>>, vector<8x8x256xbf16>
    %58 = vector.shape_cast %57 : vector<8x8x256xbf16> to vector<64x256xbf16>
    %c2_53 = arith.constant 2 : index
    %c0_54 = arith.constant 0 : index
    %c0_55 = arith.constant 0 : index
    %59 = vector.load %arg12[%c2_53, %c0_54, %c0_55] : memref<9x256x256xbf16, #tpu.memory_space<vmem>>, vector<1x256x256xbf16>
    %60 = vector.shape_cast %59 : vector<1x256x256xbf16> to vector<256x256xbf16>
    %cst_56 = arith.constant dense<0.000000e+00> : vector<64x256xf32>
    %61 = tpu.matmul %58, %60, %cst_56 {dimension_numbers = #tpu.dot_dimension_numbers<[1], [0], [0], [1], [0, 0, 1, 1], [], []>} : vector<64x256xbf16>, vector<256x256xbf16>, vector<64x256xf32> -> vector<64x256xf32>
    %62 = arith.addf %56, %61 : vector<64x256xf32>
    %c1_57 = arith.constant 1 : index
    %c0_58 = arith.constant 0 : index
    %c0_59 = arith.constant 0 : index
    %63 = vector.load %arg20[%c1_57, %c0_58, %c0_59] : memref<10x10x256xbf16, #tpu.memory_space<vmem>>, vector<8x8x256xbf16>
    %64 = vector.shape_cast %63 : vector<8x8x256xbf16> to vector<64x256xbf16>
    %c3 = arith.constant 3 : index
    %c0_60 = arith.constant 0 : index
    %c0_61 = arith.constant 0 : index
    %65 = vector.load %arg12[%c3, %c0_60, %c0_61] : memref<9x256x256xbf16, #tpu.memory_space<vmem>>, vector<1x256x256xbf16>
    %66 = vector.shape_cast %65 : vector<1x256x256xbf16> to vector<256x256xbf16>
    %cst_62 = arith.constant dense<0.000000e+00> : vector<64x256xf32>
    %67 = tpu.matmul %64, %66, %cst_62 {dimension_numbers = #tpu.dot_dimension_numbers<[1], [0], [0], [1], [0, 0, 1, 1], [], []>} : vector<64x256xbf16>, vector<256x256xbf16>, vector<64x256xf32> -> vector<64x256xf32>
    %68 = arith.addf %62, %67 : vector<64x256xf32>
    %c1_63 = arith.constant 1 : index
    %c1_64 = arith.constant 1 : index
    %c0_65 = arith.constant 0 : index
    %69 = vector.load %arg20[%c1_63, %c1_64, %c0_65] : memref<10x10x256xbf16, #tpu.memory_space<vmem>>, vector<8x8x256xbf16>
    %70 = vector.shape_cast %69 : vector<8x8x256xbf16> to vector<64x256xbf16>
    %c4 = arith.constant 4 : index
    %c0_66 = arith.constant 0 : index
    %c0_67 = arith.constant 0 : index
    %71 = vector.load %arg12[%c4, %c0_66, %c0_67] : memref<9x256x256xbf16, #tpu.memory_space<vmem>>, vector<1x256x256xbf16>
    %72 = vector.shape_cast %71 : vector<1x256x256xbf16> to vector<256x256xbf16>
    %cst_68 = arith.constant dense<0.000000e+00> : vector<64x256xf32>
    %73 = tpu.matmul %70, %72, %cst_68 {dimension_numbers = #tpu.dot_dimension_numbers<[1], [0], [0], [1], [0, 0, 1, 1], [], []>} : vector<64x256xbf16>, vector<256x256xbf16>, vector<64x256xf32> -> vector<64x256xf32>
    %74 = arith.addf %68, %73 : vector<64x256xf32>
    %c1_69 = arith.constant 1 : index
    %c2_70 = arith.constant 2 : index
    %c0_71 = arith.constant 0 : index
    %75 = vector.load %arg20[%c1_69, %c2_70, %c0_71] : memref<10x10x256xbf16, #tpu.memory_space<vmem>>, vector<8x8x256xbf16>
    %76 = vector.shape_cast %75 : vector<8x8x256xbf16> to vector<64x256xbf16>
    %c5 = arith.constant 5 : index
    %c0_72 = arith.constant 0 : index
    %c0_73 = arith.constant 0 : index
    %77 = vector.load %arg12[%c5, %c0_72, %c0_73] : memref<9x256x256xbf16, #tpu.memory_space<vmem>>, vector<1x256x256xbf16>
    %78 = vector.shape_cast %77 : vector<1x256x256xbf16> to vector<256x256xbf16>
    %cst_74 = arith.constant dense<0.000000e+00> : vector<64x256xf32>
    %79 = tpu.matmul %76, %78, %cst_74 {dimension_numbers = #tpu.dot_dimension_numbers<[1], [0], [0], [1], [0, 0, 1, 1], [], []>} : vector<64x256xbf16>, vector<256x256xbf16>, vector<64x256xf32> -> vector<64x256xf32>
    %80 = arith.addf %74, %79 : vector<64x256xf32>
    %c2_75 = arith.constant 2 : index
    %c0_76 = arith.constant 0 : index
    %c0_77 = arith.constant 0 : index
    %81 = vector.load %arg20[%c2_75, %c0_76, %c0_77] : memref<10x10x256xbf16, #tpu.memory_space<vmem>>, vector<8x8x256xbf16>
    %82 = vector.shape_cast %81 : vector<8x8x256xbf16> to vector<64x256xbf16>
    %c6 = arith.constant 6 : index
    %c0_78 = arith.constant 0 : index
    %c0_79 = arith.constant 0 : index
    %83 = vector.load %arg12[%c6, %c0_78, %c0_79] : memref<9x256x256xbf16, #tpu.memory_space<vmem>>, vector<1x256x256xbf16>
    %84 = vector.shape_cast %83 : vector<1x256x256xbf16> to vector<256x256xbf16>
    %cst_80 = arith.constant dense<0.000000e+00> : vector<64x256xf32>
    %85 = tpu.matmul %82, %84, %cst_80 {dimension_numbers = #tpu.dot_dimension_numbers<[1], [0], [0], [1], [0, 0, 1, 1], [], []>} : vector<64x256xbf16>, vector<256x256xbf16>, vector<64x256xf32> -> vector<64x256xf32>
    %86 = arith.addf %80, %85 : vector<64x256xf32>
    %c2_81 = arith.constant 2 : index
    %c1_82 = arith.constant 1 : index
    %c0_83 = arith.constant 0 : index
    %87 = vector.load %arg20[%c2_81, %c1_82, %c0_83] : memref<10x10x256xbf16, #tpu.memory_space<vmem>>, vector<8x8x256xbf16>
    %88 = vector.shape_cast %87 : vector<8x8x256xbf16> to vector<64x256xbf16>
    %c7 = arith.constant 7 : index
    %c0_84 = arith.constant 0 : index
    %c0_85 = arith.constant 0 : index
    %89 = vector.load %arg12[%c7, %c0_84, %c0_85] : memref<9x256x256xbf16, #tpu.memory_space<vmem>>, vector<1x256x256xbf16>
    %90 = vector.shape_cast %89 : vector<1x256x256xbf16> to vector<256x256xbf16>
    %cst_86 = arith.constant dense<0.000000e+00> : vector<64x256xf32>
    %91 = tpu.matmul %88, %90, %cst_86 {dimension_numbers = #tpu.dot_dimension_numbers<[1], [0], [0], [1], [0, 0, 1, 1], [], []>} : vector<64x256xbf16>, vector<256x256xbf16>, vector<64x256xf32> -> vector<64x256xf32>
    %92 = arith.addf %86, %91 : vector<64x256xf32>
    %c2_87 = arith.constant 2 : index
    %c2_88 = arith.constant 2 : index
    %c0_89 = arith.constant 0 : index
    %93 = vector.load %arg20[%c2_87, %c2_88, %c0_89] : memref<10x10x256xbf16, #tpu.memory_space<vmem>>, vector<8x8x256xbf16>
    %94 = vector.shape_cast %93 : vector<8x8x256xbf16> to vector<64x256xbf16>
    %c8 = arith.constant 8 : index
    %c0_90 = arith.constant 0 : index
    %c0_91 = arith.constant 0 : index
    %95 = vector.load %arg12[%c8, %c0_90, %c0_91] : memref<9x256x256xbf16, #tpu.memory_space<vmem>>, vector<1x256x256xbf16>
    %96 = vector.shape_cast %95 : vector<1x256x256xbf16> to vector<256x256xbf16>
    %cst_92 = arith.constant dense<0.000000e+00> : vector<64x256xf32>
    %97 = tpu.matmul %94, %96, %cst_92 {dimension_numbers = #tpu.dot_dimension_numbers<[1], [0], [0], [1], [0, 0, 1, 1], [], []>} : vector<64x256xbf16>, vector<256x256xbf16>, vector<64x256xf32> -> vector<64x256xf32>
    %98 = arith.addf %92, %97 : vector<64x256xf32>
    %c0_93 = arith.constant 0 : index
    %c0_94 = arith.constant 0 : index
    %99 = vector.load %arg13[%c0_93, %c0_94] : memref<1x256xf32, #tpu.memory_space<vmem>>, vector<1x256xf32>
    %100 = vector.broadcast %99 : vector<1x256xf32> to vector<64x256xf32>
    %101 = arith.mulf %98, %100 : vector<64x256xf32>
    %c0_95 = arith.constant 0 : index
    %c0_96 = arith.constant 0 : index
    %102 = vector.load %arg14[%c0_95, %c0_96] : memref<1x256xf32, #tpu.memory_space<vmem>>, vector<1x256xf32>
    %103 = vector.broadcast %102 : vector<1x256xf32> to vector<64x256xf32>
    %104 = arith.addf %101, %103 : vector<64x256xf32>
    %cst_97 = arith.constant 0.000000e+00 : f32
    %105 = vector.broadcast %cst_97 : f32 to vector<64x256xf32>
    %106 = arith.maximumf %104, %105 : vector<64x256xf32>
    %c0_98 = arith.constant 0 : index
    %c0_99 = arith.constant 0 : index
    %107 = vector.load %arg15[%c0_98, %c0_99] : memref<256x2xf32, #tpu.memory_space<vmem>>, vector<256x2xf32>
    %cst_100 = arith.constant dense<0.000000e+00> : vector<64x2xf32>
    %108 = tpu.matmul %106, %107, %cst_100 {dimension_numbers = #tpu.dot_dimension_numbers<[1], [0], [0], [1], [0, 0, 1, 1], [], []>} : vector<64x256xf32>, vector<256x2xf32>, vector<64x2xf32> -> vector<64x2xf32>
    %c0_101 = arith.constant 0 : index
    %c0_102 = arith.constant 0 : index
    %109 = vector.load %arg16[%c0_101, %c0_102] : memref<1x2xf32, #tpu.memory_space<vmem>>, vector<1x2xf32>
    %110 = vector.broadcast %109 : vector<1x2xf32> to vector<64x2xf32>
    %111 = arith.addf %108, %110 : vector<64x2xf32>
    %112 = vector.shape_cast %111 : vector<64x2xf32> to vector<8x8x2xf32>
    %113 = vector.extract_strided_slice %112 {offsets = [0, 0, 0], sizes = [8, 8, 1], strides = [1, 1, 1]} : vector<8x8x2xf32> to vector<8x8x1xf32>
    %114 = vector.shape_cast %113 : vector<8x8x1xf32> to vector<8x8xf32>
    %c0_103 = arith.constant 0 : index
    %c0_104 = arith.constant 0 : index
    %115 = vector.load %arg18[%c0_103, %c0_104] : memref<8x64xf32, #tpu.memory_space<vmem>>, vector<8x64xf32>
    %cst_105 = arith.constant dense<0.000000e+00> : vector<8x64xf32>
    %116 = tpu.matmul %114, %115, %cst_105 {dimension_numbers = #tpu.dot_dimension_numbers<[1], [0], [0], [1], [0, 0, 1, 1], [], []>} : vector<8x8xf32>, vector<8x64xf32>, vector<8x64xf32> -> vector<8x64xf32>
    %c0_106 = arith.constant 0 : index
    %c0_107 = arith.constant 0 : index
    %117 = vector.load %arg17[%c0_106, %c0_107] : memref<64x8xf32, #tpu.memory_space<vmem>>, vector<64x8xf32>
    %cst_108 = arith.constant dense<0.000000e+00> : vector<64x64xf32>
    %118 = tpu.matmul %117, %116, %cst_108 {dimension_numbers = #tpu.dot_dimension_numbers<[1], [0], [0], [1], [0, 0, 1, 1], [], []>} : vector<64x8xf32>, vector<8x64xf32>, vector<64x64xf32> -> vector<64x64xf32>
    %c0_109 = arith.constant 0 : index
    %c0_110 = arith.constant 0 : index
    %c0_111 = arith.constant 0 : index
    %c0_112 = arith.constant 0 : index
    %119 = vector.load %arg19[%c0_109, %c0_110, %c0_111, %c0_112] : memref<1x2x64x64xf32, #tpu.memory_space<vmem>>, vector<1x1x64x64xf32>
    %120 = vector.shape_cast %119 : vector<1x1x64x64xf32> to vector<64x64xf32>
    %121 = vector.shape_cast %118 : vector<64x64xf32> to vector<1x1x64x64xf32>
    tpu.vector_store %arg19[%c0_109, %c0_110, %c0_111, %c0_112], %121 {strides = array<i32>} : memref<1x2x64x64xf32, #tpu.memory_space<vmem>>, vector<1x1x64x64xf32>,
    %122 = vector.extract_strided_slice %112 {offsets = [0, 0, 1], sizes = [8, 8, 1], strides = [1, 1, 1]} : vector<8x8x2xf32> to vector<8x8x1xf32>
    %123 = vector.shape_cast %122 : vector<8x8x1xf32> to vector<8x8xf32>
    %c0_113 = arith.constant 0 : index
    %c0_114 = arith.constant 0 : index
    %124 = vector.load %arg18[%c0_113, %c0_114] : memref<8x64xf32, #tpu.memory_space<vmem>>, vector<8x64xf32>
    %cst_115 = arith.constant dense<0.000000e+00> : vector<8x64xf32>
    %125 = tpu.matmul %123, %124, %cst_115 {dimension_numbers = #tpu.dot_dimension_numbers<[1], [0], [0], [1], [0, 0, 1, 1], [], []>} : vector<8x8xf32>, vector<8x64xf32>, vector<8x64xf32> -> vector<8x64xf32>
    %c0_116 = arith.constant 0 : index
    %c0_117 = arith.constant 0 : index
    %126 = vector.load %arg17[%c0_116, %c0_117] : memref<64x8xf32, #tpu.memory_space<vmem>>, vector<64x8xf32>
    %cst_118 = arith.constant dense<0.000000e+00> : vector<64x64xf32>
    %127 = tpu.matmul %126, %125, %cst_118 {dimension_numbers = #tpu.dot_dimension_numbers<[1], [0], [0], [1], [0, 0, 1, 1], [], []>} : vector<64x8xf32>, vector<8x64xf32>, vector<64x64xf32> -> vector<64x64xf32>
    %c0_119 = arith.constant 0 : index
    %c1_120 = arith.constant 1 : index
    %c0_121 = arith.constant 0 : index
    %c0_122 = arith.constant 0 : index
    %128 = vector.load %arg19[%c0_119, %c1_120, %c0_121, %c0_122] : memref<1x2x64x64xf32, #tpu.memory_space<vmem>>, vector<1x1x64x64xf32>
    %129 = vector.shape_cast %128 : vector<1x1x64x64xf32> to vector<64x64xf32>
    %130 = vector.shape_cast %127 : vector<64x64xf32> to vector<1x1x64x64xf32>
    tpu.vector_store %arg19[%c0_119, %c1_120, %c0_121, %c0_122], %130 {strides = array<i32>} : memref<1x2x64x64xf32, #tpu.memory_space<vmem>>, vector<1x1x64x64xf32>,
    return
  }
  func.func @transform_0(%arg0: i32) -> (i32, i32, i32, i32) {
    %c0_i32 = arith.constant 0 : i32
    %c0_i32_0 = arith.constant 0 : i32
    %c0_i32_1 = arith.constant 0 : i32
    %c0_i32_2 = arith.constant 0 : i32
    return %arg0, %c0_i32, %c0_i32_0, %c0_i32_1 : i32, i32, i32, i32
  }
  func.func @transform_1(%arg0: i32) -> (i32, i32) {
    %c0_i32 = arith.constant 0 : i32
    %c0_i32_0 = arith.constant 0 : i32
    %c0_i32_1 = arith.constant 0 : i32
    return %c0_i32, %c0_i32_0 : i32, i32
  }
  func.func @transform_2(%arg0: i32) -> (i32, i32) {
    %c0_i32 = arith.constant 0 : i32
    %c0_i32_0 = arith.constant 0 : i32
    %c0_i32_1 = arith.constant 0 : i32
    return %c0_i32, %c0_i32_0 : i32, i32
  }
  func.func @transform_3(%arg0: i32) -> (i32, i32) {
    %c0_i32 = arith.constant 0 : i32
    %c0_i32_0 = arith.constant 0 : i32
    %c0_i32_1 = arith.constant 0 : i32
    return %c0_i32, %c0_i32_0 : i32, i32
  }
  func.func @transform_4(%arg0: i32) -> (i32, i32) {
    %c0_i32 = arith.constant 0 : i32
    %c0_i32_0 = arith.constant 0 : i32
    %c0_i32_1 = arith.constant 0 : i32
    return %c0_i32, %c0_i32_0 : i32, i32
  }
  func.func @transform_5(%arg0: i32) -> (i32, i32) {
    %c0_i32 = arith.constant 0 : i32
    %c0_i32_0 = arith.constant 0 : i32
    %c0_i32_1 = arith.constant 0 : i32
    return %c0_i32, %c0_i32_0 : i32, i32
  }
  func.func @transform_6(%arg0: i32) -> (i32, i32) {
    %c0_i32 = arith.constant 0 : i32
    %c0_i32_0 = arith.constant 0 : i32
    %c0_i32_1 = arith.constant 0 : i32
    return %c0_i32, %c0_i32_0 : i32, i32
  }
  func.func @transform_7(%arg0: i32) -> (i32, i32) {
    %c0_i32 = arith.constant 0 : i32
    %c0_i32_0 = arith.constant 0 : i32
    %c0_i32_1 = arith.constant 0 : i32
    return %c0_i32, %c0_i32_0 : i32, i32
  }
  func.func @transform_8(%arg0: i32) -> (i32, i32) {
    %c0_i32 = arith.constant 0 : i32
    %c0_i32_0 = arith.constant 0 : i32
    %c0_i32_1 = arith.constant 0 : i32
    return %c0_i32, %c0_i32_0 : i32, i32
  }
  func.func @transform_9(%arg0: i32) -> (i32, i32) {
    %c0_i32 = arith.constant 0 : i32
    %c0_i32_0 = arith.constant 0 : i32
    %c0_i32_1 = arith.constant 0 : i32
    return %c0_i32, %c0_i32_0 : i32, i32
  }
  func.func @transform_10(%arg0: i32) -> (i32, i32) {
    %c0_i32 = arith.constant 0 : i32
    %c0_i32_0 = arith.constant 0 : i32
    %c0_i32_1 = arith.constant 0 : i32
    return %c0_i32, %c0_i32_0 : i32, i32
  }
  func.func @transform_11(%arg0: i32) -> (i32, i32, i32) {
    %c0_i32 = arith.constant 0 : i32
    %c0_i32_0 = arith.constant 0 : i32
    %c0_i32_1 = arith.constant 0 : i32
    %c0_i32_2 = arith.constant 0 : i32
    return %c0_i32, %c0_i32_0, %c0_i32_1 : i32, i32, i32
  }
  func.func @transform_12(%arg0: i32) -> (i32, i32) {
    %c0_i32 = arith.constant 0 : i32
    %c0_i32_0 = arith.constant 0 : i32
    %c0_i32_1 = arith.constant 0 : i32
    return %c0_i32, %c0_i32_0 : i32, i32
  }
  func.func @transform_13(%arg0: i32) -> (i32, i32) {
    %c0_i32 = arith.constant 0 : i32
    %c0_i32_0 = arith.constant 0 : i32
    %c0_i32_1 = arith.constant 0 : i32
    return %c0_i32, %c0_i32_0 : i32, i32
  }
  func.func @transform_14(%arg0: i32) -> (i32, i32) {
    %c0_i32 = arith.constant 0 : i32
    %c0_i32_0 = arith.constant 0 : i32
    %c0_i32_1 = arith.constant 0 : i32
    return %c0_i32, %c0_i32_0 : i32, i32
  }
  func.func @transform_15(%arg0: i32) -> (i32, i32) {
    %c0_i32 = arith.constant 0 : i32
    %c0_i32_0 = arith.constant 0 : i32
    %c0_i32_1 = arith.constant 0 : i32
    return %c0_i32, %c0_i32_0 : i32, i32
  }
  func.func @transform_16(%arg0: i32) -> (i32, i32) {
    %c0_i32 = arith.constant 0 : i32
    %c0_i32_0 = arith.constant 0 : i32
    %c0_i32_1 = arith.constant 0 : i32
    return %c0_i32, %c0_i32_0 : i32, i32
  }
  func.func @transform_17(%arg0: i32) -> (i32, i32) {
    %c0_i32 = arith.constant 0 : i32
    %c0_i32_0 = arith.constant 0 : i32
    %c0_i32_1 = arith.constant 0 : i32
    return %c0_i32, %c0_i32_0 : i32, i32
  }
  func.func @transform_18(%arg0: i32) -> (i32, i32, i32, i32) {
    %c0_i32 = arith.constant 0 : i32
    %c0_i32_0 = arith.constant 0 : i32
    %c0_i32_1 = arith.constant 0 : i32
    %c0_i32_2 = arith.constant 0 : i32
    return %arg0, %c0_i32, %c0_i32_0, %c0_i32_1 : i32, i32, i32, i32
  }
}

</mosaic_0001>

<bundles_post_ra>
// kernel: gru_deeplabv3_forward.2
= control target key start
LH: loop header
LB: loop body
LE: loop exit
PB: predicated region body
PF: predicated region fallthrough
CT: control target
= control target key end

     0   :  { %s2881_s24 = smov 0   ;;  %s3489_s0 = inlined_call_operand.vmem [shape: f32[2,8,8,192], index: 0, kind: input, shape index: {}]   ;;  %s3490_s1 = inlined_call_operand.vmem [shape: f32[192,16], index: 1, kind: input, shape index: {}]   ;;  %s3491_s2 = inlined_call_operand.vmem [shape: f32[1,16], index: 2, kind: input, shape index: {}]   ;;  %s3492_s3 = inlined_call_operand.vmem [shape: f32[9,16,64], index: 3, kind: input, shape index: {}]   ;;  %s3493_s4 = inlined_call_operand.vmem [shape: f32[1,64], index: 4, kind: input, shape index: {}]   ;;  %s3494_s5 = inlined_call_operand.vmem [shape: f32[1,64], index: 5, kind: input, shape index: {}]   ;;  %s3495_s6 = inlined_call_operand.vmem [shape: f32[1,64], index: 6, kind: input, shape index: {}]   ;;  %s3496_s7 = inlined_call_operand.vmem [shape: f32[2,8,8,32], index: 7, kind: output, shape index: {}]  }
   0x1 LB: > { %s2264_s25 = sadd.s32 4294967295, %s2836_s24   ;;  %p2268_p0 = scmp.ge.s32.totalorder %s2836_s24, 1  ;;  %s2836_s24 = sphi %s2881_s24, %s17_s24  }
   0x2   : > { %p237_p1 = scmp.lt.s32.totalorder %s2836_s24, 3 }
   0x4   : > { %p238_p2 = pnand %p2268_p0, %p237_p1 }
   0x5   : > { %v295_v0 = vld [vmem:[%s3490_s1] sm:$0xff] (!%p238_p2)  ;;  %v296_v1 = vld [vmem:[%s3490_s1 + $0x8] sm:$0xff] (!%p238_p2)  ;;  %v297_v2 = vld [vmem:[%s3490_s1 + $0x10] sm:$0xff] (!%p238_p2)  ;;  %p269_p3 = scmp.lt.s32.totalorder (!%p238_p2), %s2264_s25, 1  ;;  %v2838_v3 = vmov (!%p238_p2), 0.0|0.0   ;;  %vm326_vm0 = vcmask (!%p238_p2), 523264  }
   0x6   : > { %241 = sbr.rel (%p238_p2) target bundleno = 1702 (0x6a6), region = 48  ;;  %2619 = vmatprep.subr.bf16.mxu0 (!%p238_p2), %v2838_v3  ;;  %v2620_v4 = vpack.c.bf16 (!%p238_p2), %v296_v1, %v295_v0  ;;  %v298_v5 = vld [vmem:[%s3490_s1 + $0x18] sm:$0xff] (!%p238_p2)  ;;  %v299_v7 = vld [vmem:[%s3490_s1 + $0x20] sm:$0xff] (!%p238_p2)  ;;  %v300_v8 = vld [vmem:[%s3490_s1 + $0x28] sm:$0xff] (!%p238_p2)  ;;  %vm464_vm1 = vcmask (!%p238_p2), 130048   ;;  %vm466_vm2 = vcmask (!%p238_p2), 123904  }
   0x7   : > { %v2623_v6 = vpack.c.bf16 (!%p238_p2), %v298_v5, %v297_v2  ;;  %v2626_v9 = vpack.c.bf16 (!%p238_p2), %v300_v8, %v299_v7  ;;  %v301_v10 = vld [vmem:[%s3490_s1 + $0x30] sm:$0xff] (!%p238_p2)  ;;  %v302_v11 = vld [vmem:[%s3490_s1 + $0x38] sm:$0xff] (!%p238_p2)  ;;  %v303_v14 = vld [vmem:[%s3490_s1 + $0x40] sm:$0xff] (!%p238_p2)  ;;  %v2839_v53 = vmov (!%p238_p2), 0.0   ;;  %vm1828_vm3 = vcmask (!%p238_p2), 261120   ;;  %s2840_s12 = smov (!%p238_p2), 96  }
   0x8   : > { %2621 = vmatpush1.bf16.msra.mxu0 (!%p238_p2), %v2620_v4  ;;  %v2629_v13 = vpack.c.bf16 (!%p238_p2), %v302_v11, %v301_v10  ;;  %v304_v15 = vld [vmem:[%s3490_s1 + $0x48] sm:$0xff] (!%p238_p2)  ;;  %v305_v17 = vld [vmem:[%s3490_s1 + $0x50] sm:$0xff] (!%p238_p2)  ;;  %v306_v18 = vld [vmem:[%s3490_s1 + $0x58] sm:$0xff] (!%p238_p2)  ;;  %468 = vst.msk [vmem:[#allocation2 + $0x10] sm:$0xff] (!%p238_p2), %vm464_vm1, %v2839_v53 }
   0x9   : > { %2622 = vmatprep.subr.bf16.mxu0 (!%p238_p2), %v2838_v3  ;;  %v2632_v16 = vpack.c.bf16 (!%p238_p2), %v304_v15, %v303_v14  ;;  %v2635_v19 = vpack.c.bf16 (!%p238_p2), %v306_v18, %v305_v17  ;;  %v307_v20 = vld [vmem:[%s3490_s1 + $0x60] sm:$0xff] (!%p238_p2)  ;;  %v308_v21 = vld [vmem:[%s3490_s1 + $0x68] sm:$0xff] (!%p238_p2)  ;;  %v309_v23 = vld [vmem:[%s3490_s1 + $0x70] sm:$0xff] (!%p238_p2)  ;;  %469 = vst.msk [vmem:[#allocation2 + $0x18] sm:$0x3] (!%p238_p2), %vm466_vm2, %v2839_v53 }
   0xa   : > { %v2638_v22 = vpack.c.bf16 (!%p238_p2), %v308_v21, %v307_v20  ;;  %v310_v24 = vld [vmem:[%s3490_s1 + $0x78] sm:$0xff] (!%p238_p2)  ;;  %v311_v26 = vld [vmem:[%s3490_s1 + $0x80] sm:$0xff] (!%p238_p2)  ;;  %v312_v27 = vld [vmem:[%s3490_s1 + $0x88] sm:$0xff] (!%p238_p2)  ;;  %465 = vst.msk [vmem:[#allocation2] sm:$0xff] (!%p238_p2), %vm464_vm1, %v2839_v53 }
   0xb   : > { %v2641_v25 = vpack.c.bf16 (!%p238_p2), %v310_v24, %v309_v23  ;;  %v2644_v28 = vpack.c.bf16 (!%p238_p2), %v312_v27, %v311_v26  ;;  %v313_v29 = vld [vmem:[%s3490_s1 + $0x90] sm:$0xff] (!%p238_p2)  ;;  %v314_v30 = vld [vmem:[%s3490_s1 + $0x98] sm:$0xff] (!%p238_p2)  ;;  %v315_v32 = vld [vmem:[%s3490_s1 + $0xa0] sm:$0xff] (!%p238_p2)  ;;  %467 = vst.msk [vmem:[#allocation2 + $0x8] sm:$0x3] (!%p238_p2), %vm466_vm2, %v2839_v53 }
   0xc   : > { %2624 = vmatpush1.bf16.msra.mxu0 (!%p238_p2), %v2623_v6  ;;  %v2647_v31 = vpack.c.bf16 (!%p238_p2), %v314_v30, %v313_v29  ;;  %v316_v33 = vld [vmem:[%s3490_s1 + $0xa8] sm:$0xff] (!%p238_p2)  ;;  %v317_v35 = vld [vmem:[%s3490_s1 + $0xb0] sm:$0xff] (!%p238_p2)  ;;  %v318_v36 = vld [vmem:[%s3490_s1 + $0xb8] sm:$0xff] (!%p238_p2)  ;;  %470 = vst.msk [vmem:[#allocation2 + $0x20] sm:$0xff] (!%p238_p2), %vm464_vm1, %v2839_v53 }
   0xd   : > { %s3498_s25 = smov (!%p269_p3, %s2264_s25), 1  ;;  %2625 = vmatprep.subr.bf16.mxu0 %v2838_v3  ;;  %v2650_v34 = vpack.c.bf16 %v316_v33, %v315_v32  ;;  %v2653_v37 = vpack.c.bf16 %v318_v36, %v317_v35  ;;  %471 = vst.msk [vmem:[#allocation2 + $0x28] sm:$0x3] %vm466_vm2, %v2839_v53  ;;  %473 = vst.msk [vmem:[#allocation2 + $0x38] sm:$0x3] %vm466_vm2, %v2839_v53  ;;  %v2282_v54 = vld [vmem:[%s3492_s3 + $0x10] sm:$0xff] }
   0xe   : > { %s2383_s15 = sshll.u32 %s3498_s25, 7  ;;  %472 = vst.msk [vmem:[#allocation2 + $0x30] sm:$0xff] %vm464_vm1, %v2839_v53  ;;  %474 = vst.msk [vmem:[#allocation2 + $0x40] sm:$0xff] %vm464_vm1, %v2839_v53  ;;  %v2283_v55 = vld [vmem:[%s3492_s3 + $0x18] sm:$0xff]  ;;  %v2300_v56 = vld [vmem:[%s3492_s3 + $0x20] sm:$0xff]  ;;  %s2384_s8 = sshll.u32 %s3498_s25, 6 }
   0xf   : > { %s2913_s18 = scalar_lea.vmem %s3489_s0, %s2383_s15  ;;  %475 = vst.msk [vmem:[#allocation2 + $0x48] sm:$0x3] %vm466_vm2, %v2839_v53  ;;  %477 = vst.msk [vmem:[#allocation2 + $0x58] sm:$0x3] %vm466_vm2, %v2839_v53  ;;  %v2655_v57 = vpack.c.bf16 %v2283_v55, %v2282_v54  ;;  %v2301_v58 = vld [vmem:[%s3492_s3 + $0x28] sm:$0xff]  ;;  %v2310_v62 = vld [vmem:[%s3492_s3 + $0x30] sm:$0xff]  ;;  %s3468_s11 = scalar_lea.vmem %s3496_s7, %s2384_s8 }
  0x10   : > { %v280_v12 = vld [vmem:[%s2913_s18 + $0x8] sm:$0xff]  ;;  %2627 = vmatpush1.bf16.msra.mxu0 %v2626_v9  ;;  %v279_v38 = vld [vmem:[%s2913_s18] sm:$0xff]  ;;  %v282_v39 = vld [vmem:[%s2913_s18 + $0x18] sm:$0xff]  ;;  %476 = vst.msk [vmem:[#allocation2 + $0x50] sm:$0xff] %vm464_vm1, %v2839_v53  ;;  %v2663_v59 = vpack.c.bf16 %v2301_v58, %v2300_v56 }
  0x11   : > { %2274 = vmatprep.mubr.msk.f32.mxu0 %vm326_vm0, %v280_v12  ;;  %2628 = vmatprep.subr.bf16.mxu0 %v2838_v3  ;;  %v281_v40 = vld [vmem:[%s2913_s18 + $0x10] sm:$0xff]  ;;  %v284_v41 = vld [vmem:[%s2913_s18 + $0x28] sm:$0xff]  ;;  %v283_v42 = vld [vmem:[%s2913_s18 + $0x20] sm:$0xff]  ;;  %478 = vst.msk [vmem:[#allocation2 + $0x60] sm:$0xff] %vm464_vm1, %v2839_v53 }
  0x12   : > { %v286_v43 = vld [vmem:[%s2913_s18 + $0x38] sm:$0xff]  ;;  %v285_v44 = vld [vmem:[%s2913_s18 + $0x30] sm:$0xff]  ;;  %v288_v45 = vld [vmem:[%s2913_s18 + $0x48] sm:$0xff]  ;;  %479 = vst.msk [vmem:[#allocation2 + $0x68] sm:$0x3] %vm466_vm2, %v2839_v53  ;;  %2664 = vmatprep.subr.bf16.mxu1 %v2663_v59 }
  0x13   : > { %v287_v46 = vld [vmem:[%s2913_s18 + $0x40] sm:$0xff]  ;;  %v290_v47 = vld [vmem:[%s2913_s18 + $0x58] sm:$0xff]  ;;  %v289_v48 = vld [vmem:[%s2913_s18 + $0x50] sm:$0xff]  ;;  %480 = vst.msk [vmem:[#allocation2 + $0x70] sm:$0xff] %vm464_vm1, %v2839_v53  ;;  %2666 = vmatpush3.bf16.msra.mxu1 %v2663_v59 }
  0x14   : > { %2630 = vmatpush1.bf16.msra.mxu0 %v2629_v13  ;;  %v292_v49 = vld [vmem:[%s2913_s18 + $0x68] sm:$0xff]  ;;  %v291_v50 = vld [vmem:[%s2913_s18 + $0x60] sm:$0xff]  ;;  %v294_v51 = vld [vmem:[%s2913_s18 + $0x78] sm:$0xff]  ;;  %481 = vst.msk [vmem:[#allocation2 + $0x78] sm:$0x3] %vm466_vm2, %v2839_v53 }
  0x15   : > { %2631 = vmatprep.subr.bf16.mxu0 %v2838_v3  ;;  %v293_v52 = vld [vmem:[%s2913_s18 + $0x70] sm:$0xff]  ;;  %482 = vst.msk [vmem:[#allocation2 + $0x80] sm:$0xff] %vm464_vm1, %v2839_v53  ;;  %484 = vst.msk [vmem:[#allocation2 + $0x90] sm:$0xff] %vm464_vm1, %v2839_v53  ;;  %v505_v60 = vld [vmem:[#allocation2 + $0x1] sm:$0xff] }
  0x16   : > { %483 = vst.msk [vmem:[#allocation2 + $0x88] sm:$0x3] %vm466_vm2, %v2839_v53  ;;  %485 = vst.msk [vmem:[#allocation2 + $0x98] sm:$0x3] %vm466_vm2, %v2839_v53  ;;  %v774_v61 = vld [vmem:[#allocation2 + $0x2] sm:$0xff]  ;;  %v2311_v63 = vld [vmem:[%s3492_s3 + $0x38] sm:$0xff] }
  0x17   : > { %2511 = vmatprep.mubr.msk.f32.mxu1 %vm464_vm1, %v774_v61  ;;  %v2667_v0 = vpack.c.bf16 %v2311_v63, %v2310_v62  ;;  %v503_v1 = vld [vmem:[%s3492_s3] sm:$0xff]  ;;  %v504_v2 = vld [vmem:[%s3492_s3 + $0x8] sm:$0xff]  ;;  %v2330_v53 = vld [vmem:[%s3492_s3 + $0x50] sm:$0xff] }
  0x18   : > { %2633 = vmatpush1.bf16.msra.mxu0 %v2632_v16  ;;  %v3042_v4 = vld [vmem:[%s3491_s2] ss:$0 sm:$0xff]  ;;  %v2321_v15 = vld [vmem:[%s3492_s3 + $0x48] sm:$0xff]  ;;  %v2331_v56 = vld [vmem:[%s3492_s3 + $0x58] sm:$0xff] }
  0x19   : > { %2634 = vmatprep.subr.bf16.mxu0 %v2838_v3  ;;  %2668 = vmatprep.subr.bf16.mxu1 %v2667_v0  ;;  %v2320_v14 = vld [vmem:[%s3492_s3 + $0x40] sm:$0xff]  ;;  %v2675_v58 = vpack.c.bf16 %v2331_v56, %v2330_v53 }
  0x1c   : > { %2636 = vmatpush1.bf16.msra.mxu0 %v2635_v19  ;;  %v3055_v19 = vpack.c.bf16 %v2321_v15, %v2320_v14 }
  0x1d   : > { %2637 = vmatprep.subr.bf16.mxu0 %v2838_v3  ;;  %v1522_v14 = vld [vmem:[#allocation2 + $0x91] sm:$0xff] }
  0x1e   : > { %v1670_v15 = vld [vmem:[#allocation2 + $0x92] sm:$0xff] }
  0x20   : > { %2639 = vmatpush1.bf16.msra.mxu0 %v2638_v22 }
  0x21   : > { %2640 = vmatprep.subr.bf16.mxu0 %v2838_v3 }
  0x24   : > { %2642 = vmatpush1.bf16.msra.mxu0 %v2641_v25 }
  0x25   : > { %2643 = vmatprep.subr.bf16.mxu0 %v2838_v3 }
  0x28   : > { %2645 = vmatpush1.bf16.msra.mxu0 %v2644_v28 }
  0x29   : > { %2646 = vmatprep.subr.bf16.mxu0 %v2838_v3 }
  0x2c   : > { %2648 = vmatpush1.bf16.msra.mxu0 %v2647_v31 }
  0x2d   : > { %2649 = vmatprep.subr.bf16.mxu0 %v2838_v3 }
  0x30   : > { %2651 = vmatpush1.bf16.msra.mxu0 %v2650_v34 }
  0x31   : > { %2652 = vmatprep.subr.bf16.mxu0 %v2838_v3  ;;  %v2659_v3 = vpack.c.bf16 %v504_v2, %v503_v1  ;;  %v2340_v2 = vld [vmem:[%s3492_s3 + $0x60] sm:$0xff] }
  0x34   : > { %2654 = vmatpush1.bf16.msra.mxu0 %v2653_v37 }
  0x35   : > { %2656 = vmatprep.subr.bf16.mxu0 %v2655_v57 }
  0x37   : > { %416 = vmatmul.mubr.f32.vlgmr.msra.gmra.mrb[0].mxu0 %v279_v38 }
  0x38   : > { %2275 = vmatprep.mubr.msk.f32.mxu0 %vm326_vm0, %v282_v39  ;;  %2658 = vmatpush3.bf16.msra.mxu0 %v2655_v57 }
  0x39   : > { %2660 = vmatprep.subr.bf16.mxu0 %v2659_v3 }
  0x3b   : > { %421 = vmatmul.mubr.f32.gmra.mrb[2].mxu0 %v281_v40 }
  0x3c   : > { %2276 = vmatprep.mubr.msk.f32.mxu0 %vm326_vm0, %v284_v41 }
  0x3f   : > { %426 = vmatmul.mubr.f32.gmra.mrb[4].mxu0 %v283_v42 }
  0x40   : > { %2277 = vmatprep.mubr.msk.f32.mxu0 %vm326_vm0, %v286_v43 }
  0x43   : > { %431 = vmatmul.mubr.f32.gmra.mrb[6].mxu0 %v285_v44 }
  0x44   : > { %2278 = vmatprep.mubr.msk.f32.mxu0 %vm326_vm0, %v288_v45 }
  0x47   : > { %436 = vmatmul.mubr.f32.gmra.mrb[8].mxu0 %v287_v46 }
  0x48   : > { %2279 = vmatprep.mubr.msk.f32.mxu0 %vm326_vm0, %v290_v47 }
  0x4b   : > { %441 = vmatmul.mubr.f32.gmra.mrb[10].mxu0 %v289_v48 }
  0x4c   : > { %2280 = vmatprep.mubr.msk.f32.mxu0 %vm326_vm0, %v292_v49 }
  0x4f   : > { %446 = vmatmul.mubr.f32.gmra.mrb[12].mxu0 %v291_v50 }
  0x50   : > { %2281 = vmatprep.mubr.msk.f32.mxu0 %vm326_vm0, %v294_v51 }
  0x53   : > { %451 = vmatmul.mubr.f32.gmra.mrb[14].mxu0 %v293_v52  ;;  %v495_v52 = vld [vmem:[#allocation2] sm:$0xff] }
  0x54   : > { %2479 = vmatprep.mubr.msk.f32.mxu0 %vm464_vm1, %v505_v60 }
 0x10a   : > { %v417_v5 = vpop.f32.mrb[0].mxu0 }
 0x10b   : > { %v418_v6 = vadd.f32 %v3042_v4, %v417_v5  ;;  %v419_v7 = vpop.f32.mrb[1].mxu0 }
 0x10c   : > { %v2351_v7 = vld [vmem:[%s3492_s3 + $0x78] sm:$0xff] }
 0x10d   : > { %v456_v8 = vmax.f32 %v418_v6, 0.0  ;;  %v2350_v6 = vld [vmem:[%s3492_s3 + $0x70] sm:$0xff] }
 0x10e   : > { %v422_v9 = vpop.f32.mrb[2].mxu0 }
 0x10f   : > { %487 = vst.msk [vmem:[#allocation2 + $0x11] sm:$0xff] %vm464_vm1, %v456_v8  ;;  %v423_v10 = vadd.f32 %v3042_v4, %v422_v9  ;;  %v424_v11 = vpop.f32.mrb[3].mxu0  ;;  %v2683_v8 = vpack.c.bf16 %v2351_v7, %v2350_v6 }
 0x110   : > { %v2361_v11 = vld [vmem:[%s3492_s3 + $0x88] sm:$0xff] }
 0x111   : > { %v457_v12 = vmax.f32 %v423_v10, 0.0  ;;  %v2360_v10 = vld [vmem:[%s3492_s3 + $0x80] sm:$0xff] }
 0x112   : > { %v427_v13 = vpop.f32.mrb[4].mxu0 }
 0x113   : > { %488 = vst.msk [vmem:[#allocation2 + $0x21] sm:$0xff] %vm464_vm1, %v457_v12  ;;  %v428_v16 = vadd.f32 %v3042_v4, %v427_v13  ;;  %v429_v17 = vpop.f32.mrb[5].mxu0  ;;  %v2687_v12 = vpack.c.bf16 %v2361_v11, %v2360_v10  ;;  %v1374_v13 = vld [vmem:[#allocation2 + $0x90] sm:$0xff] }
 0x115   : > { %v458_v18 = vmax.f32 %v428_v16, 0.0 }
 0x116   : > { %v432_v20 = vpop.f32.mrb[6].mxu0  ;;  %v3057_v21 = vld [vmem:[#allocation2 + $0x11] sm:$0xff] }
 0x117   : > { %v3059_v22 = vld [vmem:[#allocation2 + $0x12] sm:$0xff]  ;;  %489 = vst.msk [vmem:[#allocation2 + $0x31] sm:$0xff] %vm464_vm1, %v458_v18  ;;  %v433_v23 = vadd.f32 %v3042_v4, %v432_v20  ;;  %v434_v24 = vpop.f32.mrb[7].mxu0  ;;  %2480 = vmatmul.mubr.msk.f32.vlgmr.msra.gmra.mrb[16].mxu0 %vm464_vm1, %v3057_v21 }
 0x118   : > { %2512 = vmatmul.mubr.msk.f32.vlgmr.msra.gmra.mrb[0].mxu1 %vm464_vm1, %v3059_v22  ;;  %2662 = vmatpush3.bf16.msra.mxu0 %v2659_v3  ;;  %v922_v57 = vld [vmem:[#allocation2 + $0x10] sm:$0xff]  ;;  %v2341_v3 = vld [vmem:[%s3492_s3 + $0x68] sm:$0xff] }
 0x119   : > { %2670 = vmatpush3.bf16.msra.mxu1 %v2667_v0  ;;  %v459_v25 = vmax.f32 %v433_v23, 0.0 }
 0x11a   : > { %2672 = vmatprep.subr.bf16.mxu1 %v3055_v19  ;;  %v437_v26 = vpop.f32.mrb[8].mxu0  ;;  %v3068_v27 = vld [vmem:[#allocation2 + $0x21] sm:$0xff] }
 0x11b   : > { %v3070_v28 = vld [vmem:[#allocation2 + $0x22] sm:$0xff]  ;;  %490 = vst.msk [vmem:[#allocation2 + $0x41] sm:$0xff] %vm464_vm1, %v459_v25  ;;  %v438_v29 = vadd.f32 %v3042_v4, %v437_v26  ;;  %v439_v30 = vpop.f32.mrb[9].mxu0  ;;  %2482 = vmatprep.mubr.msk.f32.mxu0 %vm464_vm1, %v3068_v27  ;;  %v2370_v25 = vld [vmem:[%s3493_s4] ss:$0 sm:$0xff] }
 0x11c   : > { %2514 = vmatprep.mubr.msk.f32.mxu1 %vm464_vm1, %v3070_v28  ;;  %v923_v59 = vld [vmem:[#allocation2 + $0x20] sm:$0xff] }
 0x11d   : > { %v460_v31 = vmax.f32 %v438_v29, 0.0 }
 0x11e   : > { %v442_v32 = vpop.f32.mrb[10].mxu0  ;;  %v3078_v33 = vld [vmem:[#allocation2 + $0x31] sm:$0xff] }
 0x11f   : > { %v3080_v34 = vld [vmem:[#allocation2 + $0x32] sm:$0xff]  ;;  %491 = vst.msk [vmem:[#allocation2 + $0x51] sm:$0xff] %vm464_vm1, %v460_v31  ;;  %v443_v35 = vadd.f32 %v3042_v4, %v442_v32  ;;  %v444_v36 = vpop.f32.mrb[11].mxu0  ;;  %2483 = vmatmul.mubr.msk.f32.gmra.mrb[18].mxu0 %vm464_vm1, %v3078_v33 }
 0x120   : > { %2515 = vmatmul.mubr.msk.f32.gmra.mrb[2].mxu1 %vm464_vm1, %v3080_v34  ;;  %v924_v60 = vld [vmem:[#allocation2 + $0x30] sm:$0xff] }
 0x121   : > { %v461_v37 = vmax.f32 %v443_v35, 0.0 }
 0x122   : > { %v447_v38 = vpop.f32.mrb[12].mxu0  ;;  %v3088_v39 = vld [vmem:[#allocation2 + $0x41] sm:$0xff] }
 0x123   : > { %v3090_v40 = vld [vmem:[#allocation2 + $0x42] sm:$0xff]  ;;  %492 = vst.msk [vmem:[#allocation2 + $0x61] sm:$0xff] %vm464_vm1, %v461_v37  ;;  %v448_v41 = vadd.f32 %v3042_v4, %v447_v38  ;;  %v449_v42 = vpop.f32.mrb[13].mxu0  ;;  %2485 = vmatprep.mubr.msk.f32.mxu0 %vm464_vm1, %v3088_v39 }
 0x124   : > { %2517 = vmatprep.mubr.msk.f32.mxu1 %vm464_vm1, %v3090_v40  ;;  %v925_v61 = vld [vmem:[#allocation2 + $0x40] sm:$0xff] }
 0x125   : > { %v462_v43 = vmax.f32 %v448_v41, 0.0 }
 0x126   : > { %v3098_v44 = vld [vmem:[#allocation2 + $0x51] sm:$0xff]  ;;  %v452_v46 = vpop.f32.mrb[14].mxu0 }
 0x127   : > { %v3100_v45 = vld [vmem:[#allocation2 + $0x52] sm:$0xff]  ;;  %493 = vst.msk [vmem:[#allocation2 + $0x71] sm:$0xff] %vm464_vm1, %v462_v43  ;;  %2486 = vmatmul.mubr.msk.f32.gmra.mrb[20].mxu0 %vm464_vm1, %v3098_v44  ;;  %v453_v47 = vadd.f32 %v3042_v4, %v452_v46  ;;  %v454_v48 = vpop.f32.mrb[15].mxu0  ;;  %v2679_v4 = vpack.c.bf16 %v2341_v3, %v2340_v2 }
 0x128   : > { %2518 = vmatmul.mubr.msk.f32.gmra.mrb[4].mxu1 %vm464_vm1, %v3100_v45  ;;  %v926_v62 = vld [vmem:[#allocation2 + $0x50] sm:$0xff] }
 0x129   : > { %v463_v49 = vmax.f32 %v453_v47, 0.0 }
 0x12a   : > { %v3108_v50 = vld [vmem:[#allocation2 + $0x61] sm:$0xff] }
 0x12b   : > { %v3110_v51 = vld [vmem:[#allocation2 + $0x62] sm:$0xff]  ;;  %2488 = vmatprep.mubr.msk.f32.mxu0 %vm464_vm1, %v3108_v50  ;;  %494 = vst.msk [vmem:[#allocation2 + $0x81] sm:$0xff] %vm464_vm1, %v463_v49 }
 0x12c   : > { %2520 = vmatprep.mubr.msk.f32.mxu1 %vm464_vm1, %v3110_v51  ;;  %v927_v63 = vld [vmem:[#allocation2 + $0x60] sm:$0xff] }
 0x12e   : > { %v3120_v54 = vld [vmem:[#allocation2 + $0x71] sm:$0xff] }
 0x12f   : > { %v3122_v55 = vld [vmem:[#allocation2 + $0x72] sm:$0xff]  ;;  %2489 = vmatmul.mubr.msk.f32.gmra.mrb[22].mxu0 %vm464_vm1, %v3120_v54 }
 0x130   : > { %2521 = vmatmul.mubr.msk.f32.gmra.mrb[6].mxu1 %vm464_vm1, %v3122_v55  ;;  %2495 = vmatprep.mubr.msk.f32.mxu0 %vm464_vm1, %v495_v52  ;;  %v928_v0 = vld [vmem:[#allocation2 + $0x70] sm:$0xff] }
 0x131   : > { %2527 = vmatprep.mubr.msk.f32.mxu1 %vm464_vm1, %v922_v57 }
 0x132   : > { %v929_v1 = vld [vmem:[#allocation2 + $0x80] sm:$0xff] }
 0x133   : > { %2496 = vmatmul.mubr.msk.f32.vlgmr.msra.gmra.mrb[16].mxu0 %vm464_vm1, %v922_v57  ;;  %v1077_v5 = vld [vmem:[#allocation2 + $0x81] sm:$0xff] }
 0x134   : > { %2528 = vmatmul.mubr.msk.f32.vlgmr.msra.gmra.mrb[0].mxu1 %vm464_vm1, %v923_v59  ;;  %2498 = vmatprep.mubr.msk.f32.mxu0 %vm464_vm1, %v923_v59  ;;  %v1225_v9 = vld [vmem:[#allocation2 + $0x82] sm:$0xff] }
 0x135   : > { %2674 = vmatpush3.bf16.msra.mxu1 %v3055_v19  ;;  %2530 = vmatprep.mubr.msk.f32.mxu1 %vm464_vm1, %v924_v60 }
 0x136   : > { %2676 = vmatprep.subr.bf16.mxu1 %v2675_v58 }
 0x137   : > { %2499 = vmatmul.mubr.msk.f32.gmra.mrb[18].mxu0 %vm464_vm1, %v924_v60 }
 0x138   : > { %2531 = vmatmul.mubr.msk.f32.gmra.mrb[2].mxu1 %vm464_vm1, %v925_v61  ;;  %2501 = vmatprep.mubr.msk.f32.mxu0 %vm464_vm1, %v925_v61 }
 0x139   : > { %2533 = vmatprep.mubr.msk.f32.mxu1 %vm464_vm1, %v926_v62 }
 0x13b   : > { %2502 = vmatmul.mubr.msk.f32.gmra.mrb[20].mxu0 %vm464_vm1, %v926_v62 }
 0x13c   : > { %2534 = vmatmul.mubr.msk.f32.gmra.mrb[4].mxu1 %vm464_vm1, %v927_v63  ;;  %2504 = vmatprep.mubr.msk.f32.mxu0 %vm464_vm1, %v927_v63 }
 0x13d   : > { %2536 = vmatprep.mubr.msk.f32.mxu1 %vm464_vm1, %v928_v0 }
 0x13f   : > { %2505 = vmatmul.mubr.msk.f32.gmra.mrb[22].mxu0 %vm464_vm1, %v928_v0 }
 0x140   : > { %2537 = vmatmul.mubr.msk.f32.gmra.mrb[6].mxu1 %vm464_vm1, %v929_v1 }
 0x141   : > { %2543 = vmatprep.mubr.msk.f32.mxu1 %vm464_vm1, %v3057_v21 }
 0x144   : > { %2544 = vmatmul.mubr.msk.f32.vlgmr.msra.gmra.mrb[0].mxu1 %vm464_vm1, %v3068_v27 }
 0x145   : > { %2678 = vmatpush3.bf16.msra.mxu1 %v2675_v58  ;;  %2546 = vmatprep.mubr.msk.f32.mxu1 %vm464_vm1, %v3078_v33 }
 0x146   : > { %2680 = vmatprep.subr.bf16.mxu1 %v2679_v4 }
 0x148   : > { %2547 = vmatmul.mubr.msk.f32.gmra.mrb[2].mxu1 %vm464_vm1, %v3088_v39 }
 0x149   : > { %2549 = vmatprep.mubr.msk.f32.mxu1 %vm464_vm1, %v3098_v44 }
 0x14c   : > { %2550 = vmatmul.mubr.msk.f32.gmra.mrb[4].mxu1 %vm464_vm1, %v3108_v50 }
 0x14d   : > { %2552 = vmatprep.mubr.msk.f32.mxu1 %vm464_vm1, %v3120_v54 }
 0x150   : > { %2553 = vmatmul.mubr.msk.f32.gmra.mrb[6].mxu1 %vm464_vm1, %v1077_v5 }
 0x151   : > { %2559 = vmatprep.mubr.msk.f32.mxu1 %vm464_vm1, %v3059_v22 }
 0x154   : > { %2560 = vmatmul.mubr.msk.f32.vlgmr.msra.gmra.mrb[0].mxu1 %vm464_vm1, %v3070_v28 }
 0x155   : > { %2682 = vmatpush3.bf16.msra.mxu1 %v2679_v4  ;;  %2562 = vmatprep.mubr.msk.f32.mxu1 %vm464_vm1, %v3080_v34 }
 0x156   : > { %2684 = vmatprep.subr.bf16.mxu1 %v2683_v8 }
 0x158   : > { %2563 = vmatmul.mubr.msk.f32.gmra.mrb[2].mxu1 %vm464_vm1, %v3090_v40 }
 0x159   : > { %2565 = vmatprep.mubr.msk.f32.mxu1 %vm464_vm1, %v3100_v45 }
 0x15c   : > { %2566 = vmatmul.mubr.msk.f32.gmra.mrb[4].mxu1 %vm464_vm1, %v3110_v51 }
 0x15d   : > { %2568 = vmatprep.mubr.msk.f32.mxu1 %vm464_vm1, %v3122_v55 }
 0x160   : > { %2569 = vmatmul.mubr.msk.f32.gmra.mrb[6].mxu1 %vm464_vm1, %v1225_v9 }
 0x161   : > { %2575 = vmatprep.mubr.msk.f32.mxu1 %vm464_vm1, %v923_v59 }
 0x164   : > { %2576 = vmatmul.mubr.msk.f32.vlgmr.msra.gmra.mrb[0].mxu1 %vm464_vm1, %v924_v60 }
 0x165   : > { %2686 = vmatpush3.bf16.msra.mxu1 %v2683_v8  ;;  %2578 = vmatprep.mubr.msk.f32.mxu1 %vm464_vm1, %v925_v61 }
 0x166   : > { %2688 = vmatprep.subr.bf16.mxu1 %v2687_v12 }
 0x168   : > { %2579 = vmatmul.mubr.msk.f32.gmra.mrb[2].mxu1 %vm464_vm1, %v926_v62 }
 0x169   : > { %2581 = vmatprep.mubr.msk.f32.mxu1 %vm464_vm1, %v927_v63 }
 0x16c   : > { %2582 = vmatmul.mubr.msk.f32.gmra.mrb[4].mxu1 %vm464_vm1, %v928_v0 }
 0x16d   : > { %2584 = vmatprep.mubr.msk.f32.mxu1 %vm464_vm1, %v929_v1 }
 0x170   : > { %2585 = vmatmul.mubr.msk.f32.gmra.mrb[6].mxu1 %vm464_vm1, %v1374_v13 }
 0x171   : > { %2591 = vmatprep.mubr.msk.f32.mxu1 %vm464_vm1, %v3068_v27 }
 0x174   : > { %2592 = vmatmul.mubr.msk.f32.vlgmr.msra.gmra.mrb[0].mxu1 %vm464_vm1, %v3078_v33 }
 0x175   : > { %2690 = vmatpush3.bf16.msra.mxu1 %v2687_v12  ;;  %2594 = vmatprep.mubr.msk.f32.mxu1 %vm464_vm1, %v3088_v39 }
 0x178   : > { %2595 = vmatmul.mubr.msk.f32.gmra.mrb[2].mxu1 %vm464_vm1, %v3098_v44 }
 0x179   : > { %2597 = vmatprep.mubr.msk.f32.mxu1 %vm464_vm1, %v3108_v50 }
 0x17c   : > { %2598 = vmatmul.mubr.msk.f32.gmra.mrb[4].mxu1 %vm464_vm1, %v3120_v54 }
 0x17d   : > { %2600 = vmatprep.mubr.msk.f32.mxu1 %vm464_vm1, %v1077_v5 }
 0x180   : > { %2601 = vmatmul.mubr.msk.f32.gmra.mrb[6].mxu1 %vm464_vm1, %v1522_v14 }
 0x181   : > { %2607 = vmatprep.mubr.msk.f32.mxu1 %vm464_vm1, %v3070_v28 }
 0x184   : > { %2608 = vmatmul.mubr.msk.f32.vlgmr.msra.gmra.mrb[0].mxu1 %vm464_vm1, %v3080_v34 }
 0x185   : > { %2610 = vmatprep.mubr.msk.f32.mxu1 %vm464_vm1, %v3090_v40 }
 0x188   : > { %2611 = vmatmul.mubr.msk.f32.gmra.mrb[2].mxu1 %vm464_vm1, %v3100_v45 }
 0x189   : > { %2613 = vmatprep.mubr.msk.f32.mxu1 %vm464_vm1, %v3110_v51 }
 0x18c   : > { %2614 = vmatmul.mubr.msk.f32.gmra.mrb[4].mxu1 %vm464_vm1, %v3122_v55 }
 0x18d   : > { %2616 = vmatprep.mubr.msk.f32.mxu1 %vm464_vm1, %v1225_v9 }
 0x190   : > { %2617 = vmatmul.mubr.msk.f32.gmra.mrb[6].mxu1 %vm464_vm1, %v1670_v15 }
 0x206   : > { %v2497_v16 = vpop.f32.mrb[16].mxu0 }
 0x207   : > { %v735_v17 = vpop.f32.mrb[17].mxu0 }
 0x20a   : > { %v2500_v18 = vpop.f32.mrb[18].mxu0 }
 0x20b   : > { %v745_v19 = vpop.f32.mrb[19].mxu0 }
 0x20e   : > { %v2503_v20 = vpop.f32.mrb[20].mxu0 }
 0x20f   : > { %v755_v21 = vpop.f32.mrb[21].mxu0 }
 0x212   : > { %v2506_v22 = vpop.f32.mrb[22].mxu0 }
 0x213   : > { %v765_v23 = vpop.f32.mrb[23].mxu0 }
 0x257   : > { %v2609_v24 = vpop.f32.mrb[0].mxu1 }
 0x258   : > { %v2691_v26 = vadd.f32 %v2609_v24, %v2497_v16  ;;  %v1764_v27 = vpop.f32.mrb[1].mxu1 }
 0x259   : > { %v2692_v28 = vadd.f32 %v1764_v27, %v735_v17 }
 0x25a   : > { %v3235_v29 = vadd.f32 %v2691_v26, %v2370_v25 }
 0x25b   : > { %v3237_v30 = vadd.f32 %v2692_v28, %v2370_v25  ;;  %v2612_v31 = vpop.f32.mrb[2].mxu1 }
 0x25c   : > { %v2693_v32 = vadd.f32 %v2612_v31, %v2500_v18  ;;  %v1774_v33 = vpop.f32.mrb[3].mxu1  ;;  %1999 = vrot.lane.b32.xlu1 %v3235_v29, %s2840_s12  ;;  %v1830_v34 = vsel %vm1828_vm3, %v3235_v29, 0.0 }
 0x25d   : > { %v1829_v35 = vsel %vm1828_vm3, %v3237_v30, 0.0  ;;  %v2694_v36 = vadd.f32 %v1774_v33, %v745_v19 }
 0x25e   : > { %v3245_v37 = vadd.f32 %v2693_v32, %v2370_v25  ;;  %v1831_v40 = vadd.f32 %v1830_v34, %v1829_v35 }
 0x25f   : > { %v3247_v38 = vadd.f32 %v2694_v36, %v2370_v25  ;;  %v2615_v39 = vpop.f32.mrb[4].mxu1 }
 0x260   : > { %v2695_v41 = vadd.f32 %v2615_v39, %v2503_v20  ;;  %v1784_v42 = vpop.f32.mrb[5].mxu1  ;;  %v1834_v49 = vsel %vm1828_vm3, %v3245_v37, 0.0 }
 0x261   : > { %v1832_v43 = vsel %vm1828_vm3, %v3247_v38, 0.0  ;;  %v2696_v44 = vadd.f32 %v1784_v42, %v755_v21  ;;  %2001 = vrot.lane.b32.xlu1 %v3247_v38, %s2840_s12 }
 0x262   : > { %v1833_v45 = vadd.f32 %v1832_v43, %v1831_v40  ;;  %v3253_v46 = vadd.f32 %v2695_v41, %v2370_v25 }
 0x263   : > { %v3255_v47 = vadd.f32 %v2696_v44, %v2370_v25  ;;  %v2618_v48 = vpop.f32.mrb[6].mxu1 }
 0x264   : > { %v2697_v50 = vadd.f32 %v2618_v48, %v2506_v22  ;;  %v1794_v51 = vpop.f32.mrb[7].mxu1  ;;  %v1835_v52 = vadd.f32 %v1834_v49, %v1833_v45  ;;  %v1838_v58 = vsel %vm1828_vm3, %v3253_v46, 0.0 }
 0x265   : > { %v2698_v53 = vadd.f32 %v1794_v51, %v765_v23  ;;  %2003 = vrot.lane.b32.xlu1 %v3245_v37, %s2840_s12  ;;  %v1836_v54 = vsel %vm1828_vm3, %v3255_v47, 0.0 }
 0x266   : > { %v1837_v55 = vadd.f32 %v1836_v54, %v1835_v52  ;;  %v3263_v56 = vadd.f32 %v2697_v50, %v2370_v25 }
 0x267   : > { %v3265_v57 = vadd.f32 %v2698_v53, %v2370_v25 }
 0x268   : > { %v1839_v59 = vadd.f32 %v1838_v58, %v1837_v55  ;;  %v1842_v62 = vsel %vm1828_vm3, %v3263_v56, 0.0 }
 0x269   : > { %2005 = vrot.lane.b32.xlu1 %v3255_v47, %s2840_s12  ;;  %v1840_v60 = vsel %vm1828_vm3, %v3265_v57, 0.0 }
 0x26a   : > { %v1841_v61 = vadd.f32 %v1840_v60, %v1839_v59 }
 0x26c   : > { %v1843_v63 = vadd.f32 %v1842_v62, %v1841_v61 }
 0x26e   : > { %1844 = vadd.xlane.f32.xlu0 %v1843_v63 }
 0x284   : > { %1997 = vrot.lane.b32.xlu0 %v3237_v30, %s2840_s12 }
 0x288   : > { %2007 = vrot.lane.b32.xlu0 %v3253_v46, %s2840_s12 }
 0x28c   : > { %2009 = vrot.lane.b32.xlu0 %v3265_v57, %s2840_s12 }
 0x290   : > { %2011 = vrot.lane.b32.xlu0 %v3263_v56, %s2840_s12 }
 0x2ce   : > { %v2000_v0 = vpop.permute.xlu1 %1999 }
 0x2cf   : > { %v2022_v7 = vsel %vm1828_vm3, %v2000_v0, 0.0 }
 0x2d3   : > { %v2002_v1 = vpop.permute.xlu1 %2001 }
 0x2d4   : > { %v2024_v11 = vsel %vm1828_vm3, %v2002_v1, 0.0 }
 0x2d7   : > { %v2004_v4 = vpop.permute.xlu1 %2003 }
 0x2d8   : > { %v2026_v16 = vsel %vm1828_vm3, %v2004_v4, 0.0 }
 0x2db   : > { %v2006_v13 = vpop.permute.xlu1 %2005 }
 0x2dc   : > { %v2028_v19 = vsel %vm1828_vm3, %v2006_v13, 0.0 }
 0x2fb   : > { %v1845_v2 = vpop.xlane.xlu0 %1844 }
 0x2fc   : > { %v1846_v3 = vrot.slane %v1845_v2, 4 }
 0x2fe   : > { %v1847_v5 = vadd.f32 %v1846_v3, %v1845_v2 }
 0x2ff   : > { %v1998_v6 = vpop.permute.xlu0 %1997 }
 0x300   : > { %v1848_v8 = vrot.slane %v1847_v5, 2  ;;  %v2021_v9 = vsel %vm1828_vm3, %v1998_v6, 0.0 }
 0x301   : > { %v2023_v10 = vadd.f32 %v2022_v7, %v2021_v9 }
 0x302   : > { %v1849_v12 = vadd.f32 %v1848_v8, %v1847_v5 }
 0x303   : > { %v2025_v14 = vadd.f32 %v2024_v11, %v2023_v10  ;;  %v2008_v15 = vpop.permute.xlu0 %2007 }
 0x304   : > { %v1850_v17 = vrot.slane %v1849_v12, 1  ;;  %v2030_v23 = vsel %vm1828_vm3, %v2008_v15, 0.0 }
 0x305   : > { %v2027_v18 = vadd.f32 %v2026_v16, %v2025_v14 }
 0x306   : > { %v1851_v20 = vadd.f32 %v1850_v17, %v1849_v12 }
 0x307   : > { %v2029_v21 = vadd.f32 %v2028_v19, %v2027_v18  ;;  %v2010_v22 = vpop.permute.xlu0 %2009 }
 0x308   : > { %2755 = vpush %v1851_v20  ;;  %v2032_v25 = vsel %vm1828_vm3, %v2010_v22, 0.0 }
 0x309   : > { %v2031_v24 = vadd.f32 %v2030_v23, %v2029_v21 }
 0x30b   : > { %v2033_v26 = vadd.f32 %v2032_v25, %v2031_v24  ;;  %v2012_v27 = vpop.permute.xlu0 %2011 }
 0x30c   : > { %v2034_v28 = vsel %vm1828_vm3, %v2012_v27, 0.0 }
 0x30d   : > { %v2035_v31 = vadd.f32 %v2034_v28, %v2033_v26 }
 0x30f   : > { %2036 = vadd.xlane.f32.xlu0 %v2035_v31 }
 0x339   : > { %s2756_s13 = spop %2755 }
 0x33a   : > { %s1855_s18 = smul.f32 0.00048828125, %s2756_s13 }
 0x33c   : > { %v1856_v32 = vstv %s1855_s18 }
 0x33d   : > { %v3292_v33 = vsub.f32 %v3237_v30, %v1856_v32  ;;  %v3295_v34 = vsub.f32 %v3235_v29, %v1856_v32  ;;  %v3298_v35 = vsub.f32 %v3247_v38, %v1856_v32  ;;  %v3301_v36 = vsub.f32 %v3245_v37, %v1856_v32 }
 0x33e   : > { %v3304_v39 = vsub.f32 %v3255_v47, %v1856_v32  ;;  %v3313_v43 = vsub.f32 %v3253_v46, %v1856_v32  ;;  %v3320_v50 = vsub.f32 %v3265_v57, %v1856_v32  ;;  %v3326_v54 = vsub.f32 %v3263_v56, %v1856_v32 }
 0x33f   : > { %v1865_v40 = vmul.f32 %v3292_v33, %v3292_v33  ;;  %v1866_v41 = vmul.f32 %v3295_v34, %v3295_v34  ;;  %v1867_v42 = vmul.f32 %v3298_v35, %v3298_v35  ;;  %v1868_v44 = vmul.f32 %v3301_v36, %v3301_v36 }
 0x340   : > { %v1869_v51 = vmul.f32 %v3304_v39, %v3304_v39  ;;  %v1870_v55 = vmul.f32 %v3313_v43, %v3313_v43  ;;  %v1871_v60 = vmul.f32 %v3320_v50, %v3320_v50  ;;  %v1872_v63 = vmul.f32 %v3326_v54, %v3326_v54 }
 0x341   : > { %v1873_v45 = vsel %vm1828_vm3, %v1865_v40, 0.0  ;;  %v1874_v48 = vsel %vm1828_vm3, %v1866_v41, 0.0  ;;  %v1876_v52 = vsel %vm1828_vm3, %v1867_v42, 0.0  ;;  %v1878_v58 = vsel %vm1828_vm3, %v1868_v44, 0.0 }
 0x342   : > { %v1875_v49 = vadd.f32 %v1874_v48, %v1873_v45  ;;  %v1880_v61 = vsel %vm1828_vm3, %v1869_v51, 0.0  ;;  %v1882_v0 = vsel %vm1828_vm3, %v1870_v55, 0.0  ;;  %v1884_v2 = vsel %vm1828_vm3, %v1871_v60, 0.0 }
 0x343   : > { %v1886_v4 = vsel %vm1828_vm3, %v1872_v63, 0.0 }
 0x344   : > { %v1877_v53 = vadd.f32 %v1876_v52, %v1875_v49 }
 0x346   : > { %v1879_v59 = vadd.f32 %v1878_v58, %v1877_v53 }
 0x348   : > { %v1881_v62 = vadd.f32 %v1880_v61, %v1879_v59 }
 0x34a   : > { %v1883_v1 = vadd.f32 %v1882_v0, %v1881_v62 }
 0x34c   : > { %v1885_v3 = vadd.f32 %v1884_v2, %v1883_v1 }
 0x34e   : > { %v1887_v5 = vadd.f32 %v1886_v4, %v1885_v3 }
 0x350   : > { %1888 = vadd.xlane.f32.xlu1 %v1887_v5 }
 0x39c   : > { %v2037_v13 = vpop.xlane.xlu0 %2036 }
 0x39d   : > { %v2038_v14 = vrot.slane %v2037_v13, 4 }
 0x39f   : > { %v2039_v15 = vadd.f32 %v2038_v14, %v2037_v13 }
 0x3a1   : > { %v2040_v16 = vrot.slane %v2039_v15, 2 }
 0x3a3   : > { %v2041_v18 = vadd.f32 %v2040_v16, %v2039_v15 }
 0x3a5   : > { %v2042_v19 = vrot.slane %v2041_v18, 1 }
 0x3a7   : > { %v2043_v21 = vadd.f32 %v2042_v19, %v2041_v18  ;;  %v3402_v18 = vld [vmem:[%s3494_s5] ss:$0 sm:$0xff] }
 0x3dd   : > { %v1889_v6 = vpop.xlane.xlu1 %1888 }
 0x3de   : > { %v1890_v7 = vrot.slane %v1889_v6, 4 }
 0x3e0   : > { %v1891_v8 = vadd.f32 %v1890_v7, %v1889_v6 }
 0x3e2   : > { %v1892_v9 = vrot.slane %v1891_v8, 2 }
 0x3e4   : > { %v1893_v10 = vadd.f32 %v1892_v9, %v1891_v8 }
 0x3e6   : > { %v1894_v11 = vrot.slane %v1893_v10, 1 }
 0x3e8   : > { %v1895_v12 = vadd.f32 %v1894_v11, %v1893_v10 }
 0x3ea   : > { %2757 = vpush %v1895_v12 }
 0x41b   : > { %s2758_s14 = spop %2757 }
 0x41c   : > { %s1899_s15 = smul.f32 0.00048828125, %s2758_s14 }
 0x41e   : > { %s1900_s16 = sadd.f32 1e-05, %s1899_s15 }
 0x420   : > { %v1901_v17 = vstv %s1900_s16 }
 0x421   : > { %2778 = vrsqrt.f32 %v1901_v17 }
 0x42b   : > { %v2779_v20 = vpop.eup %2778 }
 0x42c   : > { %2759 = vpush %v2779_v20 }
 0x42d   : > { %2761 = vpush %v2043_v21 }
 0x45d   : > { %s3339_s17 = spop %2759 }
 0x45e   : > { %s2762_s19 = spop %2761 }
 0x45f   : > { %s2047_s20 = smul.f32 0.00048828125, %s2762_s19 }
 0x461   : > { %v2048_v22 = vstv %s2047_s20 }
 0x462   : > { %v3342_v23 = vsub.f32 %v3235_v29, %v2048_v22  ;;  %v3345_v24 = vsub.f32 %v3237_v30, %v2048_v22  ;;  %v3352_v27 = vsub.f32 %v3247_v38, %v2048_v22  ;;  %v3359_v28 = vsub.f32 %v3245_v37, %v2048_v22 }
 0x463   : > { %v3365_v31 = vsub.f32 %v3255_v47, %v2048_v22  ;;  %v3371_v32 = vsub.f32 %v3253_v46, %v2048_v22  ;;  %v3377_v40 = vsub.f32 %v3265_v57, %v2048_v22  ;;  %v3383_v41 = vsub.f32 %v3263_v56, %v2048_v22  ;;  %v3410_v22 = vld [vmem:[%s3495_s6] ss:$0 sm:$0xff] }
 0x464   : > { %v2058_v25 = vmul.f32 %v3342_v23, %v3342_v23  ;;  %v2057_v26 = vmul.f32 %v3345_v24, %v3345_v24  ;;  %v2059_v29 = vmul.f32 %v3352_v27, %v3352_v27  ;;  %v2060_v30 = vmul.f32 %v3359_v28, %v3359_v28 }
 0x465   : > { %v2061_v38 = vmul.f32 %v3365_v31, %v3365_v31  ;;  %v2062_v37 = vmul.f32 %v3371_v32, %v3371_v32  ;;  %v2063_v47 = vmul.f32 %v3377_v40, %v3377_v40  ;;  %v2064_v46 = vmul.f32 %v3383_v41, %v3383_v41 }
 0x466   : > { %2075 = vrot.lane.b32.xlu0 %v2058_v25, %s2840_s12  ;;  %2073 = vrot.lane.b32.xlu1 %v2057_v26, %s2840_s12 }
 0x46a   : > { %2077 = vrot.lane.b32.xlu1 %v2059_v29, %s2840_s12 }
 0x46e   : > { %2079 = vrot.lane.b32.xlu1 %v2060_v30, %s2840_s12 }
 0x472   : > { %2081 = vrot.lane.b32.xlu1 %v2061_v38, %s2840_s12 }
 0x476   : > { %2083 = vrot.lane.b32.xlu1 %v2062_v37, %s2840_s12 }
 0x47a   : > { %2085 = vrot.lane.b32.xlu1 %v2063_v47, %s2840_s12 }
 0x47e   : > { %2087 = vrot.lane.b32.xlu1 %v2064_v46, %s2840_s12 }
 0x4d8   : > { %v2074_v42 = vpop.permute.xlu1 %2073  ;;  %v2076_v45 = vpop.permute.xlu0 %2075 }
 0x4d9   : > { %v2098_v48 = vsel %vm1828_vm3, %v2076_v45, 0.0  ;;  %v2097_v49 = vsel %vm1828_vm3, %v2074_v42, 0.0 }
 0x4da   : > { %v2099_v56 = vadd.f32 %v2098_v48, %v2097_v49 }
 0x4dc   : > { %v2078_v44 = vpop.permute.xlu1 %2077 }
 0x4dd   : > { %v2100_v52 = vsel %vm1828_vm3, %v2078_v44, 0.0 }
 0x4de   : > { %v2101_v55 = vadd.f32 %v2100_v52, %v2099_v56 }
 0x4e0   : > { %v2080_v57 = vpop.permute.xlu1 %2079 }
 0x4e1   : > { %v2102_v53 = vsel %vm1828_vm3, %v2080_v57, 0.0 }
 0x4e2   : > { %v2103_v60 = vadd.f32 %v2102_v53, %v2101_v55 }
 0x4e4   : > { %v2082_v51 = vpop.permute.xlu1 %2081 }
 0x4e5   : > { %v2104_v59 = vsel %vm1828_vm3, %v2082_v51, 0.0 }
 0x4e6   : > { %v2105_v62 = vadd.f32 %v2104_v59, %v2103_v60 }
 0x4e8   : > { %v2084_v58 = vpop.permute.xlu1 %2083 }
 0x4e9   : > { %v2106_v61 = vsel %vm1828_vm3, %v2084_v58, 0.0  ;;  %v1904_v58 = vstv %s3339_s17 }
 0x4ea   : > { %v2107_v1 = vadd.f32 %v2106_v61, %v2105_v62  ;;  %v1905_v59 = vmul.f32 %v1904_v58, %v3292_v33  ;;  %v1906_v60 = vmul.f32 %v1904_v58, %v3295_v34  ;;  %v1907_v62 = vmul.f32 %v1904_v58, %v3298_v35 }
 0x4eb   : > { %v1910_v35 = vmul.f32 %v1904_v58, %v3313_v43 }
 0x4ec   : > { %v2086_v63 = vpop.permute.xlu1 %2085  ;;  %v1919_v61 = vmul.f32 %v3402_v18, %v1905_v59 }
 0x4ed   : > { %v2108_v0 = vsel %vm1828_vm3, %v2086_v63, 0.0 }
 0x4ee   : > { %v2109_v2 = vadd.f32 %v2108_v0, %v2107_v1  ;;  %v1933_v63 = vadd.f32 %v3410_v22, %v1919_v61  ;;  %v1920_v0 = vmul.f32 %v3402_v18, %v1906_v60  ;;  %v1908_v1 = vmul.f32 %v1904_v58, %v3301_v36 }
 0x4f0   : > { %v2088_v3 = vpop.permute.xlu1 %2087 }
 0x4f1   : > { %v2110_v4 = vsel %vm1828_vm3, %v2088_v3, 0.0  ;;  %v1934_v3 = vadd.f32 %v3410_v22, %v1920_v0 }
 0x4f2   : > { %v2111_v5 = vadd.f32 %v2110_v4, %v2109_v2  ;;  %v2373_v2 = vmul.f32 -1.442695, %v1933_v63  ;;  %v1921_v4 = vmul.f32 %v3402_v18, %v1907_v62 }
 0x4f3   : > { %v2374_v33 = vmul.f32 -1.442695, %v1934_v3 }
 0x4f4   : > { %2112 = vadd.xlane.f32.xlu0 %v2111_v5  ;;  %v1909_v5 = vmul.f32 %v1904_v58, %v3304_v39  ;;  %v1935_v34 = vadd.f32 %v3410_v22, %v1921_v4 }
 0x4f6   : > { %v1923_v36 = vmul.f32 %v3402_v18, %v1909_v5 }
 0x4f8   : > { %v1937_v39 = vadd.f32 %v3410_v22, %v1923_v36 }
 0x581   : > { %v2113_v6 = vpop.xlane.xlu0 %2112 }
 0x582   : > { %v2114_v7 = vrot.slane %v2113_v6, 4 }
 0x584   : > { %v2115_v8 = vadd.f32 %v2114_v7, %v2113_v6  ;;  %v1922_v6 = vmul.f32 %v3402_v18, %v1908_v1  ;;  %v2375_v7 = vmul.f32 -1.442695, %v1935_v34 }
 0x586   : > { %v2116_v9 = vrot.slane %v2115_v8, 2 }
 0x588   : > { %v2117_v10 = vadd.f32 %v2116_v9, %v2115_v8  ;;  %v1936_v8 = vadd.f32 %v3410_v22, %v1922_v6  ;;  %v1911_v9 = vmul.f32 %v1904_v58, %v3320_v50 }
 0x58a   : > { %v2118_v11 = vrot.slane %v2117_v10, 1 }
 0x58c   : > { %v2119_v12 = vadd.f32 %v2118_v11, %v2117_v10  ;;  %v2376_v10 = vmul.f32 -1.442695, %v1936_v8  ;;  %v1924_v11 = vmul.f32 %v3402_v18, %v1910_v35 }
 0x58e   : > { %2763 = vpush %v2119_v12  ;;  %v1938_v43 = vadd.f32 %v3410_v22, %v1924_v11 }
 0x590   : > { %v2378_v50 = vmul.f32 -1.442695, %v1938_v43 }
 0x5bf   : > { %s2764_s21 = spop %2763 }
 0x5c0   : > { %s2123_s22 = smul.f32 0.00048828125, %s2764_s21 }
 0x5c2   : > { %s2124_s23 = sadd.f32 1e-05, %s2123_s22 }
 0x5c4   : > { %v2125_v13 = vstv %s2124_s23 }
 0x5c5   : > { %2780 = vrsqrt.f32 %v2125_v13  ;;  %v1912_v13 = vmul.f32 %v1904_v58, %v3326_v54 }
 0x5cf   : > { %v2781_v14 = vpop.eup %2780 }
 0x5d0   : > { %2765 = vpush %v2781_v14  ;;  %v2377_v14 = vmul.f32 -1.442695, %v1937_v39 }
 0x601   : > { %s2766_s26 = spop %2765 }
 0x602   : > { %v2128_v15 = vstv %s2766_s26 }
 0x603   : > { %v2129_v16 = vmul.f32 %v2128_v15, %v3345_v24  ;;  %v2130_v17 = vmul.f32 %v2128_v15, %v3342_v23  ;;  %v2131_v19 = vmul.f32 %v2128_v15, %v3352_v27  ;;  %v2132_v23 = vmul.f32 %v2128_v15, %v3359_v28 }
 0x604   : > { %v2133_v27 = vmul.f32 %v2128_v15, %v3365_v31  ;;  %v2134_v38 = vmul.f32 %v2128_v15, %v3371_v32  ;;  %v2135_v46 = vmul.f32 %v2128_v15, %v3377_v40  ;;  %v2136_v32 = vmul.f32 %v2128_v15, %v3383_v41 }
 0x605   : > { %v2137_v20 = vmul.f32 %v3402_v18, %v2129_v16  ;;  %v2138_v21 = vmul.f32 %v3402_v18, %v2130_v17  ;;  %v2139_v25 = vmul.f32 %v3402_v18, %v2131_v19  ;;  %v2140_v29 = vmul.f32 %v3402_v18, %v2132_v23 }
 0x606   : > { %v2141_v37 = vmul.f32 %v3402_v18, %v2133_v27  ;;  %v2142_v42 = vmul.f32 %v3402_v18, %v2134_v38  ;;  %v2143_v45 = vmul.f32 %v3402_v18, %v2135_v46  ;;  %v2144_v40 = vmul.f32 %v3402_v18, %v2136_v32 }
 0x607   : > { %v2145_v24 = vadd.f32 %v3410_v22, %v2137_v20  ;;  %v2146_v26 = vadd.f32 %v3410_v22, %v2138_v21  ;;  %v2147_v30 = vadd.f32 %v3410_v22, %v2139_v25  ;;  %v2148_v47 = vadd.f32 %v3410_v22, %v2140_v29 }
 0x608   : > { %v2149_v31 = vadd.f32 %v3410_v22, %v2141_v37  ;;  %v2150_v57 = vadd.f32 %v3410_v22, %v2142_v42  ;;  %v2151_v49 = vadd.f32 %v3410_v22, %v2143_v45  ;;  %v2152_v52 = vadd.f32 %v3410_v22, %v2144_v40 }
 0x609   : > { %2782 = vtanh.f32 %v2145_v24  ;;  %v1925_v15 = vmul.f32 %v3402_v18, %v1911_v9  ;;  %v1926_v20 = vmul.f32 %v3402_v18, %v1912_v13 }
 0x60a   : > { %2784 = vtanh.f32 %v2146_v26 }
 0x60b   : > { %2786 = vtanh.f32 %v2147_v30  ;;  %v1939_v19 = vadd.f32 %v3410_v22, %v1925_v15  ;;  %v1940_v23 = vadd.f32 %v3410_v22, %v1926_v20 }
 0x60c   : > { %2788 = vtanh.f32 %v2148_v47 }
 0x60d   : > { %2790 = vtanh.f32 %v2149_v31  ;;  %v2379_v54 = vmul.f32 -1.442695, %v1939_v19  ;;  %v2380_v27 = vmul.f32 -1.442695, %v1940_v23 }
 0x60e   : > { %2792 = vtanh.f32 %v2150_v57 }
 0x60f   : > { %2794 = vtanh.f32 %v2151_v49 }
 0x610   : > { %2796 = vtanh.f32 %v2152_v52 }
 0x611   : > { %2798 = vpow2.f32 %v2373_v2 }
 0x612   : > { %2800 = vpow2.f32 %v2374_v33 }
 0x613   : > { %v2783_v28 = vpop.eup %2782  ;;  %2802 = vpow2.f32 %v2375_v7 }
 0x614   : > { %2169 = vrot.lane.b32.xlu1 %v2783_v28, %s2840_s12  ;;  %v2785_v44 = vpop.eup %2784  ;;  %2804 = vpow2.f32 %v2376_v10 }
 0x615   : > { %v2787_v48 = vpop.eup %2786  ;;  %2806 = vpow2.f32 %v2377_v14 }
 0x616   : > { %v2789_v51 = vpop.eup %2788 }
 0x617   : > { %v2791_v41 = vpop.eup %2790 }
 0x618   : > { %2171 = vrot.lane.b32.xlu1 %v2785_v44, %s2840_s12  ;;  %v2793_v56 = vpop.eup %2792 }
 0x619   : > { %v2795_v53 = vpop.eup %2794 }
 0x61a   : > { %v2797_v55 = vpop.eup %2796 }
 0x61b   : > { %v2799_v12 = vpop.eup %2798 }
 0x61c   : > { %2173 = vrot.lane.b32.xlu1 %v2787_v48, %s2840_s12  ;;  %v1965_v16 = vadd.f32 1.0, %v2799_v12  ;;  %v2801_v17 = vpop.eup %2800 }
 0x61d   : > { %v1966_v21 = vadd.f32 1.0, %v2801_v17  ;;  %v2803_v24 = vpop.eup %2802 }
 0x61e   : > { %2808 = vrcp.f32 %v1965_v16  ;;  %v1967_v25 = vadd.f32 1.0, %v2803_v24  ;;  %v2805_v26 = vpop.eup %2804 }
 0x61f   : > { %2810 = vpow2.f32 %v2378_v50  ;;  %v1968_v29 = vadd.f32 1.0, %v2805_v26  ;;  %v2807_v30 = vpop.eup %2806 }
 0x620   : > { %2175 = vrot.lane.b32.xlu1 %v2789_v51, %s2840_s12  ;;  %2812 = vrcp.f32 %v1966_v21  ;;  %v1969_v22 = vadd.f32 1.0, %v2807_v30 }
 0x621   : > { %2814 = vpow2.f32 %v2379_v54 }
 0x622   : > { %2816 = vrcp.f32 %v1967_v25 }
 0x623   : > { %2818 = vpow2.f32 %v2380_v27 }
 0x624   : > { %2177 = vrot.lane.b32.xlu1 %v2791_v41, %s2840_s12  ;;  %2820 = vrcp.f32 %v1968_v29 }
 0x625   : > { %2822 = vrcp.f32 %v1969_v22 }
 0x628   : > { %2179 = vrot.lane.b32.xlu1 %v2793_v56, %s2840_s12  ;;  %v2809_v38 = vpop.eup %2808 }
 0x629   : > { %v2811_v47 = vpop.eup %2810 }
 0x62a   : > { %v2813_v28 = vpop.eup %2812  ;;  %v1970_v31 = vadd.f32 1.0, %v2811_v47 }
 0x62b   : > { %v2815_v44 = vpop.eup %2814 }
 0x62c   : > { %2181 = vrot.lane.b32.xlu1 %v2795_v53, %s2840_s12  ;;  %v2817_v32 = vpop.eup %2816  ;;  %2824 = vrcp.f32 %v1970_v31  ;;  %v1971_v48 = vadd.f32 1.0, %v2815_v44 }
 0x62d   : > { %v2819_v40 = vpop.eup %2818 }
 0x62e   : > { %v2821_v49 = vpop.eup %2820  ;;  %2826 = vrcp.f32 %v1971_v48  ;;  %v1972_v41 = vadd.f32 1.0, %v2819_v40 }
 0x62f   : > { %v2823_v56 = vpop.eup %2822 }
 0x630   : > { %2183 = vrot.lane.b32.xlu1 %v2797_v55, %s2840_s12  ;;  %2828 = vrcp.f32 %v1972_v41 }
 0x636   : > { %v2825_v58 = vpop.eup %2824 }
 0x638   : > { %v2827_v61 = vpop.eup %2826 }
 0x63a   : > { %v2829_v0 = vpop.eup %2828 }
 0x686   : > { %v2170_v18 = vpop.permute.xlu1 %2169 }
 0x687   : > { %v2193_v37 = vmul.f32 %v2809_v38, %v2170_v18 }
 0x689   : > { %2201 = vst.msk [vmem:[%s3468_s11] sm:$0xff] %vm1828_vm3, %v2193_v37 }
 0x68a   : > { %v2172_v46 = vpop.permute.xlu1 %2171 }
 0x68b   : > { %v2194_v42 = vmul.f32 %v2813_v28, %v2172_v46 }
 0x68d   : > { %2202 = vst.msk [vmem:[%s3468_s11 + $0x8] sm:$0xff] %vm1828_vm3, %v2194_v42 }
 0x68e   : > { %v2174_v45 = vpop.permute.xlu1 %2173 }
 0x68f   : > { %v2195_v57 = vmul.f32 %v2817_v32, %v2174_v45 }
 0x691   : > { %2203 = vst.msk [vmem:[%s3468_s11 + $0x10] sm:$0xff] %vm1828_vm3, %v2195_v57 }
 0x692   : > { %v2176_v51 = vpop.permute.xlu1 %2175 }
 0x693   : > { %v2196_v52 = vmul.f32 %v2821_v49, %v2176_v51 }
 0x695   : > { %2204 = vst.msk [vmem:[%s3468_s11 + $0x18] sm:$0xff] %vm1828_vm3, %v2196_v52 }
 0x696   : > { %v2178_v53 = vpop.permute.xlu1 %2177 }
 0x697   : > { %v2197_v55 = vmul.f32 %v2823_v56, %v2178_v53 }
 0x699   : > { %2205 = vst.msk [vmem:[%s3468_s11 + $0x20] sm:$0xff] %vm1828_vm3, %v2197_v55 }
 0x69a   : > { %v2180_v59 = vpop.permute.xlu1 %2179 }
 0x69b   : > { %v2198_v60 = vmul.f32 %v2825_v58, %v2180_v59 }
 0x69d   : > { %2206 = vst.msk [vmem:[%s3468_s11 + $0x28] sm:$0xff] %vm1828_vm3, %v2198_v60 }
 0x69e   : > { %v2182_v62 = vpop.permute.xlu1 %2181 }
 0x69f   : > { %v2199_v63 = vmul.f32 %v2827_v61, %v2182_v62 }
 0x6a1   : > { %2207 = vst.msk [vmem:[%s3468_s11 + $0x30] sm:$0xff] %vm1828_vm3, %v2199_v63 }
 0x6a2   : > { %v2184_v1 = vpop.permute.xlu1 %2183 }
 0x6a3   : > { %v2200_v2 = vmul.f32 %v2829_v0, %v2184_v1 }
 0x6a5   : > { %2208 = vst.msk [vmem:[%s3468_s11 + $0x38] sm:$0xff] %vm1828_vm3, %v2200_v2 }
 0x6a6 PF: > { %s17_s24 = sadd.s32 1, %s2836_s24  }
 0x6a7   : > { %p14_p4 = scmp.ge.s32.totalorder %s17_s24, 4  }
 0x6a9   :  { %16 = sbr.rel (!%p14_p4) target bundleno = 1 (0x1), region = 88 }

// kernel: gru_deeplabv3_forward.3
= control target key start
LH: loop header
LB: loop body
LE: loop exit
PB: predicated region body
PF: predicated region fallthrough
CT: control target
= control target key end

     0   :  { %s12584_s0 = inlined_call_operand.vmem [shape: f32[2,8,8,32], index: 0, kind: input, shape index: {}]   ;;  %s12585_s1 = inlined_call_operand.vmem [shape: f32[32,1024], index: 1, kind: input, shape index: {}]   ;;  %s12586_s2 = inlined_call_operand.vmem [shape: f32[1,1024], index: 2, kind: input, shape index: {}]   ;;  %s12587_s3 = inlined_call_operand.vmem [shape: f32[1,1024], index: 3, kind: input, shape index: {}]   ;;  %s12588_s4 = inlined_call_operand.vmem [shape: f32[32,256], index: 4, kind: input, shape index: {}]   ;;  %s12589_s5 = inlined_call_operand.vmem [shape: f32[1,256], index: 5, kind: input, shape index: {}, may-alias: {5,9,12}]   ;;  %s12590_s6 = inlined_call_operand.vmem [shape: f32[1,256], index: 6, kind: input, shape index: {}, may-alias: {6,10,13}]   ;;  %s12591_s7 = inlined_call_operand.vmem [shape: bf16[1024,256], index: 7, kind: input, shape index: {}]   ;;  %s12592_s8 = inlined_call_operand.vmem [shape: bf16[256,256], index: 8, kind: input, shape index: {}]   ;;  %s12593_s9 = inlined_call_operand.vmem [shape: f32[1,256], index: 9, kind: input, shape index: {}, may-alias: {5,9,12}]   ;;  %s12594_s10 = inlined_call_operand.vmem [shape: f32[1,256], index: 10, kind: input, shape index: {}, may-alias: {6,10,13}]   ;;  %s12595_s11 = inlined_call_operand.vmem [shape: bf16[9,256,256], index: 11, kind: input, shape index: {}]   ;;  %s12596_s12 = inlined_call_operand.vmem [shape: f32[1,256], index: 12, kind: input, shape index: {}, may-alias: {5,9,12}]   ;;  %s12597_s13 = inlined_call_operand.vmem [shape: f32[1,256], index: 13, kind: input, shape index: {}, may-alias: {6,10,13}]   ;;  %s12598_s14 = inlined_call_operand.vmem [shape: f32[256,2], index: 14, kind: input, shape index: {}]   ;;  %s12599_s15 = inlined_call_operand.vmem [shape: f32[1,2], index: 15, kind: input, shape index: {}]   ;;  %s12600_s16 = inlined_call_operand.vmem [shape: f32[64,8], index: 16, kind: input, shape index: {}]   ;;  %s12601_s17 = inlined_call_operand.vmem [shape: f32[8,64], index: 17, kind: input, shape index: {}]   ;;  %s12602_s18 = inlined_call_operand.hbm [shape: f32[2,2,64,64], index: 18, kind: output, shape index: {}]  }
   0x1   :  { %12621 = sst [smem:[#allocation16_spill]] %s12584_s0 }
   0x2   :  { %12622 = sst [smem:[#allocation17_spill]] %s12585_s1 }
   0x3   :  { %12623 = sst [smem:[#allocation18_spill]] %s12586_s2 }
   0x4   :  { %12624 = sst [smem:[#allocation19_spill]] %s12602_s18 }
   0x5   :  { %23 = vsyncpa [#allocation4], 0 }
   0x6   :  { %25 = vsyncpa [#allocation4 + $0x1], 0  ;;  %s9563_s27 = smov 0   ;;  %s9565_s28 = smov 0  }
   0x7   :  { %s9567_s29 = smov 0   ;;  %s9569_s30 = smov 0  }
   0x8 LB: > { %12625 = sst [smem:[#allocation6_spill]] %s9447_s27  ;;  %s9584_s0 = sadd.s32 4294967295, %s9459_s30   ;;  %s9459_s30 = sphi %s9569_s30, %s12682_s30   ;;  %s9455_s29 = sphi %s9567_s29, %s12684_s29   ;;  %s9451_s28 = sphi %s9565_s28, %s12686_s28   ;;  %s9447_s27 = sphi %s9563_s27, %s12685_s27  }
   0x9   : > { %12626 = sst [smem:[#allocation7_spill]] %s9455_s29  ;;  %s7379_s19 = sadd.s32 4294967294, %s9459_s30  }
   0xa   : > { %12627 = sst [smem:[#allocation8_spill]] %s9459_s30  ;;  %s9588_s1 = sadd.s32 1, %s9459_s30  }
   0xb   : > { %12628 = sst [smem:[#allocation9_spill]] %s9588_s1  ;;  %s421_s20 = sadd.s32 1, %s9455_s29 }
   0xc   : > { %s418_s21 = ssub.s32 %s9459_s30, %s9588_s1  ;;  %p431_p0 = scmp.ne.s32.totalorder %s9455_s29, %s9451_s28 }
   0xd   : > { %p419_p1 = scmp.eq.s32.totalorder %s418_s21, 0  ;;  %p432_p2 = scmp.eq.s32.totalorder %s9584_s0, 1 }
   0xe   : > { %p437_p3 = scmp.ne.s32.totalorder %s9451_s28, %s9447_s27  ;;  %p438_p4 = scmp.eq.s32.totalorder %s7379_s19, 1 }
   0xf   : > { %s9599_s22 = scalar_select %p419_p1, %s9455_s29, %s421_s20  }
  0x10   : > { %p9601_p5 = por %p432_p2, %p431_p0  ;;  %p9605_p6 = por %p438_p4, %p437_p3 }
  0x11   : > { %12629 = sst [smem:[#allocation10_spill]] %s9599_s22  ;;  %p7382_p7 = scmp.ge.s32.totalorder %s9459_s30, 1 }
  0x12   : > { %s12631_s23 = scalar_select %p9605_p6, 1, 0 }
  0x13   : > { %p515_p8 = scmp.lt.s32.totalorder %s9459_s30, 3 }
  0x14   : > { %12632 = sst [smem:[#allocation11_spill]] %s12631_s23 }
  0x15   : > { %p516_p9 = pnand %p7382_p7, %p515_p8 }
  0x17   : > { %519 = sbr.rel (%p516_p9) target bundleno = 2578 (0xa12), region = 92 }
  0x1e   : > { %s12633_s26 = sld [smem:[#allocation17_spill]]  ;;  %p569_p10 = scmp.lt.s32.totalorder %s9584_s0, 1  ;;  %v12612_v7 = vmov 0.0   ;;  %vm615_vm0 = vcmask 261120   ;;  %v1392_v51 = vld [vmem:[%s12588_s4 + $0x8] sm:$0xff]  ;;  %v1394_v52 = vld [vmem:[%s12588_s4 + $0x18] sm:$0xff] }
  0x1f   : > { %704 = vmatprep.mubr.f32.mxu0 %v12612_v7  ;;  %835 = vmatprep.mubr.f32.mxu1 %v12612_v7  ;;  %s12634_s24 = sld [smem:[#allocation16_spill]]  ;;  %v8417_v57 = vpack.c.bf16 %v1394_v52, %v1392_v51  ;;  %v1391_v59 = vld [vmem:[%s12588_s4] sm:$0xff]  ;;  %v1393_v60 = vld [vmem:[%s12588_s4 + $0x10] sm:$0xff]  ;;  %v1396_v62 = vld [vmem:[%s12588_s4 + $0x28] sm:$0xff]  ;;  %vm3051_vm1 = vcmask 1043456   ;;  %vm3054_vm3 = vcmask 1047556  }
  0x20   : > { %s570_s27 = scalar_select %p569_p10, %s9584_s0, 1  ;;  %v1398_v63 = vld [vmem:[%s12588_s4 + $0x38] sm:$0xff]  ;;  %vm3052_vm2 = vsmask.f32 7938  ;;  %vm3055_vm4 = vsmask.f32 7954 }
  0x21   : > { %vm3161_vm5 = vsmask.f32 3328  ;;  %vm3162_vm6 = vsmask.f32 7440  ;;  %vm3061_vm7 = vcmask 1040384   ;;  %vm10930_vm9 = vmand %vm3051_vm1, %vm3052_vm2  ;;  %vm3064_vm10 = vcmask 1044484  }
  0x22   : > { %s8259_s29 = sshll.u32 %s570_s27, 6  ;;  %vm3062_vm8 = vsmask.f32 256  ;;  %vm3065_vm11 = vsmask.f32 4352  ;;  %vm10938_vm12 = vmor %vm3161_vm5, %vm3162_vm6  ;;  %vm3871_vm2 = vcmask 1042432  }
  0x23   : > { %vm10944_vm13 = vmand %vm3054_vm3, %vm3055_vm4  ;;  %vm3872_vm3 = vcmask 1046532   ;;  %vm9464_vm5 = vmmov 0   ;;  %vm6788_vm6 = vcmask 1041409   ;;  %s566_s1 = sand.u32 1, %s9451_s28   ;;  %s8268_s23 = sshll.u32 %s9584_s0, 11 }
  0x24   : > { %v584_v0 = vld [vmem:[%s12633_s26 + $0x8] sm:$0xff]  ;;  %v583_v2 = vld [vmem:[%s12633_s26] sm:$0xff]  ;;  %v586_v12 = vld [vmem:[%s12633_s26 + $0x18] sm:$0xff]  ;;  %s7383_s18 = sshll.u32 %s566_s1, 7  ;;  %s12543_s0 = scalar_lea.sflag [#allocation4], %s566_s1 }
  0x25   : > { %v592_v1 = vld [vmem:[%s12633_s26 + $0x48] sm:$0xff]  ;;  %v591_v4 = vld [vmem:[%s12633_s26 + $0x40] sm:$0xff]  ;;  %v594_v13 = vld [vmem:[%s12633_s26 + $0x58] sm:$0xff]  ;;  %s9660_s25 = scalar_lea.vmem %s12634_s24, %s8259_s29  ;;  %s12637_s24 = sld [smem:[#allocation18_spill]] }
  0x26   : > { %v8385_v3 = vpack.c.bf16 %v592_v1, %v584_v0  ;;  %v600_v5 = vld [vmem:[%s12633_s26 + $0x88] sm:$0xff]  ;;  %v8387_v8 = vpack.c.bf16 %v591_v4, %v583_v2  ;;  %v599_v10 = vld [vmem:[%s12633_s26 + $0x80] sm:$0xff]  ;;  %v585_v14 = vld [vmem:[%s12633_s26 + $0x10] sm:$0xff]  ;;  %v8393_v17 = vpack.c.bf16 %v594_v13, %v586_v12  ;;  %v8419_v4 = vpack.c.bf16 %v1393_v60, %v1391_v59  ;;  %s12491_s29 = scalar_lea.vmem [#allocation3], %s7383_s18 }
  0x27   : > { %v608_v6 = vld [vmem:[%s12633_s26 + $0xc8] sm:$0xff]  ;;  %v607_v11 = vld [vmem:[%s12633_s26 + $0xc0] sm:$0xff]  ;;  %v593_v15 = vld [vmem:[%s12633_s26 + $0x50] sm:$0xff]  ;;  %s7317_s20 = sshll.u32 %s12491_s29, 4  ;;  %s12535_s20 = int_to_ptr.vmem [resolvable:$true] %s7317_s20 }
  0x28   : > { %v8389_v9 = vpack.c.bf16 %v608_v6, %v600_v5  ;;  %8386 = vmatprep.subr.bf16.mxu0 %v8385_v3  ;;  %v8391_v16 = vpack.c.bf16 %v607_v11, %v599_v10  ;;  %v602_v18 = vld [vmem:[%s12633_s26 + $0x98] sm:$0xff]  ;;  %v8395_v20 = vpack.c.bf16 %v593_v15, %v585_v14  ;;  %v601_v22 = vld [vmem:[%s12633_s26 + $0x90] sm:$0xff]  ;;  %8457 = vmatprep.subr.bf16.mxu1 %v8393_v17  ;;  %v9669_v24 = vld [vmem:[%s9660_s25] sm:$0xff]  ;;  %s9397_s27 = scalar_lea.vmem %s12535_s20, 2048 }
  0x29   : > { %8388 = vmatpush1.bf16.msra.mxu0 %v8387_v8  ;;  %v610_v19 = vld [vmem:[%s12633_s26 + $0xd8] sm:$0xff]  ;;  %v609_v23 = vld [vmem:[%s12633_s26 + $0xd0] sm:$0xff]  ;;  %v588_v26 = vld [vmem:[%s12633_s26 + $0x28] sm:$0xff]  ;;  %v1368_v36 = vsel %vm615_vm0, %v9669_v24, 0.0  ;;  %v8421_v5 = vpack.c.bf16 %v1398_v63, %v1396_v62  ;;  %v12611_v62 = vlaneseq  ;;  %p9398_p11 = scmp.ne.s32.totalorder %s12535_s20, %s9397_s27 }
  0x2a   : > { %8390 = vmatprep.subr.bf16.mxu0 %v8389_v9  ;;  %v8397_v21 = vpack.c.bf16 %v610_v19, %v602_v18  ;;  %8459 = vmatpush1.bf16.msra.mxu1 %v8395_v20  ;;  %v8399_v25 = vpack.c.bf16 %v609_v23, %v601_v22  ;;  %v596_v27 = vld [vmem:[%s12633_s26 + $0x68] sm:$0xff]  ;;  %v9684_v29 = vld [vmem:[%s9660_s25 + $0x18] sm:$0xff]  ;;  %v9687_v31 = vld [vmem:[%s9660_s25 + $0x10] sm:$0xff] }
  0x2b   : > { %v9681_v28 = vld [vmem:[%s9660_s25 + $0x8] sm:$0xff]  ;;  %v8401_v30 = vpack.c.bf16 %v596_v27, %v588_v26  ;;  %v9694_v32 = vld [vmem:[%s9660_s25 + $0x20] sm:$0xff]  ;;  %v9712_v34 = vld [vmem:[%s9660_s25 + $0x30] sm:$0xff]  ;;  %v1371_v39 = vsel %vm615_vm0, %v9687_v31, 0.0  ;;  %v1373_v43 = vsel %vm615_vm0, %v9684_v29, 0.0  ;;  %p9399_p12 = pnand %p9398_p11, %p9601_p5 }
  0x2c   : > { %8458 = vmatprep.subr.bf16.mxu1 %v8397_v21  ;;  %v9703_v33 = vld [vmem:[%s9660_s25 + $0x28] sm:$0xff]  ;;  %v9721_v35 = vld [vmem:[%s9660_s25 + $0x38] sm:$0xff]  ;;  %v1369_v37 = vsel %vm615_vm0, %v9681_v28, 0.0  ;;  %v587_v41 = vld [vmem:[%s12633_s26 + $0x20] sm:$0xff]  ;;  %v1375_v49 = vsel %vm615_vm0, %v9694_v32, 0.0  ;;  %v1379_v61 = vsel %vm615_vm0, %v9712_v34, 0.0 }
  0x2d   : > { %8392 = vmatpush1.bf16.msra.mxu0 %v8391_v16  ;;  %v1370_v38 = vadd.f32 %v1369_v37, %v1368_v36  ;;  %v595_v42 = vld [vmem:[%s12633_s26 + $0x60] sm:$0xff]  ;;  %v604_v44 = vld [vmem:[%s12633_s26 + $0xa8] sm:$0xff]  ;;  %v1377_v55 = vsel %vm615_vm0, %v9703_v33, 0.0  ;;  %v1397_v2 = vld [vmem:[%s12588_s4 + $0x30] sm:$0xff]  ;;  %v1381_v3 = vsel %vm615_vm0, %v9721_v35, 0.0  ;;  %p9400_p13 = pneg %p9399_p12 }
  0x2e   : > { %8394 = vmatprep.subr.bf16.mxu0 %v8393_v17  ;;  %8460 = vmatpush1.bf16.msra.mxu1 %v8399_v25  ;;  %v612_v45 = vld [vmem:[%s12633_s26 + $0xe8] sm:$0xff]  ;;  %v603_v47 = vld [vmem:[%s12633_s26 + $0xa0] sm:$0xff]  ;;  %v8403_v50 = vpack.c.bf16 %v595_v42, %v587_v41  ;;  %v8707_v18 = vld [vmem:[%s12592_s8 + $0x14] ss:$8 sps:$4 sm:$0xff]  }
  0x2f   : > { %v1372_v40 = vadd.f32 %v1371_v39, %v1370_v38  ;;  %v611_v48 = vld [vmem:[%s12633_s26 + $0xe0] sm:$0xff]  ;;  %v8405_v53 = vpack.c.bf16 %v612_v45, %v604_v44  ;;  %v8705_v19 = vld [vmem:[%s12592_s8 + $0x10] ss:$8 sps:$4 sm:$0xff]   ;;  %v8713_v22 = vld [vmem:[%s12592_s8 + $0x34] ss:$8 sps:$4 sm:$0xff]  }
  0x30   : > { %7386 = vmatmul.mubr.msk.f32.vlgmr.msra.gmra.mrb[0].mxu0 %vm615_vm0, %v9669_v24  ;;  %v8407_v56 = vpack.c.bf16 %v611_v48, %v603_v47  ;;  %v1395_v1 = vld [vmem:[%s12588_s4 + $0x20] sm:$0xff]  ;;  %v8711_v23 = vld [vmem:[%s12592_s8 + $0x30] ss:$8 sps:$4 sm:$0xff]   ;;  %v8719_v26 = vld [vmem:[%s12592_s8 + $0x54] ss:$8 sps:$4 sm:$0xff]  }
  0x31   : > { %710 = vmatprep.mubr.f32.mxu0 %v12612_v7  ;;  %8396 = vmatpush1.bf16.msra.mxu0 %v8395_v20  ;;  %v1374_v46 = vadd.f32 %v1373_v43, %v1372_v40  ;;  %v8423_v8 = vpack.c.bf16 %v1397_v2, %v1395_v1  ;;  %v8704_v16 = vld [vmem:[%s12592_s8 + $0x4] ss:$8 sps:$4 sm:$0xff]   ;;  %v8702_v17 = vld [vmem:[%s12592_s8] ss:$8 sps:$4 sm:$0xff]   ;;  %v8717_v27 = vld [vmem:[%s12592_s8 + $0x50] ss:$8 sps:$4 sm:$0xff]  }
  0x32   : > { %8398 = vmatprep.subr.bf16.mxu0 %v8397_v21  ;;  %7397 = vmatmul.mubr.msk.f32.vlgmr.msra.gmra.mrb[0].mxu1 %vm615_vm0, %v9684_v29  ;;  %v8710_v20 = vld [vmem:[%s12592_s8 + $0x24] ss:$8 sps:$4 sm:$0xff]   ;;  %v8708_v21 = vld [vmem:[%s12592_s8 + $0x20] ss:$8 sps:$4 sm:$0xff]   ;;  %v8737_v38 = vld [vmem:[%s12592_s8 + $0xb4] ss:$8 sps:$4 sm:$0xff]  }
  0x33   : > { %841 = vmatprep.mubr.f32.mxu1 %v12612_v7  ;;  %v1376_v54 = vadd.f32 %v1375_v49, %v1374_v46  ;;  %v8734_v36 = vld [vmem:[%s12592_s8 + $0xa4] ss:$8 sps:$4 sm:$0xff]   ;;  %v8732_v37 = vld [vmem:[%s12592_s8 + $0xa0] ss:$8 sps:$4 sm:$0xff]   ;;  %v8735_v39 = vld [vmem:[%s12592_s8 + $0xb0] ss:$8 sps:$4 sm:$0xff]  }
  0x34   : > { %7387 = vmatmul.mubr.msk.f32.gmra.mrb[2].mxu0 %vm615_vm0, %v9681_v28  ;;  %v8740_v40 = vld [vmem:[%s12592_s8 + $0xc4] ss:$8 sps:$4 sm:$0xff]   ;;  %v8738_v41 = vld [vmem:[%s12592_s8 + $0xc0] ss:$8 sps:$4 sm:$0xff]   ;;  %v8743_v42 = vld [vmem:[%s12592_s8 + $0xd4] ss:$8 sps:$4 sm:$0xff]  }
  0x35   : > { %716 = vmatprep.mubr.f32.mxu0 %v12612_v7  ;;  %8400 = vmatpush1.bf16.msra.mxu0 %v8399_v25  ;;  %v1378_v58 = vadd.f32 %v1377_v55, %v1376_v54  ;;  %v8714_v25 = vld [vmem:[%s12592_s8 + $0x40] ss:$8 sps:$4 sm:$0xff]   ;;  %v8741_v43 = vld [vmem:[%s12592_s8 + $0xd0] ss:$8 sps:$4 sm:$0xff]   ;;  %v8746_v44 = vld [vmem:[%s12592_s8 + $0xe4] ss:$8 sps:$4 sm:$0xff]  }
  0x36   : > { %8402 = vmatprep.subr.bf16.mxu0 %v8401_v30  ;;  %7398 = vmatmul.mubr.msk.f32.gmra.mrb[2].mxu1 %vm615_vm0, %v9694_v32  ;;  %v8725_v30 = vld [vmem:[%s12592_s8 + $0x74] ss:$8 sps:$4 sm:$0xff]   ;;  %v8744_v45 = vld [vmem:[%s12592_s8 + $0xe0] ss:$8 sps:$4 sm:$0xff]   ;;  %v8747_v47 = vld [vmem:[%s12592_s8 + $0xf0] ss:$8 sps:$4 sm:$0xff]  }
  0x37   : > { %847 = vmatprep.mubr.f32.mxu1 %v12612_v7  ;;  %v1380_v0 = vadd.f32 %v1379_v61, %v1378_v58  ;;  %v8749_v46 = vld [vmem:[%s12592_s8 + $0xf4] ss:$8 sps:$4 sm:$0xff]   ;;  %v8752_v48 = vld [vmem:[%s12591_s7 + $0x4] ss:$8 sps:$4 sm:$0xff]   ;;  %vm10953_vm14 = vmand %vm3061_vm7, %vm3062_vm8  ;;  %vm6790_vm7 = vcmask 1042434   ;;  %vm6792_vm8 = vcmask 1043459  }
  0x38   : > { %7388 = vmatmul.mubr.msk.f32.gmra.mrb[4].mxu0 %vm615_vm0, %v9687_v31  ;;  %v590_v49 = vld [vmem:[%s12633_s26 + $0x38] sm:$0xff]  ;;  %v589_v52 = vld [vmem:[%s12633_s26 + $0x30] sm:$0xff]  ;;  %v9384_v61 = vld [vmem:[%s9660_s25] sm:$0xff] }
  0x39   : > { %722 = vmatprep.mubr.f32.mxu0 %v12612_v7  ;;  %v1382_v6 = vadd.f32 %v1381_v3, %v1380_v0  ;;  %v606_v55 = vld [vmem:[%s12633_s26 + $0xb8] sm:$0xff]  ;;  %v605_v58 = vld [vmem:[%s12633_s26 + $0xb0] sm:$0xff]  ;;  %v9385_v63 = vld [vmem:[%s9660_s25 + $0x8] sm:$0xff]  ;;  %v9958_v0 = vshrl.u32 %v12611_v62, 7 }
  0x3a   : > { %7399 = vmatmul.mubr.msk.f32.gmra.mrb[4].mxu1 %vm615_vm0, %v9703_v33  ;;  %v613_v59 = vld [vmem:[%s12633_s26 + $0xf0] sm:$0xff]  ;;  %v9970_v3 = vld [vmem:[%s12637_s24] sm:$0xff]  ;;  %vm3066_vm15 = vmand %vm3064_vm10, %vm3065_vm11  ;;  %vm6798_vm11 = vcmask 1046534   ;;  %s12678_s24 = sld [smem:[#allocation19_spill]] }
  0x3b   : > { %853 = vmatprep.mubr.f32.mxu1 %v12612_v7  ;;  %v1383_v9 = vrot.slane %v1382_v6, 4  ;;  %v8415_v60 = vpack.c.bf16 %v613_v59, %v605_v58  ;;  %12635 = vst [vmem:[#allocation12_spill] sm:$0xff] %v9958_v0  ;;  %v9386_v1 = vld [vmem:[%s9660_s25 + $0x10] sm:$0xff]  ;;  %v9964_v2 = vsub.s32 0, %v9958_v0  ;;  %vm10981_vm1 = vmor %vm3066_vm15, %vm10953_vm14 }
  0x3c   : > { %7389 = vmatmul.mubr.msk.f32.gmra.mrb[6].mxu0 %vm615_vm0, %v9684_v29  ;;  %vm11170_vm4 = vmor %vm3871_vm2, %vm3872_vm3 }
  0x3d   : > { %728 = vmatprep.mubr.f32.mxu0 %v12612_v7  ;;  %v1384_v10 = vadd.f32 %v1383_v9, %v1382_v6  ;;  %12636 = vst [vmem:[#allocation13_spill] sm:$0xff] %v9964_v2  ;;  %v9979_v6 = vrot.slane %v9970_v3, %v9964_v2 }
  0x3e   : > { %7400 = vmatmul.mubr.msk.f32.gmra.mrb[6].mxu1 %vm615_vm0, %v9712_v34 }
  0x3f   : > { %859 = vmatprep.mubr.f32.mxu1 %v12612_v7  ;;  %v1385_v11 = vrot.slane %v1384_v10, 2 }
  0x40   : > { %7390 = vmatmul.mubr.msk.f32.gmra.mrb[8].mxu0 %vm615_vm0, %v9694_v32  ;;  %s12533_s22 = scalar_lea.hbm %s12678_s24, %s8268_s23 }
  0x41   : > { %734 = vmatprep.mubr.f32.mxu0 %v12612_v7  ;;  %v1386_v12 = vadd.f32 %v1385_v11, %v1384_v10  ;;  %v9388_v11 = vld [vmem:[%s9660_s25 + $0x20] sm:$0xff] }
  0x42   : > { %7401 = vmatmul.mubr.msk.f32.gmra.mrb[8].mxu1 %vm615_vm0, %v9721_v35 }
  0x43   : > { %1043 = vmatprep.mubr.f32.mxu1 %v12612_v7  ;;  %v1387_v13 = vrot.slane %v1386_v12, 1 }
  0x44   : > { %7391 = vmatmul.mubr.msk.f32.gmra.mrb[10].mxu0 %vm615_vm0, %v9703_v33 }
  0x45   : > { %740 = vmatprep.mubr.f32.mxu0 %v12612_v7  ;;  %v1388_v14 = vadd.f32 %v1387_v13, %v1386_v12 }
  0x47   : > { %v1390_v15 = vmul.f32 0.015625, %v1388_v14 }
  0x48   : > { %7392 = vmatmul.mubr.msk.f32.gmra.mrb[12].mxu0 %vm615_vm0, %v9712_v34 }
  0x49   : > { %746 = vmatprep.mubr.f32.mxu0 %v12612_v7 }
  0x4c   : > { %7393 = vmatmul.mubr.msk.f32.gmra.mrb[14].mxu0 %vm615_vm0, %v9721_v35 }
  0x4d   : > { %817 = vmatprep.mubr.f32.mxu0 %v12612_v7 }
  0x50   : > { %7394 = vmatmul.mubr.msk.f32.vlgmr.msra.gmra.mrb[16].mxu0 %vm615_vm0, %v9669_v24 }
  0x51   : > { %823 = vmatprep.mubr.f32.mxu0 %v12612_v7  ;;  %8404 = vmatpush1.bf16.msra.mxu0 %v8403_v50  ;;  %v598_v50 = vld [vmem:[%s12633_s26 + $0x78] sm:$0xff] }
  0x52   : > { %8406 = vmatprep.subr.bf16.mxu0 %v8405_v53  ;;  %v8409_v51 = vpack.c.bf16 %v598_v50, %v590_v49  ;;  %v597_v53 = vld [vmem:[%s12633_s26 + $0x70] sm:$0xff] }
  0x53   : > { %v8411_v54 = vpack.c.bf16 %v597_v53, %v589_v52 }
  0x54   : > { %7395 = vmatmul.mubr.msk.f32.gmra.mrb[18].mxu0 %vm615_vm0, %v9681_v28  ;;  %8410 = vmatprep.subr.bf16.mxu1 %v8409_v51 }
  0x55   : > { %829 = vmatprep.mubr.f32.mxu0 %v12612_v7  ;;  %8408 = vmatpush1.bf16.msra.mxu0 %v8407_v56  ;;  %v614_v56 = vld [vmem:[%s12633_s26 + $0xf8] sm:$0xff] }
  0x56   : > { %8418 = vmatprep.subr.bf16.mxu0 %v8417_v57  ;;  %8412 = vmatpush1.bf16.msra.mxu1 %v8411_v54  ;;  %v8413_v57 = vpack.c.bf16 %v614_v56, %v606_v55 }
  0x58   : > { %7396 = vmatmul.mubr.msk.f32.gmra.mrb[20].mxu0 %vm615_vm0, %v9687_v31  ;;  %8414 = vmatprep.subr.bf16.mxu1 %v8413_v57 }
  0x59   : > { %930 = vmatprep.mubr.f32.mxu0 %v12612_v7 }
  0x5a   : > { %8416 = vmatpush1.bf16.msra.mxu1 %v8415_v60 }
  0x5c   : > { %7402 = vmatmul.mubr.msk.f32.vlgmr.msra.gmra.mrb[22].mxu0 %vm615_vm0, %v9669_v24  ;;  %v8716_v24 = vld [vmem:[%s12592_s8 + $0x44] ss:$8 sps:$4 sm:$0xff]  }
  0x5d   : > { %936 = vmatprep.mubr.f32.mxu0 %v12612_v7  ;;  %8420 = vmatpush1.bf16.msra.mxu0 %v8419_v4  ;;  %v9973_v4 = vsub.s32 1, %v9958_v0 }
  0x5e   : > { %8422 = vmatprep.subr.bf16.mxu0 %v8421_v5  ;;  %7410 = vmatmul.mubr.msk.f32.vlgmr.msra.gmra.mrb[10].mxu1 %vm615_vm0, %v9384_v61  ;;  %v9387_v5 = vld [vmem:[%s9660_s25 + $0x18] sm:$0xff] }
  0x5f   : > { %1049 = vmatprep.mubr.f32.mxu1 %v12612_v7  ;;  %12638 = vst [vmem:[#allocation14_spill] sm:$0xff] %v9973_v4  ;;  %v9989_v9 = vrot.slane %v9970_v3, %v9973_v4 }
  0x60   : > { %7403 = vmatmul.mubr.msk.f32.gmra.mrb[24].mxu0 %vm615_vm0, %v9681_v28  ;;  %v8722_v28 = vld [vmem:[%s12592_s8 + $0x64] ss:$8 sps:$4 sm:$0xff]  }
  0x61   : > { %942 = vmatprep.mubr.f32.mxu0 %v12612_v7  ;;  %8424 = vmatpush1.bf16.msra.mxu0 %v8423_v8  ;;  %v9985_v8 = vld [vmem:[%s12587_s3] sm:$0xff] }
  0x62   : > { %1857 = vmatprep.subr.bf16.mxu0 %v8704_v16  ;;  %7411 = vmatmul.mubr.msk.f32.gmra.mrb[12].mxu1 %vm615_vm0, %v9385_v63  ;;  %v9996_v13 = vrot.slane %v9985_v8, %v9964_v2  ;;  %v10002_v16 = vrot.slane %v9985_v8, %v9973_v4 }
  0x63   : > { %1055 = vmatprep.mubr.f32.mxu1 %v12612_v7 }
  0x64   : > { %7404 = vmatmul.mubr.msk.f32.gmra.mrb[26].mxu0 %vm615_vm0, %v9687_v31  ;;  %v8723_v31 = vld [vmem:[%s12592_s8 + $0x70] ss:$8 sps:$4 sm:$0xff]  }
  0x65   : > { %948 = vmatprep.mubr.f32.mxu0 %v12612_v7 }
  0x66   : > { %7412 = vmatmul.mubr.msk.f32.gmra.mrb[14].mxu1 %vm615_vm0, %v9386_v1 }
  0x67   : > { %1061 = vmatprep.mubr.f32.mxu1 %v12612_v7 }
  0x68   : > { %7405 = vmatmul.mubr.msk.f32.gmra.mrb[28].mxu0 %vm615_vm0, %v9684_v29  ;;  %v8720_v29 = vld [vmem:[%s12592_s8 + $0x60] ss:$8 sps:$4 sm:$0xff]  }
  0x69   : > { %954 = vmatprep.mubr.f32.mxu0 %v12612_v7 }
  0x6a   : > { %7413 = vmatmul.mubr.msk.f32.gmra.mrb[16].mxu1 %vm615_vm0, %v9387_v5 }
  0x6b   : > { %1067 = vmatprep.mubr.f32.mxu1 %v12612_v7 }
  0x6c   : > { %7406 = vmatmul.mubr.msk.f32.gmra.mrb[30].mxu0 %vm615_vm0, %v9694_v32  ;;  %v8728_v32 = vld [vmem:[%s12592_s8 + $0x84] ss:$8 sps:$4 sm:$0xff]  }
  0x6d   : > { %960 = vmatprep.mubr.f32.mxu0 %v12612_v7 }
  0x6e   : > { %7414 = vmatmul.mubr.msk.f32.gmra.mrb[18].mxu1 %vm615_vm0, %v9388_v11 }
  0x6f   : > { %1073 = vmatprep.mubr.f32.mxu1 %v12612_v7 }
  0x70   : > { %7407 = vmatmul.mubr.msk.f32.gmra.mrb[32].mxu0 %vm615_vm0, %v9703_v33  ;;  %v8726_v33 = vld [vmem:[%s12592_s8 + $0x80] ss:$8 sps:$4 sm:$0xff]  }
  0x71   : > { %966 = vmatprep.mubr.f32.mxu0 %v12612_v7 }
  0x74   : > { %7408 = vmatmul.mubr.msk.f32.gmra.mrb[34].mxu0 %vm615_vm0, %v9712_v34  ;;  %v8731_v34 = vld [vmem:[%s12592_s8 + $0x94] ss:$8 sps:$4 sm:$0xff]  }
  0x75   : > { %972 = vmatprep.mubr.f32.mxu0 %v12612_v7 }
  0x78   : > { %7409 = vmatmul.mubr.msk.f32.gmra.mrb[36].mxu0 %vm615_vm0, %v9721_v35  ;;  %v8729_v35 = vld [vmem:[%s12592_s8 + $0x90] ss:$8 sps:$4 sm:$0xff]  }
  0x79   : > { %1466 = vmatprep.mubr.f32.mxu0 %v12612_v7 }
  0x7c   : > { %7418 = vmatmul.mubr.msk.f32.vlgmr.msra.gmra.mrb[38].mxu0 %vm615_vm0, %v1390_v15 }
  0x7d   : > { %1858 = vmatpush1.bf16.msra.mxu0 %v8702_v17 }
  0x7e   : > { %1859 = vmatprep.subr.bf16.mxu0 %v8707_v18 }
  0x81   : > { %1860 = vmatpush1.bf16.msra.mxu0 %v8705_v19 }
  0x82   : > { %1861 = vmatprep.subr.bf16.mxu0 %v8710_v20  ;;  %v9389_v20 = vld [vmem:[%s9660_s25 + $0x28] sm:$0xff] }
  0x83   : > { %7415 = vmatmul.mubr.msk.f32.gmra.mrb[20].mxu1 %vm615_vm0, %v9389_v20  ;;  %v1104_v20 = vsub.s32 2, %v9958_v0 }
  0x84   : > { %1079 = vmatprep.mubr.f32.mxu1 %v12612_v7 }
  0x85   : > { %1862 = vmatpush1.bf16.msra.mxu0 %v8708_v21 }
  0x86   : > { %1863 = vmatprep.subr.bf16.mxu0 %v8713_v22 }
  0x89   : > { %1864 = vmatpush1.bf16.msra.mxu0 %v8711_v23 }
  0x8a   : > { %1865 = vmatprep.subr.bf16.mxu0 %v8716_v24 }
  0x8d   : > { %1866 = vmatpush1.bf16.msra.mxu0 %v8714_v25 }
  0x8e   : > { %1867 = vmatprep.subr.bf16.mxu0 %v8719_v26 }
  0x91   : > { %1868 = vmatpush1.bf16.msra.mxu0 %v8717_v27 }
  0x92   : > { %1869 = vmatprep.subr.bf16.mxu0 %v8722_v28 }
  0x95   : > { %1870 = vmatpush1.bf16.msra.mxu0 %v8720_v29  ;;  %v9390_v29 = vld [vmem:[%s9660_s25 + $0x30] sm:$0xff] }
  0x96   : > { %1871 = vmatprep.subr.bf16.mxu0 %v8725_v30  ;;  %7416 = vmatmul.mubr.msk.f32.gmra.mrb[22].mxu1 %vm615_vm0, %v9390_v29 }
  0x97   : > { %1085 = vmatprep.mubr.f32.mxu1 %v12612_v7 }
  0x99   : > { %1872 = vmatpush1.bf16.msra.mxu0 %v8723_v31 }
  0x9a   : > { %1873 = vmatprep.subr.bf16.mxu0 %v8728_v32 }
  0x9d   : > { %1874 = vmatpush1.bf16.msra.mxu0 %v8726_v33 }
  0x9e   : > { %1875 = vmatprep.subr.bf16.mxu0 %v8731_v34 }
  0xa1   : > { %1876 = vmatpush1.bf16.msra.mxu0 %v8729_v35 }
  0xa2   : > { %1877 = vmatprep.subr.bf16.mxu0 %v8734_v36 }
  0xa5   : > { %1878 = vmatpush1.bf16.msra.mxu0 %v8732_v37 }
  0xa6   : > { %1879 = vmatprep.subr.bf16.mxu0 %v8737_v38 }
  0xa9   : > { %1880 = vmatpush1.bf16.msra.mxu0 %v8735_v39 }
  0xaa   : > { %1881 = vmatprep.subr.bf16.mxu0 %v8740_v40 }
  0xad   : > { %1882 = vmatpush1.bf16.msra.mxu0 %v8738_v41  ;;  %v9391_v41 = vld [vmem:[%s9660_s25 + $0x38] sm:$0xff]  ;;  %s9465_s25 = smov [#allocation3]  }
  0xae   : > { %1883 = vmatprep.subr.bf16.mxu0 %v8743_v42  ;;  %7417 = vmatmul.mubr.msk.f32.gmra.mrb[24].mxu1 %vm615_vm0, %v9391_v41  ;;  %vm10974_vm0 = vmor %vm10944_vm13, %vm10930_vm9  ;;  %vm6796_vm9 = vcmask 1045509   ;;  %vm6802_vm13 = vcmask 64512   ;;  %s9401_s19 = sshll.u32 %s9465_s25, 4  ;;  %s9402_s19 = int_to_ptr.vmem [resolvable:$false] %s9401_s19 }
  0xaf   : > { %s9403_s18 = scalar_lea.vmem %s9402_s19, 4096  ;;  %p9404_p0 = scmp.lt.s32.totalorder %s12535_s20, %s9402_s19 }
  0xb0   : > { %p9405_p1 = scmp.lt.s32.totalorder %s9403_s18, %s9397_s27 }
  0xb1   : > { %1884 = vmatpush1.bf16.msra.mxu0 %v8741_v43 }
  0xb2   : > { %1885 = vmatprep.subr.bf16.mxu0 %v8746_v44  ;;  %p9406_p2 = por %p9405_p1, %p9404_p0 }
  0xb4   : > { %p9407_p3 = pnand %p9406_p2, %p9400_p13 }
  0xb5   : > { %1886 = vmatpush1.bf16.msra.mxu0 %v8744_v45 }
  0xb6   : > { %1887 = vmatprep.subr.bf16.mxu0 %v8749_v46 }
  0xb9   : > { %1888 = vmatpush1.bf16.msra.mxu0 %v8747_v47 }
  0xba   : > { %2546 = vmatprep.subr.bf16.mxu0 %v8752_v48 }
 0x103   : > { %v706_v10 = vpop.f32.mrb[0].mxu0 }
 0x104   : > { %v1134_v12 = vmul.f32 %v9979_v6, %v706_v10  ;;  %v708_v14 = vpop.f32.mrb[1].mxu0 }
 0x105   : > { %v1135_v15 = vmul.f32 %v9989_v9, %v708_v14  ;;  %v10004_v17 = vpop.f32.mrb[0].mxu1 }
 0x106   : > { %v10006_v19 = vpop.f32.mrb[1].mxu1  ;;  %v1240_v21 = vadd.f32 %v9996_v13, %v1134_v12 }
 0x107   : > { %v712_v18 = vpop.f32.mrb[2].mxu0  ;;  %v1241_v24 = vadd.f32 %v10002_v16, %v1135_v15 }
 0x108   : > { %v1142_v22 = vmul.f32 %v9979_v6, %v712_v18  ;;  %v714_v23 = vpop.f32.mrb[3].mxu0  ;;  %v1304_v30 = vmax.f32 %v1240_v21, 0.0 }
 0x109   : > { %v1143_v25 = vmul.f32 %v9989_v9, %v714_v23  ;;  %v1305_v34 = vmax.f32 %v1241_v24, 0.0  ;;  %v1108_v24 = vsub.s32 3, %v9958_v0 }
 0x10a   : > { %v1248_v26 = vadd.f32 %v9996_v13, %v1142_v22 }
 0x10b   : > { %v1249_v27 = vadd.f32 %v10002_v16, %v1143_v25  ;;  %v718_v28 = vpop.f32.mrb[4].mxu0 }
 0x10c   : > { %v1312_v31 = vmax.f32 %v1248_v26, 0.0  ;;  %v1150_v32 = vmul.f32 %v9979_v6, %v718_v28  ;;  %v720_v33 = vpop.f32.mrb[5].mxu0 }
 0x10d   : > { %v1313_v35 = vmax.f32 %v1249_v27, 0.0  ;;  %v1151_v36 = vmul.f32 %v9989_v9, %v720_v33 }
 0x10e   : > { %v10022_v37 = vpack.c.bf16 %v1312_v31, %v1304_v30  ;;  %v1256_v42 = vadd.f32 %v9996_v13, %v1150_v32  ;;  %v10058_v32 = vrot.slane %v9970_v3, %v1104_v20 }
 0x10f   : > { %v1257_v38 = vadd.f32 %v10002_v16, %v1151_v36  ;;  %v724_v39 = vpop.f32.mrb[6].mxu0  ;;  %v10025_v40 = vpack.c.bf16 %v1313_v35, %v1305_v34  ;;  %v10062_v34 = vrot.slane %v9970_v3, %v1108_v24 }
 0x110   : > { %v1158_v43 = vmul.f32 %v9979_v6, %v724_v39  ;;  %v726_v44 = vpop.f32.mrb[7].mxu0  ;;  %v1320_v49 = vmax.f32 %v1256_v42, 0.0 }
 0x111   : > { %v1159_v45 = vmul.f32 %v9989_v9, %v726_v44  ;;  %v1321_v53 = vmax.f32 %v1257_v38, 0.0 }
 0x112   : > { %v1264_v46 = vadd.f32 %v9996_v13, %v1158_v43 }
 0x113   : > { %v1265_v47 = vadd.f32 %v10002_v16, %v1159_v45  ;;  %v730_v48 = vpop.f32.mrb[8].mxu0 }
 0x114   : > { %v1328_v50 = vmax.f32 %v1264_v46, 0.0  ;;  %v1166_v51 = vmul.f32 %v9979_v6, %v730_v48  ;;  %v732_v52 = vpop.f32.mrb[9].mxu0  ;;  %v10072_v46 = vrot.slane %v9985_v8, %v1108_v24  ;;  %v1161_v48 = vmul.f32 %v10062_v34, %v10006_v19 }
 0x115   : > { %v1329_v54 = vmax.f32 %v1265_v47, 0.0  ;;  %v1167_v55 = vmul.f32 %v9989_v9, %v732_v52 }
 0x116   : > { %v10036_v56 = vpack.c.bf16 %v1328_v50, %v1320_v49  ;;  %v1272_v60 = vadd.f32 %v9996_v13, %v1166_v51 }
 0x117   : > { %v1273_v57 = vadd.f32 %v10002_v16, %v1167_v55  ;;  %v736_v58 = vpop.f32.mrb[10].mxu0  ;;  %v10039_v59 = vpack.c.bf16 %v1329_v54, %v1321_v53  ;;  %v1112_v53 = vsub.s32 4, %v9958_v0 }
 0x118   : > { %v1174_v61 = vmul.f32 %v9979_v6, %v736_v58  ;;  %v738_v63 = vpop.f32.mrb[11].mxu0  ;;  %v1336_v12 = vmax.f32 %v1272_v60, 0.0 }
 0x119   : > { %v1175_v1 = vmul.f32 %v9989_v9, %v738_v63  ;;  %v1337_v21 = vmax.f32 %v1273_v57, 0.0 }
 0x11a   : > { %v1280_v5 = vadd.f32 %v9996_v13, %v1174_v61  ;;  %v1267_v61 = vadd.f32 %v10072_v46, %v1161_v48 }
 0x11b   : > { %v1281_v10 = vadd.f32 %v10002_v16, %v1175_v1  ;;  %v742_v11 = vpop.f32.mrb[12].mxu0 }
 0x11c   : > { %v1344_v14 = vmax.f32 %v1280_v5, 0.0  ;;  %v1182_v15 = vmul.f32 %v9979_v6, %v742_v11  ;;  %v744_v18 = vpop.f32.mrb[13].mxu0  ;;  %v10094_v11 = vrot.slane %v9970_v3, %v1112_v53  ;;  %v1331_v24 = vmax.f32 %v1267_v61, 0.0 }
 0x11d   : > { %v1345_v22 = vmax.f32 %v1281_v10, 0.0  ;;  %v1183_v23 = vmul.f32 %v9989_v9, %v744_v18 }
 0x11e   : > { %v10050_v25 = vpack.c.bf16 %v1344_v14, %v1336_v12  ;;  %v1288_v29 = vadd.f32 %v9996_v13, %v1182_v15 }
 0x11f   : > { %v1289_v26 = vadd.f32 %v10002_v16, %v1183_v23  ;;  %v748_v27 = vpop.f32.mrb[14].mxu0  ;;  %v10053_v28 = vpack.c.bf16 %v1345_v22, %v1337_v21 }
 0x120   : > { %v1190_v30 = vmul.f32 %v9979_v6, %v748_v27  ;;  %v750_v31 = vpop.f32.mrb[15].mxu0  ;;  %v1352_v39 = vmax.f32 %v1288_v29, 0.0  ;;  %v10068_v6 = vrot.slane %v9985_v8, %v1104_v20 }
 0x121   : > { %v1191_v33 = vmul.f32 %v9989_v9, %v750_v31  ;;  %v1353_v44 = vmax.f32 %v1289_v26, 0.0  ;;  %v10108_v31 = vrot.slane %v9985_v8, %v1112_v53 }
 0x122   : > { %v1296_v35 = vadd.f32 %v9996_v13, %v1190_v30  ;;  %v1160_v13 = vmul.f32 %v10058_v32, %v10004_v17  ;;  %v1116_v17 = vsub.s32 5, %v9958_v0 }
 0x123   : > { %v1297_v36 = vadd.f32 %v10002_v16, %v1191_v33  ;;  %v819_v38 = vpop.f32.mrb[16].mxu0 }
 0x124   : > { %v1360_v41 = vmax.f32 %v1296_v35, 0.0  ;;  %v1136_v42 = vmul.f32 %v10058_v32, %v819_v38  ;;  %v821_v43 = vpop.f32.mrb[17].mxu0  ;;  %v1266_v58 = vadd.f32 %v10068_v6, %v1160_v13  ;;  %v10098_v18 = vrot.slane %v9970_v3, %v1116_v17 }
 0x125   : > { %v1361_v45 = vmax.f32 %v1297_v36, 0.0  ;;  %v1137_v9 = vmul.f32 %v10062_v34, %v821_v43  ;;  %v10112_v38 = vrot.slane %v9985_v8, %v1116_v17 }
 0x126   : > { %v10076_v16 = vpack.c.bf16 %v1360_v41, %v1352_v39  ;;  %v1242_v50 = vadd.f32 %v10068_v6, %v1136_v42  ;;  %v1330_v22 = vmax.f32 %v1266_v58, 0.0 }
 0x127   : > { %v825_v47 = vpop.f32.mrb[18].mxu0  ;;  %v10080_v49 = vpack.c.bf16 %v1361_v45, %v1353_v44  ;;  %v1243_v54 = vadd.f32 %v10072_v46, %v1137_v9 }
 0x128   : > { %v1144_v51 = vmul.f32 %v10058_v32, %v825_v47  ;;  %v827_v52 = vpop.f32.mrb[19].mxu0  ;;  %v1306_v63 = vmax.f32 %v1242_v50, 0.0 }
 0x129   : > { %v1145_v55 = vmul.f32 %v10062_v34, %v827_v52  ;;  %v1307_v12 = vmax.f32 %v1243_v54, 0.0 }
 0x12a   : > { %v1250_v57 = vadd.f32 %v10068_v6, %v1144_v51 }
 0x12b   : > { %v1251_v19 = vadd.f32 %v10072_v46, %v1145_v55  ;;  %v831_v60 = vpop.f32.mrb[20].mxu0 }
 0x12c   : > { %v1314_v1 = vmax.f32 %v1250_v57, 0.0  ;;  %v1152_v5 = vmul.f32 %v10058_v32, %v831_v60  ;;  %v833_v10 = vpop.f32.mrb[21].mxu0 }
 0x12d   : > { %v1315_v14 = vmax.f32 %v1251_v19, 0.0  ;;  %v1153_v15 = vmul.f32 %v10062_v34, %v833_v10 }
 0x12e   : > { %v10100_v20 = vpack.c.bf16 %v1314_v1, %v1306_v63  ;;  %v1258_v21 = vadd.f32 %v10068_v6, %v1152_v5 }
 0x12f   : > { %v1259_v23 = vadd.f32 %v10072_v46, %v1153_v15  ;;  %v932_v26 = vpop.f32.mrb[22].mxu0  ;;  %v10104_v27 = vpack.c.bf16 %v1315_v14, %v1307_v12 }
 0x130   : > { %v1322_v29 = vmax.f32 %v1258_v21, 0.0  ;;  %v1138_v30 = vmul.f32 %v10094_v11, %v932_v26  ;;  %v934_v33 = vpop.f32.mrb[23].mxu0 }
 0x131   : > { %v1323_v35 = vmax.f32 %v1259_v23, 0.0  ;;  %v1139_v36 = vmul.f32 %v10098_v18, %v934_v33 }
 0x132   : > { %v10114_v39 = vpack.c.bf16 %v1330_v22, %v1322_v29  ;;  %v1244_v43 = vadd.f32 %v10108_v31, %v1138_v30 }
 0x133   : > { %v938_v41 = vpop.f32.mrb[24].mxu0  ;;  %v10116_v42 = vpack.c.bf16 %v1331_v24, %v1323_v35  ;;  %v1245_v9 = vadd.f32 %v10112_v38, %v1139_v36 }
 0x134   : > { %v1146_v44 = vmul.f32 %v10094_v11, %v938_v41  ;;  %v940_v45 = vpop.f32.mrb[25].mxu0  ;;  %v1308_v51 = vmax.f32 %v1244_v43, 0.0 }
 0x135   : > { %v1147_v13 = vmul.f32 %v10098_v18, %v940_v45  ;;  %v1309_v55 = vmax.f32 %v1245_v9, 0.0 }
 0x136   : > { %v1252_v47 = vadd.f32 %v10108_v31, %v1146_v44 }
 0x137   : > { %v1253_v48 = vadd.f32 %v10112_v38, %v1147_v13  ;;  %v944_v50 = vpop.f32.mrb[26].mxu0 }
 0x138   : > { %v1316_v52 = vmax.f32 %v1252_v47, 0.0  ;;  %v1154_v53 = vmul.f32 %v10094_v11, %v944_v50  ;;  %v946_v54 = vpop.f32.mrb[27].mxu0 }
 0x139   : > { %v1317_v17 = vmax.f32 %v1253_v48, 0.0  ;;  %v1155_v57 = vmul.f32 %v10098_v18, %v946_v54 }
 0x13a   : > { %v10126_v58 = vpack.c.bf16 %v1316_v52, %v1308_v51  ;;  %v1260_v61 = vadd.f32 %v10108_v31, %v1154_v53 }
 0x13b   : > { %v950_v19 = vpop.f32.mrb[28].mxu0  ;;  %v10128_v60 = vpack.c.bf16 %v1317_v17, %v1309_v55  ;;  %v1261_v5 = vadd.f32 %v10112_v38, %v1155_v57  ;;  %v1473_v57 = vld [vmem:[%s12589_s5] sm:$0x3] }
 0x13c   : > { %v1162_v63 = vmul.f32 %v10094_v11, %v950_v19  ;;  %v952_v1 = vpop.f32.mrb[29].mxu0  ;;  %v1324_v21 = vmax.f32 %v1260_v61, 0.0 }
 0x13d   : > { %v1163_v10 = vmul.f32 %v10098_v18, %v952_v1  ;;  %v1325_v26 = vmax.f32 %v1261_v5, 0.0 }
 0x13e   : > { %v1268_v12 = vadd.f32 %v10108_v31, %v1162_v63  ;;  %v1487_v63 = vld [vmem:[%s12590_s6] sm:$0x3] }
 0x13f   : > { %v1269_v14 = vadd.f32 %v10112_v38, %v1163_v10  ;;  %v956_v15 = vpop.f32.mrb[30].mxu0 }
 0x140   : > { %v1332_v22 = vmax.f32 %v1268_v12, 0.0  ;;  %v1170_v23 = vmul.f32 %v10094_v11, %v956_v15  ;;  %v958_v24 = vpop.f32.mrb[31].mxu0 }
 0x141   : > { %v1333_v29 = vmax.f32 %v1269_v14, 0.0  ;;  %v1171_v30 = vmul.f32 %v10098_v18, %v958_v24  ;;  %v1478_v14 = vrot.slane %v1473_v57, %v9964_v2  ;;  %v1492_v24 = vrot.slane %v1487_v63, %v9964_v2 }
 0x142   : > { %v10138_v33 = vpack.c.bf16 %v1332_v22, %v1324_v21  ;;  %v1276_v41 = vadd.f32 %v10108_v31, %v1170_v23  ;;  %v1482_v22 = vrot.slane %v1473_v57, %v9973_v4 }
 0x143   : > { %v962_v35 = vpop.f32.mrb[32].mxu0  ;;  %v10140_v36 = vpack.c.bf16 %v1333_v29, %v1325_v26  ;;  %v1277_v45 = vadd.f32 %v10112_v38, %v1171_v30  ;;  %v1496_v30 = vrot.slane %v1487_v63, %v9973_v4 }
 0x144   : > { %v1178_v43 = vmul.f32 %v10094_v11, %v962_v35  ;;  %v964_v44 = vpop.f32.mrb[33].mxu0  ;;  %v1340_v50 = vmax.f32 %v1276_v41, 0.0 }
 0x145   : > { %v1179_v9 = vmul.f32 %v10098_v18, %v964_v44  ;;  %v1341_v54 = vmax.f32 %v1277_v45, 0.0 }
 0x146   : > { %v1284_v13 = vadd.f32 %v10108_v31, %v1178_v43 }
 0x147   : > { %v1285_v47 = vadd.f32 %v10112_v38, %v1179_v9  ;;  %v968_v48 = vpop.f32.mrb[34].mxu0 }
 0x148   : > { %v1348_v51 = vmax.f32 %v1284_v13, 0.0  ;;  %v1186_v52 = vmul.f32 %v10094_v11, %v968_v48  ;;  %v970_v53 = vpop.f32.mrb[35].mxu0 }
 0x149   : > { %v1349_v55 = vmax.f32 %v1285_v47, 0.0  ;;  %v1187_v17 = vmul.f32 %v10098_v18, %v970_v53  ;;  %v8755_v53 = vld [vmem:[%s12591_s7 + $0x14] ss:$8 sps:$4 sm:$0xff]  }
 0x14a   : > { %v10153_v19 = vpack.c.bf16 %v1348_v51, %v1340_v50  ;;  %v1292_v5 = vadd.f32 %v10108_v31, %v1186_v52 }
 0x14b   : > { %v974_v61 = vpop.f32.mrb[36].mxu0  ;;  %v10158_v1 = vpack.c.bf16 %v1349_v55, %v1341_v54  ;;  %v1293_v15 = vadd.f32 %v10112_v38, %v1187_v17  ;;  %v8753_v54 = vld [vmem:[%s12591_s7 + $0x10] ss:$8 sps:$4 sm:$0xff]   ;;  %v843_v55 = vpop.f32.mrb[2].mxu1  ;;  %v8758_v17 = vld [vmem:[%s12591_s7 + $0x24] ss:$8 sps:$4 sm:$0xff]  }
 0x14c   : > { %v1194_v10 = vmul.f32 %v10094_v11, %v974_v61  ;;  %v976_v12 = vpop.f32.mrb[37].mxu0  ;;  %v1356_v35 = vmax.f32 %v1292_v5, 0.0  ;;  %v1168_v57 = vmul.f32 %v10058_v32, %v843_v55  ;;  %v845_v61 = vpop.f32.mrb[3].mxu1 }
 0x14d   : > { %v1195_v21 = vmul.f32 %v10098_v18, %v976_v12  ;;  %v1357_v44 = vmax.f32 %v1293_v15, 0.0  ;;  %v1169_v63 = vmul.f32 %v10062_v34, %v845_v61  ;;  %v849_v5 = vpop.f32.mrb[4].mxu1 }
 0x14e   : > { %v1300_v23 = vadd.f32 %v10108_v31, %v1194_v10  ;;  %v1176_v10 = vmul.f32 %v10058_v32, %v849_v5  ;;  %v1274_v12 = vadd.f32 %v10068_v6, %v1168_v57  ;;  %v851_v15 = vpop.f32.mrb[5].mxu1  ;;  %v8765_v57 = vld [vmem:[%s12591_s7 + $0x50] ss:$8 sps:$4 sm:$0xff]  }
 0x14f   : > { %v1301_v26 = vadd.f32 %v10112_v38, %v1195_v21  ;;  %v1468_v29 = vpop.f32.mrb[38].mxu0  ;;  %v8750_v38 = vld [vmem:[%s12591_s7] ss:$8 sps:$4 sm:$0xff]   ;;  %v8761_v21 = vld [vmem:[%s12591_s7 + $0x34] ss:$8 sps:$4 sm:$0xff]  }
 0x150   : > { %v1364_v11 = vmax.f32 %v1300_v23, 0.0  ;;  %v1485_v41 = vmul.f32 %v1478_v14, %v1468_v29  ;;  %v1470_v43 = vpop.f32.mrb[39].mxu0  ;;  %v1275_v14 = vadd.f32 %v10072_v46, %v1169_v63  ;;  %v1177_v23 = vmul.f32 %v10062_v34, %v851_v15  ;;  %v8776_v15 = vld [vmem:[%s12591_s7 + $0x84] ss:$8 sps:$4 sm:$0xff]  }
 0x151   : > { %v1365_v45 = vmax.f32 %v1301_v26, 0.0  ;;  %v1486_v9 = vmul.f32 %v1482_v22, %v1470_v43  ;;  %v1282_v22 = vadd.f32 %v10068_v6, %v1176_v10  ;;  %v8759_v26 = vld [vmem:[%s12591_s7 + $0x30] ss:$8 sps:$4 sm:$0xff]   ;;  %v1338_v29 = vmax.f32 %v1274_v12, 0.0  ;;  %v8770_v10 = vld [vmem:[%s12591_s7 + $0x64] ss:$8 sps:$4 sm:$0xff]  }
 0x152   : > { %v1499_v13 = vadd.f32 %v1492_v24, %v1485_v41  ;;  %v10170_v18 = vpack.c.bf16 %v1364_v11, %v1356_v35  ;;  %v1283_v24 = vadd.f32 %v10072_v46, %v1177_v23  ;;  %v855_v11 = vpop.f32.mrb[6].mxu1  ;;  %v8764_v41 = vld [vmem:[%s12591_s7 + $0x44] ss:$8 sps:$4 sm:$0xff]   ;;  %v8773_v12 = vld [vmem:[%s12591_s7 + $0x74] ss:$8 sps:$4 sm:$0xff]  }
 0x153   : > { %v1500_v47 = vadd.f32 %v1496_v30, %v1486_v9  ;;  %v10172_v48 = vpack.c.bf16 %v1365_v45, %v1357_v44  ;;  %v1339_v30 = vmax.f32 %v1275_v14, 0.0  ;;  %v1346_v35 = vmax.f32 %v1282_v22, 0.0  ;;  %v857_v45 = vpop.f32.mrb[7].mxu1  ;;  %v8771_v14 = vld [vmem:[%s12591_s7 + $0x70] ss:$8 sps:$4 sm:$0xff]  }
 0x154   : > { %v1501_v31 = vmax.f32 %v1499_v13, 0.0  ;;  %v1347_v43 = vmax.f32 %v1283_v24, 0.0  ;;  %v1184_v44 = vmul.f32 %v10058_v32, %v855_v11  ;;  %v1185_v9 = vmul.f32 %v10062_v34, %v857_v45  ;;  %v861_v13 = vpop.f32.mrb[8].mxu1  ;;  %v8779_v22 = vld [vmem:[%s12591_s7 + $0x94] ss:$8 sps:$4 sm:$0xff]  }
 0x155   : > { %v1502_v50 = vmax.f32 %v1500_v47, 0.0  ;;  %v1192_v47 = vmul.f32 %v10058_v32, %v861_v13  ;;  %v8777_v23 = vld [vmem:[%s12591_s7 + $0x90] ss:$8 sps:$4 sm:$0xff]   ;;  %v8782_v24 = vld [vmem:[%s12591_s7 + $0xa4] ss:$8 sps:$4 sm:$0xff]  }
 0x156   : > { %v1663_v52 = vpack.c.bf16 %v1501_v31, %v1501_v31  ;;  %v8762_v31 = vld [vmem:[%s12591_s7 + $0x40] ss:$8 sps:$4 sm:$0xff]   ;;  %v8795_v13 = vld [vmem:[%s12591_s7 + $0xf0] ss:$8 sps:$4 sm:$0xff]  }
 0x157   : > { %v1664_v51 = vpack.c.bf16 %v1502_v50, %v1502_v50  ;;  %v1290_v50 = vadd.f32 %v10068_v6, %v1184_v44  ;;  %v1298_v32 = vadd.f32 %v10068_v6, %v1192_v47  ;;  %v8786_v11 = vld [vmem:[%s12591_s7 + $0xc0] ss:$8 sps:$4 sm:$0xff]   ;;  %v8794_v44 = vld [vmem:[%s12591_s7 + $0xe4] ss:$8 sps:$4 sm:$0xff]  }
 0x158   : > { %v8792_v45 = vld [vmem:[%s12591_s7 + $0xe0] ss:$8 sps:$4 sm:$0xff]   ;;  %v8800_v47 = vld [vmem:[%s12591_s7 + $0x104] ss:$8 sps:$4 sm:$0xff]  }
 0x159   : > { %1889 = vmatprep.mubr.bf16.mxu0 %v1664_v51  ;;  %v1291_v51 = vadd.f32 %v10072_v46, %v1185_v9  ;;  %v1354_v61 = vmax.f32 %v1290_v50, 0.0  ;;  %v1362_v5 = vmax.f32 %v1298_v32, 0.0  ;;  %v8797_v9 = vld [vmem:[%s12591_s7 + $0xf4] ss:$8 sps:$4 sm:$0xff]   ;;  %v8812_v32 = vld [vmem:[%s12591_s7 + $0x144] ss:$8 sps:$4 sm:$0xff]  }
 0x15a   : > { %1890 = vmatmul.mubr.bf16.vlgmr.msra.gmra.mrb[40].mxu0 %v1663_v52  ;;  %v10215_v52 = vpack.c.bf16 %v1347_v43, %v1339_v30  ;;  %v8783_v30 = vld [vmem:[%s12591_s7 + $0xb0] ss:$8 sps:$4 sm:$0xff]   ;;  %v8803_v50 = vld [vmem:[%s12591_s7 + $0x114] ss:$8 sps:$4 sm:$0xff]  }
 0x15b   : > { %2547 = vmatpush1.bf16.msra.mxu0 %v8750_v38  ;;  %2578 = vmatprep.mubr.bf16.mxu0 %v10025_v40  ;;  %v8756_v40 = vld [vmem:[%s12591_s7 + $0x20] ss:$8 sps:$4 sm:$0xff]   ;;  %v863_v38 = vpop.f32.mrb[9].mxu1  ;;  %v1355_v63 = vmax.f32 %v1291_v51, 0.0  ;;  %v8789_v43 = vld [vmem:[%s12591_s7 + $0xd0] ss:$8 sps:$4 sm:$0xff]  }
 0x15c   : > { %2548 = vmatprep.subr.bf16.mxu0 %v8755_v53  ;;  %v10217_v53 = vpack.c.bf16 %v1346_v35, %v1338_v29  ;;  %v1193_v55 = vmul.f32 %v10062_v34, %v863_v38  ;;  %v8768_v34 = vld [vmem:[%s12591_s7 + $0x60] ss:$8 sps:$4 sm:$0xff]   ;;  %v8785_v29 = vld [vmem:[%s12591_s7 + $0xb4] ss:$8 sps:$4 sm:$0xff]   ;;  %v8788_v35 = vld [vmem:[%s12591_s7 + $0xc4] ss:$8 sps:$4 sm:$0xff]  }
 0x15d   : > { %v8801_v51 = vld [vmem:[%s12591_s7 + $0x110] ss:$8 sps:$4 sm:$0xff]   ;;  %v8806_v38 = vld [vmem:[%s12591_s7 + $0x124] ss:$8 sps:$4 sm:$0xff]  }
 0x15f   : > { %2549 = vmatpush1.bf16.msra.mxu0 %v8753_v54  ;;  %v8767_v54 = vld [vmem:[%s12591_s7 + $0x54] ss:$8 sps:$4 sm:$0xff]  }
 0x160   : > { %2550 = vmatprep.subr.bf16.mxu0 %v8758_v17  ;;  %v1299_v17 = vadd.f32 %v10072_v46, %v1193_v55  ;;  %v10236_v46 = vpack.c.bf16 %v1362_v5, %v1354_v61  ;;  %v8810_v55 = vld [vmem:[%s12591_s7 + $0x140] ss:$8 sps:$4 sm:$0xff]   ;;  %v8824_v61 = vld [vmem:[%s12591_s7 + $0x184] ss:$8 sps:$4 sm:$0xff]  }
 0x161   : > { %v8830_v5 = vld [vmem:[%s12591_s7 + $0x1a4] ss:$8 sps:$4 sm:$0xff]  }
 0x163   : > { %2551 = vmatpush1.bf16.msra.mxu0 %v8756_v40  ;;  %v1363_v40 = vmax.f32 %v1299_v17, 0.0  ;;  %v8818_v17 = vld [vmem:[%s12591_s7 + $0x164] ss:$8 sps:$4 sm:$0xff]  }
 0x164   : > { %2552 = vmatprep.subr.bf16.mxu0 %v8761_v21  ;;  %v8774_v21 = vld [vmem:[%s12591_s7 + $0x80] ss:$8 sps:$4 sm:$0xff]  }
 0x165   : > { %v10234_v6 = vpack.c.bf16 %v1363_v40, %v1355_v63  ;;  %v8822_v63 = vld [vmem:[%s12591_s7 + $0x180] ss:$8 sps:$4 sm:$0xff]   ;;  %v8833_v40 = vld [vmem:[%s12591_s7 + $0x1b4] ss:$8 sps:$4 sm:$0xff]  }
 0x167   : > { %2553 = vmatpush1.bf16.msra.mxu0 %v8759_v26  ;;  %v8780_v26 = vld [vmem:[%s12591_s7 + $0xa0] ss:$8 sps:$4 sm:$0xff]  }
 0x168   : > { %2554 = vmatprep.subr.bf16.mxu0 %v8764_v41  ;;  %v8791_v41 = vld [vmem:[%s12591_s7 + $0xd4] ss:$8 sps:$4 sm:$0xff]  }
 0x16b   : > { %2555 = vmatpush1.bf16.msra.mxu0 %v8762_v31  ;;  %v8798_v31 = vld [vmem:[%s12591_s7 + $0x100] ss:$8 sps:$4 sm:$0xff]  }
 0x16c   : > { %2556 = vmatprep.subr.bf16.mxu0 %v8767_v54  ;;  %v8804_v54 = vld [vmem:[%s12591_s7 + $0x120] ss:$8 sps:$4 sm:$0xff]  }
 0x16f   : > { %2557 = vmatpush1.bf16.msra.mxu0 %v8765_v57  ;;  %v8816_v57 = vld [vmem:[%s12591_s7 + $0x160] ss:$8 sps:$4 sm:$0xff]  }
 0x170   : > { %2558 = vmatprep.subr.bf16.mxu0 %v8770_v10  ;;  %v8828_v10 = vld [vmem:[%s12591_s7 + $0x1a0] ss:$8 sps:$4 sm:$0xff]  }
 0x173   : > { %2559 = vmatpush1.bf16.msra.mxu0 %v8768_v34  ;;  %v8831_v34 = vld [vmem:[%s12591_s7 + $0x1b0] ss:$8 sps:$4 sm:$0xff]  }
 0x174   : > { %2560 = vmatprep.subr.bf16.mxu0 %v8773_v12  ;;  %v8836_v12 = vld [vmem:[%s12591_s7 + $0x1c4] ss:$8 sps:$4 sm:$0xff]  }
 0x177   : > { %2561 = vmatpush1.bf16.msra.mxu0 %v8771_v14  ;;  %v8834_v14 = vld [vmem:[%s12591_s7 + $0x1c0] ss:$8 sps:$4 sm:$0xff]  }
 0x178   : > { %2562 = vmatprep.subr.bf16.mxu0 %v8776_v15  ;;  %v1045_v15 = vpop.f32.mrb[10].mxu1 }
 0x17b   : > { %2563 = vmatpush1.bf16.msra.mxu0 %v8774_v21  ;;  %v1120_v21 = vsub.s32 6, %v9958_v0 }
 0x17c   : > { %2564 = vmatprep.subr.bf16.mxu0 %v8779_v22  ;;  %v1124_v22 = vsub.s32 7, %v9958_v0 }
 0x17f   : > { %2565 = vmatpush1.bf16.msra.mxu0 %v8777_v23  ;;  %v8839_v23 = vld [vmem:[%s12591_s7 + $0x1d4] ss:$8 sps:$4 sm:$0xff]  }
 0x180   : > { %2566 = vmatprep.subr.bf16.mxu0 %v8782_v24  ;;  %v1047_v24 = vpop.f32.mrb[11].mxu1 }
 0x183   : > { %2567 = vmatpush1.bf16.msra.mxu0 %v8780_v26  ;;  %v10384_v26 = vrot.slane %v9970_v3, %v1120_v21 }
 0x184   : > { %2568 = vmatprep.subr.bf16.mxu0 %v8785_v29  ;;  %v10387_v29 = vrot.slane %v9985_v8, %v1120_v21 }
 0x187   : > { %2569 = vmatpush1.bf16.msra.mxu0 %v8783_v30  ;;  %v10390_v30 = vrot.slane %v9970_v3, %v1124_v22  ;;  %v8842_v3 = vld [vmem:[%s12591_s7 + $0x1e4] ss:$8 sps:$4 sm:$0xff]  }
 0x188   : > { %2570 = vmatprep.subr.bf16.mxu0 %v8788_v35  ;;  %v10393_v35 = vrot.slane %v9985_v8, %v1124_v22 }
 0x18b   : > { %2571 = vmatpush1.bf16.msra.mxu0 %v8786_v11  ;;  %v1051_v11 = vpop.f32.mrb[12].mxu1 }
 0x18c   : > { %2572 = vmatprep.subr.bf16.mxu0 %v8791_v41  ;;  %v8837_v41 = vld [vmem:[%s12591_s7 + $0x1d0] ss:$8 sps:$4 sm:$0xff]  }
 0x18f   : > { %2573 = vmatpush1.bf16.msra.mxu0 %v8789_v43  ;;  %v1140_v43 = vmul.f32 %v10384_v26, %v1045_v15 }
 0x190   : > { %2574 = vmatprep.subr.bf16.mxu0 %v8794_v44  ;;  %v1141_v44 = vmul.f32 %v10390_v30, %v1047_v24 }
 0x193   : > { %2575 = vmatpush1.bf16.msra.mxu0 %v8792_v45  ;;  %v1148_v45 = vmul.f32 %v10384_v26, %v1051_v11  ;;  %v8849_v11 = vld [vmem:[%s12591_s7 + $0x210] ss:$8 sps:$4 sm:$0xff]  }
 0x194   : > { %2576 = vmatprep.subr.bf16.mxu0 %v8797_v9  ;;  %v1053_v9 = vpop.f32.mrb[13].mxu1 }
 0x195   : > { %v1149_v8 = vmul.f32 %v10390_v30, %v1053_v9 }
 0x197   : > { %2577 = vmatpush1.bf16.msra.mxu0 %v8795_v13  ;;  %v1246_v13 = vadd.f32 %v10387_v29, %v1140_v43 }
 0x198   : > { %2619 = vmatprep.subr.bf16.mxu0 %v8800_v47  ;;  %v1247_v47 = vadd.f32 %v10393_v35, %v1141_v44 }
 0x19a   : > { %2579 = vmatmul.mubr.bf16.vlgmr.msra.gmra.mrb[44].mxu0 %v10022_v37  ;;  %v8809_v37 = vld [vmem:[%s12591_s7 + $0x134] ss:$8 sps:$4 sm:$0xff]  }
 0x19b   : > { %2588 = vmatprep.mubr.bf16.mxu0 %v10039_v59  ;;  %2620 = vmatpush1.bf16.msra.mxu0 %v8798_v31  ;;  %v8807_v59 = vld [vmem:[%s12591_s7 + $0x130] ss:$8 sps:$4 sm:$0xff]   ;;  %v1254_v31 = vadd.f32 %v10387_v29, %v1148_v45 }
 0x19c   : > { %2621 = vmatprep.subr.bf16.mxu0 %v8803_v50  ;;  %v1255_v50 = vadd.f32 %v10393_v35, %v1149_v8 }
 0x19f   : > { %2622 = vmatpush1.bf16.msra.mxu0 %v8801_v51  ;;  %v8840_v51 = vld [vmem:[%s12591_s7 + $0x1e0] ss:$8 sps:$4 sm:$0xff]  }
 0x1a0   : > { %2623 = vmatprep.subr.bf16.mxu0 %v8806_v38  ;;  %v1310_v38 = vmax.f32 %v1246_v13, 0.0 }
 0x1a2   : > { %2589 = vmatmul.mubr.bf16.gmra.mrb[48].mxu0 %v10036_v56  ;;  %v8815_v56 = vld [vmem:[%s12591_s7 + $0x154] ss:$8 sps:$4 sm:$0xff]  }
 0x1a3   : > { %2598 = vmatprep.mubr.bf16.mxu0 %v10053_v28  ;;  %2624 = vmatpush1.bf16.msra.mxu0 %v8804_v54  ;;  %v8813_v28 = vld [vmem:[%s12591_s7 + $0x150] ss:$8 sps:$4 sm:$0xff]   ;;  %v1311_v54 = vmax.f32 %v1247_v47, 0.0 }
 0x1a4   : > { %2625 = vmatprep.subr.bf16.mxu0 %v8809_v37  ;;  %v1318_v37 = vmax.f32 %v1254_v31, 0.0 }
 0x1a7   : > { %2626 = vmatpush1.bf16.msra.mxu0 %v8807_v59  ;;  %v8845_v59 = vld [vmem:[%s12591_s7 + $0x1f4] ss:$8 sps:$4 sm:$0xff]  }
 0x1a8   : > { %2627 = vmatprep.subr.bf16.mxu0 %v8812_v32  ;;  %v1319_v32 = vmax.f32 %v1255_v50, 0.0 }
 0x1aa   : > { %2599 = vmatmul.mubr.bf16.gmra.mrb[52].mxu0 %v10050_v25  ;;  %v8821_v25 = vld [vmem:[%s12591_s7 + $0x174] ss:$8 sps:$4 sm:$0xff]  }
 0x1ab   : > { %2608 = vmatprep.mubr.bf16.mxu0 %v10080_v49  ;;  %2628 = vmatpush1.bf16.msra.mxu0 %v8810_v55  ;;  %v8819_v49 = vld [vmem:[%s12591_s7 + $0x170] ss:$8 sps:$4 sm:$0xff]   ;;  %v10415_v55 = vpack.c.bf16 %v1318_v37, %v1310_v38  ;;  %v8857_v37 = vld [vmem:[%s12591_s7 + $0x234] ss:$8 sps:$4 sm:$0xff]  }
 0x1ac   : > { %2629 = vmatprep.subr.bf16.mxu0 %v8815_v56  ;;  %v10417_v56 = vpack.c.bf16 %v1319_v32, %v1311_v54 }
 0x1af   : > { %2630 = vmatpush1.bf16.msra.mxu0 %v8813_v28  ;;  %v8843_v28 = vld [vmem:[%s12591_s7 + $0x1f0] ss:$8 sps:$4 sm:$0xff]  }
 0x1b0   : > { %2631 = vmatprep.subr.bf16.mxu0 %v8818_v17  ;;  %v1057_v17 = vpop.f32.mrb[14].mxu1 }
 0x1b2   : > { %2609 = vmatmul.mubr.bf16.gmra.mrb[56].mxu0 %v10076_v16  ;;  %v8827_v16 = vld [vmem:[%s12591_s7 + $0x194] ss:$8 sps:$4 sm:$0xff]  }
 0x1b3   : > { %2632 = vmatpush1.bf16.msra.mxu0 %v8816_v57  ;;  %2651 = vmatprep.mubr.bf16.mxu0 %v10104_v27  ;;  %v8825_v27 = vld [vmem:[%s12591_s7 + $0x190] ss:$8 sps:$4 sm:$0xff]   ;;  %v8848_v57 = vld [vmem:[%s12591_s7 + $0x204] ss:$8 sps:$4 sm:$0xff]  }
 0x1b4   : > { %2633 = vmatprep.subr.bf16.mxu0 %v8821_v25  ;;  %v1156_v25 = vmul.f32 %v10384_v26, %v1057_v17 }
 0x1b7   : > { %2634 = vmatpush1.bf16.msra.mxu0 %v8819_v49  ;;  %v1059_v49 = vpop.f32.mrb[15].mxu1 }
 0x1b8   : > { %2635 = vmatprep.subr.bf16.mxu0 %v8824_v61  ;;  %v1157_v61 = vmul.f32 %v10390_v30, %v1059_v49 }
 0x1bb   : > { %2636 = vmatpush1.bf16.msra.mxu0 %v8822_v63  ;;  %v1063_v63 = vpop.f32.mrb[16].mxu1 }
 0x1bc   : > { %2637 = vmatprep.subr.bf16.mxu0 %v8827_v16  ;;  %v1262_v16 = vadd.f32 %v10387_v29, %v1156_v25  ;;  %v8855_v25 = vld [vmem:[%s12591_s7 + $0x230] ss:$8 sps:$4 sm:$0xff]  }
 0x1bf   : > { %2638 = vmatpush1.bf16.msra.mxu0 %v8825_v27  ;;  %v1164_v27 = vmul.f32 %v10384_v26, %v1063_v63 }
 0x1c0   : > { %2639 = vmatprep.subr.bf16.mxu0 %v8830_v5  ;;  %v8846_v5 = vld [vmem:[%s12591_s7 + $0x200] ss:$8 sps:$4 sm:$0xff]  }
 0x1c3   : > { %2640 = vmatpush1.bf16.msra.mxu0 %v8828_v10  ;;  %v1263_v10 = vadd.f32 %v10393_v35, %v1157_v61 }
 0x1c4   : > { %2641 = vmatprep.subr.bf16.mxu0 %v8833_v40  ;;  %v1065_v40 = vpop.f32.mrb[17].mxu1 }
 0x1c5   : > { %v1165_v15 = vmul.f32 %v10390_v30, %v1065_v40  ;;  %v1327_v21 = vmax.f32 %v1263_v10, 0.0  ;;  %v1069_v24 = vpop.f32.mrb[18].mxu1 }
 0x1c6   : > { %v1071_v43 = vpop.f32.mrb[19].mxu1 }
 0x1c7   : > { %2642 = vmatpush1.bf16.msra.mxu0 %v8831_v34  ;;  %v8851_v34 = vld [vmem:[%s12591_s7 + $0x214] ss:$8 sps:$4 sm:$0xff]   ;;  %v1173_v45 = vmul.f32 %v10390_v30, %v1071_v43  ;;  %v1075_v9 = vpop.f32.mrb[20].mxu1 }
 0x1c8   : > { %2643 = vmatprep.subr.bf16.mxu0 %v8836_v12  ;;  %v1326_v12 = vmax.f32 %v1262_v16, 0.0  ;;  %v1180_v8 = vmul.f32 %v10384_v26, %v1075_v9  ;;  %v1077_v13 = vpop.f32.mrb[21].mxu1  ;;  %v8860_v16 = vld [vmem:[%s12591_s7 + $0x244] ss:$8 sps:$4 sm:$0xff]   ;;  %v8945_v9 = vld [vmem:[%s12595_s11 + $0x10] ss:$8 sps:$4 sm:$0xff]  }
 0x1c9   : > { %v1279_v47 = vadd.f32 %v10393_v35, %v1173_v45  ;;  %v1181_v31 = vmul.f32 %v10390_v30, %v1077_v13  ;;  %v8947_v45 = vld [vmem:[%s12595_s11 + $0x14] ss:$8 sps:$4 sm:$0xff]   ;;  %v8948_v13 = vld [vmem:[%s12595_s11 + $0x20] ss:$8 sps:$4 sm:$0xff]  }
 0x1ca   : > { %v1286_v54 = vadd.f32 %v10387_v29, %v1180_v8  ;;  %v8875_v8 = vld [vmem:[%s12591_s7 + $0x294] ss:$8 sps:$4 sm:$0xff]  }
 0x1cb   : > { %2644 = vmatpush1.bf16.msra.mxu0 %v8834_v14  ;;  %v1270_v14 = vadd.f32 %v10387_v29, %v1164_v27  ;;  %v1287_v32 = vadd.f32 %v10393_v35, %v1181_v31  ;;  %v8873_v31 = vld [vmem:[%s12591_s7 + $0x290] ss:$8 sps:$4 sm:$0xff]  }
 0x1cc   : > { %2645 = vmatprep.subr.bf16.mxu0 %v8839_v23  ;;  %v1271_v23 = vadd.f32 %v10393_v35, %v1165_v15 }
 0x1cd   : > { %v1334_v22 = vmax.f32 %v1270_v14, 0.0  ;;  %v1351_v17 = vmax.f32 %v1287_v32, 0.0  ;;  %v8858_v14 = vld [vmem:[%s12591_s7 + $0x240] ss:$8 sps:$4 sm:$0xff]  }
 0x1ce   : > { %v1335_v44 = vmax.f32 %v1271_v23, 0.0  ;;  %v8960_v32 = vld [vmem:[%s12595_s11 + $0x40] ss:$8 sps:$4 sm:$0xff]  }
 0x1cf   : > { %2646 = vmatpush1.bf16.msra.mxu0 %v8837_v41  ;;  %v1172_v41 = vmul.f32 %v10384_v26, %v1069_v24 }
 0x1d0   : > { %2647 = vmatprep.subr.bf16.mxu0 %v8842_v3  ;;  %v10449_v3 = vpack.c.bf16 %v1334_v22, %v1326_v12  ;;  %v10455_v50 = vpack.c.bf16 %v1335_v44, %v1327_v21  ;;  %v8863_v22 = vld [vmem:[%s12591_s7 + $0x254] ss:$8 sps:$4 sm:$0xff]   ;;  %v8867_v44 = vld [vmem:[%s12591_s7 + $0x270] ss:$8 sps:$4 sm:$0xff]  }
 0x1d3   : > { %2648 = vmatpush1.bf16.msra.mxu0 %v8840_v51  ;;  %v8852_v51 = vld [vmem:[%s12591_s7 + $0x220] ss:$8 sps:$4 sm:$0xff]  }
 0x1d4   : > { %2649 = vmatprep.subr.bf16.mxu0 %v8845_v59  ;;  %v1343_v59 = vmax.f32 %v1279_v47, 0.0  ;;  %v8956_v47 = vld [vmem:[%s12595_s11 + $0x34] ss:$8 sps:$4 sm:$0xff]  }
 0x1d7   : > { %2650 = vmatpush1.bf16.msra.mxu0 %v8843_v28  ;;  %v1350_v28 = vmax.f32 %v1286_v54, 0.0  ;;  %v8962_v54 = vld [vmem:[%s12595_s11 + $0x44] ss:$8 sps:$4 sm:$0xff]  }
 0x1d8   : > { %2692 = vmatprep.subr.bf16.mxu0 %v8848_v57  ;;  %v1081_v57 = vpop.f32.mrb[22].mxu1 }
 0x1d9   : > { %v1188_v49 = vmul.f32 %v10384_v26, %v1081_v57  ;;  %v1083_v61 = vpop.f32.mrb[23].mxu1  ;;  %v8884_v57 = vld [vmem:[%s12591_s7 + $0x2c4] ss:$8 sps:$4 sm:$0xff]  }
 0x1da   : > { %2652 = vmatmul.mubr.bf16.vlgmr.msra.gmra.mrb[44].mxu0 %v10100_v20  ;;  %v8854_v20 = vld [vmem:[%s12591_s7 + $0x224] ss:$8 sps:$4 sm:$0xff]   ;;  %v1087_v27 = vpop.f32.mrb[24].mxu1 }
 0x1db   : > { %2661 = vmatprep.mubr.bf16.mxu0 %v10116_v42  ;;  %2693 = vmatpush1.bf16.msra.mxu0 %v8846_v5  ;;  %v1278_v42 = vadd.f32 %v10387_v29, %v1172_v41  ;;  %v10477_v5 = vpack.c.bf16 %v1351_v17, %v1343_v59  ;;  %v1294_v10 = vadd.f32 %v10387_v29, %v1188_v49  ;;  %v8866_v41 = vld [vmem:[%s12591_s7 + $0x264] ss:$8 sps:$4 sm:$0xff]   ;;  %v8881_v59 = vld [vmem:[%s12591_s7 + $0x2b4] ss:$8 sps:$4 sm:$0xff]   ;;  %v8879_v17 = vld [vmem:[%s12591_s7 + $0x2b0] ss:$8 sps:$4 sm:$0xff]  }
 0x1dc   : > { %2694 = vmatprep.subr.bf16.mxu0 %v8851_v34  ;;  %v1196_v40 = vmul.f32 %v10384_v26, %v1087_v27  ;;  %v8974_v49 = vld [vmem:[%s12595_s11 + $0x64] ss:$8 sps:$4 sm:$0xff]   ;;  %v8980_v27 = vld [vmem:[%s12595_s11 + $0x74] ss:$8 sps:$4 sm:$0xff]  }
 0x1dd   : > { %v1342_v38 = vmax.f32 %v1278_v42, 0.0  ;;  %v1358_v15 = vmax.f32 %v1294_v10, 0.0  ;;  %v8870_v42 = vld [vmem:[%s12591_s7 + $0x280] ss:$8 sps:$4 sm:$0xff]   ;;  %v8885_v10 = vld [vmem:[%s12591_s7 + $0x2d0] ss:$8 sps:$4 sm:$0xff]  }
 0x1de   : > { %v1302_v21 = vadd.f32 %v10387_v29, %v1196_v40  ;;  %v8890_v40 = vld [vmem:[%s12591_s7 + $0x2e4] ss:$8 sps:$4 sm:$0xff]  }
 0x1df   : > { %2695 = vmatpush1.bf16.msra.mxu0 %v8849_v11  ;;  %v10471_v63 = vpack.c.bf16 %v1350_v28, %v1342_v38  ;;  %v8861_v11 = vld [vmem:[%s12591_s7 + $0x250] ss:$8 sps:$4 sm:$0xff]   ;;  %v8968_v28 = vld [vmem:[%s12595_s11 + $0x54] ss:$8 sps:$4 sm:$0xff]  }
 0x1e0   : > { %2696 = vmatprep.subr.bf16.mxu0 %v8854_v20  ;;  %v1366_v24 = vmax.f32 %v1302_v21, 0.0  ;;  %v8944_v20 = vld [vmem:[%s12595_s11 + $0x4] ss:$8 sps:$4 sm:$0xff]   ;;  %v8954_v38 = vld [vmem:[%s12595_s11 + $0x30] ss:$8 sps:$4 sm:$0xff]  }
 0x1e1   : > { %3774 = vmatprep.subr.bf16.mxu1 %v8944_v20  ;;  %v8891_v21 = vld [vmem:[%s12591_s7 + $0x2f0] ss:$8 sps:$4 sm:$0xff]  }
 0x1e2   : > { %2662 = vmatmul.mubr.bf16.gmra.mrb[48].mxu0 %v10114_v39  ;;  %v1189_v39 = vmul.f32 %v10390_v30, %v1083_v61  ;;  %v10496_v29 = vpack.c.bf16 %v1366_v24, %v1358_v15  ;;  %v8882_v61 = vld [vmem:[%s12591_s7 + $0x2c0] ss:$8 sps:$4 sm:$0xff]   ;;  %v8897_v24 = vld [vmem:[%s12591_s7 + $0x310] ss:$8 sps:$4 sm:$0xff]  }
 0x1e3   : > { %2697 = vmatpush1.bf16.msra.mxu0 %v8852_v51  ;;  %2671 = vmatprep.mubr.bf16.mxu0 %v10215_v52  ;;  %v1089_v52 = vpop.f32.mrb[25].mxu1  ;;  %v8878_v51 = vld [vmem:[%s12591_s7 + $0x2a4] ss:$8 sps:$4 sm:$0xff]   ;;  %v8984_v15 = vld [vmem:[%s12595_s11 + $0x80] ss:$8 sps:$4 sm:$0xff]  }
 0x1e4   : > { %2698 = vmatprep.subr.bf16.mxu0 %v8857_v37  ;;  %v1295_v34 = vadd.f32 %v10393_v35, %v1189_v39  ;;  %v1197_v12 = vmul.f32 %v10390_v30, %v1089_v52  ;;  %v8876_v37 = vld [vmem:[%s12591_s7 + $0x2a0] ss:$8 sps:$4 sm:$0xff]   ;;  %v8978_v52 = vld [vmem:[%s12595_s11 + $0x70] ss:$8 sps:$4 sm:$0xff]  }
 0x1e5   : > { %v8972_v39 = vld [vmem:[%s12595_s11 + $0x60] ss:$8 sps:$4 sm:$0xff]  }
 0x1e6   : > { %v1359_v23 = vmax.f32 %v1295_v34, 0.0  ;;  %v1303_v26 = vadd.f32 %v10393_v35, %v1197_v12  ;;  %v8869_v35 = vld [vmem:[%s12591_s7 + $0x274] ss:$8 sps:$4 sm:$0xff]   ;;  %v8986_v34 = vld [vmem:[%s12595_s11 + $0x84] ss:$8 sps:$4 sm:$0xff]  }
 0x1e7   : > { %2699 = vmatpush1.bf16.msra.mxu0 %v8855_v25  ;;  %v8966_v25 = vld [vmem:[%s12595_s11 + $0x50] ss:$8 sps:$4 sm:$0xff]   ;;  %v8888_v12 = vld [vmem:[%s12591_s7 + $0x2e0] ss:$8 sps:$4 sm:$0xff]  }
 0x1e8   : > { %2700 = vmatprep.subr.bf16.mxu0 %v8860_v16  ;;  %v1367_v30 = vmax.f32 %v1303_v26, 0.0  ;;  %v8887_v16 = vld [vmem:[%s12591_s7 + $0x2d4] ss:$8 sps:$4 sm:$0xff]  }
 0x1e9   : > { %v8899_v26 = vld [vmem:[%s12591_s7 + $0x314] ss:$8 sps:$4 sm:$0xff]  }
 0x1ea   : > { %2672 = vmatmul.mubr.bf16.gmra.mrb[52].mxu0 %v10217_v53  ;;  %v10501_v43 = vpack.c.bf16 %v1367_v30, %v1359_v23  ;;  %v8864_v53 = vld [vmem:[%s12591_s7 + $0x260] ss:$8 sps:$4 sm:$0xff]   ;;  %v8902_v30 = vld [vmem:[%s12591_s7 + $0x324] ss:$8 sps:$4 sm:$0xff]  }
 0x1eb   : > { %2701 = vmatpush1.bf16.msra.mxu0 %v8858_v14  ;;  %2681 = vmatprep.mubr.bf16.mxu0 %v10234_v6  ;;  %v8942_v6 = vld [vmem:[%s12595_s11] ss:$8 sps:$4 sm:$0xff]   ;;  %v8893_v14 = vld [vmem:[%s12591_s7 + $0x2f4] ss:$8 sps:$4 sm:$0xff]  }
 0x1ec   : > { %2702 = vmatprep.subr.bf16.mxu0 %v8863_v22  ;;  %3775 = vmatpush1.bf16.msra.mxu1 %v8942_v6  ;;  %v8896_v22 = vld [vmem:[%s12591_s7 + $0x304] ss:$8 sps:$4 sm:$0xff]   ;;  %v8894_v23 = vld [vmem:[%s12591_s7 + $0x300] ss:$8 sps:$4 sm:$0xff]  }
 0x1ed   : > { %3776 = vmatprep.subr.bf16.mxu1 %v8947_v45  ;;  %v8917_v45 = vld [vmem:[%s12591_s7 + $0x374] ss:$8 sps:$4 sm:$0xff]  }
 0x1ef   : > { %2703 = vmatpush1.bf16.msra.mxu0 %v8861_v11  ;;  %v8900_v11 = vld [vmem:[%s12591_s7 + $0x320] ss:$8 sps:$4 sm:$0xff]  }
 0x1f0   : > { %2704 = vmatprep.subr.bf16.mxu0 %v8866_v41  ;;  %3777 = vmatpush1.bf16.msra.mxu1 %v8945_v9  ;;  %v8908_v41 = vld [vmem:[%s12591_s7 + $0x344] ss:$8 sps:$4 sm:$0xff]  }
 0x1f1   : > { %v8920_v9 = vld [vmem:[%s12591_s7 + $0x384] ss:$8 sps:$4 sm:$0xff]  }
 0x1f2   : > { %2682 = vmatmul.mubr.bf16.gmra.mrb[56].mxu0 %v10236_v46  ;;  %v8872_v46 = vld [vmem:[%s12591_s7 + $0x284] ss:$8 sps:$4 sm:$0xff]  }
 0x1f3   : > { %2705 = vmatpush1.bf16.msra.mxu0 %v8864_v53  ;;  %2724 = vmatprep.mubr.bf16.mxu0 %v10128_v60  ;;  %v8950_v60 = vld [vmem:[%s12595_s11 + $0x24] ss:$8 sps:$4 sm:$0xff]   ;;  %v8906_v53 = vld [vmem:[%s12591_s7 + $0x340] ss:$8 sps:$4 sm:$0xff]  }
 0x1f4   : > { %2706 = vmatprep.subr.bf16.mxu0 %v8869_v35  ;;  %3778 = vmatprep.subr.bf16.mxu1 %v8950_v60  ;;  %v8914_v35 = vld [vmem:[%s12591_s7 + $0x364] ss:$8 sps:$4 sm:$0xff]   ;;  %v8918_v60 = vld [vmem:[%s12591_s7 + $0x380] ss:$8 sps:$4 sm:$0xff]  }
 0x1f5   : > { %3779 = vmatpush1.bf16.msra.mxu1 %v8948_v13  ;;  %v8929_v13 = vld [vmem:[%s12591_s7 + $0x3b4] ss:$8 sps:$4 sm:$0xff]  }
 0x1f6   : > { %3780 = vmatprep.subr.bf16.mxu1 %v8956_v47  ;;  %v8927_v47 = vld [vmem:[%s12591_s7 + $0x3b0] ss:$8 sps:$4 sm:$0xff]  }
 0x1f7   : > { %2707 = vmatpush1.bf16.msra.mxu0 %v8867_v44 }
 0x1f8   : > { %2708 = vmatprep.subr.bf16.mxu0 %v8872_v46  ;;  %v8915_v46 = vld [vmem:[%s12591_s7 + $0x370] ss:$8 sps:$4 sm:$0xff]  }
 0x1f9   : > { %3781 = vmatpush1.bf16.msra.mxu1 %v8954_v38  ;;  %v8935_v38 = vld [vmem:[%s12591_s7 + $0x3d4] ss:$8 sps:$4 sm:$0xff]  }
 0x1fa   : > { %3782 = vmatprep.subr.bf16.mxu1 %v8962_v54  ;;  %v8933_v54 = vld [vmem:[%s12591_s7 + $0x3d0] ss:$8 sps:$4 sm:$0xff]  }
 0x1fb   : > { %2709 = vmatpush1.bf16.msra.mxu0 %v8870_v42  ;;  %v8926_v42 = vld [vmem:[%s12591_s7 + $0x3a4] ss:$8 sps:$4 sm:$0xff]  }
 0x1fc   : > { %2710 = vmatprep.subr.bf16.mxu0 %v8875_v8  ;;  %v8924_v8 = vld [vmem:[%s12591_s7 + $0x3a0] ss:$8 sps:$4 sm:$0xff]  }
 0x1fd   : > { %3783 = vmatpush1.bf16.msra.mxu1 %v8960_v32  ;;  %v8941_v32 = vld [vmem:[%s12591_s7 + $0x3f4] ss:$8 sps:$4 sm:$0xff]  }
 0x1fe   : > { %3784 = vmatprep.subr.bf16.mxu1 %v8968_v28  ;;  %v8939_v28 = vld [vmem:[%s12591_s7 + $0x3f0] ss:$8 sps:$4 sm:$0xff]  }
 0x1ff   : > { %2711 = vmatpush1.bf16.msra.mxu0 %v8873_v31  ;;  %v8932_v31 = vld [vmem:[%s12591_s7 + $0x3c4] ss:$8 sps:$4 sm:$0xff]  }
 0x200   : > { %2712 = vmatprep.subr.bf16.mxu0 %v8878_v51  ;;  %v8930_v51 = vld [vmem:[%s12591_s7 + $0x3c0] ss:$8 sps:$4 sm:$0xff]  }
 0x201   : > { %3785 = vmatpush1.bf16.msra.mxu1 %v8966_v25  ;;  %v8959_v25 = vld [vmem:[%s12595_s11 + $0x114] ss:$8 sps:$4 sm:$0xff]  }
 0x202   : > { %3786 = vmatprep.subr.bf16.mxu1 %v8974_v49  ;;  %v8957_v49 = vld [vmem:[%s12595_s11 + $0x110] ss:$8 sps:$4 sm:$0xff]  }
 0x203   : > { %2713 = vmatpush1.bf16.msra.mxu0 %v8876_v37  ;;  %v8938_v37 = vld [vmem:[%s12591_s7 + $0x3e4] ss:$8 sps:$4 sm:$0xff]  }
 0x204   : > { %2714 = vmatprep.subr.bf16.mxu0 %v8881_v59  ;;  %v8936_v59 = vld [vmem:[%s12591_s7 + $0x3e0] ss:$8 sps:$4 sm:$0xff]  }
 0x205   : > { %3787 = vmatpush1.bf16.msra.mxu1 %v8972_v39  ;;  %v8977_v39 = vld [vmem:[%s12595_s11 + $0x144] ss:$8 sps:$4 sm:$0xff]  }
 0x206   : > { %3788 = vmatprep.subr.bf16.mxu1 %v8980_v27  ;;  %v8975_v27 = vld [vmem:[%s12595_s11 + $0x140] ss:$8 sps:$4 sm:$0xff]  }
 0x207   : > { %2715 = vmatpush1.bf16.msra.mxu0 %v8879_v17  ;;  %v8953_v17 = vld [vmem:[%s12595_s11 + $0x104] ss:$8 sps:$4 sm:$0xff]  }
 0x208   : > { %2716 = vmatprep.subr.bf16.mxu0 %v8884_v57  ;;  %v8951_v57 = vld [vmem:[%s12595_s11 + $0x100] ss:$8 sps:$4 sm:$0xff]  }
 0x209   : > { %3789 = vmatpush1.bf16.msra.mxu1 %v8978_v52  ;;  %v8998_v52 = vld [vmem:[%s12595_s11 + $0xa4] ss:$8 sps:$4 sm:$0xff]  }
 0x20a   : > { %3790 = vmatprep.subr.bf16.mxu1 %v8986_v34  ;;  %v8996_v34 = vld [vmem:[%s12595_s11 + $0xa0] ss:$8 sps:$4 sm:$0xff]  }
 0x20b   : > { %2717 = vmatpush1.bf16.msra.mxu0 %v8882_v61  ;;  %v8965_v61 = vld [vmem:[%s12595_s11 + $0x124] ss:$8 sps:$4 sm:$0xff]  }
 0x20c   : > { %2718 = vmatprep.subr.bf16.mxu0 %v8887_v16  ;;  %v8963_v16 = vld [vmem:[%s12595_s11 + $0x120] ss:$8 sps:$4 sm:$0xff]  }
 0x20d   : > { %3791 = vmatpush1.bf16.msra.mxu1 %v8984_v15  ;;  %v9001_v15 = vld [vmem:[%s12595_s11 + $0x184] ss:$8 sps:$4 sm:$0xff]  }
 0x20f   : > { %2719 = vmatpush1.bf16.msra.mxu0 %v8885_v10  ;;  %v8989_v10 = vld [vmem:[%s12595_s11 + $0x164] ss:$8 sps:$4 sm:$0xff]  }
 0x210   : > { %2720 = vmatprep.subr.bf16.mxu0 %v8890_v40  ;;  %v8987_v40 = vld [vmem:[%s12595_s11 + $0x160] ss:$8 sps:$4 sm:$0xff]  }
 0x213   : > { %2721 = vmatpush1.bf16.msra.mxu0 %v8888_v12  ;;  %v8993_v12 = vld [vmem:[%s12595_s11 + $0x170] ss:$8 sps:$4 sm:$0xff]  }
 0x214   : > { %2722 = vmatprep.subr.bf16.mxu0 %v8893_v14  ;;  %v9004_v14 = vld [vmem:[%s12595_s11 + $0xb4] ss:$8 sps:$4 sm:$0xff]  }
 0x217   : > { %2723 = vmatpush1.bf16.msra.mxu0 %v8891_v21  ;;  %v9002_v21 = vld [vmem:[%s12595_s11 + $0xb0] ss:$8 sps:$4 sm:$0xff]  }
 0x218   : > { %2765 = vmatprep.subr.bf16.mxu0 %v8896_v22  ;;  %v8999_v22 = vld [vmem:[%s12595_s11 + $0x180] ss:$8 sps:$4 sm:$0xff]  }
 0x21a   : > { %2725 = vmatmul.mubr.bf16.vlgmr.msra.gmra.mrb[44].mxu0 %v10126_v58  ;;  %v8905_v58 = vld [vmem:[%s12591_s7 + $0x334] ss:$8 sps:$4 sm:$0xff]  }
 0x21b   : > { %2734 = vmatprep.mubr.bf16.mxu0 %v10140_v36  ;;  %2766 = vmatpush1.bf16.msra.mxu0 %v8894_v23  ;;  %v8903_v36 = vld [vmem:[%s12591_s7 + $0x330] ss:$8 sps:$4 sm:$0xff]   ;;  %v9010_v23 = vld [vmem:[%s12595_s11 + $0xc4] ss:$8 sps:$4 sm:$0xff]  }
 0x21c   : > { %2767 = vmatprep.subr.bf16.mxu0 %v8899_v26  ;;  %v9008_v26 = vld [vmem:[%s12595_s11 + $0xc0] ss:$8 sps:$4 sm:$0xff]  }
 0x21f   : > { %2768 = vmatpush1.bf16.msra.mxu0 %v8897_v24  ;;  %v9007_v24 = vld [vmem:[%s12595_s11 + $0x194] ss:$8 sps:$4 sm:$0xff]  }
 0x220   : > { %2769 = vmatprep.subr.bf16.mxu0 %v8902_v30  ;;  %v9005_v30 = vld [vmem:[%s12595_s11 + $0x190] ss:$8 sps:$4 sm:$0xff]  }
 0x222   : > { %2735 = vmatmul.mubr.bf16.gmra.mrb[48].mxu0 %v10138_v33  ;;  %v8911_v33 = vld [vmem:[%s12591_s7 + $0x354] ss:$8 sps:$4 sm:$0xff]  }
 0x223   : > { %2744 = vmatprep.mubr.bf16.mxu0 %v10158_v1  ;;  %2770 = vmatpush1.bf16.msra.mxu0 %v8900_v11  ;;  %v8909_v1 = vld [vmem:[%s12591_s7 + $0x350] ss:$8 sps:$4 sm:$0xff]   ;;  %v9462_v11 = vmov 0  }
 0x224   : > { %2771 = vmatprep.subr.bf16.mxu0 %v8905_v58  ;;  %2913 = vst [vmem:[#allocation2 + $0x18] sm:$0x11] %v9462_v11  ;;  %2910 = vst [vmem:[#allocation2] sm:$0xff] %v9462_v11  ;;  %v9016_v58 = vld [vmem:[%s12595_s11 + $0xd4] ss:$8 sps:$4 sm:$0xff]   ;;  %8698 = vset.pattern.permute.xlu0 %v9462_v11 }
 0x225   : > { %2911 = vst [vmem:[#allocation2 + $0x8] sm:$0x11] %v9462_v11  ;;  %2915 = vst [vmem:[#allocation2 + $0x28] sm:$0x11] %v9462_v11  ;;  %8699 = vset.pattern.permute.xlu1 %v9462_v11 }
 0x226   : > { %2917 = vst [vmem:[#allocation2 + $0x38] sm:$0x11] %v9462_v11  ;;  %2919 = vst [vmem:[#allocation2 + $0x48] sm:$0x11] %v9462_v11 }
 0x227   : > { %2772 = vmatpush1.bf16.msra.mxu0 %v8903_v36  ;;  %2921 = vst [vmem:[#allocation2 + $0x58] sm:$0x11] %v9462_v11  ;;  %2923 = vst [vmem:[#allocation2 + $0x68] sm:$0x11] %v9462_v11  ;;  %v9013_v36 = vld [vmem:[%s12595_s11 + $0x1a4] ss:$8 sps:$4 sm:$0xff]  }
 0x228   : > { %2773 = vmatprep.subr.bf16.mxu0 %v8908_v41  ;;  %2925 = vst [vmem:[#allocation2 + $0x78] sm:$0x11] %v9462_v11  ;;  %2927 = vst [vmem:[#allocation2 + $0x88] sm:$0x11] %v9462_v11  ;;  %v9014_v41 = vld [vmem:[%s12595_s11 + $0xd0] ss:$8 sps:$4 sm:$0xff]  }
 0x229   : > { %2928 = vst [vmem:[#allocation2 + $0x90] sm:$0xff] %v9462_v11  ;;  %2929 = vst [vmem:[#allocation2 + $0x98] sm:$0x11] %v9462_v11 }
 0x22a   : > { %2745 = vmatmul.mubr.bf16.gmra.mrb[52].mxu0 %v10153_v19  ;;  %v8912_v19 = vld [vmem:[%s12591_s7 + $0x360] ss:$8 sps:$4 sm:$0xff]  }
 0x22b   : > { %2754 = vmatprep.mubr.bf16.mxu0 %v10172_v48  ;;  %2774 = vmatpush1.bf16.msra.mxu0 %v8906_v53  ;;  %v9011_v53 = vld [vmem:[%s12595_s11 + $0x1a0] ss:$8 sps:$4 sm:$0xff]  }
 0x22c   : > { %2775 = vmatprep.subr.bf16.mxu0 %v8911_v33  ;;  %v9022_v33 = vld [vmem:[%s12595_s11 + $0xe4] ss:$8 sps:$4 sm:$0xff]  }
 0x22d   : > { %v10661_v6 = vpop.f32.mrb[40].mxu0 }
 0x22e   : > { %v10663_v20 = vpop.f32.mrb[41].mxu0 }
 0x22f   : > { %2776 = vmatpush1.bf16.msra.mxu0 %v8909_v1  ;;  %v1895_v44 = vpop.f32.mrb[42].mxu0  ;;  %v9020_v1 = vld [vmem:[%s12595_s11 + $0xe0] ss:$8 sps:$4 sm:$0xff]  }
 0x230   : > { %v1896_v48 = vpop.f32.mrb[43].mxu0  ;;  %2777 = vmatprep.subr.bf16.mxu0 %v8914_v35  ;;  %v9017_v35 = vld [vmem:[%s12595_s11 + $0x1b0] ss:$8 sps:$4 sm:$0xff]   ;;  %v9019_v44 = vld [vmem:[%s12595_s11 + $0x1b4] ss:$8 sps:$4 sm:$0xff]  }
 0x231   : > { %v9026_v48 = vld [vmem:[%s12595_s11 + $0xf0] ss:$8 sps:$4 sm:$0xff]  }
 0x232   : > { %2755 = vmatmul.mubr.bf16.gmra.mrb[56].mxu0 %v10170_v18  ;;  %v8923_v18 = vld [vmem:[%s12591_s7 + $0x394] ss:$8 sps:$4 sm:$0xff]  }
 0x233   : > { %2778 = vmatpush1.bf16.msra.mxu0 %v8912_v19  ;;  %2797 = vmatprep.mubr.bf16.mxu0 %v10417_v56  ;;  %v8921_v56 = vld [vmem:[%s12591_s7 + $0x390] ss:$8 sps:$4 sm:$0xff]   ;;  %v9025_v19 = vld [vmem:[%s12595_s11 + $0x1c4] ss:$8 sps:$4 sm:$0xff]  }
 0x234   : > { %2779 = vmatprep.subr.bf16.mxu0 %v8917_v45  ;;  %v9028_v45 = vld [vmem:[%s12595_s11 + $0xf4] ss:$8 sps:$4 sm:$0xff]  }
 0x237   : > { %2780 = vmatpush1.bf16.msra.mxu0 %v8915_v46  ;;  %v9023_v46 = vld [vmem:[%s12595_s11 + $0x1c0] ss:$8 sps:$4 sm:$0xff]  }
 0x238   : > { %2781 = vmatprep.subr.bf16.mxu0 %v8920_v9  ;;  %v9031_v9 = vld [vmem:[%s12595_s11 + $0x1d4] ss:$8 sps:$4 sm:$0xff]  }
 0x23b   : > { %2782 = vmatpush1.bf16.msra.mxu0 %v8918_v60  ;;  %v9029_v60 = vld [vmem:[%s12595_s11 + $0x1d0] ss:$8 sps:$4 sm:$0xff]  }
 0x23c   : > { %2783 = vmatprep.subr.bf16.mxu0 %v8923_v18  ;;  %v9034_v18 = vld [vmem:[%s12595_s11 + $0x204] ss:$8 sps:$4 sm:$0xff]  }
 0x23f   : > { %2784 = vmatpush1.bf16.msra.mxu0 %v8921_v56  ;;  %v9037_v56 = vld [vmem:[%s12595_s11 + $0x1e4] ss:$8 sps:$4 sm:$0xff]  }
 0x240   : > { %2785 = vmatprep.subr.bf16.mxu0 %v8926_v42  ;;  %v9035_v42 = vld [vmem:[%s12595_s11 + $0x1e0] ss:$8 sps:$4 sm:$0xff]  }
 0x243   : > { %2786 = vmatpush1.bf16.msra.mxu0 %v8924_v8  ;;  %v9043_v8 = vld [vmem:[%s12595_s11 + $0x1f4] ss:$8 sps:$4 sm:$0xff]  }
 0x244   : > { %2787 = vmatprep.subr.bf16.mxu0 %v8929_v13  ;;  %v9041_v13 = vld [vmem:[%s12595_s11 + $0x1f0] ss:$8 sps:$4 sm:$0xff]  }
 0x247   : > { %2788 = vmatpush1.bf16.msra.mxu0 %v8927_v47  ;;  %v2838_v47 = vld [vmem:[%s12593_s9] sm:$0x3] }
 0x248   : > { %2789 = vmatprep.subr.bf16.mxu0 %v8932_v31  ;;  %v2866_v31 = vld [vmem:[%s12594_s10] sm:$0x3] }
 0x24b   : > { %2790 = vmatpush1.bf16.msra.mxu0 %v8930_v51  ;;  %v10894_v51 = vrot.slane %v10661_v6, %v9964_v2  ;;  %v10910_v6 = vrot.slane %v2866_v31, %v9964_v2 }
 0x24c   : > { %2791 = vmatprep.subr.bf16.mxu0 %v8935_v38  ;;  %v10897_v38 = vrot.slane %v2838_v47, %v9964_v2 }
 0x24f   : > { %2792 = vmatpush1.bf16.msra.mxu0 %v8933_v54  ;;  %v10901_v54 = vrot.slane %v10663_v20, %v9964_v2  ;;  %v10916_v20 = vrot.slane %v2866_v31, %v9973_v4 }
 0x250   : > { %2793 = vmatprep.subr.bf16.mxu0 %v8938_v37 }
 0x253   : > { %2794 = vmatpush1.bf16.msra.mxu0 %v8936_v59  ;;  %v10904_v59 = vrot.slane %v2838_v47, %v9973_v4 }
 0x254   : > { %2795 = vmatprep.subr.bf16.mxu0 %v8941_v32  ;;  %v3167_v32 = vrot.slane %v9462_v11, 4 }
 0x257   : > { %2796 = vmatpush1.bf16.msra.mxu0 %v8939_v28  ;;  %v3170_v28 = vrot.slane %v9462_v11, 5 }
 0x258   : > { %3501 = vmatprep.subr.bf16.mxu0 %v8953_v17 }
 0x25a   : > { %2798 = vmatmul.mubr.bf16.vlgmr.msra.gmra.mrb[44].mxu0 %v10415_v55  ;;  %v8971_v55 = vld [vmem:[%s12595_s11 + $0x134] ss:$8 sps:$4 sm:$0xff]  }
 0x25b   : > { %2807 = vmatprep.mubr.bf16.mxu0 %v10455_v50  ;;  %3502 = vmatpush1.bf16.msra.mxu0 %v8951_v57  ;;  %v8969_v50 = vld [vmem:[%s12595_s11 + $0x130] ss:$8 sps:$4 sm:$0xff]  }
 0x25c   : > { %3503 = vmatprep.subr.bf16.mxu0 %v8959_v25  ;;  %v10912_v25 = vld [vmem:[#allocation2 + $0x8] sm:$0x11] }
 0x25f   : > { %3504 = vmatpush1.bf16.msra.mxu0 %v8957_v49 }
 0x260   : > { %3505 = vmatprep.subr.bf16.mxu0 %v8965_v61 }
 0x262   : > { %2808 = vmatmul.mubr.bf16.gmra.mrb[48].mxu0 %v10449_v3  ;;  %v8983_v3 = vld [vmem:[%s12595_s11 + $0x154] ss:$8 sps:$4 sm:$0xff]  }
 0x263   : > { %2817 = vmatprep.mubr.bf16.mxu0 %v10477_v5  ;;  %3506 = vmatpush1.bf16.msra.mxu0 %v8963_v16  ;;  %v8981_v5 = vld [vmem:[%s12595_s11 + $0x150] ss:$8 sps:$4 sm:$0xff]  }
 0x264   : > { %3507 = vmatprep.subr.bf16.mxu0 %v8971_v55 }
 0x267   : > { %3508 = vmatpush1.bf16.msra.mxu0 %v8969_v50 }
 0x268   : > { %3509 = vmatprep.subr.bf16.mxu0 %v8977_v39 }
 0x26a   : > { %2818 = vmatmul.mubr.bf16.gmra.mrb[52].mxu0 %v10471_v63  ;;  %v8992_v63 = vld [vmem:[%s12595_s11 + $0x94] ss:$8 sps:$4 sm:$0xff]  }
 0x26b   : > { %2827 = vmatprep.mubr.bf16.mxu0 %v10501_v43  ;;  %3510 = vmatpush1.bf16.msra.mxu0 %v8975_v27  ;;  %v8990_v43 = vld [vmem:[%s12595_s11 + $0x90] ss:$8 sps:$4 sm:$0xff]  }
 0x26c   : > { %3511 = vmatprep.subr.bf16.mxu0 %v8983_v3  ;;  %3792 = vmatprep.subr.bf16.mxu1 %v8992_v63  ;;  %v3171_v3 = vor.u32 %v3170_v28, %v3167_v32 }
 0x26d   : > { %3793 = vmatpush1.bf16.msra.mxu1 %v8990_v43 }
 0x26e   : > { %3794 = vmatprep.subr.bf16.mxu1 %v8998_v52 }
 0x26f   : > { %3512 = vmatpush1.bf16.msra.mxu0 %v8981_v5  ;;  %v3174_v5 = vshll.u32 %v10912_v25, 16 }
 0x270   : > { %3513 = vmatprep.subr.bf16.mxu0 %v8989_v10 }
 0x271   : > { %3795 = vmatpush1.bf16.msra.mxu1 %v8996_v34 }
 0x272   : > { %2828 = vmatmul.mubr.bf16.gmra.mrb[56].mxu0 %v10496_v29  ;;  %v8995_v29 = vld [vmem:[%s12595_s11 + $0x174] ss:$8 sps:$4 sm:$0xff]   ;;  %3796 = vmatprep.subr.bf16.mxu1 %v9004_v14 }
 0x273   : > { %3514 = vmatpush1.bf16.msra.mxu0 %v8987_v40 }
 0x274   : > { %3515 = vmatprep.subr.bf16.mxu0 %v8995_v29 }
 0x275   : > { %3797 = vmatpush1.bf16.msra.mxu1 %v9002_v21  ;;  %v3172_v21 = vrot.slane %v3171_v3, 4 }
 0x276   : > { %3798 = vmatprep.subr.bf16.mxu1 %v9010_v23 }
 0x277   : > { %3516 = vmatpush1.bf16.msra.mxu0 %v8993_v12 }
 0x278   : > { %3517 = vmatprep.subr.bf16.mxu0 %v9001_v15 }
 0x279   : > { %3799 = vmatpush1.bf16.msra.mxu1 %v9008_v26 }
 0x27a   : > { %3800 = vmatprep.subr.bf16.mxu1 %v9016_v58 }
 0x27b   : > { %3518 = vmatpush1.bf16.msra.mxu0 %v8999_v22  ;;  %v3176_v22 = vrot.slane %v3174_v5, 5  ;;  %v3074_v5 = vld [vmem:[#allocation2 + $0x28] sm:$0x11] }
 0x27c   : > { %3519 = vmatprep.subr.bf16.mxu0 %v9007_v24 }
 0x27d   : > { %3801 = vmatpush1.bf16.msra.mxu1 %v9014_v41 }
 0x27e   : > { %3802 = vmatprep.subr.bf16.mxu1 %v9022_v33 }
 0x27f   : > { %3520 = vmatpush1.bf16.msra.mxu0 %v9005_v30  ;;  %v9351_v30 = vld [vmem:[%s12595_s11 + $0x850] ss:$8 sps:$4 sm:$0xff]  }
 0x280   : > { %3521 = vmatprep.subr.bf16.mxu0 %v9013_v36 }
 0x281   : > { %3803 = vmatpush1.bf16.msra.mxu1 %v9020_v1  ;;  %v10949_v1 = vld [vmem:[#allocation2] sm:$0xee] }
 0x282   : > { %3804 = vmatprep.subr.bf16.mxu1 %v9028_v45 }
 0x283   : > { %3522 = vmatpush1.bf16.msra.mxu0 %v9011_v53 }
 0x284   : > { %3523 = vmatprep.subr.bf16.mxu0 %v9019_v44 }
 0x285   : > { %3805 = vmatpush1.bf16.msra.mxu1 %v9026_v48 }
 0x286   : > { %4131 = vmatprep.subr.bf16.mxu1 %v9034_v18 }
 0x287   : > { %3524 = vmatpush1.bf16.msra.mxu0 %v9017_v35 }
 0x288   : > { %3525 = vmatprep.subr.bf16.mxu0 %v9025_v19 }
 0x28b   : > { %3526 = vmatpush1.bf16.msra.mxu0 %v9023_v46 }
 0x28c   : > { %3527 = vmatprep.subr.bf16.mxu0 %v9031_v9 }
 0x28f   : > { %3528 = vmatpush1.bf16.msra.mxu0 %v9029_v60  ;;  %v10964_v60 = vsel %vm10938_vm12, %v3172_v21, %v3176_v22 }
 0x290   : > { %3529 = vmatprep.subr.bf16.mxu0 %v9037_v56 }
 0x293   : > { %3530 = vmatpush1.bf16.msra.mxu0 %v9035_v42 }
 0x294   : > { %3531 = vmatprep.subr.bf16.mxu0 %v9043_v8  ;;  %v7699_v8 = vrot.slane %v10949_v1, 9  ;;  %v9061_v1 = vld [vmem:[%s12595_s11 + $0x274] ss:$8 sps:$4 sm:$0xff]  }
 0x297   : > { %3532 = vmatpush1.bf16.msra.mxu0 %v9041_v13 }
 0x32d   : > { %v2799_v37 = vpop.f32.mrb[44].mxu0 }
 0x32e   : > { %v8461_v17 = vadd.f32 %v2799_v37, %v10894_v51  ;;  %v2801_v57 = vpop.f32.mrb[45].mxu0 }
 0x32f   : > { %v8462_v49 = vadd.f32 %v2801_v57, %v10901_v54  ;;  %v2803_v61 = vpop.f32.mrb[46].mxu0 }
 0x330   : > { %v2850_v16 = vmul.f32 %v8461_v17, %v10897_v38  ;;  %v8463_v55 = vadd.f32 %v2803_v61, %v10894_v51  ;;  %v2805_v50 = vpop.f32.mrb[47].mxu0  ;;  %v3068_v17 = vld [vmem:[#allocation2 + $0x18] sm:$0x11] }
 0x331   : > { %v2851_v39 = vmul.f32 %v8462_v49, %v10904_v59  ;;  %v8464_v27 = vadd.f32 %v2805_v50, %v10901_v54 }
 0x332   : > { %v2878_v10 = vadd.f32 %v10910_v6, %v2850_v16  ;;  %v2852_v40 = vmul.f32 %v8463_v55, %v10897_v38 }
 0x333   : > { %v2879_v63 = vadd.f32 %v10916_v20, %v2851_v39  ;;  %v2853_v43 = vmul.f32 %v8464_v27, %v10904_v59 }
 0x334   : > { %v2894_v52 = vmax.f32 %v2878_v10, 0.0  ;;  %v2880_v34 = vadd.f32 %v10910_v6, %v2852_v40 }
 0x335   : > { %v2895_v29 = vmax.f32 %v2879_v63, 0.0  ;;  %v2881_v14 = vadd.f32 %v10916_v20, %v2853_v43  ;;  %v2809_v15 = vpop.f32.mrb[48].mxu0 }
 0x336   : > { %v2896_v23 = vmax.f32 %v2880_v34, 0.0  ;;  %v8465_v26 = vadd.f32 %v2809_v15, %v10894_v51  ;;  %v2811_v24 = vpop.f32.mrb[49].mxu0 }
 0x337   : > { %v8260_v58 = vpack.c.bf16 %v2895_v29, %v2894_v52  ;;  %v2897_v41 = vmax.f32 %v2881_v14, 0.0  ;;  %v8466_v53 = vadd.f32 %v2811_v24, %v10901_v54  ;;  %v2813_v33 = vpop.f32.mrb[50].mxu0  ;;  %v3876_v52 = vrot.slane %v10912_v25, 5 }
 0x338   : > { %v2854_v44 = vmul.f32 %v8465_v26, %v10897_v38  ;;  %v8467_v19 = vadd.f32 %v2813_v33, %v10894_v51  ;;  %v2815_v48 = vpop.f32.mrb[51].mxu0 }
 0x339   : > { %v2971_v45 = vshrl.u32 %v8260_v58, 16  ;;  %v8261_v46 = vpack.c.bf16 %v2897_v41, %v2896_v23  ;;  %v2855_v9 = vmul.f32 %v8466_v53, %v10904_v59  ;;  %v8468_v42 = vadd.f32 %v2815_v48, %v10901_v54 }
 0x33a   : > { %v2882_v18 = vadd.f32 %v10910_v6, %v2854_v44  ;;  %v2856_v56 = vmul.f32 %v8467_v19, %v10897_v38  ;;  %v2974_v47 = vshll.u32 %v8260_v58, 16 }
 0x33b   : > { %v2973_v13 = vrot.slane %v2971_v45, 7  ;;  %v2979_v37 = vshrl.u32 %v8261_v46, 16  ;;  %v2883_v32 = vadd.f32 %v10916_v20, %v2855_v9  ;;  %v2982_v57 = vshll.u32 %v8261_v46, 16 }
 0x33c   : > { %v2898_v49 = vmax.f32 %v2882_v18, 0.0  ;;  %v2884_v61 = vadd.f32 %v10910_v6, %v2856_v56  ;;  %v2857_v16 = vmul.f32 %v8468_v42, %v10904_v59 }
 0x33d   : > { %v2976_v55 = vor.u32 %v2974_v47, %v2973_v13  ;;  %v2977_v50 = vrot.slane %v2973_v13, 4  ;;  %v2981_v39 = vrot.slane %v2979_v37, 7  ;;  %v2899_v27 = vmax.f32 %v2883_v32, 0.0  ;;  %v2819_v3 = vpop.f32.mrb[52].mxu0  ;;  %v3080_v47 = vld [vmem:[#allocation2 + $0x38] sm:$0x11] }
 0x33e   : > { %v2900_v10 = vmax.f32 %v2884_v61, 0.0  ;;  %v2885_v40 = vadd.f32 %v10916_v20, %v2857_v16  ;;  %v8469_v63 = vadd.f32 %v2819_v3, %v10894_v51  ;;  %v2821_v43 = vpop.f32.mrb[53].mxu0 }
 0x33f   : > { %v10992_v34 = vsel %vm10974_vm0, %v2976_v55, 0  ;;  %v3069_v29 = vsel %vm10981_vm1, %v2977_v50, %v3068_v17  ;;  %v2984_v12 = vor.u32 %v2982_v57, %v2981_v39  ;;  %v2985_v14 = vrot.slane %v2981_v39, 4  ;;  %v2823_v15 = vpop.f32.mrb[54].mxu0 }
 0x340   : > { %3060 = vst [vmem:[#allocation2 + $0x10] sm:$0xff] %v10992_v34  ;;  %3070 = vst [vmem:[#allocation2 + $0x18] sm:$0x11] %v3069_v29  ;;  %v8262_v21 = vpack.c.bf16 %v2899_v27, %v2898_v49  ;;  %v2901_v22 = vmax.f32 %v2885_v40, 0.0  ;;  %v2858_v23 = vmul.f32 %v8469_v63, %v10897_v38  ;;  %v8470_v26 = vadd.f32 %v2821_v43, %v10901_v54  ;;  %v2825_v24 = vpop.f32.mrb[55].mxu0 }
 0x341   : > { %v11001_v58 = vsel %vm10974_vm0, %v2984_v12, 0  ;;  %v3075_v36 = vsel %vm10981_vm1, %v2985_v14, %v3074_v5  ;;  %v8471_v41 = vadd.f32 %v2823_v15, %v10894_v51  ;;  %v8472_v53 = vadd.f32 %v2825_v24, %v10901_v54  ;;  %v3086_v27 = vld [vmem:[#allocation2 + $0x48] sm:$0x11] }
 0x342   : > { %3073 = vst [vmem:[#allocation2 + $0x20] sm:$0xff] %v11001_v58  ;;  %3076 = vst [vmem:[#allocation2 + $0x28] sm:$0x11] %v3075_v36  ;;  %v2987_v33 = vshrl.u32 %v8262_v21, 16  ;;  %v2990_v35 = vshll.u32 %v8262_v21, 16  ;;  %v8263_v44 = vpack.c.bf16 %v2901_v22, %v2900_v10  ;;  %v2886_v19 = vadd.f32 %v10910_v6, %v2858_v23 }
 0x343   : > { %v2859_v48 = vmul.f32 %v8470_v26, %v10904_v59  ;;  %v2860_v45 = vmul.f32 %v8471_v41, %v10897_v38  ;;  %v2861_v46 = vmul.f32 %v8472_v53, %v10904_v59  ;;  %v3179_v9 = vshrl.u32 %v10992_v34, 16 }
 0x344   : > { %v2989_v18 = vrot.slane %v2987_v33, 7  ;;  %v2995_v56 = vshrl.u32 %v8263_v44, 16  ;;  %v2998_v42 = vshll.u32 %v8263_v44, 16  ;;  %v2902_v13 = vmax.f32 %v2886_v19, 0.0 }
 0x345   : > { %v2887_v37 = vadd.f32 %v10916_v20, %v2859_v48  ;;  %v2888_v32 = vadd.f32 %v10910_v6, %v2860_v45  ;;  %v2889_v17 = vadd.f32 %v10916_v20, %v2861_v46  ;;  %v2829_v57 = vpop.f32.mrb[56].mxu0  ;;  %v3182_v49 = vshll.u32 %v10992_v34, 16 }
 0x346   : > { %v2992_v61 = vor.u32 %v2990_v35, %v2989_v18  ;;  %v2993_v16 = vrot.slane %v2989_v18, 4  ;;  %v2997_v55 = vrot.slane %v2995_v56, 7  ;;  %v8473_v50 = vadd.f32 %v2829_v57, %v10894_v51  ;;  %v2831_v39 = vpop.f32.mrb[57].mxu0  ;;  %v9040_v57 = vld [vmem:[%s12595_s11 + $0x214] ss:$8 sps:$4 sm:$0xff]  }
 0x347   : > { %v2903_v3 = vmax.f32 %v2887_v37, 0.0  ;;  %v2904_v5 = vmax.f32 %v2888_v32, 0.0  ;;  %v2905_v10 = vmax.f32 %v2889_v17, 0.0  ;;  %v8474_v40 = vadd.f32 %v2831_v39, %v10901_v54  ;;  %v2833_v63 = vpop.f32.mrb[58].mxu0  ;;  %v3098_v37 = vld [vmem:[#allocation2 + $0x68] sm:$0x11] }
 0x348   : > { %v11021_v43 = vsel %vm10974_vm0, %v2992_v61, 0  ;;  %v3081_v29 = vsel %vm10981_vm1, %v2993_v16, %v3080_v47  ;;  %v3000_v12 = vor.u32 %v2998_v42, %v2997_v55  ;;  %v3001_v14 = vrot.slane %v2997_v55, 4  ;;  %v2835_v15 = vpop.f32.mrb[59].mxu0  ;;  %v3092_v42 = vld [vmem:[#allocation2 + $0x58] sm:$0x11] }
 0x349   : > { %3079 = vst [vmem:[#allocation2 + $0x30] sm:$0xff] %v11021_v43  ;;  %3082 = vst [vmem:[#allocation2 + $0x38] sm:$0x11] %v3081_v29  ;;  %v8264_v21 = vpack.c.bf16 %v2903_v3, %v2902_v13  ;;  %v8265_v22 = vpack.c.bf16 %v2905_v10, %v2904_v5  ;;  %v2862_v23 = vmul.f32 %v8473_v50, %v10897_v38  ;;  %v9032_v13 = vld [vmem:[%s12595_s11 + $0x200] ss:$8 sps:$4 sm:$0xff]  }
 0x34a   : > { %v2863_v26 = vmul.f32 %v8474_v40, %v10904_v59  ;;  %v11030_v24 = vsel %vm10974_vm0, %v3000_v12, 0  ;;  %v3087_v36 = vsel %vm10981_vm1, %v3001_v14, %v3086_v27  ;;  %v8475_v41 = vadd.f32 %v2833_v63, %v10894_v51  ;;  %v9038_v40 = vld [vmem:[%s12595_s11 + $0x210] ss:$8 sps:$4 sm:$0xff]   ;;  %v9046_v63 = vld [vmem:[%s12595_s11 + $0x224] ss:$8 sps:$4 sm:$0xff]  }
 0x34b   : > { %v8476_v53 = vadd.f32 %v2835_v15, %v10901_v54  ;;  %3085 = vst [vmem:[#allocation2 + $0x40] sm:$0xff] %v11030_v24  ;;  %3088 = vst [vmem:[#allocation2 + $0x48] sm:$0x11] %v3087_v36  ;;  %v3003_v33 = vshrl.u32 %v8264_v21, 16  ;;  %v3006_v35 = vshll.u32 %v8264_v21, 16  ;;  %v3011_v44 = vshrl.u32 %v8265_v22, 16 }
 0x34c   : > { %v3014_v19 = vshll.u32 %v8265_v22, 16  ;;  %v2890_v48 = vadd.f32 %v10910_v6, %v2862_v23  ;;  %v2891_v45 = vadd.f32 %v10916_v20, %v2863_v26  ;;  %v2864_v46 = vmul.f32 %v8475_v41, %v10897_v38  ;;  %v11075_v21 = vld [vmem:[#allocation2 + $0x18] sm:$0x11] }
 0x34d   : > { %v2865_v18 = vmul.f32 %v8476_v53, %v10904_v59  ;;  %v3005_v56 = vrot.slane %v3003_v33, 7  ;;  %v3013_v51 = vrot.slane %v3011_v44, 7  ;;  %v7660_v54 = vcombine.high %v9462_v11, %v10992_v34  ;;  %v3104_v53 = vld [vmem:[#allocation2 + $0x78] sm:$0x11] }
 0x34e   : > { %v7659_v47 = vcombine.low %v9462_v11, %v10992_v34  ;;  %v2906_v32 = vmax.f32 %v2890_v48, 0.0  ;;  %v2907_v17 = vmax.f32 %v2891_v45, 0.0  ;;  %v2892_v38 = vadd.f32 %v10910_v6, %v2864_v46 }
 0x34f   : > { %v2893_v59 = vadd.f32 %v10916_v20, %v2865_v18  ;;  %v3008_v61 = vor.u32 %v3006_v35, %v3005_v56  ;;  %v3009_v16 = vrot.slane %v3005_v56, 4  ;;  %v3016_v55 = vor.u32 %v3014_v19, %v3013_v51  ;;  %3806 = vmatprep.mubr.bf16.mxu1 %v7660_v54  ;;  %v9044_v19 = vld [vmem:[%s12595_s11 + $0x220] ss:$8 sps:$4 sm:$0xff]  }
 0x350   : > { %v3017_v50 = vrot.slane %v3013_v51, 4  ;;  %v8266_v39 = vpack.c.bf16 %v2907_v17, %v2906_v32  ;;  %v2908_v27 = vmax.f32 %v2892_v38, 0.0  ;;  %3807 = vmatmul.mubr.bf16.vlgmr.msra.gmra.mrb[28].mxu1 %v7659_v47  ;;  %v3193_v11 = vshrl.u32 %v11001_v58, 16  ;;  %v11096_v51 = vld [vmem:[#allocation2 + $0x28] sm:$0x11] }
 0x351   : > { %v2909_v3 = vmax.f32 %v2893_v59, 0.0  ;;  %v11056_v6 = vsel %vm10974_vm0, %v3008_v61, 0  ;;  %v3093_v20 = vsel %vm10981_vm1, %v3009_v16, %v3092_v42  ;;  %v11062_v5 = vsel %vm10974_vm0, %v3016_v55, 0  ;;  %4132 = vmatpush1.bf16.msra.mxu1 %v9032_v13  ;;  %v3110_v54 = vld [vmem:[#allocation2 + $0x88] sm:$0x11] }
 0x352   : > { %v3099_v10 = vsel %vm10981_vm1, %v3017_v50, %v3098_v37  ;;  %3091 = vst [vmem:[#allocation2 + $0x50] sm:$0xff] %v11056_v6  ;;  %3094 = vst [vmem:[#allocation2 + $0x58] sm:$0x11] %v3093_v20  ;;  %v3019_v29 = vshrl.u32 %v8266_v39, 16  ;;  %v3022_v12 = vshll.u32 %v8266_v39, 16  ;;  %4133 = vmatprep.subr.bf16.mxu1 %v9040_v57  ;;  %v3196_v15 = vshll.u32 %v11001_v58, 16 }
 0x353   : > { %3097 = vst [vmem:[#allocation2 + $0x60] sm:$0xff] %v11062_v5  ;;  %3100 = vst [vmem:[#allocation2 + $0x68] sm:$0x11] %v3099_v10  ;;  %v8267_v14 = vpack.c.bf16 %v2909_v3, %v2908_v27  ;;  %v3207_v22 = vshrl.u32 %v11021_v43, 16  ;;  %v3210_v23 = vshll.u32 %v11021_v43, 16  ;;  %v7662_v26 = vcombine.high %v11001_v58, %v11021_v43 }
 0x354   : > { %v3181_v36 = vrot.slane %v3179_v9, 4  ;;  %v3021_v41 = vrot.slane %v3019_v29, 7  ;;  %v3184_v44 = vrot.slane %v3182_v49, 5  ;;  %v3188_v48 = vshll.u32 %v11075_v21, 16  ;;  %v9049_v49 = vld [vmem:[%s12595_s11 + $0x234] ss:$8 sps:$4 sm:$0xff]  }
 0x355   : > { %v3027_v33 = vshrl.u32 %v8267_v14, 16  ;;  %v3030_v35 = vshll.u32 %v8267_v14, 16  ;;  %4134 = vmatpush1.bf16.msra.mxu1 %v9038_v40  ;;  %3816 = vmatprep.mubr.bf16.mxu1 %v7662_v26  ;;  %v7661_v45 = vcombine.low %v11001_v58, %v11021_v43  ;;  %v3221_v9 = vshrl.u32 %v11030_v24, 16  ;;  %v11108_v59 = vld [vmem:[#allocation2 + $0x38] sm:$0x11] }
 0x356   : > { %v3224_v46 = vshll.u32 %v11030_v24, 16  ;;  %v3024_v18 = vor.u32 %v3022_v12, %v3021_v41  ;;  %v3025_v56 = vrot.slane %v3021_v41, 4  ;;  %4135 = vmatprep.subr.bf16.mxu1 %v9046_v63  ;;  %v3185_v34 = vor.u32 %v3184_v44, %v3181_v36  ;;  %v9047_v61 = vld [vmem:[%s12595_s11 + $0x230] ss:$8 sps:$4 sm:$0xff]   ;;  %v9052_v3 = vld [vmem:[%s12595_s11 + $0x244] ss:$8 sps:$4 sm:$0xff]  }
 0x357   : > { %v3029_v42 = vrot.slane %v3027_v33, 7  ;;  %v3190_v13 = vrot.slane %v3188_v48, 5  ;;  %v3235_v47 = vshrl.u32 %v11056_v6, 16  ;;  %v3238_v58 = vshll.u32 %v11056_v6, 16  ;;  %v9050_v12 = vld [vmem:[%s12595_s11 + $0x240] ss:$8 sps:$4 sm:$0xff]  }
 0x358   : > { %v7664_v43 = vcombine.high %v11030_v24, %v11056_v6  ;;  %v11104_v37 = vsel %vm10974_vm0, %v3024_v18, 0  ;;  %v3105_v32 = vsel %vm10981_vm1, %v3025_v56, %v3104_v53  ;;  %3817 = vmatmul.mubr.bf16.gmra.mrb[32].mxu1 %v7661_v45  ;;  %v3186_v57 = vrot.slane %v3185_v34, 4  ;;  %v9055_v33 = vld [vmem:[%s12595_s11 + $0x254] ss:$8 sps:$4 sm:$0xff]  }
 0x359   : > { %v3032_v17 = vor.u32 %v3030_v35, %v3029_v42  ;;  %v3033_v38 = vrot.slane %v3029_v42, 4  ;;  %3103 = vst [vmem:[#allocation2 + $0x70] sm:$0xff] %v11104_v37  ;;  %3106 = vst [vmem:[#allocation2 + $0x78] sm:$0x11] %v3105_v32  ;;  %4136 = vmatpush1.bf16.msra.mxu1 %v9044_v19  ;;  %v3195_v16 = vrot.slane %v3193_v11, 4  ;;  %v3198_v55 = vrot.slane %v3196_v15, 5 }
 0x35a   : > { %3826 = vmatprep.mubr.bf16.mxu1 %v7664_v43  ;;  %v3202_v50 = vshll.u32 %v11096_v51, 16  ;;  %4137 = vmatprep.subr.bf16.mxu1 %v9049_v49  ;;  %v3209_v20 = vrot.slane %v3207_v22, 4  ;;  %v3212_v10 = vrot.slane %v3210_v23, 5  ;;  %v3191_v11 = vsel %vm10938_vm12, %v3186_v57, %v3190_v13  ;;  %v11135_v22 = vld [vmem:[#allocation2 + $0x48] sm:$0x11] }
 0x35b   : > { %v11117_v39 = vsel %vm10974_vm0, %v3032_v17, 0  ;;  %v3111_v27 = vsel %vm10981_vm1, %v3033_v38, %v3110_v54  ;;  %v3199_v40 = vor.u32 %v3198_v55, %v3195_v16  ;;  %v3216_v63 = vshll.u32 %v11108_v59, 16  ;;  %v11139_v53 = vld [vmem:[#allocation2 + $0x58] sm:$0x11]  ;;  %v3848_v56 = vld [vmem:[#allocation2 + $0x10] sm:$0xee] }
 0x35c   : > { %3109 = vst [vmem:[#allocation2 + $0x80] sm:$0xff] %v11117_v39  ;;  %3112 = vst [vmem:[#allocation2 + $0x88] sm:$0x11] %v3111_v27  ;;  %v3204_v31 = vrot.slane %v3202_v50, 5  ;;  %v7619_v28 = vcombine.low %v10964_v60, %v3191_v11  ;;  %v7620_v29 = vcombine.high %v10964_v60, %v3191_v11  ;;  %v3213_v14 = vor.u32 %v3212_v10, %v3209_v20  ;;  %v11161_v32 = vld [vmem:[#allocation2 + $0x68] sm:$0x11] }
 0x35d   : > { %v7663_v15 = vcombine.low %v11030_v24, %v11056_v6  ;;  %4138 = vmatpush1.bf16.msra.mxu1 %v9047_v61  ;;  %v3200_v23 = vrot.slane %v3199_v40, 4  ;;  %v3218_v26 = vrot.slane %v3216_v63, 5  ;;  %v3249_v36 = vshrl.u32 %v11062_v5, 16  ;;  %v5700_v7 = vld [vmem:[#allocation2 + $0x58] sm:$0x11] }
 0x35e   : > { %v3252_v41 = vshll.u32 %v11062_v5, 16  ;;  %3533 = vmatprep.mubr.bf16.mxu0 %v7620_v29  ;;  %4139 = vmatprep.subr.bf16.mxu1 %v9052_v3  ;;  %v3214_v60 = vrot.slane %v3213_v14, 4  ;;  %v3263_v6 = vshrl.u32 %v11104_v37, 16  ;;  %v3266_v35 = vshll.u32 %v11104_v37, 16 }
 0x35f   : > { %v7666_v44 = vcombine.high %v11062_v5, %v11104_v37  ;;  %3534 = vmatmul.mubr.bf16.vlgmr.msra.gmra.mrb[60].mxu0 %v7619_v28  ;;  %v3205_v19 = vsel %vm10938_vm12, %v3200_v23, %v3204_v31  ;;  %v3223_v48 = vrot.slane %v3221_v9, 4  ;;  %v3226_v45 = vrot.slane %v3224_v46, 5  ;;  %v9053_v9 = vld [vmem:[%s12595_s11 + $0x250] ss:$8 sps:$4 sm:$0xff]   ;;  %v9056_v31 = vld [vmem:[%s12595_s11 + $0x260] ss:$8 sps:$4 sm:$0xff]  }
 0x360   : > { %v3230_v18 = vshll.u32 %v11135_v22, 16  ;;  %v3219_v42 = vsel %vm10938_vm12, %v3214_v60, %v3218_v26  ;;  %3827 = vmatmul.mubr.bf16.gmra.mrb[36].mxu1 %v7663_v15  ;;  %v3237_v34 = vrot.slane %v3235_v47, 4  ;;  %v3240_v49 = vrot.slane %v3238_v58, 5  ;;  %v9058_v47 = vld [vmem:[%s12595_s11 + $0x264] ss:$8 sps:$4 sm:$0xff]  }
 0x361   : > { %v3244_v54 = vshll.u32 %v11139_v53, 16  ;;  %v7622_v13 = vcombine.high %v3205_v19, %v3219_v42  ;;  %4140 = vmatpush1.bf16.msra.mxu1 %v9050_v12  ;;  %v7621_v43 = vcombine.low %v3205_v19, %v3219_v42  ;;  %3836 = vmatprep.mubr.bf16.mxu1 %v7666_v44  ;;  %v3227_v24 = vor.u32 %v3226_v45, %v3223_v48  ;;  %v11174_v16 = vld [vmem:[#allocation2 + $0x78] sm:$0x11]  ;;  %v9062_v48 = vld [vmem:[%s12595_s11 + $0x280] ss:$8 sps:$4 sm:$0xff]  }
 0x362   : > { %v3232_v46 = vrot.slane %v3230_v18, 5  ;;  %4141 = vmatprep.subr.bf16.mxu1 %v9055_v33  ;;  %v3241_v58 = vor.u32 %v3240_v49, %v3237_v34  ;;  %v7665_v38 = vcombine.low %v11062_v5, %v11104_v37  ;;  %v7700_v61 = vrot.slane %v3848_v56, 9  ;;  %v9064_v33 = vld [vmem:[%s12595_s11 + $0x284] ss:$8 sps:$4 sm:$0xff]   ;;  %v9067_v45 = vld [vmem:[%s12595_s11 + $0x294] ss:$8 sps:$4 sm:$0xff]  }
 0x363   : > { %v3246_v17 = vrot.slane %v3244_v54, 5  ;;  %3543 = vmatprep.mubr.bf16.mxu0 %v7622_v13  ;;  %v3228_v55 = vrot.slane %v3227_v24, 4  ;;  %v3880_v50 = vrot.slane %v11075_v21, 5  ;;  %v3251_v27 = vrot.slane %v3249_v36, 4  ;;  %v9059_v36 = vld [vmem:[%s12595_s11 + $0x270] ss:$8 sps:$4 sm:$0xff]  }
 0x364   : > { %v3254_v3 = vrot.slane %v3252_v41, 5  ;;  %v3242_v20 = vrot.slane %v3241_v58, 4  ;;  %v3258_v10 = vshll.u32 %v11161_v32, 16  ;;  %v3265_v11 = vrot.slane %v3263_v6, 4  ;;  %v9065_v42 = vld [vmem:[%s12595_s11 + $0x290] ss:$8 sps:$4 sm:$0xff]  }
 0x365   : > { %v3268_v40 = vrot.slane %v3266_v35, 5  ;;  %4142 = vmatpush1.bf16.msra.mxu1 %v9053_v9  ;;  %v11187_v63 = vsel %vm11170_vm4, %v7699_v8, %v3876_v52  ;;  %v11191_v21 = vsel %vm11170_vm4, %v7700_v61, %v3880_v50  ;;  %v3272_v29 = vshll.u32 %v11174_v16, 16  ;;  %v9070_v34 = vld [vmem:[%s12595_s11 + $0x2a4] ss:$8 sps:$4 sm:$0xff]   ;;  %v11229_v49 = vld [vmem:[#allocation2 + $0x30] sm:$0xff] }
 0x366   : > { %v3255_v28 = vor.u32 %v3254_v3, %v3251_v27  ;;  %4143 = vmatprep.subr.bf16.mxu1 %v9058_v47  ;;  %v3233_v12 = vsel %vm10938_vm12, %v3228_v55, %v3232_v46  ;;  %v3247_v25 = vsel %vm10938_vm12, %v3242_v20, %v3246_v17  ;;  %v3260_v14 = vrot.slane %v3258_v10, 5  ;;  %v11231_v54 = vld [vmem:[#allocation2 + $0x20] sm:$0xff]  ;;  %v9073_v9 = vld [vmem:[%s12595_s11 + $0x2b4] ss:$8 sps:$4 sm:$0xff]   ;;  %v9071_v24 = vld [vmem:[%s12595_s11 + $0x2b0] ss:$8 sps:$4 sm:$0xff]  }
 0x367   : > { %3544 = vmatmul.mubr.bf16.gmra.mrb[64].mxu0 %v7621_v43  ;;  %v7624_v8 = vcombine.high %v3233_v12, %v3247_v25  ;;  %v7623_v52 = vcombine.low %v3233_v12, %v3247_v25  ;;  %v3269_v15 = vor.u32 %v3268_v40, %v3265_v11  ;;  %v7740_v23 = vcombine.high %v11187_v63, %v11191_v21  ;;  %v9068_v13 = vld [vmem:[%s12595_s11 + $0x2a0] ss:$8 sps:$4 sm:$0xff]   ;;  %v9076_v47 = vld [vmem:[%s12595_s11 + $0x2c4] ss:$8 sps:$4 sm:$0xff]   ;;  %v11249_v58 = vld [vmem:[#allocation2 + $0x50] sm:$0xff] }
 0x368   : > { %3837 = vmatmul.mubr.bf16.gmra.mrb[40].mxu1 %v7665_v38  ;;  %v3274_v26 = vrot.slane %v3272_v29, 5  ;;  %v3256_v41 = vrot.slane %v3255_v28, 4  ;;  %v11251_v17 = vld [vmem:[#allocation2 + $0x40] sm:$0xff]  ;;  %v9079_v50 = vld [vmem:[%s12595_s11 + $0x2d4] ss:$8 sps:$4 sm:$0xff]   ;;  %v6173_v0 = vrot.slane %v5700_v7, 5 }
 0x369   : > { %3553 = vmatprep.mubr.bf16.mxu0 %v7624_v8  ;;  %4144 = vmatpush1.bf16.msra.mxu1 %v9056_v31  ;;  %v3270_v60 = vrot.slane %v3269_v15, 4  ;;  %v9074_v38 = vld [vmem:[%s12595_s11 + $0x2c0] ss:$8 sps:$4 sm:$0xff]   ;;  %v11263_v27 = vld [vmem:[#allocation2 + $0x70] sm:$0xff]  ;;  %v9082_v10 = vld [vmem:[%s12595_s11 + $0x2e4] ss:$8 sps:$4 sm:$0xff]  }
 0x36a   : > { %4163 = vmatprep.mubr.bf16.mxu1 %v7740_v23  ;;  %4145 = vmatprep.subr.bf16.mxu1 %v9061_v1  ;;  %v3261_v6 = vsel %vm10938_vm12, %v3256_v41, %v3260_v14  ;;  %v3850_v3 = vld [vmem:[#allocation2 + $0x30] sm:$0xee]  ;;  %v11271_v11 = vld [vmem:[#allocation2 + $0x60] sm:$0xff]  ;;  %v11273_v40 = vld [vmem:[#allocation2 + $0x18] sm:$0x11]  ;;  %v3888_v8 = vrot.slane %v11108_v59, 5 }
 0x36b   : > { %v3275_v35 = vsel %vm10938_vm12, %v3270_v60, %v3274_v26  ;;  %v9077_v20 = vld [vmem:[%s12595_s11 + $0x2d0] ss:$8 sps:$4 sm:$0xff]   ;;  %v4993_v28 = vld [vmem:[#allocation2 + $0x20] sm:$0xee]  ;;  %v7702_v1 = vrot.slane %v3850_v3, 9  ;;  %v5018_v60 = vrot.slane %v11273_v40, 5 }
 0x36c   : > { %v7626_v44 = vcombine.high %v3261_v6, %v3275_v35  ;;  %v7625_v19 = vcombine.low %v3261_v6, %v3275_v35  ;;  %v4992_v31 = vld [vmem:[#allocation2 + $0x10] sm:$0xee]  ;;  %v3849_v25 = vld [vmem:[#allocation2 + $0x20] sm:$0xee]  ;;  %v11285_v15 = vld [vmem:[#allocation2 + $0x38] sm:$0x11] }
 0x36d   : > { %4146 = vmatpush1.bf16.msra.mxu1 %v9059_v36  ;;  %v9080_v14 = vld [vmem:[%s12595_s11 + $0x2e0] ss:$8 sps:$4 sm:$0xff]   ;;  %v4994_v26 = vld [vmem:[#allocation2 + $0x30] sm:$0xee]  ;;  %v7923_v41 = vrot.slane %v4992_v31, 9  ;;  %v7701_v6 = vrot.slane %v3849_v25, 9 }
 0x36e   : > { %4147 = vmatprep.subr.bf16.mxu1 %v9064_v33  ;;  %v11287_v23 = vld [vmem:[#allocation2 + $0x48] sm:$0x11]  ;;  %v9085_v36 = vld [vmem:[%s12595_s11 + $0x2f4] ss:$8 sps:$4 sm:$0xff]   ;;  %v7924_v33 = vrot.slane %v4993_v28, 9  ;;  %v4640_v25 = vshll.u32 %v11271_v11, 16 }
 0x36f   : > { %3554 = vmatmul.mubr.bf16.gmra.mrb[68].mxu0 %v7623_v52  ;;  %v11280_v52 = vld [vmem:[#allocation2 + $0x28] sm:$0x11]  ;;  %v4995_v59 = vld [vmem:[#allocation2 + $0x40] sm:$0xee]  ;;  %v11293_v35 = vld [vmem:[#allocation2 + $0x58] sm:$0x11] }
 0x370   : > { %3563 = vmatprep.mubr.bf16.mxu0 %v7626_v44  ;;  %v4996_v44 = vld [vmem:[#allocation2 + $0x50] sm:$0xee]  ;;  %v9088_v28 = vld [vmem:[%s12595_s11 + $0x304] ss:$8 sps:$4 sm:$0xff]   ;;  %v4654_v62 = vshll.u32 %v11263_v27, 16  ;;  %v4642_v55 = vrot.slane %v4640_v25, 5 }
 0x371   : > { %4148 = vmatpush1.bf16.msra.mxu1 %v9062_v48  ;;  %v11298_v48 = vsel %vm11170_vm4, %v7702_v1, %v3888_v8  ;;  %v4998_v31 = vld [vmem:[#allocation2 + $0x70] sm:$0xee]  ;;  %v11322_v1 = vld [vmem:[#allocation2 + $0x78] sm:$0x11]  ;;  %v4651_v8 = vshrl.u32 %v11263_v27, 16 }
 0x372   : > { %4149 = vmatprep.subr.bf16.mxu1 %v9067_v45  ;;  %v11300_v45 = vld [vmem:[#allocation2 + $0x68] sm:$0x11]  ;;  %v7929_v12 = vrot.slane %v4998_v31, 9  ;;  %v3852_v29 = vld [vmem:[#allocation2 + $0x50] sm:$0xee]  ;;  %v4656_v46 = vrot.slane %v4654_v62, 5 }
 0x373   : > { %v3851_v61 = vld [vmem:[#allocation2 + $0x40] sm:$0xee]  ;;  %v4653_v43 = vrot.slane %v4651_v8, 4  ;;  %v9089_v62 = vld [vmem:[%s12595_s11 + $0x310] ss:$8 sps:$4 sm:$0xff]  }
 0x374   : > { %v3854_v25 = vld [vmem:[#allocation2 + $0x70] sm:$0xee]  ;;  %v11430_v31 = vld [vmem:[#allocation2 + $0x38] sm:$0x11] }
 0x375   : > { %4150 = vmatpush1.bf16.msra.mxu1 %v9065_v42  ;;  %v5022_v42 = vrot.slane %v11280_v52, 5  ;;  %v9103_v56 = vld [vmem:[%s12595_s11 + $0x354] ss:$8 sps:$4 sm:$0xff]   ;;  %v9101_v7 = vld [vmem:[%s12595_s11 + $0x350] ss:$8 sps:$4 sm:$0xff]  }
 0x376   : > { %4151 = vmatprep.subr.bf16.mxu1 %v9070_v34  ;;  %v7925_v34 = vrot.slane %v4994_v26, 9  ;;  %v6139_v26 = vld [vmem:[#allocation2 + $0x60] sm:$0xee]  ;;  %v6140_v18 = vld [vmem:[#allocation2 + $0x70] sm:$0xee] }
 0x377   : > { %3564 = vmatmul.mubr.bf16.gmra.mrb[72].mxu0 %v7625_v19  ;;  %v3884_v19 = vrot.slane %v11096_v51, 5  ;;  %v9083_v51 = vld [vmem:[%s12595_s11 + $0x2f0] ss:$8 sps:$4 sm:$0xff]   ;;  %v11315_v3 = vsel %vm11170_vm4, %v7924_v33, %v5022_v42  ;;  %v4999_v42 = vld [vmem:[#allocation2 + $0x80] sm:$0xee]  ;;  %v8151_v4 = vrot.slane %v6139_v26, 9 }
 0x379   : > { %4152 = vmatpush1.bf16.msra.mxu1 %v9068_v13  ;;  %v4637_v13 = vshrl.u32 %v11271_v11, 16 }
 0x37a   : > { %4153 = vmatprep.subr.bf16.mxu1 %v9073_v9  ;;  %v5026_v9 = vrot.slane %v11285_v15, 5 }
 0x37d   : > { %4154 = vmatpush1.bf16.msra.mxu1 %v9071_v24  ;;  %v7926_v24 = vrot.slane %v4995_v59, 9 }
 0x37e   : > { %4155 = vmatprep.subr.bf16.mxu1 %v9076_v47  ;;  %v5030_v47 = vrot.slane %v11287_v23, 5 }
 0x380   : > { %v11337_v33 = vsel %vm11170_vm4, %v7926_v24, %v5030_v47  ;;  %v5042_v47 = vrot.slane %v11322_v1, 5 }
 0x381   : > { %4156 = vmatpush1.bf16.msra.mxu1 %v9074_v38  ;;  %v4997_v38 = vld [vmem:[#allocation2 + $0x60] sm:$0xee] }
 0x382   : > { %4157 = vmatprep.subr.bf16.mxu1 %v9079_v50  ;;  %v11311_v50 = vsel %vm11170_vm4, %v7923_v41, %v5018_v60  ;;  %v11329_v60 = vld [vmem:[#allocation2 + $0x88] sm:$0x11]  ;;  %v7928_v59 = vrot.slane %v4997_v38, 9 }
 0x383   : > { %v9086_v38 = vld [vmem:[%s12595_s11 + $0x300] ss:$8 sps:$4 sm:$0xff]  }
 0x385   : > { %4158 = vmatpush1.bf16.msra.mxu1 %v9077_v20  ;;  %v7927_v20 = vrot.slane %v4996_v44, 9  ;;  %v5038_v44 = vrot.slane %v11300_v45, 5 }
 0x386   : > { %4159 = vmatprep.subr.bf16.mxu1 %v9082_v10  ;;  %v5034_v10 = vrot.slane %v11293_v35, 5 }
 0x387   : > { %v11353_v24 = vsel %vm11170_vm4, %v7928_v59, %v5038_v44  ;;  %v9091_v59 = vld [vmem:[%s12595_s11 + $0x314] ss:$8 sps:$4 sm:$0xff]   ;;  %v4639_v44 = vrot.slane %v4637_v13, 4 }
 0x388   : > { %v6136_v13 = vld [vmem:[#allocation2 + $0x30] sm:$0xee] }
 0x389   : > { %4160 = vmatpush1.bf16.msra.mxu1 %v9080_v14  ;;  %v11333_v14 = vsel %vm11170_vm4, %v7925_v34, %v5026_v9  ;;  %v3885_v34 = vsel %vm11170_vm4, %v7701_v6, %v3884_v19  ;;  %v11349_v9 = vsel %vm11170_vm4, %v7927_v20, %v5034_v10  ;;  %v7930_v19 = vrot.slane %v4999_v42, 9 }
 0x38a   : > { %4161 = vmatprep.subr.bf16.mxu1 %v9085_v36  ;;  %v5046_v20 = vrot.slane %v11329_v60, 5  ;;  %v7739_v10 = vcombine.low %v11187_v63, %v11191_v21  ;;  %v11372_v42 = vsel %vm11170_vm4, %v7929_v12, %v5042_v47  ;;  %v7704_v63 = vrot.slane %v3852_v29, 9  ;;  %v9094_v12 = vld [vmem:[%s12595_s11 + $0x324] ss:$8 sps:$4 sm:$0xff]  }
 0x38b   : > { %v3896_v21 = vrot.slane %v11139_v53, 5  ;;  %v7703_v29 = vrot.slane %v3851_v61, 9  ;;  %v3892_v53 = vrot.slane %v11135_v22, 5  ;;  %v4643_v8 = vor.u32 %v4642_v55, %v4639_v44  ;;  %v9092_v61 = vld [vmem:[%s12595_s11 + $0x320] ss:$8 sps:$4 sm:$0xff]  }
 0x38c   : > { %v11376_v6 = vsel %vm11170_vm4, %v7930_v19, %v5046_v20  ;;  %v4657_v47 = vor.u32 %v4656_v46, %v4653_v43  ;;  %v11390_v19 = vld [vmem:[#allocation2 + $0x68] sm:$0x11]  ;;  %v11396_v20 = vld [vmem:[#allocation2 + $0x78] sm:$0x11]  ;;  %v7706_v46 = vrot.slane %v3854_v25, 9  ;;  %v3904_v55 = vrot.slane %v11174_v16, 5 }
 0x38d   : > { %4162 = vmatpush1.bf16.msra.mxu1 %v9083_v51  ;;  %v7742_v51 = vcombine.high %v3885_v34, %v11298_v48  ;;  %v3893_v22 = vsel %vm11170_vm4, %v7703_v29, %v3892_v53  ;;  %v9097_v43 = vld [vmem:[%s12595_s11 + $0x334] ss:$8 sps:$4 sm:$0xff]   ;;  %v11413_v44 = vrot.slane %v4643_v8, 4  ;;  %v9100_v16 = vld [vmem:[%s12595_s11 + $0x344] ss:$8 sps:$4 sm:$0xff]   ;;  %v3900_v29 = vrot.slane %v11161_v32, 5 }
 0x38e   : > { %4461 = vmatprep.subr.bf16.mxu1 %v9088_v28  ;;  %v11422_v53 = vld [vmem:[#allocation2 + $0x28] sm:$0x11]  ;;  %v11424_v25 = vld [vmem:[#allocation2 + $0x98] sm:$0x11]  ;;  %v6142_v28 = vld [vmem:[#allocation2 + $0x90] sm:$0xee] }
 0x38f   : > { %v9098_v32 = vld [vmem:[%s12595_s11 + $0x340] ss:$8 sps:$4 sm:$0xff]   ;;  %v6177_v2 = vrot.slane %v11390_v19, 5 }
 0x390   : > { %4164 = vmatmul.mubr.bf16.vlgmr.msra.gmra.mrb[28].mxu1 %v7739_v10  ;;  %v7741_v10 = vcombine.low %v3885_v34, %v11298_v48  ;;  %v9095_v34 = vld [vmem:[%s12595_s11 + $0x330] ss:$8 sps:$4 sm:$0xff]  }
 0x391   : > { %4173 = vmatprep.mubr.bf16.mxu1 %v7742_v51  ;;  %4462 = vmatpush1.bf16.msra.mxu1 %v9086_v38  ;;  %v11394_v38 = vsel %vm11170_vm4, %v7704_v63, %v3896_v21  ;;  %v3853_v51 = vld [vmem:[#allocation2 + $0x60] sm:$0xee]  ;;  %v11415_v63 = vrot.slane %v4657_v47, 4  ;;  %v5789_v21 = vshll.u32 %v11396_v20, 16 }
 0x392   : > { %4463 = vmatprep.subr.bf16.mxu1 %v9091_v59  ;;  %v5775_v59 = vshll.u32 %v11390_v19, 16  ;;  %v7744_v48 = vcombine.high %v3893_v22, %v11394_v38  ;;  %v7743_v41 = vcombine.low %v3893_v22, %v11394_v38  ;;  %v6141_v38 = vld [vmem:[#allocation2 + $0x80] sm:$0xee] }
 0x393   : > { %v5791_v47 = vrot.slane %v5789_v21, 5 }
 0x394   : > { %v5777_v8 = vrot.slane %v5775_v59, 5 }
 0x395   : > { %4464 = vmatpush1.bf16.msra.mxu1 %v9089_v62  ;;  %v6135_v62 = vld [vmem:[#allocation2 + $0x20] sm:$0xee] }
 0x396   : > { %4465 = vmatprep.subr.bf16.mxu1 %v9094_v12  ;;  %v7705_v12 = vrot.slane %v3853_v51, 9  ;;  %v5698_v51 = vld [vmem:[#allocation2 + $0x48] sm:$0x11]  ;;  %v8147_v36 = vrot.slane %v6135_v62, 9  ;;  %v8148_v62 = vrot.slane %v6136_v13, 9  ;;  %v6165_v13 = vrot.slane %v11430_v31, 5 }
 0x398   : > { %4174 = vmatmul.mubr.bf16.gmra.mrb[32].mxu1 %v7741_v10  ;;  %v11428_v10 = vsel %vm11170_vm4, %v7706_v46, %v3904_v55  ;;  %v6161_v46 = vrot.slane %v11422_v53, 5  ;;  %v6137_v55 = vld [vmem:[#allocation2 + $0x40] sm:$0xee]  ;;  %v3901_v59 = vsel %vm11170_vm4, %v7705_v12, %v3900_v29  ;;  %v8154_v12 = vrot.slane %v6142_v28, 9 }
 0x399   : > { %4183 = vmatprep.mubr.bf16.mxu1 %v7744_v48  ;;  %4466 = vmatpush1.bf16.msra.mxu1 %v9092_v61  ;;  %v11438_v61 = vsel %vm10938_vm12, %v11413_v44, %v5777_v8  ;;  %v6138_v8 = vld [vmem:[#allocation2 + $0x50] sm:$0xee]  ;;  %v6189_v29 = vrot.slane %v11424_v25, 5  ;;  %v6169_v48 = vrot.slane %v5698_v51, 5  ;;  %v11466_v28 = vsel %vm11170_vm4, %v8148_v62, %v6165_v13  ;;  %v9112_v13 = vld [vmem:[%s12595_s11 + $0x380] ss:$8 sps:$4 sm:$0xff]  }
 0x39a   : > { %4467 = vmatprep.subr.bf16.mxu1 %v9097_v43  ;;  %v11443_v43 = vsel %vm10938_vm12, %v11415_v63, %v5791_v47  ;;  %v7746_v47 = vcombine.high %v3901_v59, %v11428_v10  ;;  %v11460_v21 = vsel %vm11170_vm4, %v8147_v36, %v6161_v46  ;;  %v8150_v22 = vrot.slane %v6138_v8, 9 }
 0x39b   : > { %12653 = vst [vmem:[#allocation15_spill] sm:$0xff] %v11443_v43  ;;  %v5706_v43 = vld [vmem:[#allocation2 + $0x88] sm:$0x11]  ;;  %v6181_v25 = vrot.slane %v11396_v20, 5  ;;  %v8187_v26 = vcombine.low %v11460_v21, %v11466_v28  ;;  %v8153_v51 = vrot.slane %v6141_v38, 9  ;;  %v11493_v46 = vsel %vm11170_vm4, %v8151_v4, %v6177_v2 }
 0x39c   : > { %v11482_v19 = vsel %vm11170_vm4, %v8150_v22, %v6173_v0  ;;  %v11505_v62 = vsel %vm11170_vm4, %v8154_v12, %v6189_v29  ;;  %v9104_v2 = vld [vmem:[%s12595_s11 + $0x360] ss:$8 sps:$4 sm:$0xff]   ;;  %v7745_v8 = vcombine.low %v3901_v59, %v11428_v10  ;;  %v9109_v10 = vld [vmem:[%s12595_s11 + $0x370] ss:$8 sps:$4 sm:$0xff]   ;;  %v9114_v59 = vld [vmem:[%s12595_s11 + $0x384] ss:$8 sps:$4 sm:$0xff]  }
 0x39d   : > { %4468 = vmatpush1.bf16.msra.mxu1 %v9095_v34  ;;  %v8149_v34 = vrot.slane %v6137_v55, 9  ;;  %v9115_v38 = vld [vmem:[%s12595_s11 + $0x390] ss:$8 sps:$4 sm:$0xff]   ;;  %v9120_v22 = vld [vmem:[%s12595_s11 + $0x3a4] ss:$8 sps:$4 sm:$0xff]  }
 0x39e   : > { %4469 = vmatprep.subr.bf16.mxu1 %v9100_v16  ;;  %v8152_v16 = vrot.slane %v6140_v18, 9  ;;  %v9106_v18 = vld [vmem:[%s12595_s11 + $0x364] ss:$8 sps:$4 sm:$0xff]  }
 0x39f   : > { %v11470_v36 = vsel %vm11170_vm4, %v8149_v34, %v6169_v48  ;;  %v6185_v48 = vrot.slane %v5706_v43, 5  ;;  %v9111_v43 = vld [vmem:[%s12595_s11 + $0x374] ss:$8 sps:$4 sm:$0xff]  }
 0x3a0   : > { %4184 = vmatmul.mubr.bf16.gmra.mrb[36].mxu1 %v7743_v41  ;;  %v8188_v41 = vcombine.high %v11460_v21, %v11466_v28  ;;  %v8190_v20 = vcombine.high %v11470_v36, %v11482_v19  ;;  %v11497_v0 = vsel %vm11170_vm4, %v8152_v16, %v6181_v25  ;;  %v9117_v34 = vld [vmem:[%s12595_s11 + $0x394] ss:$8 sps:$4 sm:$0xff]   ;;  %v9118_v16 = vld [vmem:[%s12595_s11 + $0x3a0] ss:$8 sps:$4 sm:$0xff]  }
 0x3a1   : > { %4193 = vmatprep.mubr.bf16.mxu1 %v7746_v47  ;;  %4470 = vmatpush1.bf16.msra.mxu1 %v9098_v32  ;;  %v8189_v32 = vcombine.low %v11470_v36, %v11482_v19  ;;  %v8191_v55 = vcombine.low %v11493_v46, %v11497_v0  ;;  %v11512_v4 = vsel %vm11170_vm4, %v8153_v51, %v6185_v48  ;;  %v11515_v47 = vld [vmem:[#allocation2 + $0x10] sm:$0xff]  ;;  %v9126_v51 = vld [vmem:[%s12595_s11 + $0x3c4] ss:$8 sps:$4 sm:$0xff]   ;;  %v6588_v28 = vld [vmem:[%s12598_s14 + $0x58] sm:$0xff] }
 0x3a2   : > { %4471 = vmatprep.subr.bf16.mxu1 %v9103_v56  ;;  %v8192_v56 = vcombine.high %v11493_v46, %v11497_v0  ;;  %v8194_v12 = vcombine.high %v11512_v4, %v11505_v62  ;;  %v8193_v29 = vcombine.low %v11512_v4, %v11505_v62  ;;  %v7812_v57 = vcombine.high %v11515_v47, %v11231_v54  ;;  %v9123_v25 = vld [vmem:[%s12595_s11 + $0x3b4] ss:$8 sps:$4 sm:$0xff]   ;;  %v6605_v36 = vld [vmem:[%s12598_s14 + $0xe0] sm:$0xff]  ;;  %v6606_v19 = vld [vmem:[%s12598_s14 + $0xe8] sm:$0xff] }
 0x3a3   : > { %v9129_v48 = vld [vmem:[%s12595_s11 + $0x3d4] ss:$8 sps:$4 sm:$0xff]   ;;  %v8449_v46 = vpack.c.bf16 %v6606_v19, %v6605_v36 }
 0x3a4   : > { %v6587_v21 = vld [vmem:[%s12598_s14 + $0x50] sm:$0xff] }
 0x3a5   : > { %4472 = vmatpush1.bf16.msra.mxu1 %v9101_v7  ;;  %v9121_v7 = vld [vmem:[%s12595_s11 + $0x3b0] ss:$8 sps:$4 sm:$0xff]  }
 0x3a6   : > { %4473 = vmatprep.subr.bf16.mxu1 %v9106_v18  ;;  %v9124_v18 = vld [vmem:[%s12595_s11 + $0x3c0] ss:$8 sps:$4 sm:$0xff]   ;;  %v6607_v0 = vld [vmem:[%s12598_s14 + $0xf0] sm:$0xff] }
 0x3a7   : > { %v6591_v4 = vld [vmem:[%s12598_s14 + $0x70] sm:$0xff] }
 0x3a8   : > { %4194 = vmatmul.mubr.bf16.gmra.mrb[40].mxu1 %v7745_v8  ;;  %v9132_v8 = vld [vmem:[%s12595_s11 + $0x3e4] ss:$8 sps:$4 sm:$0xff]  }
 0x3a9   : > { %4474 = vmatpush1.bf16.msra.mxu1 %v9104_v2  ;;  %4493 = vmatprep.mubr.bf16.mxu1 %v7812_v57  ;;  %v9127_v2 = vld [vmem:[%s12595_s11 + $0x3d0] ss:$8 sps:$4 sm:$0xff]   ;;  %v9135_v57 = vld [vmem:[%s12595_s11 + $0x3f4] ss:$8 sps:$4 sm:$0xff]  }
 0x3aa   : > { %4475 = vmatprep.subr.bf16.mxu1 %v9111_v43  ;;  %v9130_v43 = vld [vmem:[%s12595_s11 + $0x3e0] ss:$8 sps:$4 sm:$0xff]  }
 0x3ad   : > { %4476 = vmatpush1.bf16.msra.mxu1 %v9109_v10  ;;  %v9133_v10 = vld [vmem:[%s12595_s11 + $0x3f0] ss:$8 sps:$4 sm:$0xff]  }
 0x3ae   : > { %4477 = vmatprep.subr.bf16.mxu1 %v9114_v59  ;;  %v9138_v59 = vld [vmem:[%s12595_s11 + $0x404] ss:$8 sps:$4 sm:$0xff]  }
 0x3b1   : > { %4478 = vmatpush1.bf16.msra.mxu1 %v9112_v13  ;;  %v9136_v13 = vld [vmem:[%s12595_s11 + $0x400] ss:$8 sps:$4 sm:$0xff]  }
 0x3b2   : > { %4479 = vmatprep.subr.bf16.mxu1 %v9117_v34  ;;  %v7811_v34 = vcombine.low %v11515_v47, %v11231_v54 }
 0x3b5   : > { %4480 = vmatpush1.bf16.msra.mxu1 %v9115_v38  ;;  %v9142_v38 = vld [vmem:[%s12595_s11 + $0x414] ss:$8 sps:$4 sm:$0xff]  }
 0x3b6   : > { %4481 = vmatprep.subr.bf16.mxu1 %v9120_v22  ;;  %v7814_v22 = vcombine.high %v11229_v49, %v11251_v17 }
 0x3b9   : > { %4482 = vmatpush1.bf16.msra.mxu1 %v9118_v16  ;;  %v9140_v16 = vld [vmem:[%s12595_s11 + $0x410] ss:$8 sps:$4 sm:$0xff]  }
 0x3ba   : > { %4483 = vmatprep.subr.bf16.mxu1 %v9123_v25  ;;  %v9146_v25 = vld [vmem:[%s12595_s11 + $0x424] ss:$8 sps:$4 sm:$0xff]  }
 0x3bd   : > { %4484 = vmatpush1.bf16.msra.mxu1 %v9121_v7  ;;  %v4581_v7 = vshrl.u32 %v11231_v54, 16 }
 0x3be   : > { %4485 = vmatprep.subr.bf16.mxu1 %v9126_v51  ;;  %v4584_v51 = vshll.u32 %v11231_v54, 16 }
 0x3c1   : > { %4486 = vmatpush1.bf16.msra.mxu1 %v9124_v18  ;;  %v9144_v18 = vld [vmem:[%s12595_s11 + $0x420] ss:$8 sps:$4 sm:$0xff]  }
 0x3c2   : > { %4487 = vmatprep.subr.bf16.mxu1 %v9129_v48  ;;  %v7813_v48 = vcombine.low %v11229_v49, %v11251_v17 }
 0x3c5   : > { %4488 = vmatpush1.bf16.msra.mxu1 %v9127_v2  ;;  %v9149_v2 = vld [vmem:[%s12595_s11 + $0x434] ss:$8 sps:$4 sm:$0xff]  }
 0x3c6   : > { %4489 = vmatprep.subr.bf16.mxu1 %v9132_v8  ;;  %v4567_v8 = vshrl.u32 %v11515_v47, 16 }
 0x3c9   : > { %4490 = vmatpush1.bf16.msra.mxu1 %v9130_v43  ;;  %v4570_v43 = vshll.u32 %v11515_v47, 16 }
 0x3ca   : > { %4491 = vmatprep.subr.bf16.mxu1 %v9135_v57  ;;  %v7816_v57 = vcombine.high %v11249_v58, %v11062_v5 }
 0x3cd   : > { %4492 = vmatpush1.bf16.msra.mxu1 %v9133_v10  ;;  %v4583_v10 = vrot.slane %v4581_v7, 4  ;;  %v9155_v7 = vld [vmem:[%s12595_s11 + $0x454] ss:$8 sps:$4 sm:$0xff]  }
 0x3ce   : > { %4903 = vmatprep.subr.bf16.mxu1 %v9138_v59  ;;  %v4586_v59 = vrot.slane %v4584_v51, 5 }
 0x3d0   : > { %4494 = vmatmul.mubr.bf16.vlgmr.msra.gmra.mrb[28].mxu1 %v7811_v34  ;;  %v9152_v34 = vld [vmem:[%s12595_s11 + $0x444] ss:$8 sps:$4 sm:$0xff]   ;;  %v4587_v47 = vor.u32 %v4586_v59, %v4583_v10  ;;  %v9156_v59 = vld [vmem:[%s12595_s11 + $0x460] ss:$8 sps:$4 sm:$0xff]  }
 0x3d1   : > { %4503 = vmatprep.mubr.bf16.mxu1 %v7814_v22  ;;  %4904 = vmatpush1.bf16.msra.mxu1 %v9136_v13  ;;  %v9147_v13 = vld [vmem:[%s12595_s11 + $0x430] ss:$8 sps:$4 sm:$0xff]   ;;  %v4572_v22 = vrot.slane %v4570_v43, 5  ;;  %v9158_v43 = vld [vmem:[%s12595_s11 + $0x464] ss:$8 sps:$4 sm:$0xff]  }
 0x3d2   : > { %4905 = vmatprep.subr.bf16.mxu1 %v9142_v38  ;;  %v4569_v38 = vrot.slane %v4567_v8, 4  ;;  %v12654_v8 = vcombine.high %v11104_v37, %v11117_v39 }
 0x3d4   : > { %v4573_v51 = vor.u32 %v4572_v22, %v4569_v38  ;;  %v12655_v22 = vcombine.low %v11104_v37, %v11117_v39  ;;  %v9167_v37 = vld [vmem:[%s12595_s11 + $0x494] ss:$8 sps:$4 sm:$0xff]   ;;  %v9165_v39 = vld [vmem:[%s12595_s11 + $0x490] ss:$8 sps:$4 sm:$0xff]  }
 0x3d5   : > { %4906 = vmatpush1.bf16.msra.mxu1 %v9140_v16  ;;  %v9150_v16 = vld [vmem:[%s12595_s11 + $0x440] ss:$8 sps:$4 sm:$0xff]  }
 0x3d6   : > { %4907 = vmatprep.subr.bf16.mxu1 %v9146_v25  ;;  %v7815_v25 = vcombine.low %v11249_v58, %v11062_v5  ;;  %v9153_v5 = vld [vmem:[%s12595_s11 + $0x450] ss:$8 sps:$4 sm:$0xff]  }
 0x3d8   : > { %4504 = vmatmul.mubr.bf16.gmra.mrb[32].mxu1 %v7813_v48  ;;  %v4576_v48 = vshll.u32 %v11273_v40, 16 }
 0x3d9   : > { %4513 = vmatprep.mubr.bf16.mxu1 %v7816_v57  ;;  %4908 = vmatpush1.bf16.msra.mxu1 %v9144_v18  ;;  %v4590_v18 = vshll.u32 %v11280_v52, 16  ;;  %v4574_v57 = vrot.slane %v4573_v51, 4  ;;  %v9168_v51 = vld [vmem:[%s12595_s11 + $0x4a0] ss:$8 sps:$4 sm:$0xff]  }
 0x3da   : > { %4909 = vmatprep.subr.bf16.mxu1 %v9149_v2  ;;  %v4588_v2 = vrot.slane %v4587_v47, 4  ;;  %v4578_v10 = vrot.slane %v4576_v48, 5  ;;  %v9159_v47 = vld [vmem:[%s12595_s11 + $0x470] ss:$8 sps:$4 sm:$0xff]  }
 0x3db   : > { %v4592_v52 = vrot.slane %v4590_v18, 5  ;;  %v9173_v18 = vld [vmem:[%s12595_s11 + $0x4b4] ss:$8 sps:$4 sm:$0xff]   ;;  %v9171_v48 = vld [vmem:[%s12595_s11 + $0x4b0] ss:$8 sps:$4 sm:$0xff]  }
 0x3dd   : > { %4910 = vmatpush1.bf16.msra.mxu1 %v9147_v13  ;;  %v11637_v40 = vsel %vm10938_vm12, %v4588_v2, %v4592_v52  ;;  %v11644_v13 = vsel %vm10938_vm12, %v4574_v57, %v4578_v10  ;;  %v9176_v2 = vld [vmem:[%s12595_s11 + $0x4c4] ss:$8 sps:$4 sm:$0xff]   ;;  %v9179_v57 = vld [vmem:[%s12595_s11 + $0x4d4] ss:$8 sps:$4 sm:$0xff]   ;;  %v4595_v52 = vshrl.u32 %v11229_v49, 16  ;;  %v4598_v10 = vshll.u32 %v11229_v49, 16 }
 0x3de   : > { %4911 = vmatprep.subr.bf16.mxu1 %v9152_v34  ;;  %v9161_v34 = vld [vmem:[%s12595_s11 + $0x474] ss:$8 sps:$4 sm:$0xff]   ;;  %v7884_v38 = vcombine.high %v11644_v13, %v11637_v40 }
 0x3e0   : > { %4514 = vmatmul.mubr.bf16.gmra.mrb[36].mxu1 %v7815_v25  ;;  %v9162_v25 = vld [vmem:[%s12595_s11 + $0x480] ss:$8 sps:$4 sm:$0xff]  }
 0x3e1   : > { %4523 = vmatprep.mubr.bf16.mxu1 %v12654_v8  ;;  %4912 = vmatpush1.bf16.msra.mxu1 %v9150_v16  ;;  %v9164_v16 = vld [vmem:[%s12595_s11 + $0x484] ss:$8 sps:$4 sm:$0xff]   ;;  %v4609_v8 = vshrl.u32 %v11251_v17, 16 }
 0x3e2   : > { %4913 = vmatprep.subr.bf16.mxu1 %v9155_v7  ;;  %v9170_v7 = vld [vmem:[%s12595_s11 + $0x4a4] ss:$8 sps:$4 sm:$0xff]  }
 0x3e5   : > { %4914 = vmatpush1.bf16.msra.mxu1 %v9153_v5  ;;  %v4612_v5 = vshll.u32 %v11251_v17, 16 }
 0x3e6   : > { %4915 = vmatprep.subr.bf16.mxu1 %v9158_v43  ;;  %v9174_v43 = vld [vmem:[%s12595_s11 + $0x4c0] ss:$8 sps:$4 sm:$0xff]  }
 0x3e8   : > { %4524 = vmatmul.mubr.bf16.gmra.mrb[40].mxu1 %v12655_v22  ;;  %v9182_v22 = vld [vmem:[%s12595_s11 + $0x4e4] ss:$8 sps:$4 sm:$0xff]  }
 0x3e9   : > { %4916 = vmatpush1.bf16.msra.mxu1 %v9156_v59  ;;  %4935 = vmatprep.mubr.bf16.mxu1 %v7884_v38  ;;  %v4611_v59 = vrot.slane %v4609_v8, 4  ;;  %v9177_v38 = vld [vmem:[%s12595_s11 + $0x4d0] ss:$8 sps:$4 sm:$0xff]  }
 0x3ea   : > { %4917 = vmatprep.subr.bf16.mxu1 %v9161_v34  ;;  %v4614_v34 = vrot.slane %v4612_v5, 5  ;;  %v9183_v5 = vld [vmem:[%s12595_s11 + $0x4f0] ss:$8 sps:$4 sm:$0xff]  }
 0x3ed   : > { %4918 = vmatpush1.bf16.msra.mxu1 %v9159_v47  ;;  %v4597_v47 = vrot.slane %v4595_v52, 4 }
 0x3ee   : > { %4919 = vmatprep.subr.bf16.mxu1 %v9164_v16  ;;  %v4600_v16 = vrot.slane %v4598_v10, 5 }
 0x3f1   : > { %4920 = vmatpush1.bf16.msra.mxu1 %v9162_v25  ;;  %v4615_v25 = vor.u32 %v4614_v34, %v4611_v59 }
 0x3f2   : > { %4921 = vmatprep.subr.bf16.mxu1 %v9167_v37  ;;  %v9180_v37 = vld [vmem:[%s12595_s11 + $0x4e0] ss:$8 sps:$4 sm:$0xff]  }
 0x3f3   : > { %v4616_v8 = vrot.slane %v4615_v25, 4 }
 0x3f5   : > { %4922 = vmatpush1.bf16.msra.mxu1 %v9165_v39  ;;  %v9185_v39 = vld [vmem:[%s12595_s11 + $0x4f4] ss:$8 sps:$4 sm:$0xff]  }
 0x3f6   : > { %4923 = vmatprep.subr.bf16.mxu1 %v9170_v7  ;;  %v4601_v7 = vor.u32 %v4600_v16, %v4597_v47  ;;  %v9186_v47 = vld [vmem:[%s12595_s11 + $0x500] ss:$8 sps:$4 sm:$0xff]   ;;  %v7883_v16 = vcombine.low %v11644_v13, %v11637_v40  ;;  %v9189_v40 = vld [vmem:[%s12595_s11 + $0x510] ss:$8 sps:$4 sm:$0xff]   ;;  %v9194_v13 = vld [vmem:[%s12595_s11 + $0x524] ss:$8 sps:$4 sm:$0xff]  }
 0x3f9   : > { %4924 = vmatpush1.bf16.msra.mxu1 %v9168_v51  ;;  %v4618_v51 = vshll.u32 %v11287_v23, 16  ;;  %v4602_v23 = vrot.slane %v4601_v7, 4  ;;  %v4646_v7 = vshll.u32 %v11300_v45, 16 }
 0x3fa   : > { %4925 = vmatprep.subr.bf16.mxu1 %v9173_v18  ;;  %v4623_v18 = vshrl.u32 %v11249_v58, 16 }
 0x3fb   : > { %v4620_v52 = vrot.slane %v4618_v51, 5 }
 0x3fc   : > { %v4625_v10 = vrot.slane %v4623_v18, 4  ;;  %v4632_v18 = vshll.u32 %v11293_v35, 16 }
 0x3fd   : > { %4926 = vmatpush1.bf16.msra.mxu1 %v9171_v48  ;;  %v4626_v48 = vshll.u32 %v11249_v58, 16 }
 0x3fe   : > { %4927 = vmatprep.subr.bf16.mxu1 %v9176_v2  ;;  %v4604_v2 = vshll.u32 %v11285_v15, 16  ;;  %v4621_v15 = vsel %vm10938_vm12, %v4616_v8, %v4620_v52  ;;  %v4634_v45 = vrot.slane %v4632_v18, 5  ;;  %v9201_v18 = vld [vmem:[%s12595_s11 + $0x550] ss:$8 sps:$4 sm:$0xff]  }
 0x3ff   : > { %v4628_v59 = vrot.slane %v4626_v48, 5 }
 0x400   : > { %v4606_v34 = vrot.slane %v4604_v2, 5 }
 0x401   : > { %4928 = vmatpush1.bf16.msra.mxu1 %v9174_v43  ;;  %v11713_v43 = vld [vmem:[#allocation2 + $0x80] sm:$0xff] }
 0x402   : > { %4929 = vmatprep.subr.bf16.mxu1 %v9179_v57  ;;  %v9188_v57 = vld [vmem:[%s12595_s11 + $0x504] ss:$8 sps:$4 sm:$0xff]   ;;  %v4607_v25 = vsel %vm10938_vm12, %v4602_v23, %v4606_v34  ;;  %v9192_v23 = vld [vmem:[%s12595_s11 + $0x520] ss:$8 sps:$4 sm:$0xff]   ;;  %v4674_v34 = vshll.u32 %v11329_v60, 16 }
 0x403   : > { %v7886_v51 = vcombine.high %v4607_v25, %v4621_v15  ;;  %v7885_v52 = vcombine.low %v4607_v25, %v4621_v15  ;;  %v9195_v15 = vld [vmem:[%s12595_s11 + $0x530] ss:$8 sps:$4 sm:$0xff]  }
 0x405   : > { %4930 = vmatpush1.bf16.msra.mxu1 %v9177_v38  ;;  %v4665_v38 = vshrl.u32 %v11713_v43, 16 }
 0x406   : > { %4931 = vmatprep.subr.bf16.mxu1 %v9182_v22  ;;  %v4668_v22 = vshll.u32 %v11713_v43, 16 }
 0x407   : > { %v4667_v48 = vrot.slane %v4665_v38, 4 }
 0x408   : > { %v4670_v2 = vrot.slane %v4668_v22, 5 }
 0x409   : > { %4932 = vmatpush1.bf16.msra.mxu1 %v9180_v37  ;;  %v9191_v37 = vld [vmem:[%s12595_s11 + $0x514] ss:$8 sps:$4 sm:$0xff]  }
 0x40a   : > { %4933 = vmatprep.subr.bf16.mxu1 %v9185_v39  ;;  %v4629_v39 = vor.u32 %v4628_v59, %v4625_v10  ;;  %v9197_v59 = vld [vmem:[%s12595_s11 + $0x534] ss:$8 sps:$4 sm:$0xff]  }
 0x40c   : > { %v4630_v8 = vrot.slane %v4629_v39, 4 }
 0x40d   : > { %4934 = vmatpush1.bf16.msra.mxu1 %v9183_v5  ;;  %v4648_v5 = vrot.slane %v4646_v7, 5  ;;  %v9203_v7 = vld [vmem:[%s12595_s11 + $0x554] ss:$8 sps:$4 sm:$0xff]  }
 0x40e   : > { %5273 = vmatprep.subr.bf16.mxu1 %v9188_v57  ;;  %v4671_v57 = vor.u32 %v4670_v2, %v4667_v48  ;;  %v4635_v10 = vsel %vm10938_vm12, %v4630_v8, %v4634_v45  ;;  %v9206_v48 = vld [vmem:[%s12595_s11 + $0x564] ss:$8 sps:$4 sm:$0xff]   ;;  %v9207_v8 = vld [vmem:[%s12595_s11 + $0x570] ss:$8 sps:$4 sm:$0xff]   ;;  %v9210_v45 = vld [vmem:[%s12595_s11 + $0x580] ss:$8 sps:$4 sm:$0xff]  }
 0x40f   : > { %v4649_v35 = vsel %vm10938_vm12, %v11413_v44, %v4648_v5  ;;  %v4660_v44 = vshll.u32 %v11322_v1, 16  ;;  %v9198_v1 = vld [vmem:[%s12595_s11 + $0x540] ss:$8 sps:$4 sm:$0xff]   ;;  %v9212_v5 = vld [vmem:[%s12595_s11 + $0x584] ss:$8 sps:$4 sm:$0xff]  }
 0x410   : > { %4936 = vmatmul.mubr.bf16.vlgmr.msra.gmra.mrb[28].mxu1 %v7883_v16  ;;  %v7888_v38 = vcombine.high %v4635_v10, %v4649_v35  ;;  %v11753_v22 = vrot.slane %v4671_v57, 4  ;;  %v4676_v16 = vrot.slane %v4674_v34, 5  ;;  %v9213_v57 = vld [vmem:[%s12595_s11 + $0x590] ss:$8 sps:$4 sm:$0xff]  }
 0x411   : > { %4945 = vmatprep.mubr.bf16.mxu1 %v7886_v51  ;;  %5274 = vmatpush1.bf16.msra.mxu1 %v9186_v47  ;;  %v9200_v47 = vld [vmem:[%s12595_s11 + $0x544] ss:$8 sps:$4 sm:$0xff]   ;;  %v4662_v25 = vrot.slane %v4660_v44, 5  ;;  %v9221_v44 = vld [vmem:[%s12595_s11 + $0x5b4] ss:$8 sps:$4 sm:$0xff]  }
 0x412   : > { %5275 = vmatprep.subr.bf16.mxu1 %v9191_v37  ;;  %v4677_v60 = vsel %vm10938_vm12, %v11753_v22, %v4676_v16  ;;  %v7887_v37 = vcombine.low %v4635_v10, %v4649_v35  ;;  %v9215_v35 = vld [vmem:[%s12595_s11 + $0x594] ss:$8 sps:$4 sm:$0xff]   ;;  %v9224_v16 = vld [vmem:[%s12595_s11 + $0x5c4] ss:$8 sps:$4 sm:$0xff]  }
 0x413   : > { %v4663_v39 = vsel %vm10938_vm12, %v11415_v63, %v4662_v25  ;;  %v9204_v63 = vld [vmem:[%s12595_s11 + $0x560] ss:$8 sps:$4 sm:$0xff]  }
 0x414   : > { %v7890_v51 = vcombine.high %v4663_v39, %v4677_v60  ;;  %v7889_v2 = vcombine.low %v4663_v39, %v4677_v60  ;;  %v9227_v39 = vld [vmem:[%s12595_s11 + $0x5d4] ss:$8 sps:$4 sm:$0xff]  }
 0x415   : > { %5276 = vmatpush1.bf16.msra.mxu1 %v9189_v40  ;;  %v9209_v40 = vld [vmem:[%s12595_s11 + $0x574] ss:$8 sps:$4 sm:$0xff]  }
 0x416   : > { %5277 = vmatprep.subr.bf16.mxu1 %v9194_v13  ;;  %v12656_v13 = vcombine.high %v11311_v50, %v11315_v3 }
 0x418   : > { %4946 = vmatmul.mubr.bf16.gmra.mrb[32].mxu1 %v7885_v52  ;;  %v9218_v52 = vld [vmem:[%s12595_s11 + $0x5a4] ss:$8 sps:$4 sm:$0xff]  }
 0x419   : > { %4955 = vmatprep.mubr.bf16.mxu1 %v7888_v38  ;;  %5278 = vmatpush1.bf16.msra.mxu1 %v9192_v23  ;;  %v9216_v38 = vld [vmem:[%s12595_s11 + $0x5a0] ss:$8 sps:$4 sm:$0xff]  }
 0x41a   : > { %5279 = vmatprep.subr.bf16.mxu1 %v9197_v59 }
 0x41d   : > { %5280 = vmatpush1.bf16.msra.mxu1 %v9195_v15  ;;  %v9219_v15 = vld [vmem:[%s12595_s11 + $0x5b0] ss:$8 sps:$4 sm:$0xff]  }
 0x41e   : > { %5281 = vmatprep.subr.bf16.mxu1 %v9200_v47 }
 0x420   : > { %4956 = vmatmul.mubr.bf16.gmra.mrb[36].mxu1 %v7887_v37  ;;  %v9222_v37 = vld [vmem:[%s12595_s11 + $0x5c0] ss:$8 sps:$4 sm:$0xff]  }
 0x421   : > { %4965 = vmatprep.mubr.bf16.mxu1 %v7890_v51  ;;  %5282 = vmatpush1.bf16.msra.mxu1 %v9198_v1 }
 0x422   : > { %5283 = vmatprep.subr.bf16.mxu1 %v9203_v7  ;;  %v9225_v7 = vld [vmem:[%s12595_s11 + $0x5d0] ss:$8 sps:$4 sm:$0xff]  }
 0x425   : > { %5284 = vmatpush1.bf16.msra.mxu1 %v9201_v18  ;;  %v9230_v18 = vld [vmem:[%s12595_s11 + $0x5e4] ss:$8 sps:$4 sm:$0xff]  }
 0x426   : > { %5285 = vmatprep.subr.bf16.mxu1 %v9206_v48 }
 0x428   : > { %4966 = vmatmul.mubr.bf16.gmra.mrb[40].mxu1 %v7889_v2 }
 0x429   : > { %5286 = vmatpush1.bf16.msra.mxu1 %v9204_v63  ;;  %5305 = vmatprep.mubr.bf16.mxu1 %v12656_v13  ;;  %v9233_v13 = vld [vmem:[%s12595_s11 + $0x5f4] ss:$8 sps:$4 sm:$0xff]  }
 0x42a   : > { %5287 = vmatprep.subr.bf16.mxu1 %v9209_v40  ;;  %v9228_v40 = vld [vmem:[%s12595_s11 + $0x5e0] ss:$8 sps:$4 sm:$0xff]  }
 0x42d   : > { %5288 = vmatpush1.bf16.msra.mxu1 %v9207_v8  ;;  %v9231_v8 = vld [vmem:[%s12595_s11 + $0x5f0] ss:$8 sps:$4 sm:$0xff]  }
 0x42e   : > { %5289 = vmatprep.subr.bf16.mxu1 %v9212_v5 }
 0x431   : > { %5290 = vmatpush1.bf16.msra.mxu1 %v9210_v45  ;;  %v9236_v45 = vld [vmem:[%s12595_s11 + $0x604] ss:$8 sps:$4 sm:$0xff]  }
 0x432   : > { %v11803_v23 = vpop.f32.mrb[60].mxu0  ;;  %5291 = vmatprep.subr.bf16.mxu1 %v9215_v35 }
 0x433   : > { %v11808_v10 = vpop.f32.mrb[61].mxu0 }
 0x434   : > { %v11810_v59 = vpop.f32.mrb[62].mxu0 }
 0x435   : > { %v11812_v34 = vpop.f32.mrb[63].mxu0  ;;  %5292 = vmatpush1.bf16.msra.mxu1 %v9213_v57 }
 0x436   : > { %5293 = vmatprep.subr.bf16.mxu1 %v9218_v52 }
 0x439   : > { %5294 = vmatpush1.bf16.msra.mxu1 %v9216_v38  ;;  %v9234_v38 = vld [vmem:[%s12595_s11 + $0x600] ss:$8 sps:$4 sm:$0xff]  }
 0x43a   : > { %v11823_v47 = vpop.f32.mrb[64].mxu0  ;;  %5295 = vmatprep.subr.bf16.mxu1 %v9221_v44  ;;  %v9239_v44 = vld [vmem:[%s12595_s11 + $0x614] ss:$8 sps:$4 sm:$0xff]  }
 0x43b   : > { %v11828_v25 = vpop.f32.mrb[65].mxu0 }
 0x43c   : > { %v11830_v60 = vpop.f32.mrb[66].mxu0 }
 0x43d   : > { %v11832_v1 = vpop.f32.mrb[67].mxu0  ;;  %5296 = vmatpush1.bf16.msra.mxu1 %v9219_v15  ;;  %v12657_v15 = vcombine.low %v11311_v50, %v11315_v3  ;;  %v9240_v50 = vld [vmem:[%s12595_s11 + $0x620] ss:$8 sps:$4 sm:$0xff]   ;;  %v9245_v3 = vld [vmem:[%s12595_s11 + $0x634] ss:$8 sps:$4 sm:$0xff]  }
 0x43e   : > { %5297 = vmatprep.subr.bf16.mxu1 %v9224_v16  ;;  %v12658_v16 = vcombine.high %v11333_v14, %v11337_v33 }
 0x441   : > { %5298 = vmatpush1.bf16.msra.mxu1 %v9222_v37  ;;  %v9237_v37 = vld [vmem:[%s12595_s11 + $0x610] ss:$8 sps:$4 sm:$0xff]  }
 0x442   : > { %v11843_v51 = vpop.f32.mrb[68].mxu0  ;;  %5299 = vmatprep.subr.bf16.mxu1 %v9227_v39  ;;  %v9242_v39 = vld [vmem:[%s12595_s11 + $0x624] ss:$8 sps:$4 sm:$0xff]  }
 0x443   : > { %v11848_v48 = vpop.f32.mrb[69].mxu0 }
 0x444   : > { %v11850_v63 = vpop.f32.mrb[70].mxu0 }
 0x445   : > { %v11852_v2 = vpop.f32.mrb[71].mxu0  ;;  %5300 = vmatpush1.bf16.msra.mxu1 %v9225_v7  ;;  %v12659_v7 = vcombine.low %v11333_v14, %v11337_v33  ;;  %v9246_v14 = vld [vmem:[%s12595_s11 + $0x640] ss:$8 sps:$4 sm:$0xff]   ;;  %v9251_v33 = vld [vmem:[%s12595_s11 + $0x654] ss:$8 sps:$4 sm:$0xff]  }
 0x446   : > { %5301 = vmatprep.subr.bf16.mxu1 %v9230_v18  ;;  %v12660_v18 = vcombine.high %v11349_v9, %v11353_v24 }
 0x449   : > { %5302 = vmatpush1.bf16.msra.mxu1 %v9228_v40  ;;  %v9243_v40 = vld [vmem:[%s12595_s11 + $0x630] ss:$8 sps:$4 sm:$0xff]  }
 0x44a   : > { %v11863_v5 = vpop.f32.mrb[72].mxu0  ;;  %5303 = vmatprep.subr.bf16.mxu1 %v9233_v13  ;;  %v9248_v13 = vld [vmem:[%s12595_s11 + $0x644] ss:$8 sps:$4 sm:$0xff]  }
 0x44b   : > { %v11868_v35 = vpop.f32.mrb[73].mxu0 }
 0x44c   : > { %v11870_v57 = vpop.f32.mrb[74].mxu0 }
 0x44d   : > { %v11872_v52 = vpop.f32.mrb[75].mxu0  ;;  %5304 = vmatpush1.bf16.msra.mxu1 %v9231_v8  ;;  %v12661_v8 = vcombine.low %v11349_v9, %v11353_v24  ;;  %v9252_v9 = vld [vmem:[%s12595_s11 + $0x660] ss:$8 sps:$4 sm:$0xff]   ;;  %v9259_v24 = vld [vmem:[%s12595_s11 + $0x674] ss:$8 sps:$4 sm:$0xff]  }
 0x44e   : > { %5604 = vmatprep.subr.bf16.mxu1 %v9236_v45  ;;  %v12662_v45 = vcombine.high %v11372_v42, %v11376_v6 }
 0x450   : > { %5306 = vmatmul.mubr.bf16.vlgmr.msra.gmra.mrb[28].mxu1 %v12657_v15  ;;  %v12663_v15 = vcombine.low %v11372_v42, %v11376_v6  ;;  %v9260_v6 = vld [vmem:[%s12595_s11 + $0x680] ss:$8 sps:$4 sm:$0xff]   ;;  %v9265_v42 = vld [vmem:[%s12595_s11 + $0x694] ss:$8 sps:$4 sm:$0xff]  }
 0x451   : > { %5315 = vmatprep.mubr.bf16.mxu1 %v12658_v16  ;;  %5605 = vmatpush1.bf16.msra.mxu1 %v9234_v38  ;;  %v9249_v38 = vld [vmem:[%s12595_s11 + $0x650] ss:$8 sps:$4 sm:$0xff]   ;;  %v12664_v16 = vcombine.high %v11231_v54, %v11229_v49 }
 0x452   : > { %5606 = vmatprep.subr.bf16.mxu1 %v9239_v44  ;;  %v9254_v44 = vld [vmem:[%s12595_s11 + $0x664] ss:$8 sps:$4 sm:$0xff]  }
 0x455   : > { %5607 = vmatpush1.bf16.msra.mxu1 %v9237_v37  ;;  %v9257_v37 = vld [vmem:[%s12595_s11 + $0x670] ss:$8 sps:$4 sm:$0xff]  }
 0x456   : > { %5608 = vmatprep.subr.bf16.mxu1 %v9242_v39  ;;  %v9262_v39 = vld [vmem:[%s12595_s11 + $0x684] ss:$8 sps:$4 sm:$0xff]  }
 0x458   : > { %5316 = vmatmul.mubr.bf16.gmra.mrb[32].mxu1 %v12659_v7  ;;  %v9266_v7 = vld [vmem:[%s12595_s11 + $0x6a0] ss:$8 sps:$4 sm:$0xff]  }
 0x459   : > { %5325 = vmatprep.mubr.bf16.mxu1 %v12660_v18  ;;  %5609 = vmatpush1.bf16.msra.mxu1 %v9240_v50  ;;  %v9263_v50 = vld [vmem:[%s12595_s11 + $0x690] ss:$8 sps:$4 sm:$0xff]   ;;  %v9271_v18 = vld [vmem:[%s12595_s11 + $0x6b4] ss:$8 sps:$4 sm:$0xff]  }
 0x45a   : > { %5610 = vmatprep.subr.bf16.mxu1 %v9245_v3  ;;  %v9268_v3 = vld [vmem:[%s12595_s11 + $0x6a4] ss:$8 sps:$4 sm:$0xff]  }
 0x45d   : > { %5611 = vmatpush1.bf16.msra.mxu1 %v9243_v40  ;;  %v9269_v40 = vld [vmem:[%s12595_s11 + $0x6b0] ss:$8 sps:$4 sm:$0xff]  }
 0x45e   : > { %5612 = vmatprep.subr.bf16.mxu1 %v9248_v13  ;;  %v9274_v13 = vld [vmem:[%s12595_s11 + $0x6c4] ss:$8 sps:$4 sm:$0xff]  }
 0x460   : > { %5326 = vmatmul.mubr.bf16.gmra.mrb[36].mxu1 %v12661_v8  ;;  %v9275_v8 = vld [vmem:[%s12595_s11 + $0x6d0] ss:$8 sps:$4 sm:$0xff]  }
 0x461   : > { %5335 = vmatprep.mubr.bf16.mxu1 %v12662_v45  ;;  %5613 = vmatpush1.bf16.msra.mxu1 %v9246_v14  ;;  %v9272_v14 = vld [vmem:[%s12595_s11 + $0x6c0] ss:$8 sps:$4 sm:$0xff]   ;;  %v9280_v45 = vld [vmem:[%s12595_s11 + $0x6e4] ss:$8 sps:$4 sm:$0xff]  }
 0x462   : > { %5614 = vmatprep.subr.bf16.mxu1 %v9251_v33  ;;  %v9277_v33 = vld [vmem:[%s12595_s11 + $0x6d4] ss:$8 sps:$4 sm:$0xff]  }
 0x465   : > { %5615 = vmatpush1.bf16.msra.mxu1 %v9249_v38  ;;  %v9278_v38 = vld [vmem:[%s12595_s11 + $0x6e0] ss:$8 sps:$4 sm:$0xff]  }
 0x466   : > { %5616 = vmatprep.subr.bf16.mxu1 %v9254_v44  ;;  %v9283_v44 = vld [vmem:[%s12595_s11 + $0x6f4] ss:$8 sps:$4 sm:$0xff]  }
 0x468   : > { %5336 = vmatmul.mubr.bf16.gmra.mrb[40].mxu1 %v12663_v15  ;;  %v9284_v15 = vld [vmem:[%s12595_s11 + $0x700] ss:$8 sps:$4 sm:$0xff]  }
 0x469   : > { %5617 = vmatpush1.bf16.msra.mxu1 %v9252_v9  ;;  %5636 = vmatprep.mubr.bf16.mxu1 %v12664_v16  ;;  %v9281_v9 = vld [vmem:[%s12595_s11 + $0x6f0] ss:$8 sps:$4 sm:$0xff]   ;;  %v9290_v16 = vld [vmem:[%s12595_s11 + $0x714] ss:$8 sps:$4 sm:$0xff]  }
 0x46a   : > { %5618 = vmatprep.subr.bf16.mxu1 %v9259_v24  ;;  %v9286_v24 = vld [vmem:[%s12595_s11 + $0x704] ss:$8 sps:$4 sm:$0xff]  }
 0x46d   : > { %5619 = vmatpush1.bf16.msra.mxu1 %v9257_v37  ;;  %v12665_v37 = vcombine.low %v11231_v54, %v11229_v49  ;;  %v9292_v49 = vld [vmem:[%s12595_s11 + $0x720] ss:$8 sps:$4 sm:$0xff]   ;;  %v9298_v54 = vld [vmem:[%s12595_s11 + $0x734] ss:$8 sps:$4 sm:$0xff]  }
 0x46e   : > { %5620 = vmatprep.subr.bf16.mxu1 %v9262_v39  ;;  %v12666_v39 = vcombine.high %v11251_v17, %v11249_v58 }
 0x471   : > { %5621 = vmatpush1.bf16.msra.mxu1 %v9260_v6  ;;  %v9288_v6 = vld [vmem:[%s12595_s11 + $0x710] ss:$8 sps:$4 sm:$0xff]  }
 0x472   : > { %5622 = vmatprep.subr.bf16.mxu1 %v9265_v42  ;;  %v5695_v42 = vld [vmem:[#allocation2 + $0x30] sm:$0xff] }
 0x475   : > { %5623 = vmatpush1.bf16.msra.mxu1 %v9263_v50  ;;  %v9294_v50 = vld [vmem:[%s12595_s11 + $0x724] ss:$8 sps:$4 sm:$0xff]  }
 0x476   : > { %5624 = vmatprep.subr.bf16.mxu1 %v9268_v3  ;;  %v5693_v3 = vld [vmem:[#allocation2 + $0x20] sm:$0xff] }
 0x479   : > { %5625 = vmatpush1.bf16.msra.mxu1 %v9266_v7  ;;  %v5724_v7 = vshrl.u32 %v5695_v42, 16 }
 0x47a   : > { %5626 = vmatprep.subr.bf16.mxu1 %v9271_v18  ;;  %v5727_v18 = vshll.u32 %v5695_v42, 16  ;;  %v12669_v42 = vcombine.low %v11271_v11, %v11263_v27 }
 0x47d   : > { %5627 = vmatpush1.bf16.msra.mxu1 %v9269_v40  ;;  %v5710_v40 = vshrl.u32 %v5693_v3, 16 }
 0x47e   : > { %5628 = vmatprep.subr.bf16.mxu1 %v9274_v13  ;;  %v5713_v13 = vshll.u32 %v5693_v3, 16 }
 0x481   : > { %5629 = vmatpush1.bf16.msra.mxu1 %v9272_v14  ;;  %v12667_v14 = vcombine.low %v11251_v17, %v11249_v58  ;;  %v9300_v17 = vld [vmem:[%s12595_s11 + $0x740] ss:$8 sps:$4 sm:$0xff]  }
 0x482   : > { %5630 = vmatprep.subr.bf16.mxu1 %v9277_v33  ;;  %v5726_v33 = vrot.slane %v5724_v7, 4  ;;  %v9303_v7 = vld [vmem:[%s12595_s11 + $0x750] ss:$8 sps:$4 sm:$0xff]  }
 0x485   : > { %5631 = vmatpush1.bf16.msra.mxu1 %v9275_v8  ;;  %v5729_v8 = vrot.slane %v5727_v18, 5 }
 0x486   : > { %5632 = vmatprep.subr.bf16.mxu1 %v9280_v45  ;;  %v12668_v45 = vcombine.high %v11271_v11, %v11263_v27  ;;  %v9306_v11 = vld [vmem:[%s12595_s11 + $0x760] ss:$8 sps:$4 sm:$0xff]  }
 0x487   : > { %v5730_v58 = vor.u32 %v5729_v8, %v5726_v33  ;;  %v9309_v33 = vld [vmem:[%s12595_s11 + $0x770] ss:$8 sps:$4 sm:$0xff]   ;;  %v6593_v8 = vld [vmem:[%s12598_s14 + $0x80] sm:$0xff] }
 0x489   : > { %5633 = vmatpush1.bf16.msra.mxu1 %v9278_v38  ;;  %v9296_v38 = vld [vmem:[%s12595_s11 + $0x730] ss:$8 sps:$4 sm:$0xff]   ;;  %v5731_v3 = vrot.slane %v5730_v58, 4 }
 0x48a   : > { %5634 = vmatprep.subr.bf16.mxu1 %v9283_v44  ;;  %v9302_v44 = vld [vmem:[%s12595_s11 + $0x744] ss:$8 sps:$4 sm:$0xff]   ;;  %v6596_v58 = vld [vmem:[%s12598_s14 + $0x98] sm:$0xff] }
 0x48d   : > { %5635 = vmatpush1.bf16.msra.mxu1 %v9281_v9  ;;  %v5712_v9 = vrot.slane %v5710_v40, 4 }
 0x48e   : > { %6046 = vmatprep.subr.bf16.mxu1 %v9286_v24  ;;  %v5715_v24 = vrot.slane %v5713_v13, 5  ;;  %v9311_v13 = vld [vmem:[%s12595_s11 + $0x774] ss:$8 sps:$4 sm:$0xff]  }
 0x490   : > { %5637 = vmatmul.mubr.bf16.vlgmr.msra.gmra.mrb[28].mxu1 %v12665_v37  ;;  %v5733_v37 = vshll.u32 %v11430_v31, 16  ;;  %v9308_v31 = vld [vmem:[%s12595_s11 + $0x764] ss:$8 sps:$4 sm:$0xff]  }
 0x491   : > { %5646 = vmatprep.mubr.bf16.mxu1 %v12666_v39  ;;  %6047 = vmatpush1.bf16.msra.mxu1 %v9284_v15  ;;  %v9305_v15 = vld [vmem:[%s12595_s11 + $0x754] ss:$8 sps:$4 sm:$0xff]   ;;  %v12037_v39 = vld [vmem:[#allocation2] sm:$0xff] }
 0x492   : > { %6048 = vmatprep.subr.bf16.mxu1 %v9290_v16  ;;  %v5716_v16 = vor.u32 %v5715_v24, %v5712_v9  ;;  %v6578_v9 = vld [vmem:[%s12598_s14 + $0x8] sm:$0xff]  ;;  %v6595_v24 = vld [vmem:[%s12598_s14 + $0x90] sm:$0xff] }
 0x494   : > { %v5717_v18 = vrot.slane %v5716_v16, 4  ;;  %v6579_v16 = vld [vmem:[%s12598_s14 + $0x10] sm:$0xff] }
 0x495   : > { %6049 = vmatpush1.bf16.msra.mxu1 %v9288_v6  ;;  %v8042_v6 = vcombine.high %v11713_v43, %v12037_v39 }
 0x496   : > { %6050 = vmatprep.subr.bf16.mxu1 %v9294_v50  ;;  %v5719_v50 = vshll.u32 %v11422_v53, 16  ;;  %v8041_v53 = vcombine.low %v11713_v43, %v12037_v39  ;;  %v9314_v43 = vld [vmem:[%s12595_s11 + $0x784] ss:$8 sps:$4 sm:$0xff]  }
 0x498   : > { %5647 = vmatmul.mubr.bf16.gmra.mrb[32].mxu1 %v12667_v14 }
 0x499   : > { %5656 = vmatprep.mubr.bf16.mxu1 %v12668_v45  ;;  %6051 = vmatpush1.bf16.msra.mxu1 %v9292_v49  ;;  %v5735_v49 = vrot.slane %v5733_v37, 5  ;;  %v6594_v45 = vld [vmem:[%s12598_s14 + $0x88] sm:$0xff]  ;;  %v6580_v37 = vld [vmem:[%s12598_s14 + $0x18] sm:$0xff] }
 0x49a   : > { %6052 = vmatprep.subr.bf16.mxu1 %v9298_v54  ;;  %v5721_v54 = vrot.slane %v5719_v50, 5  ;;  %v8431_v50 = vpack.c.bf16 %v6580_v37, %v6579_v16  ;;  %v6603_v16 = vld [vmem:[%s12598_s14 + $0xd0] sm:$0xff]  ;;  %v6604_v37 = vld [vmem:[%s12598_s14 + $0xd8] sm:$0xff] }
 0x49b   : > { %v12053_v27 = vsel %vm10938_vm12, %v5731_v3, %v5735_v49  ;;  %v9312_v3 = vld [vmem:[%s12595_s11 + $0x780] ss:$8 sps:$4 sm:$0xff]   ;;  %v9317_v49 = vld [vmem:[%s12595_s11 + $0x794] ss:$8 sps:$4 sm:$0xff]  }
 0x49c   : > { %v12062_v40 = vsel %vm10938_vm12, %v5717_v18, %v5721_v54  ;;  %v6582_v18 = vld [vmem:[%s12598_s14 + $0x28] sm:$0xff]  ;;  %v6599_v54 = vld [vmem:[%s12598_s14 + $0xb0] sm:$0xff] }
 0x49d   : > { %6053 = vmatpush1.bf16.msra.mxu1 %v9296_v38  ;;  %v8108_v14 = vcombine.high %v12062_v40, %v12053_v27  ;;  %v6577_v38 = vld [vmem:[%s12598_s14] sm:$0xff] }
 0x49e   : > { %6054 = vmatprep.subr.bf16.mxu1 %v9302_v44  ;;  %v8425_v44 = vpack.c.bf16 %v6594_v45, %v6593_v8  ;;  %v9320_v8 = vld [vmem:[%s12595_s11 + $0x7a4] ss:$8 sps:$4 sm:$0xff]  }
 0x49f   : > { %v6601_v45 = vld [vmem:[%s12598_s14 + $0xc0] sm:$0xff] }
 0x4a0   : > { %5657 = vmatmul.mubr.bf16.gmra.mrb[36].mxu1 %v12669_v42  ;;  %8426 = vmatprep.subr.bf16.mxu0 %v8425_v44  ;;  %v6598_v42 = vld [vmem:[%s12598_s14 + $0xa8] sm:$0xff] }
 0x4a1   : > { %5666 = vmatprep.mubr.bf16.mxu1 %v8042_v6  ;;  %6055 = vmatpush1.bf16.msra.mxu1 %v9300_v17  ;;  %v8427_v17 = vpack.c.bf16 %v6578_v9, %v6577_v38  ;;  %v6597_v6 = vld [vmem:[%s12598_s14 + $0xa0] sm:$0xff]  ;;  %v6602_v38 = vld [vmem:[%s12598_s14 + $0xc8] sm:$0xff] }
 0x4a2   : > { %6056 = vmatprep.subr.bf16.mxu1 %v9305_v15  ;;  %v8429_v15 = vpack.c.bf16 %v6596_v58, %v6595_v24  ;;  %v9318_v9 = vld [vmem:[%s12595_s11 + $0x7a0] ss:$8 sps:$4 sm:$0xff]   ;;  %v8441_v24 = vpack.c.bf16 %v6602_v38, %v6601_v45 }
 0x4a3   : > { %8428 = vmatpush3.bf16.msra.mxu0 %v8427_v17  ;;  %v6585_v58 = vld [vmem:[%s12598_s14 + $0x40] sm:$0xff]  ;;  %v6586_v17 = vld [vmem:[%s12598_s14 + $0x48] sm:$0xff] }
 0x4a4   : > { %8430 = vmatprep.subr.bf16.mxu0 %v8429_v15  ;;  %v9323_v15 = vld [vmem:[%s12595_s11 + $0x7b4] ss:$8 sps:$4 sm:$0xff]  }
 0x4a5   : > { %6057 = vmatpush1.bf16.msra.mxu1 %v9303_v7  ;;  %v8433_v7 = vpack.c.bf16 %v6598_v42, %v6597_v6  ;;  %v8443_v6 = vpack.c.bf16 %v6586_v17, %v6585_v58  ;;  %v9321_v42 = vld [vmem:[%s12595_s11 + $0x7b0] ss:$8 sps:$4 sm:$0xff]  }
 0x4a6   : > { %6058 = vmatprep.subr.bf16.mxu1 %v9308_v31  ;;  %v6581_v31 = vld [vmem:[%s12598_s14 + $0x20] sm:$0xff]  ;;  %v9393_v17 = vld [vmem:[#allocation2 + $0x58] sm:$0x11] }
 0x4a7   : > { %8432 = vmatpush3.bf16.msra.mxu0 %v8431_v50  ;;  %v5699_v50 = vld [vmem:[#allocation2 + $0x50] sm:$0xff] }
 0x4a8   : > { %5667 = vmatmul.mubr.bf16.gmra.mrb[40].mxu1 %v8041_v53  ;;  %v8435_v53 = vpack.c.bf16 %v6582_v18, %v6581_v31  ;;  %8434 = vmatprep.subr.bf16.mxu0 %v8433_v7  ;;  %v9326_v7 = vld [vmem:[%s12595_s11 + $0x7c4] ss:$8 sps:$4 sm:$0xff]   ;;  %v5752_v18 = vshrl.u32 %v5699_v50, 16 }
 0x4a9   : > { %6059 = vmatpush1.bf16.msra.mxu1 %v9306_v11  ;;  %6078 = vmatprep.mubr.bf16.mxu1 %v8108_v14  ;;  %v6600_v11 = vld [vmem:[%s12598_s14 + $0xb8] sm:$0xff]  ;;  %v5697_v31 = vld [vmem:[#allocation2 + $0x40] sm:$0xff] }
 0x4aa   : > { %6060 = vmatprep.subr.bf16.mxu1 %v9311_v13  ;;  %v9315_v13 = vld [vmem:[%s12595_s11 + $0x790] ss:$8 sps:$4 sm:$0xff]   ;;  %v8437_v14 = vpack.c.bf16 %v6600_v11, %v6599_v54  ;;  %v9324_v54 = vld [vmem:[%s12595_s11 + $0x7c0] ss:$8 sps:$4 sm:$0xff]   ;;  %v9329_v11 = vld [vmem:[%s12595_s11 + $0x7d4] ss:$8 sps:$4 sm:$0xff]  }
 0x4ab   : > { %8436 = vmatpush3.bf16.msra.mxu0 %v8435_v53  ;;  %v5738_v53 = vshrl.u32 %v5697_v31, 16 }
 0x4ac   : > { %8438 = vmatprep.subr.bf16.mxu0 %v8437_v14  ;;  %v5754_v14 = vrot.slane %v5752_v18, 4 }
 0x4ad   : > { %6061 = vmatpush1.bf16.msra.mxu1 %v9309_v33  ;;  %v6583_v33 = vld [vmem:[%s12598_s14 + $0x30] sm:$0xff]  ;;  %v5740_v45 = vrot.slane %v5738_v53, 4  ;;  %v8107_v53 = vcombine.low %v12062_v40, %v12053_v27  ;;  %v9344_v27 = vld [vmem:[%s12595_s11 + $0x824] ss:$8 sps:$4 sm:$0xff]  }
 0x4ae   : > { %6062 = vmatprep.subr.bf16.mxu1 %v9314_v43  ;;  %v6584_v43 = vld [vmem:[%s12598_s14 + $0x38] sm:$0xff] }
 0x4af   : > { %v8439_v44 = vpack.c.bf16 %v6584_v43, %v6583_v33  ;;  %v9327_v43 = vld [vmem:[%s12595_s11 + $0x7d0] ss:$8 sps:$4 sm:$0xff]  }
 0x4b1   : > { %6063 = vmatpush1.bf16.msra.mxu1 %v9312_v3  ;;  %8440 = vmatpush3.bf16.msra.mxu0 %v8439_v44  ;;  %v8445_v3 = vpack.c.bf16 %v6604_v37, %v6603_v16  ;;  %v9394_v16 = vld [vmem:[#allocation2 + $0x48] sm:$0x11] }
 0x4b2   : > { %6064 = vmatprep.subr.bf16.mxu1 %v9317_v49  ;;  %8442 = vmatprep.subr.bf16.mxu0 %v8441_v24  ;;  %v5755_v49 = vshll.u32 %v5699_v50, 16  ;;  %v9335_v24 = vld [vmem:[%s12595_s11 + $0x7f4] ss:$8 sps:$4 sm:$0xff]   ;;  %v5747_v37 = vshll.u32 %v9394_v16, 16  ;;  %v9338_v50 = vld [vmem:[%s12595_s11 + $0x804] ss:$8 sps:$4 sm:$0xff]  }
 0x4b4   : > { %v5757_v33 = vrot.slane %v5755_v49, 5  ;;  %v5808_v49 = vshrl.u32 %v12037_v39, 16 }
 0x4b5   : > { %6065 = vmatpush1.bf16.msra.mxu1 %v9315_v13  ;;  %8444 = vmatpush3.bf16.msra.mxu0 %v8443_v6  ;;  %v5741_v13 = vshll.u32 %v5697_v31, 16  ;;  %v5749_v31 = vrot.slane %v5747_v37, 5  ;;  %v12670_v37 = vld [vmem:[#allocation15_spill] sm:$0xff] }
 0x4b6   : > { %6066 = vmatprep.subr.bf16.mxu1 %v9320_v8  ;;  %8446 = vmatprep.subr.bf16.mxu0 %v8445_v3  ;;  %v9332_v8 = vld [vmem:[%s12595_s11 + $0x7e4] ss:$8 sps:$4 sm:$0xff]   ;;  %v5758_v44 = vor.u32 %v5757_v33, %v5754_v14  ;;  %v9341_v14 = vld [vmem:[%s12595_s11 + $0x814] ss:$8 sps:$4 sm:$0xff]  }
 0x4b7   : > { %v5743_v38 = vrot.slane %v5741_v13, 5 }
 0x4b8   : > { %v5759_v6 = vrot.slane %v5758_v44, 4  ;;  %v9342_v44 = vld [vmem:[%s12595_s11 + $0x820] ss:$8 sps:$4 sm:$0xff]  }
 0x4b9   : > { %6067 = vmatpush1.bf16.msra.mxu1 %v9318_v9  ;;  %v9330_v9 = vld [vmem:[%s12595_s11 + $0x7e0] ss:$8 sps:$4 sm:$0xff]   ;;  %v5744_v58 = vor.u32 %v5743_v38, %v5740_v45  ;;  %v9395_v45 = vld [vmem:[#allocation2 + $0x98] sm:$0x11] }
 0x4ba   : > { %6068 = vmatprep.subr.bf16.mxu1 %v9323_v15  ;;  %v5761_v15 = vshll.u32 %v9393_v17, 16  ;;  %v5817_v38 = vshll.u32 %v9395_v45, 16  ;;  %v9369_v45 = vld [vmem:[%s12595_s11 + $0x8b0] ss:$8 sps:$4 sm:$0xff]  }
 0x4bb   : > { %v5745_v3 = vrot.slane %v5744_v58, 4  ;;  %v9396_v58 = vld [vmem:[#allocation2 + $0x88] sm:$0x11] }
 0x4bc   : > { %v5803_v17 = vshll.u32 %v9396_v58, 16  ;;  %v5819_v16 = vrot.slane %v5817_v38, 5  ;;  %v9374_v38 = vld [vmem:[%s12595_s11 + $0x8c4] ss:$8 sps:$4 sm:$0xff]  }
 0x4bd   : > { %6069 = vmatpush1.bf16.msra.mxu1 %v9321_v42  ;;  %v9333_v42 = vld [vmem:[%s12595_s11 + $0x7f0] ss:$8 sps:$4 sm:$0xff]   ;;  %v5750_v13 = vsel %vm10938_vm12, %v5745_v3, %v5749_v31  ;;  %v9380_v58 = vld [vmem:[%s12595_s11 + $0x8e4] ss:$8 sps:$4 sm:$0xff]  }
 0x4be   : > { %6070 = vmatprep.subr.bf16.mxu1 %v9326_v7  ;;  %v5763_v7 = vrot.slane %v5761_v15, 5  ;;  %v5805_v3 = vrot.slane %v5803_v17, 5  ;;  %v9378_v17 = vld [vmem:[%s12595_s11 + $0x8e0] ss:$8 sps:$4 sm:$0xff]  }
 0x4c0   : > { %v5764_v18 = vsel %vm10938_vm12, %v5759_v6, %v5763_v7  ;;  %v12671_v6 = vcombine.high %v11438_v61, %v12670_v37  ;;  %v5806_v7 = vsel %vm10938_vm12, %v11753_v22, %v5805_v3  ;;  %v9356_v22 = vld [vmem:[%s12595_s11 + $0x864] ss:$8 sps:$4 sm:$0xff]  }
 0x4c1   : > { %6071 = vmatpush1.bf16.msra.mxu1 %v9324_v54  ;;  %v5811_v54 = vshll.u32 %v12037_v39, 16  ;;  %v8110_v33 = vcombine.high %v5750_v13, %v5764_v18 }
 0x4c2   : > { %6072 = vmatprep.subr.bf16.mxu1 %v9329_v11  ;;  %v9336_v11 = vld [vmem:[%s12595_s11 + $0x800] ss:$8 sps:$4 sm:$0xff]  }
 0x4c3   : > { %v5813_v39 = vrot.slane %v5811_v54, 5 }
 0x4c5   : > { %6073 = vmatpush1.bf16.msra.mxu1 %v9327_v43  ;;  %v5810_v43 = vrot.slane %v5808_v49, 4  ;;  %v9353_v49 = vld [vmem:[%s12595_s11 + $0x854] ss:$8 sps:$4 sm:$0xff]  }
 0x4c6   : > { %6074 = vmatprep.subr.bf16.mxu1 %v9332_v8  ;;  %v9339_v8 = vld [vmem:[%s12595_s11 + $0x810] ss:$8 sps:$4 sm:$0xff]  }
 0x4c7   : > { %v5814_v40 = vor.u32 %v5813_v39, %v5810_v43  ;;  %v9360_v43 = vld [vmem:[%s12595_s11 + $0x880] ss:$8 sps:$4 sm:$0xff]   ;;  %v9365_v39 = vld [vmem:[%s12595_s11 + $0x894] ss:$8 sps:$4 sm:$0xff]  }
 0x4c9   : > { %6075 = vmatpush1.bf16.msra.mxu1 %v9330_v9  ;;  %v8109_v9 = vcombine.low %v5750_v13, %v5764_v18  ;;  %v5815_v15 = vrot.slane %v5814_v40, 4  ;;  %v9348_v18 = vld [vmem:[%s12595_s11 + $0x840] ss:$8 sps:$4 sm:$0xff]   ;;  %v9371_v40 = vld [vmem:[%s12595_s11 + $0x8b4] ss:$8 sps:$4 sm:$0xff]  }
 0x4ca   : > { %6076 = vmatprep.subr.bf16.mxu1 %v9335_v24  ;;  %v9347_v24 = vld [vmem:[%s12595_s11 + $0x834] ss:$8 sps:$4 sm:$0xff]  }
 0x4cb   : > { %v5820_v31 = vsel %vm10938_vm12, %v5815_v15, %v5819_v16  ;;  %v9383_v15 = vld [vmem:[%s12595_s11 + $0x8f4] ss:$8 sps:$4 sm:$0xff]   ;;  %v9381_v16 = vld [vmem:[%s12595_s11 + $0x8f0] ss:$8 sps:$4 sm:$0xff]   ;;  %vm6800_vm12 = vcmask 1047559  }
 0x4cc   : > { %v8114_v54 = vcombine.high %v5806_v7, %v5820_v31  ;;  %v8113_v13 = vcombine.low %v5806_v7, %v5820_v31  ;;  %v12675_v31 = vld [vmem:[#allocation14_spill] sm:$0xff] }
 0x4cd   : > { %6077 = vmatpush1.bf16.msra.mxu1 %v9333_v42  ;;  %v9345_v42 = vld [vmem:[%s12595_s11 + $0x830] ss:$8 sps:$4 sm:$0xff]  }
 0x4ce   : > { %6416 = vmatprep.subr.bf16.mxu1 %v9338_v50  ;;  %v9350_v50 = vld [vmem:[%s12595_s11 + $0x844] ss:$8 sps:$4 sm:$0xff]  }
 0x4d0   : > { %6079 = vmatmul.mubr.bf16.vlgmr.msra.gmra.mrb[28].mxu1 %v8107_v53  ;;  %v9354_v53 = vld [vmem:[%s12595_s11 + $0x860] ss:$8 sps:$4 sm:$0xff]  }
 0x4d1   : > { %6088 = vmatprep.mubr.bf16.mxu1 %v8110_v33  ;;  %6417 = vmatpush1.bf16.msra.mxu1 %v9336_v11  ;;  %v12672_v11 = vcombine.low %v11438_v61, %v12670_v37  ;;  %v9359_v61 = vld [vmem:[%s12595_s11 + $0x874] ss:$8 sps:$4 sm:$0xff]   ;;  %v9362_v33 = vld [vmem:[%s12595_s11 + $0x884] ss:$8 sps:$4 sm:$0xff]   ;;  %v12673_v37 = vmov 0.0  }
 0x4d2   : > { %6418 = vmatprep.subr.bf16.mxu1 %v9341_v14  ;;  %v9357_v14 = vld [vmem:[%s12595_s11 + $0x870] ss:$8 sps:$4 sm:$0xff]  }
 0x4d5   : > { %6419 = vmatpush1.bf16.msra.mxu1 %v9339_v8  ;;  %v9368_v8 = vld [vmem:[%s12595_s11 + $0x8a4] ss:$8 sps:$4 sm:$0xff]  }
 0x4d6   : > { %6420 = vmatprep.subr.bf16.mxu1 %v9344_v27  ;;  %v9366_v27 = vld [vmem:[%s12595_s11 + $0x8a0] ss:$8 sps:$4 sm:$0xff]  }
 0x4d8   : > { %6089 = vmatmul.mubr.bf16.gmra.mrb[32].mxu1 %v8109_v9  ;;  %v9377_v9 = vld [vmem:[%s12595_s11 + $0x8d4] ss:$8 sps:$4 sm:$0xff]  }
 0x4d9   : > { %6098 = vmatprep.mubr.bf16.mxu1 %v12671_v6  ;;  %6421 = vmatpush1.bf16.msra.mxu1 %v9342_v44  ;;  %v9372_v44 = vld [vmem:[%s12595_s11 + $0x8c0] ss:$8 sps:$4 sm:$0xff]  }
 0x4da   : > { %6422 = vmatprep.subr.bf16.mxu1 %v9347_v24  ;;  %v9375_v24 = vld [vmem:[%s12595_s11 + $0x8d0] ss:$8 sps:$4 sm:$0xff]   ;;  %v6505_v6 = vld [vmem:[%s12596_s12] sm:$0x3] }
 0x4dd   : > { %6423 = vmatpush1.bf16.msra.mxu1 %v9345_v42  ;;  %v6533_v42 = vld [vmem:[%s12597_s13] sm:$0x3] }
 0x4de   : > { %6424 = vmatprep.subr.bf16.mxu1 %v9350_v50  ;;  %v12674_v50 = vld [vmem:[#allocation13_spill] sm:$0xff] }
 0x4df   : > { %v12363_v3 = vrot.slane %v6505_v6, %v12674_v50 }
 0x4e0   : > { %6099 = vmatmul.mubr.bf16.gmra.mrb[36].mxu1 %v12672_v11 }
 0x4e1   : > { %6108 = vmatprep.mubr.bf16.mxu1 %v8114_v54  ;;  %6425 = vmatpush1.bf16.msra.mxu1 %v9348_v18  ;;  %v12366_v18 = vrot.slane %v6505_v6, %v12675_v31  ;;  %v12370_v54 = vrot.slane %v6533_v42, %v12674_v50 }
 0x4e2   : > { %6426 = vmatprep.subr.bf16.mxu1 %v9353_v49 }
 0x4e5   : > { %6427 = vmatpush1.bf16.msra.mxu1 %v9351_v30 }
 0x4e6   : > { %6428 = vmatprep.subr.bf16.mxu1 %v9356_v22 }
 0x4e8   : > { %6109 = vmatmul.mubr.bf16.gmra.mrb[40].mxu1 %v8113_v13 }
 0x4e9   : > { %6429 = vmatpush1.bf16.msra.mxu1 %v9354_v53  ;;  %6448 = vmatprep.mubr.bf16.mxu1 %v8188_v41  ;;  %v9363_v41 = vld [vmem:[%s12595_s11 + $0x890] ss:$8 sps:$4 sm:$0xff]   ;;  %v12374_v53 = vrot.slane %v6533_v42, %v12675_v31 }
 0x4ea   : > { %6430 = vmatprep.subr.bf16.mxu1 %v9359_v61 }
 0x4ed   : > { %6431 = vmatpush1.bf16.msra.mxu1 %v9357_v14 }
 0x4ee   : > { %6432 = vmatprep.subr.bf16.mxu1 %v9362_v33 }
 0x4f1   : > { %6433 = vmatpush1.bf16.msra.mxu1 %v9360_v43 }
 0x4f2   : > { %6434 = vmatprep.subr.bf16.mxu1 %v9365_v39 }
 0x4f5   : > { %6435 = vmatpush1.bf16.msra.mxu1 %v9363_v41 }
 0x4f6   : > { %6436 = vmatprep.subr.bf16.mxu1 %v9368_v8 }
 0x4f9   : > { %6437 = vmatpush1.bf16.msra.mxu1 %v9366_v27 }
 0x4fa   : > { %6438 = vmatprep.subr.bf16.mxu1 %v9371_v40 }
 0x4fd   : > { %6439 = vmatpush1.bf16.msra.mxu1 %v9369_v45 }
 0x4fe   : > { %6440 = vmatprep.subr.bf16.mxu1 %v9374_v38 }
 0x501   : > { %6441 = vmatpush1.bf16.msra.mxu1 %v9372_v44 }
 0x502   : > { %6442 = vmatprep.subr.bf16.mxu1 %v9377_v9 }
 0x505   : > { %6443 = vmatpush1.bf16.msra.mxu1 %v9375_v24 }
 0x506   : > { %6444 = vmatprep.subr.bf16.mxu1 %v9380_v58 }
 0x509   : > { %6445 = vmatpush1.bf16.msra.mxu1 %v9378_v17 }
 0x50a   : > { %6446 = vmatprep.subr.bf16.mxu1 %v9383_v15 }
 0x50d   : > { %6447 = vmatpush1.bf16.msra.mxu1 %v9381_v16 }
 0x510   : > { %6449 = vmatmul.mubr.bf16.vlgmr.msra.gmra.mrb[28].mxu1 %v8187_v26  ;;  %v8447_v26 = vpack.c.bf16 %v6588_v28, %v6587_v21 }
 0x511   : > { %6458 = vmatprep.mubr.bf16.mxu1 %v8190_v20  ;;  %v6589_v20 = vld [vmem:[%s12598_s14 + $0x60] sm:$0xff] }
 0x512   : > { %8448 = vmatpush3.bf16.msra.mxu0 %v8447_v26 }
 0x513   : > { %8450 = vmatprep.subr.bf16.mxu0 %v8449_v46 }
 0x518   : > { %6459 = vmatmul.mubr.bf16.gmra.mrb[32].mxu1 %v8189_v32  ;;  %v6590_v32 = vld [vmem:[%s12598_s14 + $0x68] sm:$0xff] }
 0x519   : > { %6468 = vmatprep.mubr.bf16.mxu1 %v8192_v56  ;;  %v6608_v56 = vld [vmem:[%s12598_s14 + $0xf8] sm:$0xff] }
 0x51a   : > { %v8453_v62 = vpack.c.bf16 %v6608_v56, %v6607_v0 }
 0x520   : > { %6469 = vmatmul.mubr.bf16.gmra.mrb[36].mxu1 %v8191_v55  ;;  %v8451_v55 = vpack.c.bf16 %v6590_v32, %v6589_v20 }
 0x521   : > { %6478 = vmatprep.mubr.bf16.mxu1 %v8194_v12  ;;  %v6592_v12 = vld [vmem:[%s12598_s14 + $0x78] sm:$0xff] }
 0x522   : > { %8452 = vmatpush3.bf16.msra.mxu0 %v8451_v55 }
 0x523   : > { %8454 = vmatprep.subr.bf16.mxu0 %v8453_v62 }
 0x528   : > { %6479 = vmatmul.mubr.bf16.gmra.mrb[40].mxu1 %v8193_v29  ;;  %v8455_v29 = vpack.c.bf16 %v6592_v12, %v6591_v4 }
 0x52a   : > { %8456 = vmatpush3.bf16.msra.mxu0 %v8455_v29 }
 0x52b   : > { %8347 = vmatprep.subr.mxu0 %v12673_v37 }
 0x5e3   : > { %v6450_v7 = vpop.f32.mrb[28].mxu1 }
 0x5e4   : > { %v8477_v49 = vadd.f32 %v6450_v7, %v11803_v23  ;;  %v6452_v11 = vpop.f32.mrb[29].mxu1 }
 0x5e5   : > { %v8478_v30 = vadd.f32 %v6452_v11, %v11808_v10  ;;  %v6454_v22 = vpop.f32.mrb[30].mxu1 }
 0x5e6   : > { %v6517_v13 = vmul.f32 %v8477_v49, %v12363_v3  ;;  %v8479_v61 = vadd.f32 %v6454_v22, %v11810_v59  ;;  %v6456_v14 = vpop.f32.mrb[31].mxu1 }
 0x5e7   : > { %v6518_v33 = vmul.f32 %v8478_v30, %v12366_v18  ;;  %v8480_v43 = vadd.f32 %v6456_v14, %v11812_v34 }
 0x5e8   : > { %v6545_v23 = vadd.f32 %v12370_v54, %v6517_v13  ;;  %v6519_v39 = vmul.f32 %v8479_v61, %v12363_v3 }
 0x5e9   : > { %v6520_v41 = vmul.f32 %v8480_v43, %v12366_v18  ;;  %v6546_v10 = vadd.f32 %v12374_v53, %v6518_v33 }
 0x5ea   : > { %v6561_v45 = vmax.f32 %v6545_v23, 0.0  ;;  %v6547_v44 = vadd.f32 %v12370_v54, %v6519_v39 }
 0x5eb   : > { %v6460_v8 = vpop.f32.mrb[32].mxu1  ;;  %v6562_v27 = vmax.f32 %v6546_v10, 0.0  ;;  %v6548_v40 = vadd.f32 %v12374_v53, %v6520_v41 }
 0x5ec   : > { %v8481_v59 = vadd.f32 %v6460_v8, %v11823_v47  ;;  %v6462_v38 = vpop.f32.mrb[33].mxu1  ;;  %v6563_v28 = vmax.f32 %v6547_v44, 0.0 }
 0x5ed   : > { %v8482_v34 = vadd.f32 %v6462_v38, %v11828_v25  ;;  %v6464_v9 = vpop.f32.mrb[34].mxu1  ;;  %6680 = vmatprep.mubr.f32.mxu0 %v6562_v27  ;;  %v6564_v24 = vmax.f32 %v6548_v40, 0.0 }
 0x5ee   : > { %v6521_v58 = vmul.f32 %v8481_v59, %v12363_v3  ;;  %v8483_v17 = vadd.f32 %v6464_v9, %v11830_v60  ;;  %v6466_v15 = vpop.f32.mrb[35].mxu1  ;;  %6681 = vmatmul.mubr.f32.vlgmr.msra.gmra.mrb[76].mxu0 %v6561_v45 }
 0x5ef   : > { %v6522_v16 = vmul.f32 %v8482_v34, %v12366_v18  ;;  %v8484_v21 = vadd.f32 %v6466_v15, %v11832_v1  ;;  %6685 = vmatprep.mubr.f32.mxu0 %v6564_v24 }
 0x5f0   : > { %v6523_v47 = vmul.f32 %v8483_v17, %v12363_v3  ;;  %v6549_v36 = vadd.f32 %v12370_v54, %v6521_v58 }
 0x5f1   : > { %v6524_v25 = vmul.f32 %v8484_v21, %v12366_v18  ;;  %v6550_v26 = vadd.f32 %v12374_v53, %v6522_v16 }
 0x5f2   : > { %6686 = vmatmul.mubr.f32.gmra.mrb[78].mxu0 %v6563_v28  ;;  %v6565_v0 = vmax.f32 %v6549_v36, 0.0  ;;  %v6551_v1 = vadd.f32 %v12370_v54, %v6523_v47 }
 0x5f3   : > { %v6470_v19 = vpop.f32.mrb[36].mxu1  ;;  %v6566_v20 = vmax.f32 %v6550_v26, 0.0  ;;  %v6552_v60 = vadd.f32 %v12374_v53, %v6524_v25 }
 0x5f4   : > { %v8485_v32 = vadd.f32 %v6470_v19, %v11843_v51  ;;  %v6472_v46 = vpop.f32.mrb[37].mxu1  ;;  %v6567_v50 = vmax.f32 %v6551_v1, 0.0 }
 0x5f5   : > { %v8486_v56 = vadd.f32 %v6472_v46, %v11848_v48  ;;  %v6474_v55 = vpop.f32.mrb[38].mxu1  ;;  %6690 = vmatprep.mubr.f32.mxu0 %v6566_v20  ;;  %v6568_v62 = vmax.f32 %v6552_v60, 0.0 }
 0x5f6   : > { %v6525_v4 = vmul.f32 %v8485_v32, %v12363_v3  ;;  %v8487_v12 = vadd.f32 %v6474_v55, %v11850_v63  ;;  %v6476_v29 = vpop.f32.mrb[39].mxu1  ;;  %6691 = vmatmul.mubr.f32.gmra.mrb[80].mxu0 %v6565_v0 }
 0x5f7   : > { %v6526_v6 = vmul.f32 %v8486_v56, %v12366_v18  ;;  %v8488_v42 = vadd.f32 %v6476_v29, %v11852_v2  ;;  %6695 = vmatprep.mubr.f32.mxu0 %v6568_v62 }
 0x5f8   : > { %v6527_v51 = vmul.f32 %v8487_v12, %v12363_v3  ;;  %v6553_v7 = vadd.f32 %v12370_v54, %v6525_v4 }
 0x5f9   : > { %v6528_v48 = vmul.f32 %v8488_v42, %v12366_v18  ;;  %v6554_v31 = vadd.f32 %v12374_v53, %v6526_v6 }
 0x5fa   : > { %6696 = vmatmul.mubr.f32.gmra.mrb[82].mxu0 %v6567_v50  ;;  %v6569_v13 = vmax.f32 %v6553_v7, 0.0  ;;  %v6555_v2 = vadd.f32 %v12370_v54, %v6527_v51  ;;  %v9463_v7 = vmov 1  }
 0x5fb   : > { %v6480_v49 = vpop.f32.mrb[40].mxu1  ;;  %v6570_v11 = vmax.f32 %v6554_v31, 0.0  ;;  %v6556_v63 = vadd.f32 %v12374_v53, %v6528_v48 }
 0x5fc   : > { %v8489_v30 = vadd.f32 %v6480_v49, %v11863_v5  ;;  %v6482_v22 = vpop.f32.mrb[41].mxu1  ;;  %v6571_v8 = vmax.f32 %v6555_v2, 0.0  ;;  %v12676_v49 = vlaneseq }
 0x5fd   : > { %v8490_v61 = vadd.f32 %v6482_v22, %v11868_v35  ;;  %v6484_v14 = vpop.f32.mrb[42].mxu1  ;;  %6700 = vmatprep.mubr.f32.mxu0 %v6570_v11  ;;  %v6572_v33 = vmax.f32 %v6556_v63, 0.0  ;;  %v12677_v22 = vld [vmem:[#allocation12_spill] sm:$0xff] }
 0x5fe   : > { %v6529_v43 = vmul.f32 %v8489_v30, %v12363_v3  ;;  %v8491_v23 = vadd.f32 %v6484_v14, %v11870_v57  ;;  %v6486_v39 = vpop.f32.mrb[43].mxu1  ;;  %6701 = vmatmul.mubr.f32.gmra.mrb[84].mxu0 %v6569_v13  ;;  %v6755_v11 = vand.u32 127, %v12676_v49 }
 0x5ff   : > { %v6530_v41 = vmul.f32 %v8490_v61, %v12366_v18  ;;  %v8492_v10 = vadd.f32 %v6486_v39, %v11872_v52  ;;  %6705 = vmatprep.mubr.f32.mxu0 %v6572_v33 }
 0x600   : > { %v6531_v5 = vmul.f32 %v8491_v23, %v12363_v3  ;;  %v6557_v27 = vadd.f32 %v12370_v54, %v6529_v43  ;;  %v6758_v13 = vsub.s32 %v6755_v11, %v12677_v22 }
 0x601   : > { %v6532_v35 = vmul.f32 %v8492_v10, %v12366_v18  ;;  %v6558_v40 = vadd.f32 %v12374_v53, %v6530_v41  ;;  %v8227_v18 = vld [vmem:[%s12599_s15] ss:$0 sm:$0xff] }
 0x602   : > { %6706 = vmatmul.mubr.f32.gmra.mrb[86].mxu0 %v6571_v8  ;;  %v6573_v59 = vmax.f32 %v6557_v27, 0.0  ;;  %v6559_v38 = vadd.f32 %v12370_v54, %v6531_v5  ;;  %v12428_v54 = vld [vmem:[%s12601_s17] sm:$0xff] }
 0x603   : > { %v6574_v45 = vmax.f32 %v6558_v40, 0.0  ;;  %v6560_v57 = vadd.f32 %v12374_v53, %v6532_v35  ;;  %8348 = vmatpush3.msra.mxu0 %v12428_v54 }
 0x604   : > { %v6575_v52 = vmax.f32 %v6559_v38, 0.0 }
 0x605   : > { %6710 = vmatprep.mubr.f32.mxu0 %v6574_v45  ;;  %v6576_v44 = vmax.f32 %v6560_v57, 0.0 }
 0x606   : > { %6711 = vmatmul.mubr.f32.gmra.mrb[88].mxu0 %v6573_v59 }
 0x607   : > { %6715 = vmatprep.mubr.f32.mxu0 %v6576_v44 }
 0x60a   : > { %6716 = vmatmul.mubr.f32.gmra.mrb[90].mxu0 %v6575_v52 }
 0x60b   : > { %8349 = vmatprep.mubr.msk.f32.mxu0 %vm9464_vm5, %v12673_v37 }
 0x6c1   : > { %v8301_v3 = vpop.f32.mrb[76].mxu0 }
 0x6c2   : > { %v8302_v34 = vpop.f32.mrb[77].mxu0 }
 0x6c3   : > { %v8303_v9 = vadd.f32 %v8302_v34, %v8301_v3 }
 0x6c5   : > { %v8304_v24 = vpop.f32.mrb[78].mxu0  ;;  %v6683_v58 = vadd.f32 %v8303_v9, %v8227_v18 }
 0x6c6   : > { %v8305_v17 = vpop.f32.mrb[79].mxu0 }
 0x6c7   : > { %v8306_v53 = vadd.f32 %v8305_v17, %v8304_v24  ;;  %6731 = vperm.xlu0 %8698, %v6683_v58  }
 0x6c9   : > { %v6688_v15 = vadd.f32 %v8306_v53, %v8227_v18  ;;  %v8307_v16 = vpop.f32.mrb[80].mxu0 }
 0x6ca   : > { %v8308_v21 = vpop.f32.mrb[81].mxu0 }
 0x6cb   : > { %v8309_v47 = vadd.f32 %v8308_v21, %v8307_v16  ;;  %6734 = vperm.xlu0 %8698, %v6688_v15  }
 0x6cd   : > { %v8310_v28 = vpop.f32.mrb[82].mxu0  ;;  %v6693_v36 = vadd.f32 %v8309_v47, %v8227_v18 }
 0x6ce   : > { %v8311_v25 = vpop.f32.mrb[83].mxu0 }
 0x6cf   : > { %v8312_v26 = vadd.f32 %v8311_v25, %v8310_v28  ;;  %6737 = vperm.xlu1 %8699, %v6693_v36  }
 0x6d1   : > { %v6698_v19 = vadd.f32 %v8312_v26, %v8227_v18  ;;  %v8313_v20 = vpop.f32.mrb[84].mxu0 }
 0x6d2   : > { %v8314_v60 = vpop.f32.mrb[85].mxu0 }
 0x6d3   : > { %v8315_v32 = vadd.f32 %v8314_v60, %v8313_v20  ;;  %6740 = vperm.xlu1 %8699, %v6698_v19  }
 0x6d5   : > { %v6703_v46 = vadd.f32 %v8315_v32, %v8227_v18  ;;  %v8316_v0 = vpop.f32.mrb[86].mxu0 }
 0x6d6   : > { %v8317_v1 = vpop.f32.mrb[87].mxu0 }
 0x6d7   : > { %v8318_v56 = vadd.f32 %v8317_v1, %v8316_v0  ;;  %6743 = vperm.xlu0 %8698, %v6703_v46   ;;  %v6875_v1 = vld [vmem:[%s12600_s16] sm:$0xff] }
 0x6d9   : > { %v6708_v55 = vadd.f32 %v8318_v56, %v8227_v18  ;;  %v8319_v62 = vpop.f32.mrb[88].mxu0 }
 0x6da   : > { %v8320_v4 = vpop.f32.mrb[89].mxu0 }
 0x6db   : > { %v8321_v12 = vadd.f32 %v8320_v4, %v8319_v62  ;;  %6746 = vperm.xlu1 %8699, %v6708_v55   ;;  %v6877_v4 = vld [vmem:[%s12600_s16 + $0x10] sm:$0xff] }
 0x6dd   : > { %v6713_v29 = vadd.f32 %v8321_v12, %v8227_v18  ;;  %v8322_v6 = vpop.f32.mrb[90].mxu0  ;;  %v6878_v12 = vld [vmem:[%s12600_s16 + $0x18] sm:$0xff] }
 0x6de   : > { %v8323_v42 = vpop.f32.mrb[91].mxu0 }
 0x6df   : > { %v8324_v51 = vadd.f32 %v8323_v42, %v8322_v6  ;;  %6749 = vperm.xlu0 %8698, %v6713_v29   ;;  %v6880_v6 = vld [vmem:[%s12600_s16 + $0x28] sm:$0xff]  ;;  %v6882_v42 = vld [vmem:[%s12600_s16 + $0x38] sm:$0xff] }
 0x6e1   : > { %v6718_v50 = vadd.f32 %v8324_v51, %v8227_v18 }
 0x6e3   : > { %8700 = vset.pattern.permute.xlu0 %v9463_v7  ;;  %6752 = vperm.xlu1 %8699, %v6718_v50  }
 0x6e4   : > { %7023 = vperm.xlu0 %8700, %v6683_v58  }
 0x6e7   : > { %8701 = vset.pattern.permute.xlu1 %v9463_v7 }
 0x6e8   : > { %7032 = vperm.xlu0 %8700, %v6698_v19   ;;  %7026 = vperm.xlu1 %8701, %v6688_v15  }
 0x6ec   : > { %7038 = vperm.xlu0 %8700, %v6708_v55   ;;  %7029 = vperm.xlu1 %8701, %v6693_v36   ;;  %v6876_v55 = vld [vmem:[%s12600_s16 + $0x8] sm:$0xff] }
 0x6f0   : > { %7044 = vperm.xlu0 %8700, %v6718_v50   ;;  %7035 = vperm.xlu1 %8701, %v6703_v46  }
 0x6f4   : > { %7041 = vperm.xlu1 %8701, %v6713_v29   ;;  %v6879_v29 = vld [vmem:[%s12600_s16 + $0x20] sm:$0xff] }
 0x746   : > { %v6732_v48 = vpop.permute.xlu0 %6731 }
 0x747   : > { %v6759_v43 = vrot.slane %v6732_v48, %v6758_v13 }
 0x74a   : > { %v6735_v63 = vpop.permute.xlu0 %6734 }
 0x74b   : > { %v6763_v61 = vrot.slane %v6735_v63, %v6758_v13 }
 0x74d   : > { %v6789_v10 = vsel %vm6788_vm6, %v6763_v61, %v6759_v43 }
 0x74e   : > { %v6738_v31 = vpop.permute.xlu1 %6737 }
 0x74f   : > { %v6767_v14 = vrot.slane %v6738_v31, %v6758_v13 }
 0x751   : > { %v6791_v8 = vsel %vm6790_vm7, %v6767_v14, %v6789_v10 }
 0x752   : > { %v6741_v30 = vpop.permute.xlu1 %6740 }
 0x753   : > { %v6771_v23 = vrot.slane %v6741_v30, %v6758_v13 }
 0x755   : > { %v6793_v35 = vsel %vm6792_vm8, %v6771_v23, %v6791_v8 }
 0x756   : > { %v6744_v2 = vpop.permute.xlu0 %6743 }
 0x757   : > { %v6775_v39 = vrot.slane %v6744_v2, %v6758_v13 }
 0x759   : > { %v6795_v40 = vsel %vm3064_vm10, %v6775_v39, %v6793_v35 }
 0x75a   : > { %v6747_v33 = vpop.permute.xlu1 %6746 }
 0x75b   : > { %v6779_v5 = vrot.slane %v6747_v33, %v6758_v13 }
 0x75d   : > { %v6797_v57 = vsel %vm6796_vm9, %v6779_v5, %v6795_v40 }
 0x75e   : > { %v6750_v41 = vpop.permute.xlu0 %6749 }
 0x75f   : > { %v6783_v27 = vrot.slane %v6750_v41, %v6758_v13 }
 0x761   : > { %v6799_v44 = vsel %vm6798_vm11, %v6783_v27, %v6797_v57 }
 0x762   : > { %v6753_v45 = vpop.permute.xlu1 %6752 }
 0x763   : > { %v6787_v59 = vrot.slane %v6753_v45, %v6758_v13  ;;  %v7024_v38 = vpop.permute.xlu0 %7023 }
 0x764   : > { %v7049_v18 = vrot.slane %v7024_v38, %v6758_v13 }
 0x765   : > { %v6801_v52 = vsel %vm6800_vm12, %v6787_v59, %v6799_v44 }
 0x766   : > { %8350 = vmatmul.mubr.msk.f32.vlgmr.msra.gmra.mrb[92].mxu0 %vm6802_vm13, %v6801_v52 }
 0x767   : > { %v7033_v3 = vpop.permute.xlu0 %7032  ;;  %v7027_v34 = vpop.permute.xlu1 %7026  ;;  %8354 = vmatprep.mubr.msk.f32.mxu0 %vm6802_vm13, %v6875_v1 }
 0x768   : > { %v7053_v9 = vrot.slane %v7027_v34, %v6758_v13  ;;  %v7061_v15 = vrot.slane %v7033_v3, %v6758_v13 }
 0x76a   : > { %v7078_v24 = vsel %vm6788_vm6, %v7053_v9, %v7049_v18 }
 0x76b   : > { %v7030_v58 = vpop.permute.xlu1 %7029  ;;  %v7039_v17 = vpop.permute.xlu0 %7038 }
 0x76c   : > { %v7057_v53 = vrot.slane %v7030_v58, %v6758_v13  ;;  %v7069_v36 = vrot.slane %v7039_v17, %v6758_v13 }
 0x76e   : > { %v7079_v16 = vsel %vm6790_vm7, %v7057_v53, %v7078_v24 }
 0x76f   : > { %v7080_v21 = vsel %vm6792_vm8, %v7061_v15, %v7079_v16  ;;  %v7036_v47 = vpop.permute.xlu1 %7035  ;;  %v7045_v25 = vpop.permute.xlu0 %7044 }
 0x770   : > { %v7065_v28 = vrot.slane %v7036_v47, %v6758_v13  ;;  %v7077_v32 = vrot.slane %v7045_v25, %v6758_v13 }
 0x772   : > { %v7081_v26 = vsel %vm3064_vm10, %v7065_v28, %v7080_v21  ;;  %vm7012_vm10 = vcmask 523264  }
 0x773   : > { %v7082_v19 = vsel %vm6796_vm9, %v7069_v36, %v7081_v26  ;;  %v7042_v20 = vpop.permute.xlu1 %7041 }
 0x774   : > { %v7073_v60 = vrot.slane %v7042_v20, %v6758_v13 }
 0x776   : > { %v7083_v46 = vsel %vm6798_vm11, %v7073_v60, %v7082_v19 }
 0x777   : > { %v7084_v0 = vsel %vm6800_vm12, %v7077_v32, %v7083_v46 }
 0x839   : > { %v6871_v56 = vpop.f32.mrb[92].mxu0 }
 0x83a   : > { %v8351_v62 = vpop.f32.mrb[93].mxu0  ;;  %8352 = vmatprep.subr.mxu0 %v6871_v56 }
 0x83b   : > { %8353 = vmatpush3.msra.mxu0 %v6871_v56 }
 0x83c   : > { %8355 = vmatmul.mubr.msk.f32.vlgmr.msra.gmra.mrb[94].mxu0 %vm6802_vm13, %v6876_v55  ;;  %8366 = vmatprep.subr.mxu0 %v12673_v37 }
 0x83d   : > { %8357 = vmatprep.mubr.msk.f32.mxu0 %vm6802_vm13, %v6877_v4  ;;  %8367 = vmatpush3.msra.mxu0 %v12428_v54  ;;  %v6881_v54 = vld [vmem:[%s12600_s16 + $0x30] sm:$0xff] }
 0x840   : > { %8358 = vmatmul.mubr.msk.f32.gmra.mrb[96].mxu0 %vm6802_vm13, %v6878_v12 }
 0x841   : > { %8360 = vmatprep.mubr.msk.f32.mxu0 %vm6802_vm13, %v6879_v29 }
 0x844   : > { %8361 = vmatmul.mubr.msk.f32.gmra.mrb[98].mxu0 %vm6802_vm13, %v6880_v6 }
 0x845   : > { %8363 = vmatprep.mubr.msk.f32.mxu0 %vm6802_vm13, %v6881_v54 }
 0x848   : > { %8364 = vmatmul.mubr.msk.f32.gmra.mrb[100].mxu0 %vm6802_vm13, %v6882_v42 }
 0x849   : > { %8368 = vmatprep.mubr.msk.f32.mxu0 %vm9464_vm5, %v12673_v37 }
 0x84c   : > { %8369 = vmatmul.mubr.msk.f32.vlgmr.msra.gmra.mrb[102].mxu0 %vm6802_vm13, %v7084_v0 }
 0x84d   : > { %8373 = vmatprep.mubr.msk.f32.mxu0 %vm6802_vm13, %v6875_v1 }
 0x90f   : > { %v8356_v51 = vpop.f32.mrb[94].mxu0 }
 0x910   : > { %7014 = vst.msk [vmem:[%s12491_s29 + $0x8] sm:$0xff] %vm7012_vm10, %v8356_v51  ;;  %v6973_v37 = vpop.f32.mrb[95].mxu0 }
 0x911   : > { %7013 = vst.msk [vmem:[%s12491_s29] sm:$0xff] %vm7012_vm10, %v6973_v37 }
 0x913   : > { %v8359_v50 = vpop.f32.mrb[96].mxu0 }
 0x914   : > { %7016 = vst.msk [vmem:[%s12491_s29 + $0x18] sm:$0xff] %vm7012_vm10, %v8359_v50  ;;  %v6983_v7 = vpop.f32.mrb[97].mxu0 }
 0x915   : > { %7015 = vst.msk [vmem:[%s12491_s29 + $0x10] sm:$0xff] %vm7012_vm10, %v6983_v7 }
 0x917   : > { %v8362_v48 = vpop.f32.mrb[98].mxu0 }
 0x918   : > { %7018 = vst.msk [vmem:[%s12491_s29 + $0x28] sm:$0xff] %vm7012_vm10, %v8362_v48  ;;  %v6993_v31 = vpop.f32.mrb[99].mxu0 }
 0x919   : > { %7017 = vst.msk [vmem:[%s12491_s29 + $0x20] sm:$0xff] %vm7012_vm10, %v6993_v31 }
 0x91b   : > { %v8365_v49 = vpop.f32.mrb[100].mxu0 }
 0x91c   : > { %7020 = vst.msk [vmem:[%s12491_s29 + $0x38] sm:$0xff] %vm7012_vm10, %v8365_v49  ;;  %v7003_v11 = vpop.f32.mrb[101].mxu0 }
 0x91d   : > { %7019 = vst.msk [vmem:[%s12491_s29 + $0x30] sm:$0xff] %vm7012_vm10, %v7003_v11 }
 0x91f   : > { %v7153_v63 = vpop.f32.mrb[102].mxu0 }
 0x920   : > { %v8370_v30 = vpop.f32.mrb[103].mxu0  ;;  %8371 = vmatprep.subr.mxu0 %v7153_v63 }
 0x921   : > { %8372 = vmatpush3.msra.mxu0 %v7153_v63 }
 0x922   : > { %8374 = vmatmul.mubr.msk.f32.vlgmr.msra.gmra.mrb[104].mxu0 %vm6802_vm13, %v6876_v55 }
 0x923   : > { %8376 = vmatprep.mubr.msk.f32.mxu0 %vm6802_vm13, %v6877_v4 }
 0x926   : > { %8377 = vmatmul.mubr.msk.f32.gmra.mrb[106].mxu0 %vm6802_vm13, %v6878_v12 }
 0x927   : > { %8379 = vmatprep.mubr.msk.f32.mxu0 %vm6802_vm13, %v6879_v29 }
 0x92a   : > { %8380 = vmatmul.mubr.msk.f32.gmra.mrb[108].mxu0 %vm6802_vm13, %v6880_v6 }
 0x92b   : > { %8382 = vmatprep.mubr.msk.f32.mxu0 %vm6802_vm13, %v6881_v54 }
 0x92e   : > { %8383 = vmatmul.mubr.msk.f32.gmra.mrb[110].mxu0 %vm6802_vm13, %v6882_v42 }
 0x9f5   : > { %v8375_v22 = vpop.f32.mrb[104].mxu0 }
 0x9f6   : > { %8247 = vst.msk [vmem:[%s12491_s29 + $0x48] sm:$0xff] %vm7012_vm10, %v8375_v22  ;;  %v7255_v13 = vpop.f32.mrb[105].mxu0 }
 0x9f7   : > { %8246 = vst.msk [vmem:[%s12491_s29 + $0x40] sm:$0xff] %vm7012_vm10, %v7255_v13 }
 0x9f9   : > { %v8378_v2 = vpop.f32.mrb[106].mxu0 }
 0x9fa   : > { %8249 = vst.msk [vmem:[%s12491_s29 + $0x58] sm:$0xff] %vm7012_vm10, %v8378_v2  ;;  %v7265_v61 = vpop.f32.mrb[107].mxu0 }
 0x9fb   : > { %8248 = vst.msk [vmem:[%s12491_s29 + $0x50] sm:$0xff] %vm7012_vm10, %v7265_v61 }
 0x9fd   : > { %v8381_v14 = vpop.f32.mrb[108].mxu0 }
 0x9fe   : > { %8251 = vst.msk [vmem:[%s12491_s29 + $0x68] sm:$0xff] %vm7012_vm10, %v8381_v14  ;;  %v7275_v33 = vpop.f32.mrb[109].mxu0 }
 0x9ff   : > { %8250 = vst.msk [vmem:[%s12491_s29 + $0x60] sm:$0xff] %vm7012_vm10, %v7275_v33 }
 0xa01   : > { %v8384_v43 = vpop.f32.mrb[110].mxu0 }
 0xa02   : > { %8253 = vst.msk [vmem:[%s12491_s29 + $0x78] sm:$0xff] %vm7012_vm10, %v8384_v43  ;;  %v7285_v23 = vpop.f32.mrb[111].mxu0 }
 0xa03   : > { %8252 = vst.msk [vmem:[%s12491_s29 + $0x70] sm:$0xff] %vm7012_vm10, %v7285_v23 }
 0xa04   : > { %9410 = shalt.err (!%p9407_p3)
}
 0xa05   : > { %s9411_s1 = scalar_lea.hbm %s12533_s22, 2048  ;;  %s9415_s21 = scalar_lea.hbm %s12678_s24, 4096 }
 0xa06   : > { %p9412_p4 = scmp.ne.s32.totalorder %s12533_s22, %s9411_s1  ;;  %p9416_p9 = scmp.lt.u32.totalorder %s12533_s22, %s12678_s24 }
 0xa07   : > { %p9417_p10 = scmp.lt.u32.totalorder %s9415_s21, %s9411_s1  ;;  %p9419_p12 = scmp.lt.u32.totalorder %s9411_s1, %s12533_s22 }
 0xa08   : > { %p9413_p7 = pnand %p9412_p4, %p9601_p5 }
 0xa09   : > { %p9418_p11 = por %p9417_p10, %p9416_p9 }
 0xa0a   : > { %p9414_p8 = pneg %p9413_p7 }
 0xa0b   : > { %p9420_p13 = por %p9419_p12, %p9418_p11 }
 0xa0d   : > { %p9421_p0 = pnand %p9420_p13, %p9414_p8 }
 0xa0f   : > { %9424 = shalt.err (!%p9421_p0)
}
 0xa10   : > { %s9466_s27 = smov 128   ;;  %s9467_s19 = smov 8  }
 0xa11   : > { %8653 = dma.vmem_to_hbm [thread:$0]  (%p9601_p5), %s12535_s20, 2048, %s12533_s22, %s12543_s0, %s9466_s27, %s9466_s27, %s9467_s19  }
 0xa12 PF: > { %s12679_s18 = sld [smem:[#allocation8_spill]]  ;;  %s12680_s29 = sld [smem:[#allocation6_spill]] }
 0xa18   : > { %p8659_p1 = scmp.ge.s32.totalorder %s12679_s18, 2  ;;  %s7332_s30 = sand.u32 1, %s12680_s29  }
 0xa19   : > { %s7333_s1 = scalar_lea.sflag [#allocation4], %s7332_s30 }
 0xa1a   : > { %p8656_p2 = pnand %p8659_p1, %p9605_p6 }
 0xa1c   : > { %9442 = dma.done.wait (!%p8656_p2), %s7333_s1, 2048  }
 0xa1d   : > { %9444 = vsyncadd (!%p8656_p2), %s7333_s1, 4294965248  ;;  %s12682_s30 = sld [smem:[#allocation9_spill]]  ;;  %s12683_s21 = sld [smem:[#allocation7_spill]] }
 0xa1e   : > { %s12684_s29 = sld [smem:[#allocation10_spill]]  ;;  %s12685_s27 = smov %s9451_s28 }
 0xa23   : > { %p28_p3 = scmp.ge.s32.totalorder %s12682_s30, 4   ;;  %s12686_s28 = smov %s12683_s21 }
 0xa25   :  { %30 = sbr.rel (!%p28_p3) target bundleno = 8 (0x8), region = 138 }
 0xa2c   :  { %7338 = vsyncpa [#allocation4], 1 }
 0xa2d   :  { %7340 = vsyncpa [#allocation4 + $0x1], 1 }

</bundles_post_ra>
